<compile_context>
chip_gen: v5e
topology: v5e:2x2
jax: 0.10.0
libtpu: 0.0.40
codegen_flags: <defaults>
</compile_context>

<pallas_src>
import functools

import jax
import jax.numpy as jnp
import numpy as np
from jax.experimental import pallas as pl
from jax.experimental.pallas import tpu as pltpu


# ----------------------------- Pallas kernel --------------------------------


def _dblock_kernel(x_ref, w_ref, b_ref, mask_ref, o_ref, tmp_ref, *, Wp, M):
    """One ResBlock per grid step; o_ref doubles as the resident activation.

    x_ref   : (R, C) f32        zero-padded input images, flat (N*Hp*Wp, C)
    w_ref   : (1, 2, 9, C, C)   bf16 per-tap conv weights of ResBlock r
    b_ref   : (1, 2, 1, C) f32  biases of ResBlock r
    mask_ref: (M, 1) f32        1.0 on interior rows of the span, 0.0 on halo
    o_ref   : (R, C) f32        activation buffer (== kernel output)
    tmp_ref : (R, C) f32        padded conv1-output scratch
    """
    r = pl.program_id(0)
    span = Wp + 1                      # first interior output row (static)

    @pl.when(r == 0)
    def _init():
        o_ref[...] = x_ref[...]                    # activation := padded input
        tmp_ref[...] = jnp.zeros_like(tmp_ref)     # zero halo rows ONCE

    offs = tuple((dy - 1) * Wp + (dx - 1) for dy in range(3) for dx in range(3))
    mask = mask_ref[...]                           # (M, 1)

    # ---------------- conv1 + bias + ReLU ----------------
    center = o_ref[pl.ds(span, M), :]              # f32; reused as residual
    y = jnp.dot(center.astype(jnp.bfloat16), w_ref[0, 0, 4],
                preferred_element_type=jnp.float32)
    for t, off in enumerate(offs):
        if t == 4:
            continue
        y = y + jnp.dot(o_ref[pl.ds(span + off, M), :].astype(jnp.bfloat16),
                        w_ref[0, 0, t], preferred_element_type=jnp.float32)
    y = jnp.maximum(y + b_ref[0, 0], 0.0) * mask   # halo rows -> exactly 0
    yb = y.astype(jnp.bfloat16)
    tmp_ref[pl.ds(span, M), :] = y

    # ---------------- conv2 + bias + residual ----------------
    # Center tap straight from the in-register y (no tmp_ref reload).
    z = center + b_ref[0, 1] + jnp.dot(yb, w_ref[0, 1, 4],
                                       preferred_element_type=jnp.float32)
    for t, off in enumerate(offs):
        if t == 4:
            continue
        z = z + jnp.dot(tmp_ref[pl.ds(span + off, M), :].astype(jnp.bfloat16),
                        w_ref[0, 1, t], preferred_element_type=jnp.float32)
    o_ref[pl.ds(span, M), :] = z * mask            # halo rows stay exactly 0


# ------------------------------ JAX wrapper ----------------------------------


@functools.partial(jax.jit, static_argnums=(2,))
def dblock_pallas(x, all_params, num_res):
    """x: NHWC (N, H, W, C); all_params: list of (w1, b1, w2, b2) HWIO/[C]."""
    N, H, W_sp, C = x.shape
    Hp, Wp = H + 2, W_sp + 2
    rows = N * Hp * Wp
    span = Wp + 1
    M = rows - 2 * span        # one contiguous output span over all images

    orig_dtype = x.dtype
    x = x.astype(jnp.float32)

    # Raw per-tap (C, C) weights: w_all[r, c, dy*3+dx] = w[dy, dx]; bf16 for
    # the MXU (halves weight DMA/VMEM).  Biases stay f32.
    w_all = jnp.stack([
        jnp.stack([jnp.asarray(w1, jnp.float32).reshape(9, C, C),
                   jnp.asarray(w2, jnp.float32).reshape(9, C, C)])
        for (w1, b1, w2, b2) in all_params
    ]).astype(jnp.bfloat16)                                  # (nr, 2, 9, C, C)
    b_all = jnp.stack([
        jnp.stack([jnp.asarray(b1, jnp.float32).reshape(1, C),
                   jnp.asarray(b2, jnp.float32).reshape(1, C)])
        for (w1, b1, w2, b2) in all_params
    ])                                                       # (nr, 2, 1, C)

    # Interior mask over the contiguous span: 1 on real pixels, 0 on the
    # padded halo rows/cols interleaved in the flat (h, w)-major layout.
    idx = np.arange(M) + span
    q = idx % (Hp * Wp)
    hh, ww = q // Wp, q % Wp
    mask = jnp.asarray(((hh >= 1) & (hh <= H) & (ww >= 1) & (ww <= W_sp))
                       .astype(np.float32).reshape(M, 1))

    # One-time zero pad of the network input; (N, Hp, Wp, C) -> (rows, C).
    xp = jnp.pad(x, ((0, 0), (1, 1), (1, 1), (0, 0))).reshape(rows, C)

    kernel = functools.partial(_dblock_kernel, Wp=Wp, M=M)
    out_flat = pl.pallas_call(
        kernel,
        out_shape=jax.ShapeDtypeStruct((rows, C), jnp.float32),
        grid_spec=pltpu.PrefetchScalarGridSpec(
            num_scalar_prefetch=0,
            grid=(num_res,),               # ResBlocks form a dependency chain
            in_specs=[
                # Constant block index -> fetched once, stays VMEM-resident.
                pl.BlockSpec((rows, C), lambda r: (0, 0)),
                # Per-ResBlock weight/bias streaming: only block r (plus the
                # default-pipelined r+1) is resident; DMA hides behind compute.
                pl.BlockSpec((1, 2, 9, C, C), lambda r: (r, 0, 0, 0, 0)),
                pl.BlockSpec((1, 2, 1, C), lambda r: (r, 0, 0, 0)),
                pl.BlockSpec((M, 1), lambda r: (0, 0)),
            ],
            # Constant out index -> resident across all grid steps; doubles as
            # the activation buffer, written back to HBM once at the end.
            out_specs=pl.BlockSpec((rows, C), lambda r: (0, 0)),
            scratch_shapes=[pltpu.VMEM((rows, C), jnp.float32)],
        ),
        compiler_params=pltpu.CompilerParams(
            dimension_semantics=("arbitrary",)),
    )(xp, w_all, b_all, mask)

    # Halo rows were kept only for padding; strip them here (cheap XLA slice).
    out = out_flat.reshape(N, Hp, Wp, C)[:, 1:1 + H, 1:1 + W_sp, :]
    return out.astype(orig_dtype)


# ------------------------------- reference -----------------------------------


def _conv3x3_ref(x, w, b):
    y = jax.lax.conv_general_dilated(
        x, w, window_strides=(1, 1), padding="SAME",
        dimension_numbers=("NHWC", "HWIO", "NHWC"))
    return y + b.reshape(1, 1, 1, -1)


def dblock_ref(x, all_params, num_res):
    for i in range(num_res):
        w1, b1, w2, b2 = all_params[i]
        y = jnp.maximum(_conv3x3_ref(x, w1, b1), 0.0)
        x = _conv3x3_ref(y, w2, b2) + x
    return x


# ----------------------------- parameter init --------------------------------


def init_dblock_params(key, channel, num_res):
    """Deterministic init mimicking PyTorch Conv2d default (uniform kaiming)."""
    params = []
    fan_in = 9 * channel
    bound = 1.0 / np.sqrt(fan_in)
    for _ in range(num_res):
        key, k1, k2, k3, k4 = jax.random.split(key, 5)
        w1 = jax.random.uniform(k1, (3, 3, channel, channel), jnp.float32,
                                -bound, bound)
        b1 = jax.random.uniform(k2, (channel,), jnp.float32, -bound, bound)
        w2 = jax.random.uniform(k3, (3, 3, channel, channel), jnp.float32,
                                -bound, bound)
        b2 = jax.random.uniform(k4, (channel,), jnp.float32, -bound, bound)
        params.append((w1, b1, w2, b2))
    return params


# ---------------------------------- main --------------------------------------


if __name__ == "__main__":
    N, C, H, W = 2, 4, 16, 16
    NUM_RES = 8  # DBlock default

    key = jax.random.PRNGKey(0)
    key, kx = jax.random.split(key)

    # PyTorch input would be NCHW; the kernel works in NHWC.
    x_nchw = jax.random.normal(kx, (N, C, H, W), jnp.float32)
    x = jnp.transpose(x_nchw, (0, 2, 3, 1))  # -> NHWC

    params = init_dblock_params(key, C, NUM_RES)

    out = jax.block_until_ready(dblock_pallas(x, params, NUM_RES))
    ref = jax.block_until_ready(dblock_ref(x, params, NUM_RES))

    assert out.shape == (N, H, W, C)
    # Tolerance sized for bf16 MXU operands (f32 accumulation) across
    # 2*NUM_RES stacked convolutions; structural bugs are O(1) errors.
    assert np.allclose(np.asarray(out), np.asarray(ref), atol=4e-2, rtol=4e-2)

    print("KERNEL_OK")
</pallas_src>

<mosaic_0001>
module attributes {stable_mosaic.version = 11 : i64} {
  func.func @_dblock_kernel(%arg0: i32, %arg1: memref<648x4xf32, #tpu.memory_space<vmem>>, %arg2: memref<1x2x9x4x4xbf16, #tpu.memory_space<vmem>>, %arg3: memref<1x2x1x4xf32, #tpu.memory_space<vmem>>, %arg4: memref<610x1xf32, #tpu.memory_space<vmem>>, %arg5: memref<648x4xf32, #tpu.memory_space<vmem>>, %arg6: memref<648x4xf32, #tpu.memory_space<vmem>>) attributes {dimension_semantics = [#tpu.dimension_semantics<arbitrary>], iteration_bounds = array<i64: 8>, scalar_prefetch = 0 : i64, scratch_operands = 1 : i64, tpu.core_type = #tpu.core_type<tc>, window_params = [{pipeline_mode = #tpu.pipeline_mode<synchronous>, transform_indices = @transform_0, window_bounds = array<i64: 648, 4>}, {transform_indices = @transform_1, window_bounds = array<i64: 1, 2, 9, 4, 4>}, {transform_indices = @transform_2, window_bounds = array<i64: 1, 2, 1, 4>}, {pipeline_mode = #tpu.pipeline_mode<synchronous>, transform_indices = @transform_3, window_bounds = array<i64: 610, 1>}, {pipeline_mode = #tpu.pipeline_mode<synchronous>, transform_indices = @transform_4, window_bounds = array<i64: 648, 4>}]} {
    %c0_i32 = arith.constant 0 : i32
    %0 = arith.cmpi eq, %arg0, %c0_i32 : i32
    %1 = arith.extui %0 : i1 to i32
    %c0_i32_0 = arith.constant 0 : i32
    %2 = arith.cmpi ne, %1, %c0_i32_0 : i32
    scf.if %2 {
      %c0_142 = arith.constant 0 : index
      %c0_143 = arith.constant 0 : index
      %126 = vector.load %arg1[%c0_142, %c0_143] : memref<648x4xf32, #tpu.memory_space<vmem>>, vector<648x4xf32>
      %c0_144 = arith.constant 0 : index
      %c0_145 = arith.constant 0 : index
      %127 = vector.load %arg5[%c0_144, %c0_145] : memref<648x4xf32, #tpu.memory_space<vmem>>, vector<648x4xf32>
      tpu.vector_store %arg5[%c0_144, %c0_145], %126 {strides = array<i32>} : memref<648x4xf32, #tpu.memory_space<vmem>>, vector<648x4xf32>,
      %cst_146 = arith.constant 0.000000e+00 : f32
      %128 = vector.broadcast %cst_146 : f32 to vector<648x4xf32>
      %c0_147 = arith.constant 0 : index
      %c0_148 = arith.constant 0 : index
      %129 = vector.load %arg6[%c0_147, %c0_148] : memref<648x4xf32, #tpu.memory_space<vmem>>, vector<648x4xf32>
      tpu.vector_store %arg6[%c0_147, %c0_148], %128 {strides = array<i32>} : memref<648x4xf32, #tpu.memory_space<vmem>>, vector<648x4xf32>,
    } else {
    }
    %c0 = arith.constant 0 : index
    %c0_1 = arith.constant 0 : index
    %3 = vector.load %arg4[%c0, %c0_1] : memref<610x1xf32, #tpu.memory_space<vmem>>, vector<610x1xf32>
    %c19 = arith.constant 19 : index
    %c0_2 = arith.constant 0 : index
    %4 = vector.load %arg5[%c19, %c0_2] : memref<648x4xf32, #tpu.memory_space<vmem>>, vector<610x4xf32>
    %5 = arith.truncf %4 : vector<610x4xf32> to vector<610x4xbf16>
    %c0_3 = arith.constant 0 : index
    %c0_4 = arith.constant 0 : index
    %c4 = arith.constant 4 : index
    %c0_5 = arith.constant 0 : index
    %c0_6 = arith.constant 0 : index
    %6 = vector.load %arg2[%c0_3, %c0_4, %c4, %c0_5, %c0_6] : memref<1x2x9x4x4xbf16, #tpu.memory_space<vmem>>, vector<1x1x1x4x4xbf16>
    %7 = vector.shape_cast %6 : vector<1x1x1x4x4xbf16> to vector<4x4xbf16>
    %cst = arith.constant dense<0.000000e+00> : vector<610x4xf32>
    %8 = tpu.matmul %5, %7, %cst {dimension_numbers = #tpu.dot_dimension_numbers<[1], [0], [0], [1], [0, 0, 1, 1], [], []>} : vector<610x4xbf16>, vector<4x4xbf16>, vector<610x4xf32> -> vector<610x4xf32>
    %c0_7 = arith.constant 0 : index
    %c0_8 = arith.constant 0 : index
    %9 = vector.load %arg5[%c0_7, %c0_8] : memref<648x4xf32, #tpu.memory_space<vmem>>, vector<610x4xf32>
    %10 = arith.truncf %9 : vector<610x4xf32> to vector<610x4xbf16>
    %c0_9 = arith.constant 0 : index
    %c0_10 = arith.constant 0 : index
    %c0_11 = arith.constant 0 : index
    %c0_12 = arith.constant 0 : index
    %c0_13 = arith.constant 0 : index
    %11 = vector.load %arg2[%c0_9, %c0_10, %c0_11, %c0_12, %c0_13] : memref<1x2x9x4x4xbf16, #tpu.memory_space<vmem>>, vector<1x1x1x4x4xbf16>
    %12 = vector.shape_cast %11 : vector<1x1x1x4x4xbf16> to vector<4x4xbf16>
    %cst_14 = arith.constant dense<0.000000e+00> : vector<610x4xf32>
    %13 = tpu.matmul %10, %12, %cst_14 {dimension_numbers = #tpu.dot_dimension_numbers<[1], [0], [0], [1], [0, 0, 1, 1], [], []>} : vector<610x4xbf16>, vector<4x4xbf16>, vector<610x4xf32> -> vector<610x4xf32>
    %14 = arith.addf %8, %13 : vector<610x4xf32>
    %c1 = arith.constant 1 : index
    %c0_15 = arith.constant 0 : index
    %15 = vector.load %arg5[%c1, %c0_15] : memref<648x4xf32, #tpu.memory_space<vmem>>, vector<610x4xf32>
    %16 = arith.truncf %15 : vector<610x4xf32> to vector<610x4xbf16>
    %c0_16 = arith.constant 0 : index
    %c0_17 = arith.constant 0 : index
    %c1_18 = arith.constant 1 : index
    %c0_19 = arith.constant 0 : index
    %c0_20 = arith.constant 0 : index
    %17 = vector.load %arg2[%c0_16, %c0_17, %c1_18, %c0_19, %c0_20] : memref<1x2x9x4x4xbf16, #tpu.memory_space<vmem>>, vector<1x1x1x4x4xbf16>
    %18 = vector.shape_cast %17 : vector<1x1x1x4x4xbf16> to vector<4x4xbf16>
    %cst_21 = arith.constant dense<0.000000e+00> : vector<610x4xf32>
    %19 = tpu.matmul %16, %18, %cst_21 {dimension_numbers = #tpu.dot_dimension_numbers<[1], [0], [0], [1], [0, 0, 1, 1], [], []>} : vector<610x4xbf16>, vector<4x4xbf16>, vector<610x4xf32> -> vector<610x4xf32>
    %20 = arith.addf %14, %19 : vector<610x4xf32>
    %c2 = arith.constant 2 : index
    %c0_22 = arith.constant 0 : index
    %21 = vector.load %arg5[%c2, %c0_22] : memref<648x4xf32, #tpu.memory_space<vmem>>, vector<610x4xf32>
    %22 = arith.truncf %21 : vector<610x4xf32> to vector<610x4xbf16>
    %c0_23 = arith.constant 0 : index
    %c0_24 = arith.constant 0 : index
    %c2_25 = arith.constant 2 : index
    %c0_26 = arith.constant 0 : index
    %c0_27 = arith.constant 0 : index
    %23 = vector.load %arg2[%c0_23, %c0_24, %c2_25, %c0_26, %c0_27] : memref<1x2x9x4x4xbf16, #tpu.memory_space<vmem>>, vector<1x1x1x4x4xbf16>
    %24 = vector.shape_cast %23 : vector<1x1x1x4x4xbf16> to vector<4x4xbf16>
    %cst_28 = arith.constant dense<0.000000e+00> : vector<610x4xf32>
    %25 = tpu.matmul %22, %24, %cst_28 {dimension_numbers = #tpu.dot_dimension_numbers<[1], [0], [0], [1], [0, 0, 1, 1], [], []>} : vector<610x4xbf16>, vector<4x4xbf16>, vector<610x4xf32> -> vector<610x4xf32>
    %26 = arith.addf %20, %25 : vector<610x4xf32>
    %c18 = arith.constant 18 : index
    %c0_29 = arith.constant 0 : index
    %27 = vector.load %arg5[%c18, %c0_29] : memref<648x4xf32, #tpu.memory_space<vmem>>, vector<610x4xf32>
    %28 = arith.truncf %27 : vector<610x4xf32> to vector<610x4xbf16>
    %c0_30 = arith.constant 0 : index
    %c0_31 = arith.constant 0 : index
    %c3 = arith.constant 3 : index
    %c0_32 = arith.constant 0 : index
    %c0_33 = arith.constant 0 : index
    %29 = vector.load %arg2[%c0_30, %c0_31, %c3, %c0_32, %c0_33] : memref<1x2x9x4x4xbf16, #tpu.memory_space<vmem>>, vector<1x1x1x4x4xbf16>
    %30 = vector.shape_cast %29 : vector<1x1x1x4x4xbf16> to vector<4x4xbf16>
    %cst_34 = arith.constant dense<0.000000e+00> : vector<610x4xf32>
    %31 = tpu.matmul %28, %30, %cst_34 {dimension_numbers = #tpu.dot_dimension_numbers<[1], [0], [0], [1], [0, 0, 1, 1], [], []>} : vector<610x4xbf16>, vector<4x4xbf16>, vector<610x4xf32> -> vector<610x4xf32>
    %32 = arith.addf %26, %31 : vector<610x4xf32>
    %c20 = arith.constant 20 : index
    %c0_35 = arith.constant 0 : index
    %33 = vector.load %arg5[%c20, %c0_35] : memref<648x4xf32, #tpu.memory_space<vmem>>, vector<610x4xf32>
    %34 = arith.truncf %33 : vector<610x4xf32> to vector<610x4xbf16>
    %c0_36 = arith.constant 0 : index
    %c0_37 = arith.constant 0 : index
    %c5 = arith.constant 5 : index
    %c0_38 = arith.constant 0 : index
    %c0_39 = arith.constant 0 : index
    %35 = vector.load %arg2[%c0_36, %c0_37, %c5, %c0_38, %c0_39] : memref<1x2x9x4x4xbf16, #tpu.memory_space<vmem>>, vector<1x1x1x4x4xbf16>
    %36 = vector.shape_cast %35 : vector<1x1x1x4x4xbf16> to vector<4x4xbf16>
    %cst_40 = arith.constant dense<0.000000e+00> : vector<610x4xf32>
    %37 = tpu.matmul %34, %36, %cst_40 {dimension_numbers = #tpu.dot_dimension_numbers<[1], [0], [0], [1], [0, 0, 1, 1], [], []>} : vector<610x4xbf16>, vector<4x4xbf16>, vector<610x4xf32> -> vector<610x4xf32>
    %38 = arith.addf %32, %37 : vector<610x4xf32>
    %c36 = arith.constant 36 : index
    %c0_41 = arith.constant 0 : index
    %39 = vector.load %arg5[%c36, %c0_41] : memref<648x4xf32, #tpu.memory_space<vmem>>, vector<610x4xf32>
    %40 = arith.truncf %39 : vector<610x4xf32> to vector<610x4xbf16>
    %c0_42 = arith.constant 0 : index
    %c0_43 = arith.constant 0 : index
    %c6 = arith.constant 6 : index
    %c0_44 = arith.constant 0 : index
    %c0_45 = arith.constant 0 : index
    %41 = vector.load %arg2[%c0_42, %c0_43, %c6, %c0_44, %c0_45] : memref<1x2x9x4x4xbf16, #tpu.memory_space<vmem>>, vector<1x1x1x4x4xbf16>
    %42 = vector.shape_cast %41 : vector<1x1x1x4x4xbf16> to vector<4x4xbf16>
    %cst_46 = arith.constant dense<0.000000e+00> : vector<610x4xf32>
    %43 = tpu.matmul %40, %42, %cst_46 {dimension_numbers = #tpu.dot_dimension_numbers<[1], [0], [0], [1], [0, 0, 1, 1], [], []>} : vector<610x4xbf16>, vector<4x4xbf16>, vector<610x4xf32> -> vector<610x4xf32>
    %44 = arith.addf %38, %43 : vector<610x4xf32>
    %c37 = arith.constant 37 : index
    %c0_47 = arith.constant 0 : index
    %45 = vector.load %arg5[%c37, %c0_47] : memref<648x4xf32, #tpu.memory_space<vmem>>, vector<610x4xf32>
    %46 = arith.truncf %45 : vector<610x4xf32> to vector<610x4xbf16>
    %c0_48 = arith.constant 0 : index
    %c0_49 = arith.constant 0 : index
    %c7 = arith.constant 7 : index
    %c0_50 = arith.constant 0 : index
    %c0_51 = arith.constant 0 : index
    %47 = vector.load %arg2[%c0_48, %c0_49, %c7, %c0_50, %c0_51] : memref<1x2x9x4x4xbf16, #tpu.memory_space<vmem>>, vector<1x1x1x4x4xbf16>
    %48 = vector.shape_cast %47 : vector<1x1x1x4x4xbf16> to vector<4x4xbf16>
    %cst_52 = arith.constant dense<0.000000e+00> : vector<610x4xf32>
    %49 = tpu.matmul %46, %48, %cst_52 {dimension_numbers = #tpu.dot_dimension_numbers<[1], [0], [0], [1], [0, 0, 1, 1], [], []>} : vector<610x4xbf16>, vector<4x4xbf16>, vector<610x4xf32> -> vector<610x4xf32>
    %50 = arith.addf %44, %49 : vector<610x4xf32>
    %c38 = arith.constant 38 : index
    %c0_53 = arith.constant 0 : index
    %51 = vector.load %arg5[%c38, %c0_53] : memref<648x4xf32, #tpu.memory_space<vmem>>, vector<610x4xf32>
    %52 = arith.truncf %51 : vector<610x4xf32> to vector<610x4xbf16>
    %c0_54 = arith.constant 0 : index
    %c0_55 = arith.constant 0 : index
    %c8 = arith.constant 8 : index
    %c0_56 = arith.constant 0 : index
    %c0_57 = arith.constant 0 : index
    %53 = vector.load %arg2[%c0_54, %c0_55, %c8, %c0_56, %c0_57] : memref<1x2x9x4x4xbf16, #tpu.memory_space<vmem>>, vector<1x1x1x4x4xbf16>
    %54 = vector.shape_cast %53 : vector<1x1x1x4x4xbf16> to vector<4x4xbf16>
    %cst_58 = arith.constant dense<0.000000e+00> : vector<610x4xf32>
    %55 = tpu.matmul %52, %54, %cst_58 {dimension_numbers = #tpu.dot_dimension_numbers<[1], [0], [0], [1], [0, 0, 1, 1], [], []>} : vector<610x4xbf16>, vector<4x4xbf16>, vector<610x4xf32> -> vector<610x4xf32>
    %56 = arith.addf %50, %55 : vector<610x4xf32>
    %c0_59 = arith.constant 0 : index
    %c0_60 = arith.constant 0 : index
    %c0_61 = arith.constant 0 : index
    %c0_62 = arith.constant 0 : index
    %57 = vector.load %arg3[%c0_59, %c0_60, %c0_61, %c0_62] : memref<1x2x1x4xf32, #tpu.memory_space<vmem>>, vector<1x1x1x4xf32>
    %58 = vector.shape_cast %57 : vector<1x1x1x4xf32> to vector<1x4xf32>
    %59 = vector.broadcast %58 : vector<1x4xf32> to vector<610x4xf32>
    %60 = arith.addf %56, %59 : vector<610x4xf32>
    %cst_63 = arith.constant 0.000000e+00 : f32
    %61 = vector.broadcast %cst_63 : f32 to vector<610x4xf32>
    %62 = arith.maximumf %60, %61 : vector<610x4xf32>
    %63 = vector.broadcast %3 : vector<610x1xf32> to vector<610x4xf32>
    %64 = arith.mulf %62, %63 : vector<610x4xf32>
    %65 = arith.truncf %64 : vector<610x4xf32> to vector<610x4xbf16>
    %c19_64 = arith.constant 19 : index
    %c0_65 = arith.constant 0 : index
    %66 = vector.load %arg6[%c19_64, %c0_65] : memref<648x4xf32, #tpu.memory_space<vmem>>, vector<610x4xf32>
    tpu.vector_store %arg6[%c19_64, %c0_65], %64 {strides = array<i32>} : memref<648x4xf32, #tpu.memory_space<vmem>>, vector<610x4xf32>,
    %c0_66 = arith.constant 0 : index
    %c1_67 = arith.constant 1 : index
    %c0_68 = arith.constant 0 : index
    %c0_69 = arith.constant 0 : index
    %67 = vector.load %arg3[%c0_66, %c1_67, %c0_68, %c0_69] : memref<1x2x1x4xf32, #tpu.memory_space<vmem>>, vector<1x1x1x4xf32>
    %68 = vector.shape_cast %67 : vector<1x1x1x4xf32> to vector<1x4xf32>
    %69 = vector.broadcast %68 : vector<1x4xf32> to vector<610x4xf32>
    %70 = arith.addf %4, %69 : vector<610x4xf32>
    %c0_70 = arith.constant 0 : index
    %c1_71 = arith.constant 1 : index
    %c4_72 = arith.constant 4 : index
    %c0_73 = arith.constant 0 : index
    %c0_74 = arith.constant 0 : index
    %71 = vector.load %arg2[%c0_70, %c1_71, %c4_72, %c0_73, %c0_74] : memref<1x2x9x4x4xbf16, #tpu.memory_space<vmem>>, vector<1x1x1x4x4xbf16>
    %72 = vector.shape_cast %71 : vector<1x1x1x4x4xbf16> to vector<4x4xbf16>
    %cst_75 = arith.constant dense<0.000000e+00> : vector<610x4xf32>
    %73 = tpu.matmul %65, %72, %cst_75 {dimension_numbers = #tpu.dot_dimension_numbers<[1], [0], [0], [1], [0, 0, 1, 1], [], []>} : vector<610x4xbf16>, vector<4x4xbf16>, vector<610x4xf32> -> vector<610x4xf32>
    %74 = arith.addf %70, %73 : vector<610x4xf32>
    %c0_76 = arith.constant 0 : index
    %c0_77 = arith.constant 0 : index
    %75 = vector.load %arg6[%c0_76, %c0_77] : memref<648x4xf32, #tpu.memory_space<vmem>>, vector<610x4xf32>
    %76 = arith.truncf %75 : vector<610x4xf32> to vector<610x4xbf16>
    %c0_78 = arith.constant 0 : index
    %c1_79 = arith.constant 1 : index
    %c0_80 = arith.constant 0 : index
    %c0_81 = arith.constant 0 : index
    %c0_82 = arith.constant 0 : index
    %77 = vector.load %arg2[%c0_78, %c1_79, %c0_80, %c0_81, %c0_82] : memref<1x2x9x4x4xbf16, #tpu.memory_space<vmem>>, vector<1x1x1x4x4xbf16>
    %78 = vector.shape_cast %77 : vector<1x1x1x4x4xbf16> to vector<4x4xbf16>
    %cst_83 = arith.constant dense<0.000000e+00> : vector<610x4xf32>
    %79 = tpu.matmul %76, %78, %cst_83 {dimension_numbers = #tpu.dot_dimension_numbers<[1], [0], [0], [1], [0, 0, 1, 1], [], []>} : vector<610x4xbf16>, vector<4x4xbf16>, vector<610x4xf32> -> vector<610x4xf32>
    %80 = arith.addf %74, %79 : vector<610x4xf32>
    %c1_84 = arith.constant 1 : index
    %c0_85 = arith.constant 0 : index
    %81 = vector.load %arg6[%c1_84, %c0_85] : memref<648x4xf32, #tpu.memory_space<vmem>>, vector<610x4xf32>
    %82 = arith.truncf %81 : vector<610x4xf32> to vector<610x4xbf16>
    %c0_86 = arith.constant 0 : index
    %c1_87 = arith.constant 1 : index
    %c1_88 = arith.constant 1 : index
    %c0_89 = arith.constant 0 : index
    %c0_90 = arith.constant 0 : index
    %83 = vector.load %arg2[%c0_86, %c1_87, %c1_88, %c0_89, %c0_90] : memref<1x2x9x4x4xbf16, #tpu.memory_space<vmem>>, vector<1x1x1x4x4xbf16>
    %84 = vector.shape_cast %83 : vector<1x1x1x4x4xbf16> to vector<4x4xbf16>
    %cst_91 = arith.constant dense<0.000000e+00> : vector<610x4xf32>
    %85 = tpu.matmul %82, %84, %cst_91 {dimension_numbers = #tpu.dot_dimension_numbers<[1], [0], [0], [1], [0, 0, 1, 1], [], []>} : vector<610x4xbf16>, vector<4x4xbf16>, vector<610x4xf32> -> vector<610x4xf32>
    %86 = arith.addf %80, %85 : vector<610x4xf32>
    %c2_92 = arith.constant 2 : index
    %c0_93 = arith.constant 0 : index
    %87 = vector.load %arg6[%c2_92, %c0_93] : memref<648x4xf32, #tpu.memory_space<vmem>>, vector<610x4xf32>
    %88 = arith.truncf %87 : vector<610x4xf32> to vector<610x4xbf16>
    %c0_94 = arith.constant 0 : index
    %c1_95 = arith.constant 1 : index
    %c2_96 = arith.constant 2 : index
    %c0_97 = arith.constant 0 : index
    %c0_98 = arith.constant 0 : index
    %89 = vector.load %arg2[%c0_94, %c1_95, %c2_96, %c0_97, %c0_98] : memref<1x2x9x4x4xbf16, #tpu.memory_space<vmem>>, vector<1x1x1x4x4xbf16>
    %90 = vector.shape_cast %89 : vector<1x1x1x4x4xbf16> to vector<4x4xbf16>
    %cst_99 = arith.constant dense<0.000000e+00> : vector<610x4xf32>
    %91 = tpu.matmul %88, %90, %cst_99 {dimension_numbers = #tpu.dot_dimension_numbers<[1], [0], [0], [1], [0, 0, 1, 1], [], []>} : vector<610x4xbf16>, vector<4x4xbf16>, vector<610x4xf32> -> vector<610x4xf32>
    %92 = arith.addf %86, %91 : vector<610x4xf32>
    %c18_100 = arith.constant 18 : index
    %c0_101 = arith.constant 0 : index
    %93 = vector.load %arg6[%c18_100, %c0_101] : memref<648x4xf32, #tpu.memory_space<vmem>>, vector<610x4xf32>
    %94 = arith.truncf %93 : vector<610x4xf32> to vector<610x4xbf16>
    %c0_102 = arith.constant 0 : index
    %c1_103 = arith.constant 1 : index
    %c3_104 = arith.constant 3 : index
    %c0_105 = arith.constant 0 : index
    %c0_106 = arith.constant 0 : index
    %95 = vector.load %arg2[%c0_102, %c1_103, %c3_104, %c0_105, %c0_106] : memref<1x2x9x4x4xbf16, #tpu.memory_space<vmem>>, vector<1x1x1x4x4xbf16>
    %96 = vector.shape_cast %95 : vector<1x1x1x4x4xbf16> to vector<4x4xbf16>
    %cst_107 = arith.constant dense<0.000000e+00> : vector<610x4xf32>
    %97 = tpu.matmul %94, %96, %cst_107 {dimension_numbers = #tpu.dot_dimension_numbers<[1], [0], [0], [1], [0, 0, 1, 1], [], []>} : vector<610x4xbf16>, vector<4x4xbf16>, vector<610x4xf32> -> vector<610x4xf32>
    %98 = arith.addf %92, %97 : vector<610x4xf32>
    %c20_108 = arith.constant 20 : index
    %c0_109 = arith.constant 0 : index
    %99 = vector.load %arg6[%c20_108, %c0_109] : memref<648x4xf32, #tpu.memory_space<vmem>>, vector<610x4xf32>
    %100 = arith.truncf %99 : vector<610x4xf32> to vector<610x4xbf16>
    %c0_110 = arith.constant 0 : index
    %c1_111 = arith.constant 1 : index
    %c5_112 = arith.constant 5 : index
    %c0_113 = arith.constant 0 : index
    %c0_114 = arith.constant 0 : index
    %101 = vector.load %arg2[%c0_110, %c1_111, %c5_112, %c0_113, %c0_114] : memref<1x2x9x4x4xbf16, #tpu.memory_space<vmem>>, vector<1x1x1x4x4xbf16>
    %102 = vector.shape_cast %101 : vector<1x1x1x4x4xbf16> to vector<4x4xbf16>
    %cst_115 = arith.constant dense<0.000000e+00> : vector<610x4xf32>
    %103 = tpu.matmul %100, %102, %cst_115 {dimension_numbers = #tpu.dot_dimension_numbers<[1], [0], [0], [1], [0, 0, 1, 1], [], []>} : vector<610x4xbf16>, vector<4x4xbf16>, vector<610x4xf32> -> vector<610x4xf32>
    %104 = arith.addf %98, %103 : vector<610x4xf32>
    %c36_116 = arith.constant 36 : index
    %c0_117 = arith.constant 0 : index
    %105 = vector.load %arg6[%c36_116, %c0_117] : memref<648x4xf32, #tpu.memory_space<vmem>>, vector<610x4xf32>
    %106 = arith.truncf %105 : vector<610x4xf32> to vector<610x4xbf16>
    %c0_118 = arith.constant 0 : index
    %c1_119 = arith.constant 1 : index
    %c6_120 = arith.constant 6 : index
    %c0_121 = arith.constant 0 : index
    %c0_122 = arith.constant 0 : index
    %107 = vector.load %arg2[%c0_118, %c1_119, %c6_120, %c0_121, %c0_122] : memref<1x2x9x4x4xbf16, #tpu.memory_space<vmem>>, vector<1x1x1x4x4xbf16>
    %108 = vector.shape_cast %107 : vector<1x1x1x4x4xbf16> to vector<4x4xbf16>
    %cst_123 = arith.constant dense<0.000000e+00> : vector<610x4xf32>
    %109 = tpu.matmul %106, %108, %cst_123 {dimension_numbers = #tpu.dot_dimension_numbers<[1], [0], [0], [1], [0, 0, 1, 1], [], []>} : vector<610x4xbf16>, vector<4x4xbf16>, vector<610x4xf32> -> vector<610x4xf32>
    %110 = arith.addf %104, %109 : vector<610x4xf32>
    %c37_124 = arith.constant 37 : index
    %c0_125 = arith.constant 0 : index
    %111 = vector.load %arg6[%c37_124, %c0_125] : memref<648x4xf32, #tpu.memory_space<vmem>>, vector<610x4xf32>
    %112 = arith.truncf %111 : vector<610x4xf32> to vector<610x4xbf16>
    %c0_126 = arith.constant 0 : index
    %c1_127 = arith.constant 1 : index
    %c7_128 = arith.constant 7 : index
    %c0_129 = arith.constant 0 : index
    %c0_130 = arith.constant 0 : index
    %113 = vector.load %arg2[%c0_126, %c1_127, %c7_128, %c0_129, %c0_130] : memref<1x2x9x4x4xbf16, #tpu.memory_space<vmem>>, vector<1x1x1x4x4xbf16>
    %114 = vector.shape_cast %113 : vector<1x1x1x4x4xbf16> to vector<4x4xbf16>
    %cst_131 = arith.constant dense<0.000000e+00> : vector<610x4xf32>
    %115 = tpu.matmul %112, %114, %cst_131 {dimension_numbers = #tpu.dot_dimension_numbers<[1], [0], [0], [1], [0, 0, 1, 1], [], []>} : vector<610x4xbf16>, vector<4x4xbf16>, vector<610x4xf32> -> vector<610x4xf32>
    %116 = arith.addf %110, %115 : vector<610x4xf32>
    %c38_132 = arith.constant 38 : index
    %c0_133 = arith.constant 0 : index
    %117 = vector.load %arg6[%c38_132, %c0_133] : memref<648x4xf32, #tpu.memory_space<vmem>>, vector<610x4xf32>
    %118 = arith.truncf %117 : vector<610x4xf32> to vector<610x4xbf16>
    %c0_134 = arith.constant 0 : index
    %c1_135 = arith.constant 1 : index
    %c8_136 = arith.constant 8 : index
    %c0_137 = arith.constant 0 : index
    %c0_138 = arith.constant 0 : index
    %119 = vector.load %arg2[%c0_134, %c1_135, %c8_136, %c0_137, %c0_138] : memref<1x2x9x4x4xbf16, #tpu.memory_space<vmem>>, vector<1x1x1x4x4xbf16>
    %120 = vector.shape_cast %119 : vector<1x1x1x4x4xbf16> to vector<4x4xbf16>
    %cst_139 = arith.constant dense<0.000000e+00> : vector<610x4xf32>
    %121 = tpu.matmul %118, %120, %cst_139 {dimension_numbers = #tpu.dot_dimension_numbers<[1], [0], [0], [1], [0, 0, 1, 1], [], []>} : vector<610x4xbf16>, vector<4x4xbf16>, vector<610x4xf32> -> vector<610x4xf32>
    %122 = arith.addf %116, %121 : vector<610x4xf32>
    %123 = vector.broadcast %3 : vector<610x1xf32> to vector<610x4xf32>
    %124 = arith.mulf %122, %123 : vector<610x4xf32>
    %c19_140 = arith.constant 19 : index
    %c0_141 = arith.constant 0 : index
    %125 = vector.load %arg5[%c19_140, %c0_141] : memref<648x4xf32, #tpu.memory_space<vmem>>, vector<610x4xf32>
    tpu.vector_store %arg5[%c19_140, %c0_141], %124 {strides = array<i32>} : memref<648x4xf32, #tpu.memory_space<vmem>>, vector<610x4xf32>,
    return
  }
  func.func @transform_0(%arg0: i32) -> (i32, i32) {
    %c0_i32 = arith.constant 0 : i32
    %c0_i32_0 = arith.constant 0 : i32
    %c0_i32_1 = arith.constant 0 : i32
    return %c0_i32, %c0_i32_0 : i32, i32
  }
  func.func @transform_1(%arg0: i32) -> (i32, i32, i32, i32, i32) {
    %c0_i32 = arith.constant 0 : i32
    %c0_i32_0 = arith.constant 0 : i32
    %c0_i32_1 = arith.constant 0 : i32
    %c0_i32_2 = arith.constant 0 : i32
    %c0_i32_3 = arith.constant 0 : i32
    return %arg0, %c0_i32, %c0_i32_0, %c0_i32_1, %c0_i32_2 : i32, i32, i32, i32, i32
  }
  func.func @transform_2(%arg0: i32) -> (i32, i32, i32, i32) {
    %c0_i32 = arith.constant 0 : i32
    %c0_i32_0 = arith.constant 0 : i32
    %c0_i32_1 = arith.constant 0 : i32
    %c0_i32_2 = arith.constant 0 : i32
    return %arg0, %c0_i32, %c0_i32_0, %c0_i32_1 : i32, i32, i32, i32
  }
  func.func @transform_3(%arg0: i32) -> (i32, i32) {
    %c0_i32 = arith.constant 0 : i32
    %c0_i32_0 = arith.constant 0 : i32
    %c0_i32_1 = arith.constant 0 : i32
    return %c0_i32, %c0_i32_0 : i32, i32
  }
  func.func @transform_4(%arg0: i32) -> (i32, i32) {
    %c0_i32 = arith.constant 0 : i32
    %c0_i32_0 = arith.constant 0 : i32
    %c0_i32_1 = arith.constant 0 : i32
    return %c0_i32, %c0_i32_0 : i32, i32
  }
}

</mosaic_0001>

<bundles_post_ra>
// kernel: dblock_pallas.1
= control target key start
LH: loop header
LB: loop body
LE: loop exit
PB: predicated region body
PF: predicated region fallthrough
CT: control target
= control target key end

     0   :  { %s11457_s15 = smov 0   ;;  %s17696_s0 = inlined_call_operand.vmem [shape: f32[648,4], index: 0, kind: input, shape index: {}]   ;;  %s17697_s1 = inlined_call_operand.vmem [shape: bf16[8,2,9,4,4], index: 1, kind: input, shape index: {}]   ;;  %s17698_s2 = inlined_call_operand.vmem [shape: f32[8,2,1,4], index: 2, kind: input, shape index: {}]   ;;  %s17699_s3 = inlined_call_operand.vmem [shape: f32[610,1], index: 3, kind: input, shape index: {}]   ;;  %s17700_s4 = inlined_call_operand.vmem [shape: f32[648,4], index: 4, kind: output, shape index: {}]  }
   0x1 LB: > { %s10594_s16 = sadd.s32 4294967295, %s11428_s15   ;;  %p10597_p0 = scmp.ge.s32.totalorder %s11428_s15, 1  ;;  %s11428_s15 = sphi %s11457_s15, %s14_s15  }
   0x2   : > { %p166_p1 = scmp.lt.s32.totalorder %s11428_s15, 9 }
   0x4   : > { %p167_p2 = pnand %p10597_p0, %p166_p1 }
   0x6   : > { %170 = sbr.rel (%p167_p2) target bundleno = 3266 (0xcc2), region = 36 }
   0xb   : > { %p191_p3 = scmp.lt.s32.totalorder %s10594_s16, 7  ;;  %p10600_p4 = scmp.ne.s32.totalorder %s10594_s16, 0 }
   0xd   : > { %s192_s17 = scalar_select %p191_p3, %s10594_s16, 7 }
   0xe   : > { %204 = sbr.rel (%p10600_p4) target bundleno = 182 (0xb6), region = 40 }
   0xf   : > { %s11325_s18 = smul.u32 36, %s192_s17  ;;  %s10599_s19 = sshll.u32 %s192_s17, 1 }
  0x10   : > { %s11468_s22 = scalar_lea.vmem %s17698_s2, %s10599_s19 }
  0x11   : > { %s11473_s25 = scalar_lea.vmem %s17697_s1, %s11325_s18 }
  0x13   : > { %v205_v0 = vld [vmem:[%s17696_s0] sm:$0xff]  ;;  %vm286_vm0 = vcmask 31744   ;;  %v206_v1 = vld [vmem:[%s17696_s0 + $0x8] sm:$0xff]  ;;  %v207_v2 = vld [vmem:[%s17696_s0 + $0x10] sm:$0xff] }
  0x14   : > { %287 = vst.msk [vmem:[%s17700_s4] sm:$0xff] %vm286_vm0, %v205_v0  ;;  %v208_v3 = vld [vmem:[%s17696_s0 + $0x18] sm:$0xff]  ;;  %v209_v4 = vld [vmem:[%s17696_s0 + $0x20] sm:$0xff]  ;;  %v210_v5 = vld [vmem:[%s17696_s0 + $0x28] sm:$0xff] }
  0x15   : > { %288 = vst.msk [vmem:[%s17700_s4 + $0x8] sm:$0xff] %vm286_vm0, %v206_v1  ;;  %v211_v6 = vld [vmem:[%s17696_s0 + $0x30] sm:$0xff]  ;;  %v212_v7 = vld [vmem:[%s17696_s0 + $0x38] sm:$0xff]  ;;  %v213_v8 = vld [vmem:[%s17696_s0 + $0x40] sm:$0xff] }
  0x16   : > { %289 = vst.msk [vmem:[%s17700_s4 + $0x10] sm:$0xff] %vm286_vm0, %v207_v2  ;;  %v214_v9 = vld [vmem:[%s17696_s0 + $0x48] sm:$0xff]  ;;  %v215_v10 = vld [vmem:[%s17696_s0 + $0x50] sm:$0xff]  ;;  %v216_v11 = vld [vmem:[%s17696_s0 + $0x58] sm:$0xff] }
  0x17   : > { %290 = vst.msk [vmem:[%s17700_s4 + $0x18] sm:$0xff] %vm286_vm0, %v208_v3  ;;  %v217_v12 = vld [vmem:[%s17696_s0 + $0x60] sm:$0xff]  ;;  %v218_v13 = vld [vmem:[%s17696_s0 + $0x68] sm:$0xff]  ;;  %v219_v14 = vld [vmem:[%s17696_s0 + $0x70] sm:$0xff] }
  0x18   : > { %291 = vst.msk [vmem:[%s17700_s4 + $0x20] sm:$0xff] %vm286_vm0, %v209_v4  ;;  %v220_v15 = vld [vmem:[%s17696_s0 + $0x78] sm:$0xff]  ;;  %v221_v16 = vld [vmem:[%s17696_s0 + $0x80] sm:$0xff]  ;;  %v222_v17 = vld [vmem:[%s17696_s0 + $0x88] sm:$0xff] }
  0x19   : > { %292 = vst.msk [vmem:[%s17700_s4 + $0x28] sm:$0xff] %vm286_vm0, %v210_v5  ;;  %v223_v18 = vld [vmem:[%s17696_s0 + $0x90] sm:$0xff]  ;;  %v224_v19 = vld [vmem:[%s17696_s0 + $0x98] sm:$0xff]  ;;  %v225_v20 = vld [vmem:[%s17696_s0 + $0xa0] sm:$0xff] }
  0x1a   : > { %293 = vst.msk [vmem:[%s17700_s4 + $0x30] sm:$0xff] %vm286_vm0, %v211_v6  ;;  %v226_v21 = vld [vmem:[%s17696_s0 + $0xa8] sm:$0xff]  ;;  %v227_v22 = vld [vmem:[%s17696_s0 + $0xb0] sm:$0xff]  ;;  %v228_v23 = vld [vmem:[%s17696_s0 + $0xb8] sm:$0xff] }
  0x1b   : > { %294 = vst.msk [vmem:[%s17700_s4 + $0x38] sm:$0xff] %vm286_vm0, %v212_v7  ;;  %v229_v24 = vld [vmem:[%s17696_s0 + $0xc0] sm:$0xff]  ;;  %v230_v25 = vld [vmem:[%s17696_s0 + $0xc8] sm:$0xff]  ;;  %v231_v26 = vld [vmem:[%s17696_s0 + $0xd0] sm:$0xff] }
  0x1c   : > { %295 = vst.msk [vmem:[%s17700_s4 + $0x40] sm:$0xff] %vm286_vm0, %v213_v8  ;;  %v232_v27 = vld [vmem:[%s17696_s0 + $0xd8] sm:$0xff]  ;;  %v233_v28 = vld [vmem:[%s17696_s0 + $0xe0] sm:$0xff]  ;;  %v234_v29 = vld [vmem:[%s17696_s0 + $0xe8] sm:$0xff] }
  0x1d   : > { %296 = vst.msk [vmem:[%s17700_s4 + $0x48] sm:$0xff] %vm286_vm0, %v214_v9  ;;  %v235_v30 = vld [vmem:[%s17696_s0 + $0xf0] sm:$0xff]  ;;  %v236_v31 = vld [vmem:[%s17696_s0 + $0xf8] sm:$0xff]  ;;  %v237_v32 = vld [vmem:[%s17696_s0 + $0x100] sm:$0xff] }
  0x1e   : > { %297 = vst.msk [vmem:[%s17700_s4 + $0x50] sm:$0xff] %vm286_vm0, %v215_v10  ;;  %v238_v33 = vld [vmem:[%s17696_s0 + $0x108] sm:$0xff]  ;;  %v239_v34 = vld [vmem:[%s17696_s0 + $0x110] sm:$0xff]  ;;  %v240_v35 = vld [vmem:[%s17696_s0 + $0x118] sm:$0xff] }
  0x1f   : > { %298 = vst.msk [vmem:[%s17700_s4 + $0x58] sm:$0xff] %vm286_vm0, %v216_v11  ;;  %v241_v36 = vld [vmem:[%s17696_s0 + $0x120] sm:$0xff]  ;;  %v242_v37 = vld [vmem:[%s17696_s0 + $0x128] sm:$0xff]  ;;  %v243_v38 = vld [vmem:[%s17696_s0 + $0x130] sm:$0xff] }
  0x20   : > { %299 = vst.msk [vmem:[%s17700_s4 + $0x60] sm:$0xff] %vm286_vm0, %v217_v12  ;;  %v244_v39 = vld [vmem:[%s17696_s0 + $0x138] sm:$0xff]  ;;  %v245_v40 = vld [vmem:[%s17696_s0 + $0x140] sm:$0xff]  ;;  %v246_v41 = vld [vmem:[%s17696_s0 + $0x148] sm:$0xff] }
  0x21   : > { %300 = vst.msk [vmem:[%s17700_s4 + $0x68] sm:$0xff] %vm286_vm0, %v218_v13  ;;  %v247_v42 = vld [vmem:[%s17696_s0 + $0x150] sm:$0xff]  ;;  %v248_v43 = vld [vmem:[%s17696_s0 + $0x158] sm:$0xff]  ;;  %v249_v44 = vld [vmem:[%s17696_s0 + $0x160] sm:$0xff] }
  0x22   : > { %301 = vst.msk [vmem:[%s17700_s4 + $0x70] sm:$0xff] %vm286_vm0, %v219_v14  ;;  %v250_v45 = vld [vmem:[%s17696_s0 + $0x168] sm:$0xff]  ;;  %v251_v46 = vld [vmem:[%s17696_s0 + $0x170] sm:$0xff]  ;;  %v252_v47 = vld [vmem:[%s17696_s0 + $0x178] sm:$0xff] }
  0x23   : > { %302 = vst.msk [vmem:[%s17700_s4 + $0x78] sm:$0xff] %vm286_vm0, %v220_v15  ;;  %v253_v48 = vld [vmem:[%s17696_s0 + $0x180] sm:$0xff]  ;;  %v254_v49 = vld [vmem:[%s17696_s0 + $0x188] sm:$0xff]  ;;  %v255_v50 = vld [vmem:[%s17696_s0 + $0x190] sm:$0xff] }
  0x24   : > { %303 = vst.msk [vmem:[%s17700_s4 + $0x80] sm:$0xff] %vm286_vm0, %v221_v16  ;;  %v256_v51 = vld [vmem:[%s17696_s0 + $0x198] sm:$0xff]  ;;  %v257_v52 = vld [vmem:[%s17696_s0 + $0x1a0] sm:$0xff]  ;;  %v258_v53 = vld [vmem:[%s17696_s0 + $0x1a8] sm:$0xff] }
  0x25   : > { %304 = vst.msk [vmem:[%s17700_s4 + $0x88] sm:$0xff] %vm286_vm0, %v222_v17  ;;  %v259_v54 = vld [vmem:[%s17696_s0 + $0x1b0] sm:$0xff]  ;;  %v260_v55 = vld [vmem:[%s17696_s0 + $0x1b8] sm:$0xff]  ;;  %v261_v56 = vld [vmem:[%s17696_s0 + $0x1c0] sm:$0xff]  ;;  %v11430_v17 = vmov 0.0  }
  0x26   : > { %305 = vst.msk [vmem:[%s17700_s4 + $0x90] sm:$0xff] %vm286_vm0, %v223_v18  ;;  %v262_v57 = vld [vmem:[%s17696_s0 + $0x1c8] sm:$0xff]  ;;  %v263_v58 = vld [vmem:[%s17696_s0 + $0x1d0] sm:$0xff]  ;;  %v264_v59 = vld [vmem:[%s17696_s0 + $0x1d8] sm:$0xff] }
  0x27   : > { %306 = vst.msk [vmem:[%s17700_s4 + $0x98] sm:$0xff] %vm286_vm0, %v224_v19  ;;  %v265_v60 = vld [vmem:[%s17696_s0 + $0x1e0] sm:$0xff]  ;;  %v266_v61 = vld [vmem:[%s17696_s0 + $0x1e8] sm:$0xff]  ;;  %v267_v62 = vld [vmem:[%s17696_s0 + $0x1f0] sm:$0xff] }
  0x28   : > { %307 = vst.msk [vmem:[%s17700_s4 + $0xa0] sm:$0xff] %vm286_vm0, %v225_v20  ;;  %v268_v63 = vld [vmem:[%s17696_s0 + $0x1f8] sm:$0xff]  ;;  %v269_v0 = vld [vmem:[%s17696_s0 + $0x200] sm:$0xff]  ;;  %v270_v1 = vld [vmem:[%s17696_s0 + $0x208] sm:$0xff] }
  0x29   : > { %308 = vst.msk [vmem:[%s17700_s4 + $0xa8] sm:$0xff] %vm286_vm0, %v226_v21  ;;  %v271_v2 = vld [vmem:[%s17696_s0 + $0x210] sm:$0xff]  ;;  %v272_v3 = vld [vmem:[%s17696_s0 + $0x218] sm:$0xff]  ;;  %v273_v4 = vld [vmem:[%s17696_s0 + $0x220] sm:$0xff] }
  0x2a   : > { %309 = vst.msk [vmem:[%s17700_s4 + $0xb0] sm:$0xff] %vm286_vm0, %v227_v22  ;;  %v274_v5 = vld [vmem:[%s17696_s0 + $0x228] sm:$0xff]  ;;  %v275_v6 = vld [vmem:[%s17696_s0 + $0x230] sm:$0xff]  ;;  %v276_v7 = vld [vmem:[%s17696_s0 + $0x238] sm:$0xff] }
  0x2b   : > { %310 = vst.msk [vmem:[%s17700_s4 + $0xb8] sm:$0xff] %vm286_vm0, %v228_v23  ;;  %v277_v8 = vld [vmem:[%s17696_s0 + $0x240] sm:$0xff]  ;;  %v278_v9 = vld [vmem:[%s17696_s0 + $0x248] sm:$0xff]  ;;  %v279_v10 = vld [vmem:[%s17696_s0 + $0x250] sm:$0xff] }
  0x2c   : > { %311 = vst.msk [vmem:[%s17700_s4 + $0xc0] sm:$0xff] %vm286_vm0, %v229_v24  ;;  %v280_v11 = vld [vmem:[%s17696_s0 + $0x258] sm:$0xff]  ;;  %v281_v12 = vld [vmem:[%s17696_s0 + $0x260] sm:$0xff]  ;;  %v282_v13 = vld [vmem:[%s17696_s0 + $0x268] sm:$0xff] }
  0x2d   : > { %312 = vst.msk [vmem:[%s17700_s4 + $0xc8] sm:$0xff] %vm286_vm0, %v230_v25  ;;  %v283_v14 = vld [vmem:[%s17696_s0 + $0x270] sm:$0xff]  ;;  %v284_v15 = vld [vmem:[%s17696_s0 + $0x278] sm:$0xff]  ;;  %v285_v16 = vld [vmem:[%s17696_s0 + $0x280] sm:$0xff] }
  0x2e   : > { %313 = vst.msk [vmem:[%s17700_s4 + $0xd0] sm:$0xff] %vm286_vm0, %v231_v26 }
  0x2f   : > { %314 = vst.msk [vmem:[%s17700_s4 + $0xd8] sm:$0xff] %vm286_vm0, %v232_v27 }
  0x30   : > { %315 = vst.msk [vmem:[%s17700_s4 + $0xe0] sm:$0xff] %vm286_vm0, %v233_v28 }
  0x31   : > { %316 = vst.msk [vmem:[%s17700_s4 + $0xe8] sm:$0xff] %vm286_vm0, %v234_v29 }
  0x32   : > { %317 = vst.msk [vmem:[%s17700_s4 + $0xf0] sm:$0xff] %vm286_vm0, %v235_v30 }
  0x33   : > { %318 = vst.msk [vmem:[%s17700_s4 + $0xf8] sm:$0xff] %vm286_vm0, %v236_v31 }
  0x34   : > { %319 = vst.msk [vmem:[%s17700_s4 + $0x100] sm:$0xff] %vm286_vm0, %v237_v32 }
  0x35   : > { %320 = vst.msk [vmem:[%s17700_s4 + $0x108] sm:$0xff] %vm286_vm0, %v238_v33 }
  0x36   : > { %321 = vst.msk [vmem:[%s17700_s4 + $0x110] sm:$0xff] %vm286_vm0, %v239_v34 }
  0x37   : > { %322 = vst.msk [vmem:[%s17700_s4 + $0x118] sm:$0xff] %vm286_vm0, %v240_v35 }
  0x38   : > { %323 = vst.msk [vmem:[%s17700_s4 + $0x120] sm:$0xff] %vm286_vm0, %v241_v36 }
  0x39   : > { %324 = vst.msk [vmem:[%s17700_s4 + $0x128] sm:$0xff] %vm286_vm0, %v242_v37 }
  0x3a   : > { %325 = vst.msk [vmem:[%s17700_s4 + $0x130] sm:$0xff] %vm286_vm0, %v243_v38 }
  0x3b   : > { %326 = vst.msk [vmem:[%s17700_s4 + $0x138] sm:$0xff] %vm286_vm0, %v244_v39 }
  0x3c   : > { %327 = vst.msk [vmem:[%s17700_s4 + $0x140] sm:$0xff] %vm286_vm0, %v245_v40 }
  0x3d   : > { %328 = vst.msk [vmem:[%s17700_s4 + $0x148] sm:$0xff] %vm286_vm0, %v246_v41 }
  0x3e   : > { %329 = vst.msk [vmem:[%s17700_s4 + $0x150] sm:$0xff] %vm286_vm0, %v247_v42 }
  0x3f   : > { %330 = vst.msk [vmem:[%s17700_s4 + $0x158] sm:$0xff] %vm286_vm0, %v248_v43 }
  0x40   : > { %331 = vst.msk [vmem:[%s17700_s4 + $0x160] sm:$0xff] %vm286_vm0, %v249_v44 }
  0x41   : > { %332 = vst.msk [vmem:[%s17700_s4 + $0x168] sm:$0xff] %vm286_vm0, %v250_v45 }
  0x42   : > { %333 = vst.msk [vmem:[%s17700_s4 + $0x170] sm:$0xff] %vm286_vm0, %v251_v46 }
  0x43   : > { %334 = vst.msk [vmem:[%s17700_s4 + $0x178] sm:$0xff] %vm286_vm0, %v252_v47 }
  0x44   : > { %335 = vst.msk [vmem:[%s17700_s4 + $0x180] sm:$0xff] %vm286_vm0, %v253_v48 }
  0x45   : > { %336 = vst.msk [vmem:[%s17700_s4 + $0x188] sm:$0xff] %vm286_vm0, %v254_v49 }
  0x46   : > { %337 = vst.msk [vmem:[%s17700_s4 + $0x190] sm:$0xff] %vm286_vm0, %v255_v50 }
  0x47   : > { %338 = vst.msk [vmem:[%s17700_s4 + $0x198] sm:$0xff] %vm286_vm0, %v256_v51 }
  0x48   : > { %339 = vst.msk [vmem:[%s17700_s4 + $0x1a0] sm:$0xff] %vm286_vm0, %v257_v52 }
  0x49   : > { %340 = vst.msk [vmem:[%s17700_s4 + $0x1a8] sm:$0xff] %vm286_vm0, %v258_v53 }
  0x4a   : > { %341 = vst.msk [vmem:[%s17700_s4 + $0x1b0] sm:$0xff] %vm286_vm0, %v259_v54 }
  0x4b   : > { %342 = vst.msk [vmem:[%s17700_s4 + $0x1b8] sm:$0xff] %vm286_vm0, %v260_v55 }
  0x4c   : > { %343 = vst.msk [vmem:[%s17700_s4 + $0x1c0] sm:$0xff] %vm286_vm0, %v261_v56 }
  0x4d   : > { %344 = vst.msk [vmem:[%s17700_s4 + $0x1c8] sm:$0xff] %vm286_vm0, %v262_v57 }
  0x4e   : > { %345 = vst.msk [vmem:[%s17700_s4 + $0x1d0] sm:$0xff] %vm286_vm0, %v263_v58 }
  0x4f   : > { %346 = vst.msk [vmem:[%s17700_s4 + $0x1d8] sm:$0xff] %vm286_vm0, %v264_v59 }
  0x50   : > { %347 = vst.msk [vmem:[%s17700_s4 + $0x1e0] sm:$0xff] %vm286_vm0, %v265_v60 }
  0x51   : > { %348 = vst.msk [vmem:[%s17700_s4 + $0x1e8] sm:$0xff] %vm286_vm0, %v266_v61 }
  0x52   : > { %349 = vst.msk [vmem:[%s17700_s4 + $0x1f0] sm:$0xff] %vm286_vm0, %v267_v62 }
  0x53   : > { %350 = vst.msk [vmem:[%s17700_s4 + $0x1f8] sm:$0xff] %vm286_vm0, %v268_v63 }
  0x54   : > { %351 = vst.msk [vmem:[%s17700_s4 + $0x200] sm:$0xff] %vm286_vm0, %v269_v0 }
  0x55   : > { %352 = vst.msk [vmem:[%s17700_s4 + $0x208] sm:$0xff] %vm286_vm0, %v270_v1 }
  0x56   : > { %353 = vst.msk [vmem:[%s17700_s4 + $0x210] sm:$0xff] %vm286_vm0, %v271_v2 }
  0x57   : > { %354 = vst.msk [vmem:[%s17700_s4 + $0x218] sm:$0xff] %vm286_vm0, %v272_v3 }
  0x58   : > { %355 = vst.msk [vmem:[%s17700_s4 + $0x220] sm:$0xff] %vm286_vm0, %v273_v4 }
  0x59   : > { %356 = vst.msk [vmem:[%s17700_s4 + $0x228] sm:$0xff] %vm286_vm0, %v274_v5 }
  0x5a   : > { %357 = vst.msk [vmem:[%s17700_s4 + $0x230] sm:$0xff] %vm286_vm0, %v275_v6 }
  0x5b   : > { %358 = vst.msk [vmem:[%s17700_s4 + $0x238] sm:$0xff] %vm286_vm0, %v276_v7 }
  0x5c   : > { %359 = vst.msk [vmem:[%s17700_s4 + $0x240] sm:$0xff] %vm286_vm0, %v277_v8 }
  0x5d   : > { %360 = vst.msk [vmem:[%s17700_s4 + $0x248] sm:$0xff] %vm286_vm0, %v278_v9 }
  0x5e   : > { %361 = vst.msk [vmem:[%s17700_s4 + $0x250] sm:$0xff] %vm286_vm0, %v279_v10 }
  0x5f   : > { %362 = vst.msk [vmem:[%s17700_s4 + $0x258] sm:$0xff] %vm286_vm0, %v280_v11 }
  0x60   : > { %363 = vst.msk [vmem:[%s17700_s4 + $0x260] sm:$0xff] %vm286_vm0, %v281_v12 }
  0x61   : > { %364 = vst.msk [vmem:[%s17700_s4 + $0x268] sm:$0xff] %vm286_vm0, %v282_v13 }
  0x62   : > { %365 = vst.msk [vmem:[%s17700_s4 + $0x270] sm:$0xff] %vm286_vm0, %v283_v14 }
  0x63   : > { %366 = vst.msk [vmem:[%s17700_s4 + $0x278] sm:$0xff] %vm286_vm0, %v284_v15 }
  0x64   : > { %367 = vst.msk [vmem:[%s17700_s4 + $0x280] sm:$0xff] %vm286_vm0, %v285_v16 }
  0x65   : > { %368 = vst.msk [vmem:[#allocation2] sm:$0xff] %vm286_vm0, %v11430_v17 }
  0x66   : > { %369 = vst.msk [vmem:[#allocation2 + $0x8] sm:$0xff] %vm286_vm0, %v11430_v17 }
  0x67   : > { %370 = vst.msk [vmem:[#allocation2 + $0x10] sm:$0xff] %vm286_vm0, %v11430_v17 }
  0x68   : > { %371 = vst.msk [vmem:[#allocation2 + $0x18] sm:$0xff] %vm286_vm0, %v11430_v17 }
  0x69   : > { %372 = vst.msk [vmem:[#allocation2 + $0x20] sm:$0xff] %vm286_vm0, %v11430_v17 }
  0x6a   : > { %373 = vst.msk [vmem:[#allocation2 + $0x28] sm:$0xff] %vm286_vm0, %v11430_v17 }
  0x6b   : > { %374 = vst.msk [vmem:[#allocation2 + $0x30] sm:$0xff] %vm286_vm0, %v11430_v17 }
  0x6c   : > { %375 = vst.msk [vmem:[#allocation2 + $0x38] sm:$0xff] %vm286_vm0, %v11430_v17 }
  0x6d   : > { %376 = vst.msk [vmem:[#allocation2 + $0x40] sm:$0xff] %vm286_vm0, %v11430_v17 }
  0x6e   : > { %377 = vst.msk [vmem:[#allocation2 + $0x48] sm:$0xff] %vm286_vm0, %v11430_v17 }
  0x6f   : > { %378 = vst.msk [vmem:[#allocation2 + $0x50] sm:$0xff] %vm286_vm0, %v11430_v17 }
  0x70   : > { %379 = vst.msk [vmem:[#allocation2 + $0x58] sm:$0xff] %vm286_vm0, %v11430_v17 }
  0x71   : > { %380 = vst.msk [vmem:[#allocation2 + $0x60] sm:$0xff] %vm286_vm0, %v11430_v17 }
  0x72   : > { %381 = vst.msk [vmem:[#allocation2 + $0x68] sm:$0xff] %vm286_vm0, %v11430_v17 }
  0x73   : > { %382 = vst.msk [vmem:[#allocation2 + $0x70] sm:$0xff] %vm286_vm0, %v11430_v17 }
  0x74   : > { %383 = vst.msk [vmem:[#allocation2 + $0x78] sm:$0xff] %vm286_vm0, %v11430_v17 }
  0x75   : > { %384 = vst.msk [vmem:[#allocation2 + $0x80] sm:$0xff] %vm286_vm0, %v11430_v17 }
  0x76   : > { %385 = vst.msk [vmem:[#allocation2 + $0x88] sm:$0xff] %vm286_vm0, %v11430_v17 }
  0x77   : > { %386 = vst.msk [vmem:[#allocation2 + $0x90] sm:$0xff] %vm286_vm0, %v11430_v17 }
  0x78   : > { %387 = vst.msk [vmem:[#allocation2 + $0x98] sm:$0xff] %vm286_vm0, %v11430_v17 }
  0x79   : > { %388 = vst.msk [vmem:[#allocation2 + $0xa0] sm:$0xff] %vm286_vm0, %v11430_v17 }
  0x7a   : > { %389 = vst.msk [vmem:[#allocation2 + $0xa8] sm:$0xff] %vm286_vm0, %v11430_v17 }
  0x7b   : > { %390 = vst.msk [vmem:[#allocation2 + $0xb0] sm:$0xff] %vm286_vm0, %v11430_v17 }
  0x7c   : > { %391 = vst.msk [vmem:[#allocation2 + $0xb8] sm:$0xff] %vm286_vm0, %v11430_v17 }
  0x7d   : > { %392 = vst.msk [vmem:[#allocation2 + $0xc0] sm:$0xff] %vm286_vm0, %v11430_v17 }
  0x7e   : > { %393 = vst.msk [vmem:[#allocation2 + $0xc8] sm:$0xff] %vm286_vm0, %v11430_v17 }
  0x7f   : > { %394 = vst.msk [vmem:[#allocation2 + $0xd0] sm:$0xff] %vm286_vm0, %v11430_v17 }
  0x80   : > { %395 = vst.msk [vmem:[#allocation2 + $0xd8] sm:$0xff] %vm286_vm0, %v11430_v17 }
  0x81   : > { %396 = vst.msk [vmem:[#allocation2 + $0xe0] sm:$0xff] %vm286_vm0, %v11430_v17 }
  0x82   : > { %397 = vst.msk [vmem:[#allocation2 + $0xe8] sm:$0xff] %vm286_vm0, %v11430_v17 }
  0x83   : > { %398 = vst.msk [vmem:[#allocation2 + $0xf0] sm:$0xff] %vm286_vm0, %v11430_v17 }
  0x84   : > { %399 = vst.msk [vmem:[#allocation2 + $0xf8] sm:$0xff] %vm286_vm0, %v11430_v17 }
  0x85   : > { %400 = vst.msk [vmem:[#allocation2 + $0x100] sm:$0xff] %vm286_vm0, %v11430_v17 }
  0x86   : > { %401 = vst.msk [vmem:[#allocation2 + $0x108] sm:$0xff] %vm286_vm0, %v11430_v17 }
  0x87   : > { %402 = vst.msk [vmem:[#allocation2 + $0x110] sm:$0xff] %vm286_vm0, %v11430_v17 }
  0x88   : > { %403 = vst.msk [vmem:[#allocation2 + $0x118] sm:$0xff] %vm286_vm0, %v11430_v17 }
  0x89   : > { %404 = vst.msk [vmem:[#allocation2 + $0x120] sm:$0xff] %vm286_vm0, %v11430_v17 }
  0x8a   : > { %405 = vst.msk [vmem:[#allocation2 + $0x128] sm:$0xff] %vm286_vm0, %v11430_v17 }
  0x8b   : > { %406 = vst.msk [vmem:[#allocation2 + $0x130] sm:$0xff] %vm286_vm0, %v11430_v17 }
  0x8c   : > { %407 = vst.msk [vmem:[#allocation2 + $0x138] sm:$0xff] %vm286_vm0, %v11430_v17 }
  0x8d   : > { %408 = vst.msk [vmem:[#allocation2 + $0x140] sm:$0xff] %vm286_vm0, %v11430_v17 }
  0x8e   : > { %409 = vst.msk [vmem:[#allocation2 + $0x148] sm:$0xff] %vm286_vm0, %v11430_v17 }
  0x8f   : > { %410 = vst.msk [vmem:[#allocation2 + $0x150] sm:$0xff] %vm286_vm0, %v11430_v17 }
  0x90   : > { %411 = vst.msk [vmem:[#allocation2 + $0x158] sm:$0xff] %vm286_vm0, %v11430_v17 }
  0x91   : > { %412 = vst.msk [vmem:[#allocation2 + $0x160] sm:$0xff] %vm286_vm0, %v11430_v17 }
  0x92   : > { %413 = vst.msk [vmem:[#allocation2 + $0x168] sm:$0xff] %vm286_vm0, %v11430_v17 }
  0x93   : > { %414 = vst.msk [vmem:[#allocation2 + $0x170] sm:$0xff] %vm286_vm0, %v11430_v17 }
  0x94   : > { %415 = vst.msk [vmem:[#allocation2 + $0x178] sm:$0xff] %vm286_vm0, %v11430_v17 }
  0x95   : > { %416 = vst.msk [vmem:[#allocation2 + $0x180] sm:$0xff] %vm286_vm0, %v11430_v17 }
  0x96   : > { %417 = vst.msk [vmem:[#allocation2 + $0x188] sm:$0xff] %vm286_vm0, %v11430_v17 }
  0x97   : > { %418 = vst.msk [vmem:[#allocation2 + $0x190] sm:$0xff] %vm286_vm0, %v11430_v17 }
  0x98   : > { %419 = vst.msk [vmem:[#allocation2 + $0x198] sm:$0xff] %vm286_vm0, %v11430_v17 }
  0x99   : > { %420 = vst.msk [vmem:[#allocation2 + $0x1a0] sm:$0xff] %vm286_vm0, %v11430_v17 }
  0x9a   : > { %421 = vst.msk [vmem:[#allocation2 + $0x1a8] sm:$0xff] %vm286_vm0, %v11430_v17 }
  0x9b   : > { %422 = vst.msk [vmem:[#allocation2 + $0x1b0] sm:$0xff] %vm286_vm0, %v11430_v17 }
  0x9c   : > { %423 = vst.msk [vmem:[#allocation2 + $0x1b8] sm:$0xff] %vm286_vm0, %v11430_v17 }
  0x9d   : > { %424 = vst.msk [vmem:[#allocation2 + $0x1c0] sm:$0xff] %vm286_vm0, %v11430_v17 }
  0x9e   : > { %425 = vst.msk [vmem:[#allocation2 + $0x1c8] sm:$0xff] %vm286_vm0, %v11430_v17 }
  0x9f   : > { %426 = vst.msk [vmem:[#allocation2 + $0x1d0] sm:$0xff] %vm286_vm0, %v11430_v17 }
  0xa0   : > { %427 = vst.msk [vmem:[#allocation2 + $0x1d8] sm:$0xff] %vm286_vm0, %v11430_v17 }
  0xa1   : > { %428 = vst.msk [vmem:[#allocation2 + $0x1e0] sm:$0xff] %vm286_vm0, %v11430_v17 }
  0xa2   : > { %429 = vst.msk [vmem:[#allocation2 + $0x1e8] sm:$0xff] %vm286_vm0, %v11430_v17 }
  0xa3   : > { %430 = vst.msk [vmem:[#allocation2 + $0x1f0] sm:$0xff] %vm286_vm0, %v11430_v17 }
  0xa4   : > { %431 = vst.msk [vmem:[#allocation2 + $0x1f8] sm:$0xff] %vm286_vm0, %v11430_v17 }
  0xa5   : > { %432 = vst.msk [vmem:[#allocation2 + $0x200] sm:$0xff] %vm286_vm0, %v11430_v17 }
  0xa6   : > { %433 = vst.msk [vmem:[#allocation2 + $0x208] sm:$0xff] %vm286_vm0, %v11430_v17 }
  0xa7   : > { %434 = vst.msk [vmem:[#allocation2 + $0x210] sm:$0xff] %vm286_vm0, %v11430_v17 }
  0xa8   : > { %435 = vst.msk [vmem:[#allocation2 + $0x218] sm:$0xff] %vm286_vm0, %v11430_v17 }
  0xa9   : > { %436 = vst.msk [vmem:[#allocation2 + $0x220] sm:$0xff] %vm286_vm0, %v11430_v17 }
  0xaa   : > { %437 = vst.msk [vmem:[#allocation2 + $0x228] sm:$0xff] %vm286_vm0, %v11430_v17 }
  0xab   : > { %438 = vst.msk [vmem:[#allocation2 + $0x230] sm:$0xff] %vm286_vm0, %v11430_v17 }
  0xac   : > { %439 = vst.msk [vmem:[#allocation2 + $0x238] sm:$0xff] %vm286_vm0, %v11430_v17 }
  0xad   : > { %440 = vst.msk [vmem:[#allocation2 + $0x240] sm:$0xff] %vm286_vm0, %v11430_v17 }
  0xae   : > { %441 = vst.msk [vmem:[#allocation2 + $0x248] sm:$0xff] %vm286_vm0, %v11430_v17 }
  0xaf   : > { %442 = vst.msk [vmem:[#allocation2 + $0x250] sm:$0xff] %vm286_vm0, %v11430_v17 }
  0xb0   : > { %443 = vst.msk [vmem:[#allocation2 + $0x258] sm:$0xff] %vm286_vm0, %v11430_v17 }
  0xb1   : > { %444 = vst.msk [vmem:[#allocation2 + $0x260] sm:$0xff] %vm286_vm0, %v11430_v17 }
  0xb2   : > { %445 = vst.msk [vmem:[#allocation2 + $0x268] sm:$0xff] %vm286_vm0, %v11430_v17 }
  0xb3   : > { %446 = vst.msk [vmem:[#allocation2 + $0x270] sm:$0xff] %vm286_vm0, %v11430_v17 }
  0xb4   : > { %447 = vst.msk [vmem:[#allocation2 + $0x278] sm:$0xff] %vm286_vm0, %v11430_v17 }
  0xb5   : > { %448 = vst.msk [vmem:[#allocation2 + $0x280] sm:$0xff] %vm286_vm0, %v11430_v17 }
  0xb6 PF: > { %v760_v18 = vld [vmem:[%s11473_s25] sm:$0x3]  ;;  %vm879_vm1 = vcmask 1041408   ;;  %v10601_v19 = vld [vmem:[%s11473_s25 + $0x8] sm:$0x3]  ;;  %vm761_vm2 = vcmask 31744  }
  0xb7   : > { %v644_v20 = vld [vmem:[%s17700_s4] sm:$0xff]  ;;  %v881_v21 = vsel %vm879_vm1, %v760_v18, 0  ;;  %v1204_v22 = vsel %vm879_vm1, %v10601_v19, 0  ;;  %v645_v23 = vld [vmem:[%s17700_s4 + $0x8] sm:$0xff]  ;;  %v526_v28 = vld [vmem:[%s17700_s4 + $0x13] sm:$0xff]  ;;  %vm5770_vm3 = vcmask 25600  }
  0xb8   : > { %v684_v24 = vld [vmem:[%s17700_s4 + $0x140] sm:$0xff]  ;;  %v685_v25 = vld [vmem:[%s17700_s4 + $0x148] sm:$0xff]  ;;  %890 = vmatpush.bf16.msra.mxu0 %v881_v21  ;;  %11323 = vmatpush.bf16.msra.mxu2 %v881_v21  ;;  %v721_v26 = vpack.c.bf16 %v645_v23, %v644_v20  ;;  %v566_v30 = vld [vmem:[%s17700_s4 + $0x153] sm:$0xff] }
  0xb9   : > { %v741_v27 = vpack.c.bf16 %v685_v25, %v684_v24  ;;  %v527_v29 = vld [vmem:[%s17700_s4 + $0x1b] sm:$0xff]  ;;  %1213 = vmatpush.bf16.msra.mxu1 %v1204_v22  ;;  %11324 = vmatpush.bf16.msra.mxu3 %v1204_v22  ;;  %v10760_v33 = vld [vmem:[%s11473_s25 + $0x6] sm:$0x3]  ;;  %v10720_v38 = vld [vmem:[%s11473_s25 + $0x4] sm:$0x3] }
  0xba   : > { %v603_v31 = vpack.c.bf16 %v527_v29, %v526_v28  ;;  %v567_v32 = vld [vmem:[%s17700_s4 + $0x15b] sm:$0xff]  ;;  %v2681_v36 = vsel %vm879_vm1, %v10760_v33, 0  ;;  %v2163_v39 = vsel %vm879_vm1, %v10720_v38, 0  ;;  %v646_v40 = vld [vmem:[%s17700_s4 + $0x10] sm:$0xff]  ;;  %v528_v44 = vld [vmem:[%s17700_s4 + $0x23] sm:$0xff] }
  0xbb   : > { %v10680_v34 = vld [vmem:[%s11473_s25 + $0x2] sm:$0x3]  ;;  %v623_v35 = vpack.c.bf16 %v567_v32, %v566_v30  ;;  %10602 = vmatmul.msk.bf16.vlgmr.msra.gmra.mxu0 %vm761_vm2, %v721_v26  ;;  %10622 = vmatmul.msk.bf16.vlgmr.msra.gmra.mxu2 %vm761_vm2, %v741_v27  ;;  %v647_v41 = vld [vmem:[%s17700_s4 + $0x18] sm:$0xff]  ;;  %v686_v42 = vld [vmem:[%s17700_s4 + $0x150] sm:$0xff] }
  0xbc   : > { %v1645_v37 = vsel %vm879_vm1, %v10680_v34, 0  ;;  %10641 = vmatmul.msk.bf16.vlgmr.msra.gmra.mxu1 %vm761_vm2, %v603_v31  ;;  %2690 = vmatpush.bf16.msrb.mxu0 %v2681_v36  ;;  %v687_v43 = vld [vmem:[%s17700_s4 + $0x158] sm:$0xff]  ;;  %v529_v45 = vld [vmem:[%s17700_s4 + $0x2b] sm:$0xff]  ;;  %v568_v46 = vld [vmem:[%s17700_s4 + $0x163] sm:$0xff]  ;;  %v722_v48 = vpack.c.bf16 %v647_v41, %v646_v40 }
  0xbd   : > { %10661 = vmatmul.msk.bf16.vlgmr.msra.gmra.mxu3 %vm761_vm2, %v623_v35  ;;  %1654 = vmatpush.bf16.msrb.mxu2 %v1645_v37  ;;  %v569_v47 = vld [vmem:[%s17700_s4 + $0x16b] sm:$0xff]  ;;  %v742_v49 = vpack.c.bf16 %v687_v43, %v686_v42  ;;  %v604_v50 = vpack.c.bf16 %v529_v45, %v528_v44  ;;  %v648_v52 = vld [vmem:[%s17700_s4 + $0x20] sm:$0xff]  ;;  %v530_v56 = vld [vmem:[%s17700_s4 + $0x33] sm:$0xff] }
  0xbe   : > { %2172 = vmatpush.bf16.msrb.mxu3 %v2163_v39  ;;  %v624_v51 = vpack.c.bf16 %v569_v47, %v568_v46  ;;  %v649_v53 = vld [vmem:[%s17700_s4 + $0x28] sm:$0xff]  ;;  %v688_v54 = vld [vmem:[%s17700_s4 + $0x160] sm:$0xff]  ;;  %v570_v58 = vld [vmem:[%s17700_s4 + $0x173] sm:$0xff] }
  0xbf   : > { %v689_v55 = vld [vmem:[%s17700_s4 + $0x168] sm:$0xff]  ;;  %v531_v57 = vld [vmem:[%s17700_s4 + $0x3b] sm:$0xff]  ;;  %v723_v60 = vpack.c.bf16 %v649_v53, %v648_v52  ;;  %v650_v0 = vld [vmem:[%s17700_s4 + $0x30] sm:$0xff] }
  0xc0   : > { %v571_v59 = vld [vmem:[%s17700_s4 + $0x17b] sm:$0xff]  ;;  %v743_v61 = vpack.c.bf16 %v689_v55, %v688_v54  ;;  %v605_v62 = vpack.c.bf16 %v531_v57, %v530_v56  ;;  %v690_v2 = vld [vmem:[%s17700_s4 + $0x170] sm:$0xff]  ;;  %v532_v4 = vld [vmem:[%s17700_s4 + $0x43] sm:$0xff] }
  0xc1   : > { %v625_v63 = vpack.c.bf16 %v571_v59, %v570_v58  ;;  %v651_v1 = vld [vmem:[%s17700_s4 + $0x38] sm:$0xff]  ;;  %v533_v5 = vld [vmem:[%s17700_s4 + $0x4b] sm:$0xff]  ;;  %v572_v6 = vld [vmem:[%s17700_s4 + $0x183] sm:$0xff] }
  0xc2   : > { %v691_v3 = vld [vmem:[%s17700_s4 + $0x178] sm:$0xff]  ;;  %v573_v7 = vld [vmem:[%s17700_s4 + $0x18b] sm:$0xff]  ;;  %v724_v8 = vpack.c.bf16 %v651_v1, %v650_v0  ;;  %v606_v10 = vpack.c.bf16 %v533_v5, %v532_v4  ;;  %v652_v12 = vld [vmem:[%s17700_s4 + $0x40] sm:$0xff] }
  0xc3   : > { %v744_v9 = vpack.c.bf16 %v691_v3, %v690_v2  ;;  %v626_v11 = vpack.c.bf16 %v573_v7, %v572_v6  ;;  %v653_v13 = vld [vmem:[%s17700_s4 + $0x48] sm:$0xff]  ;;  %v692_v14 = vld [vmem:[%s17700_s4 + $0x180] sm:$0xff]  ;;  %v534_v16 = vld [vmem:[%s17700_s4 + $0x53] sm:$0xff] }
  0xc4   : > { %v693_v15 = vld [vmem:[%s17700_s4 + $0x188] sm:$0xff]  ;;  %v535_v17 = vld [vmem:[%s17700_s4 + $0x5b] sm:$0xff]  ;;  %v574_v18 = vld [vmem:[%s17700_s4 + $0x193] sm:$0xff]  ;;  %v725_v20 = vpack.c.bf16 %v653_v13, %v652_v12 }
  0xc5   : > { %v575_v19 = vld [vmem:[%s17700_s4 + $0x19b] sm:$0xff]  ;;  %v745_v21 = vpack.c.bf16 %v693_v15, %v692_v14  ;;  %v607_v22 = vpack.c.bf16 %v535_v17, %v534_v16  ;;  %v654_v24 = vld [vmem:[%s17700_s4 + $0x50] sm:$0xff]  ;;  %v536_v28 = vld [vmem:[%s17700_s4 + $0x63] sm:$0xff] }
  0xc6   : > { %v627_v23 = vpack.c.bf16 %v575_v19, %v574_v18  ;;  %v655_v25 = vld [vmem:[%s17700_s4 + $0x58] sm:$0xff]  ;;  %v694_v26 = vld [vmem:[%s17700_s4 + $0x190] sm:$0xff]  ;;  %v576_v30 = vld [vmem:[%s17700_s4 + $0x1a3] sm:$0xff] }
  0xc7   : > { %v695_v27 = vld [vmem:[%s17700_s4 + $0x198] sm:$0xff]  ;;  %v537_v29 = vld [vmem:[%s17700_s4 + $0x6b] sm:$0xff]  ;;  %v726_v32 = vpack.c.bf16 %v655_v25, %v654_v24  ;;  %v656_v36 = vld [vmem:[%s17700_s4 + $0x60] sm:$0xff] }
  0xc8   : > { %v577_v31 = vld [vmem:[%s17700_s4 + $0x1ab] sm:$0xff]  ;;  %v746_v33 = vpack.c.bf16 %v695_v27, %v694_v26  ;;  %v608_v34 = vpack.c.bf16 %v537_v29, %v536_v28  ;;  %v696_v38 = vld [vmem:[%s17700_s4 + $0x1a0] sm:$0xff]  ;;  %v538_v40 = vld [vmem:[%s17700_s4 + $0x73] sm:$0xff] }
  0xc9   : > { %v628_v35 = vpack.c.bf16 %v577_v31, %v576_v30  ;;  %v657_v37 = vld [vmem:[%s17700_s4 + $0x68] sm:$0xff]  ;;  %v539_v41 = vld [vmem:[%s17700_s4 + $0x7b] sm:$0xff]  ;;  %v578_v42 = vld [vmem:[%s17700_s4 + $0x1b3] sm:$0xff] }
  0xca   : > { %v697_v39 = vld [vmem:[%s17700_s4 + $0x1a8] sm:$0xff]  ;;  %v579_v43 = vld [vmem:[%s17700_s4 + $0x1bb] sm:$0xff]  ;;  %v727_v44 = vpack.c.bf16 %v657_v37, %v656_v36  ;;  %v609_v46 = vpack.c.bf16 %v539_v41, %v538_v40  ;;  %v542_v2 = vld [vmem:[%s17700_s4 + $0x93] sm:$0xff] }
  0xcb   : > { %10603 = vmatmul.msk.bf16.gmra.mxu0 %vm761_vm2, %v722_v48  ;;  %10623 = vmatmul.msk.bf16.gmra.mxu2 %vm761_vm2, %v742_v49  ;;  %v747_v45 = vpack.c.bf16 %v697_v39, %v696_v38  ;;  %v629_v47 = vpack.c.bf16 %v579_v43, %v578_v42  ;;  %v658_v48 = vld [vmem:[%s17700_s4 + $0x70] sm:$0xff]  ;;  %v659_v49 = vld [vmem:[%s17700_s4 + $0x78] sm:$0xff]  ;;  %v540_v52 = vld [vmem:[%s17700_s4 + $0x83] sm:$0xff] }
  0xcc   : > { %10642 = vmatmul.msk.bf16.gmra.mxu1 %vm761_vm2, %v604_v50  ;;  %v698_v50 = vld [vmem:[%s17700_s4 + $0x1b0] sm:$0xff]  ;;  %v580_v54 = vld [vmem:[%s17700_s4 + $0x1c3] sm:$0xff]  ;;  %v728_v56 = vpack.c.bf16 %v659_v49, %v658_v48  ;;  %v543_v3 = vld [vmem:[%s17700_s4 + $0x9b] sm:$0xff] }
  0xcd   : > { %10662 = vmatmul.msk.bf16.gmra.mxu3 %vm761_vm2, %v624_v51  ;;  %v699_v51 = vld [vmem:[%s17700_s4 + $0x1b8] sm:$0xff]  ;;  %v541_v53 = vld [vmem:[%s17700_s4 + $0x8b] sm:$0xff]  ;;  %v700_v0 = vld [vmem:[%s17700_s4 + $0x1c0] sm:$0xff] }
  0xce   : > { %v581_v55 = vld [vmem:[%s17700_s4 + $0x1cb] sm:$0xff]  ;;  %v748_v57 = vpack.c.bf16 %v699_v51, %v698_v50  ;;  %v610_v58 = vpack.c.bf16 %v541_v53, %v540_v52  ;;  %v582_v4 = vld [vmem:[%s17700_s4 + $0x1d3] sm:$0xff]  ;;  %v583_v5 = vld [vmem:[%s17700_s4 + $0x1db] sm:$0xff] }
  0xcf   : > { %v630_v59 = vpack.c.bf16 %v581_v55, %v580_v54  ;;  %v701_v1 = vld [vmem:[%s17700_s4 + $0x1c8] sm:$0xff]  ;;  %v662_v19 = vld [vmem:[%s17700_s4 + $0x90] sm:$0xff]  ;;  %v664_v43 = vld [vmem:[%s17700_s4 + $0xa0] sm:$0xff] }
  0xd0   : > { %v749_v7 = vpack.c.bf16 %v701_v1, %v700_v0  ;;  %v545_v24 = vld [vmem:[%s17700_s4 + $0xab] sm:$0xff]  ;;  %v584_v25 = vld [vmem:[%s17700_s4 + $0x1e3] sm:$0xff]  ;;  %v547_v48 = vld [vmem:[%s17700_s4 + $0xbb] sm:$0xff] }
  0xd1   : > { %v585_v26 = vld [vmem:[%s17700_s4 + $0x1eb] sm:$0xff]  ;;  %v586_v49 = vld [vmem:[%s17700_s4 + $0x1f3] sm:$0xff]  ;;  %v587_v50 = vld [vmem:[%s17700_s4 + $0x1fb] sm:$0xff] }
  0xdb   : > { %10604 = vmatmul.msk.bf16.gmra.mxu0 %vm761_vm2, %v723_v60  ;;  %10624 = vmatmul.msk.bf16.gmra.mxu2 %vm761_vm2, %v743_v61  ;;  %v10800_v60 = vld [vmem:[%s11473_s25 + $0xa] sm:$0x3] }
  0xdc   : > { %10643 = vmatmul.msk.bf16.gmra.mxu1 %vm761_vm2, %v605_v62  ;;  %v3199_v61 = vsel %vm879_vm1, %v10800_v60, 0  ;;  %v660_v62 = vld [vmem:[%s17700_s4 + $0x80] sm:$0xff] }
  0xdd   : > { %10663 = vmatmul.msk.bf16.gmra.mxu3 %vm761_vm2, %v625_v63  ;;  %3208 = vmatpush.bf16.msrb.mxu1 %v3199_v61  ;;  %v661_v63 = vld [vmem:[%s17700_s4 + $0x88] sm:$0xff] }
  0xde   : > { %v729_v6 = vpack.c.bf16 %v661_v63, %v660_v62 }
  0xeb   : > { %10605 = vmatmul.msk.bf16.gmra.mxu0 %vm761_vm2, %v724_v8  ;;  %10625 = vmatmul.msk.bf16.gmra.mxu2 %vm761_vm2, %v744_v9  ;;  %v611_v9 = vpack.c.bf16 %v543_v3, %v542_v2  ;;  %v666_v3 = vld [vmem:[%s17700_s4 + $0xb0] sm:$0xff] }
  0xec   : > { %10644 = vmatmul.msk.bf16.gmra.mxu1 %vm761_vm2, %v606_v10  ;;  %v631_v10 = vpack.c.bf16 %v583_v5, %v582_v4  ;;  %v667_v4 = vld [vmem:[%s17700_s4 + $0xb8] sm:$0xff]  ;;  %v706_v5 = vld [vmem:[%s17700_s4 + $0x1f0] sm:$0xff] }
  0xed   : > { %10664 = vmatmul.msk.bf16.gmra.mxu3 %vm761_vm2, %v626_v11 }
  0xfb   : > { %10606 = vmatmul.msk.bf16.gmra.mxu0 %vm761_vm2, %v725_v20  ;;  %10626 = vmatmul.msk.bf16.gmra.mxu2 %vm761_vm2, %v745_v21  ;;  %v663_v20 = vld [vmem:[%s17700_s4 + $0x98] sm:$0xff]  ;;  %v702_v21 = vld [vmem:[%s17700_s4 + $0x1d0] sm:$0xff] }
  0xfc   : > { %10645 = vmatmul.msk.bf16.gmra.mxu1 %vm761_vm2, %v607_v22  ;;  %v703_v22 = vld [vmem:[%s17700_s4 + $0x1d8] sm:$0xff]  ;;  %v730_v29 = vpack.c.bf16 %v663_v20, %v662_v19 }
  0xfd   : > { %10665 = vmatmul.msk.bf16.gmra.mxu3 %vm761_vm2, %v627_v23  ;;  %v544_v23 = vld [vmem:[%s17700_s4 + $0xa3] sm:$0xff]  ;;  %v750_v30 = vpack.c.bf16 %v703_v22, %v702_v21 }
 0x10b   : > { %10607 = vmatmul.msk.bf16.gmra.mxu0 %vm761_vm2, %v726_v32  ;;  %10627 = vmatmul.msk.bf16.gmra.mxu2 %vm761_vm2, %v746_v33  ;;  %v612_v33 = vpack.c.bf16 %v545_v24, %v544_v23 }
 0x10c   : > { %10646 = vmatmul.msk.bf16.gmra.mxu1 %vm761_vm2, %v608_v34  ;;  %v632_v34 = vpack.c.bf16 %v585_v26, %v584_v25 }
 0x10d   : > { %10666 = vmatmul.msk.bf16.gmra.mxu3 %vm761_vm2, %v628_v35 }
 0x11b   : > { %10608 = vmatmul.msk.bf16.gmra.mxu0 %vm761_vm2, %v727_v44  ;;  %10628 = vmatmul.msk.bf16.gmra.mxu2 %vm761_vm2, %v747_v45  ;;  %v665_v44 = vld [vmem:[%s17700_s4 + $0xa8] sm:$0xff]  ;;  %v704_v45 = vld [vmem:[%s17700_s4 + $0x1e0] sm:$0xff] }
 0x11c   : > { %10647 = vmatmul.msk.bf16.gmra.mxu1 %vm761_vm2, %v609_v46  ;;  %v705_v46 = vld [vmem:[%s17700_s4 + $0x1e8] sm:$0xff]  ;;  %v731_v53 = vpack.c.bf16 %v665_v44, %v664_v43 }
 0x11d   : > { %10667 = vmatmul.msk.bf16.gmra.mxu3 %vm761_vm2, %v629_v47  ;;  %v546_v47 = vld [vmem:[%s17700_s4 + $0xb3] sm:$0xff]  ;;  %v751_v54 = vpack.c.bf16 %v705_v46, %v704_v45 }
 0x12b   : > { %10609 = vmatmul.msk.bf16.gmra.mxu0 %vm761_vm2, %v728_v56  ;;  %10629 = vmatmul.msk.bf16.gmra.mxu2 %vm761_vm2, %v748_v57  ;;  %v613_v57 = vpack.c.bf16 %v547_v48, %v546_v47 }
 0x12c   : > { %10648 = vmatmul.msk.bf16.gmra.mxu1 %vm761_vm2, %v610_v58  ;;  %v633_v58 = vpack.c.bf16 %v587_v50, %v586_v49 }
 0x12d   : > { %10668 = vmatmul.msk.bf16.gmra.mxu3 %vm761_vm2, %v630_v59 }
 0x138   : > { %v892_v8 = vpop.f32.mrf.mxu0 }
 0x139   : > { %v1215_v11 = vpop.f32.mrf.mxu1 }
 0x13a   : > { %v12464_v12 = vadd.f32 %v1215_v11, %v892_v8  ;;  %v549_v8 = vld [vmem:[%s17700_s4 + $0xcb] sm:$0xff] }
 0x13b   : > { %10610 = vmatmul.msk.bf16.gmra.mxu0 %vm761_vm2, %v729_v6  ;;  %10630 = vmatmul.msk.bf16.gmra.mxu2 %vm761_vm2, %v749_v7  ;;  %v707_v6 = vld [vmem:[%s17700_s4 + $0x1f8] sm:$0xff]  ;;  %v548_v7 = vld [vmem:[%s17700_s4 + $0xc3] sm:$0xff] }
 0x13c   : > { %10649 = vmatmul.msk.bf16.gmra.mxu1 %vm761_vm2, %v611_v9  ;;  %v588_v9 = vld [vmem:[%s17700_s4 + $0x203] sm:$0xff]  ;;  %v614_v20 = vpack.c.bf16 %v549_v8, %v548_v7 }
 0x13d   : > { %10669 = vmatmul.msk.bf16.gmra.mxu3 %vm761_vm2, %v631_v10  ;;  %v589_v10 = vld [vmem:[%s17700_s4 + $0x20b] sm:$0xff] }
 0x13e   : > { %v992_v13 = vpop.f32.mrf.mxu2  ;;  %v634_v21 = vpack.c.bf16 %v589_v10, %v588_v9 }
 0x140   : > { %v1315_v14 = vpop.f32.mrf.mxu3  ;;  %v894_v16 = vpop.f32.mrf.mxu0 }
 0x141   : > { %v12470_v15 = vadd.f32 %v1315_v14, %v992_v13  ;;  %v1217_v17 = vpop.f32.mrf.mxu1  ;;  %v732_v14 = vpack.c.bf16 %v667_v4, %v666_v3  ;;  %v553_v3 = vld [vmem:[%s17700_s4 + $0xeb] sm:$0xff]  ;;  %v592_v4 = vld [vmem:[%s17700_s4 + $0x223] sm:$0xff] }
 0x142   : > { %v12472_v18 = vadd.f32 %v1217_v17, %v894_v16  ;;  %v752_v16 = vpack.c.bf16 %v707_v6, %v706_v5  ;;  %v593_v5 = vld [vmem:[%s17700_s4 + $0x22b] sm:$0xff] }
 0x146   : > { %v994_v27 = vpop.f32.mrf.mxu2 }
 0x148   : > { %v1317_v28 = vpop.f32.mrf.mxu3  ;;  %v897_v32 = vpop.f32.mrf.mxu0 }
 0x149   : > { %v12498_v31 = vadd.f32 %v1317_v28, %v994_v27  ;;  %v1220_v35 = vpop.f32.mrf.mxu1 }
 0x14a   : > { %v12500_v36 = vadd.f32 %v1220_v35, %v897_v32  ;;  %v669_v32 = vld [vmem:[%s17700_s4 + $0xc8] sm:$0xff]  ;;  %v550_v35 = vld [vmem:[%s17700_s4 + $0xd3] sm:$0xff] }
 0x14b   : > { %10611 = vmatmul.msk.bf16.gmra.mxu0 %vm761_vm2, %v730_v29  ;;  %10631 = vmatmul.msk.bf16.gmra.mxu2 %vm761_vm2, %v750_v30  ;;  %v668_v30 = vld [vmem:[%s17700_s4 + $0xc0] sm:$0xff] }
 0x14c   : > { %10650 = vmatmul.msk.bf16.gmra.mxu1 %vm761_vm2, %v612_v33  ;;  %v708_v33 = vld [vmem:[%s17700_s4 + $0x200] sm:$0xff]  ;;  %v733_v44 = vpack.c.bf16 %v669_v32, %v668_v30  ;;  %v673_v30 = vld [vmem:[%s17700_s4 + $0xe8] sm:$0xff] }
 0x14d   : > { %10670 = vmatmul.msk.bf16.gmra.mxu3 %vm761_vm2, %v632_v34  ;;  %v709_v34 = vld [vmem:[%s17700_s4 + $0x208] sm:$0xff]  ;;  %v712_v32 = vld [vmem:[%s17700_s4 + $0x220] sm:$0xff] }
 0x14e   : > { %v997_v37 = vpop.f32.mrf.mxu2  ;;  %v753_v45 = vpack.c.bf16 %v709_v34, %v708_v33  ;;  %v713_v33 = vld [vmem:[%s17700_s4 + $0x228] sm:$0xff]  ;;  %v554_v34 = vld [vmem:[%s17700_s4 + $0xf3] sm:$0xff] }
 0x150   : > { %v1320_v38 = vpop.f32.mrf.mxu3  ;;  %v899_v40 = vpop.f32.mrf.mxu0 }
 0x151   : > { %v12506_v39 = vadd.f32 %v1320_v38, %v997_v37  ;;  %v1222_v41 = vpop.f32.mrf.mxu1  ;;  %v551_v37 = vld [vmem:[%s17700_s4 + $0xdb] sm:$0xff]  ;;  %v590_v38 = vld [vmem:[%s17700_s4 + $0x213] sm:$0xff] }
 0x152   : > { %v12508_v42 = vadd.f32 %v1222_v41, %v899_v40  ;;  %v591_v40 = vld [vmem:[%s17700_s4 + $0x21b] sm:$0xff]  ;;  %v615_v48 = vpack.c.bf16 %v551_v37, %v550_v35  ;;  %v594_v37 = vld [vmem:[%s17700_s4 + $0x233] sm:$0xff] }
 0x153   : > { %v635_v49 = vpack.c.bf16 %v591_v40, %v590_v38  ;;  %v555_v35 = vld [vmem:[%s17700_s4 + $0xfb] sm:$0xff] }
 0x154   : > { %v595_v38 = vld [vmem:[%s17700_s4 + $0x23b] sm:$0xff] }
 0x156   : > { %v999_v51 = vpop.f32.mrf.mxu2 }
 0x158   : > { %v1322_v52 = vpop.f32.mrf.mxu3  ;;  %v902_v56 = vpop.f32.mrf.mxu0 }
 0x159   : > { %v12534_v55 = vadd.f32 %v1322_v52, %v999_v51  ;;  %v1225_v59 = vpop.f32.mrf.mxu1 }
 0x15a   : > { %v12536_v60 = vadd.f32 %v1225_v59, %v902_v56  ;;  %v670_v59 = vld [vmem:[%s17700_s4 + $0xd0] sm:$0xff] }
 0x15b   : > { %10612 = vmatmul.msk.bf16.gmra.mxu0 %vm761_vm2, %v731_v53  ;;  %10632 = vmatmul.msk.bf16.gmra.mxu2 %vm761_vm2, %v751_v54 }
 0x15c   : > { %10651 = vmatmul.msk.bf16.gmra.mxu1 %vm761_vm2, %v613_v57 }
 0x15d   : > { %10671 = vmatmul.msk.bf16.gmra.mxu3 %vm761_vm2, %v633_v58 }
 0x15e   : > { %v1002_v61 = vpop.f32.mrf.mxu2 }
 0x160   : > { %v1325_v62 = vpop.f32.mrf.mxu3  ;;  %v904_v0 = vpop.f32.mrf.mxu0 }
 0x161   : > { %v12542_v63 = vadd.f32 %v1325_v62, %v1002_v61  ;;  %v1227_v1 = vpop.f32.mrf.mxu1  ;;  %v671_v61 = vld [vmem:[%s17700_s4 + $0xd8] sm:$0xff]  ;;  %v710_v62 = vld [vmem:[%s17700_s4 + $0x210] sm:$0xff] }
 0x162   : > { %v12544_v2 = vadd.f32 %v1227_v1, %v904_v0  ;;  %v711_v0 = vld [vmem:[%s17700_s4 + $0x218] sm:$0xff]  ;;  %v552_v1 = vld [vmem:[%s17700_s4 + $0xe3] sm:$0xff]  ;;  %v734_v8 = vpack.c.bf16 %v671_v61, %v670_v59 }
 0x163   : > { %v754_v9 = vpack.c.bf16 %v711_v0, %v710_v62  ;;  %v674_v0 = vld [vmem:[%s17700_s4 + $0xf0] sm:$0xff] }
 0x166   : > { %v1004_v11 = vpop.f32.mrf.mxu2 }
 0x168   : > { %v1327_v13 = vpop.f32.mrf.mxu3  ;;  %v907_v19 = vpop.f32.mrf.mxu0 }
 0x169   : > { %v12570_v17 = vadd.f32 %v1327_v13, %v1004_v11  ;;  %v1230_v22 = vpop.f32.mrf.mxu1  ;;  %v616_v13 = vpack.c.bf16 %v553_v3, %v552_v1  ;;  %v675_v1 = vld [vmem:[%s17700_s4 + $0xf8] sm:$0xff]  ;;  %v714_v3 = vld [vmem:[%s17700_s4 + $0x230] sm:$0xff] }
 0x16a   : > { %v12572_v23 = vadd.f32 %v1230_v22, %v907_v19 }
 0x16b   : > { %10613 = vmatmul.msk.bf16.gmra.mxu0 %vm761_vm2, %v732_v14  ;;  %10633 = vmatmul.msk.bf16.gmra.mxu2 %vm761_vm2, %v752_v16  ;;  %v636_v14 = vpack.c.bf16 %v593_v5, %v592_v4  ;;  %v715_v4 = vld [vmem:[%s17700_s4 + $0x238] sm:$0xff]  ;;  %v556_v5 = vld [vmem:[%s17700_s4 + $0x103] sm:$0xff] }
 0x16c   : > { %10652 = vmatmul.msk.bf16.gmra.mxu1 %vm761_vm2, %v614_v20 }
 0x16d   : > { %10672 = vmatmul.msk.bf16.gmra.mxu3 %vm761_vm2, %v634_v21 }
 0x16e   : > { %v1007_v24 = vpop.f32.mrf.mxu2 }
 0x170   : > { %v1330_v25 = vpop.f32.mrf.mxu3  ;;  %v909_v27 = vpop.f32.mrf.mxu0 }
 0x171   : > { %v12578_v26 = vadd.f32 %v1330_v25, %v1007_v24  ;;  %v1232_v28 = vpop.f32.mrf.mxu1 }
 0x172   : > { %v12580_v29 = vadd.f32 %v1232_v28, %v909_v27  ;;  %v672_v28 = vld [vmem:[%s17700_s4 + $0xe0] sm:$0xff] }
 0x173   : > { %17778 = vst [vmem:[#allocation3_spill] sm:$0xff] %v12578_v26 }
 0x176   : > { %v1009_v41 = vpop.f32.mrf.mxu2 }
 0x178   : > { %v1332_v43 = vpop.f32.mrf.mxu3  ;;  %v912_v47 = vpop.f32.mrf.mxu0 }
 0x179   : > { %v12606_v46 = vadd.f32 %v1332_v43, %v1009_v41  ;;  %v1235_v50 = vpop.f32.mrf.mxu1  ;;  %v735_v43 = vpack.c.bf16 %v673_v30, %v672_v28 }
 0x17a   : > { %v12608_v51 = vadd.f32 %v1235_v50, %v912_v47 }
 0x17b   : > { %17779 = vst [vmem:[#allocation4_spill] sm:$0xff] %v12606_v46  ;;  %10614 = vmatmul.msk.bf16.gmra.mxu0 %vm761_vm2, %v733_v44  ;;  %10634 = vmatmul.msk.bf16.gmra.mxu2 %vm761_vm2, %v753_v45  ;;  %v755_v44 = vpack.c.bf16 %v713_v33, %v712_v32 }
 0x17c   : > { %10653 = vmatmul.msk.bf16.gmra.mxu1 %vm761_vm2, %v615_v48  ;;  %v617_v48 = vpack.c.bf16 %v555_v35, %v554_v34 }
 0x17d   : > { %10673 = vmatmul.msk.bf16.gmra.mxu3 %vm761_vm2, %v635_v49  ;;  %v637_v49 = vpack.c.bf16 %v595_v38, %v594_v37  ;;  %v676_v38 = vld [vmem:[%s17700_s4 + $0x100] sm:$0xff] }
 0x17e   : > { %v1012_v52 = vpop.f32.mrf.mxu2 }
 0x180   : > { %v1335_v53 = vpop.f32.mrf.mxu3  ;;  %v914_v56 = vpop.f32.mrf.mxu0 }
 0x181   : > { %v12614_v54 = vadd.f32 %v1335_v53, %v1012_v52  ;;  %v1237_v57 = vpop.f32.mrf.mxu1 }
 0x182   : > { %v12616_v58 = vadd.f32 %v1237_v57, %v914_v56 }
 0x183   : > { %17780 = vst [vmem:[#allocation5_spill] sm:$0xff] %v12614_v54 }
 0x186   : > { %v1014_v6 = vpop.f32.mrf.mxu2 }
 0x188   : > { %v1337_v7 = vpop.f32.mrf.mxu3  ;;  %v917_v11 = vpop.f32.mrf.mxu0 }
 0x189   : > { %v12642_v10 = vadd.f32 %v1337_v7, %v1014_v6  ;;  %v1240_v16 = vpop.f32.mrf.mxu1  ;;  %v557_v6 = vld [vmem:[%s17700_s4 + $0x10b] sm:$0xff]  ;;  %v596_v7 = vld [vmem:[%s17700_s4 + $0x243] sm:$0xff] }
 0x18a   : > { %v12644_v19 = vadd.f32 %v1240_v16, %v917_v11 }
 0x18b   : > { %17781 = vst [vmem:[#allocation6_spill] sm:$0xff] %v12642_v10  ;;  %10615 = vmatmul.msk.bf16.gmra.mxu0 %vm761_vm2, %v734_v8  ;;  %10635 = vmatmul.msk.bf16.gmra.mxu2 %vm761_vm2, %v754_v9  ;;  %v597_v8 = vld [vmem:[%s17700_s4 + $0x24b] sm:$0xff] }
 0x18c   : > { %10654 = vmatmul.msk.bf16.gmra.mxu1 %vm761_vm2, %v616_v13  ;;  %v736_v13 = vpack.c.bf16 %v675_v1, %v674_v0 }
 0x18d   : > { %10674 = vmatmul.msk.bf16.gmra.mxu3 %vm761_vm2, %v636_v14  ;;  %v756_v14 = vpack.c.bf16 %v715_v4, %v714_v3 }
 0x18e   : > { %v1017_v20 = vpop.f32.mrf.mxu2 }
 0x190   : > { %v1340_v21 = vpop.f32.mrf.mxu3  ;;  %v919_v24 = vpop.f32.mrf.mxu0 }
 0x191   : > { %v12650_v22 = vadd.f32 %v1340_v21, %v1017_v20  ;;  %v1242_v25 = vpop.f32.mrf.mxu1  ;;  %v618_v21 = vpack.c.bf16 %v557_v6, %v556_v5 }
 0x192   : > { %v12652_v27 = vadd.f32 %v1242_v25, %v919_v24  ;;  %v638_v24 = vpack.c.bf16 %v597_v8, %v596_v7 }
 0x193   : > { %17782 = vst [vmem:[#allocation7_spill] sm:$0xff] %v12650_v22 }
 0x196   : > { %v1019_v40 = vpop.f32.mrf.mxu2 }
 0x198   : > { %v1342_v41 = vpop.f32.mrf.mxu3  ;;  %v922_v47 = vpop.f32.mrf.mxu0 }
 0x199   : > { %v12678_v45 = vadd.f32 %v1342_v41, %v1019_v40  ;;  %v1245_v50 = vpop.f32.mrf.mxu1  ;;  %v677_v40 = vld [vmem:[%s17700_s4 + $0x108] sm:$0xff]  ;;  %v716_v41 = vld [vmem:[%s17700_s4 + $0x240] sm:$0xff] }
 0x19a   : > { %v12680_v52 = vadd.f32 %v1245_v50, %v922_v47  ;;  %v559_v47 = vld [vmem:[%s17700_s4 + $0x11b] sm:$0xff] }
 0x19b   : > { %17783 = vst [vmem:[#allocation8_spill] sm:$0xff] %v12678_v45  ;;  %10616 = vmatmul.msk.bf16.gmra.mxu0 %vm761_vm2, %v735_v43  ;;  %10636 = vmatmul.msk.bf16.gmra.mxu2 %vm761_vm2, %v755_v44  ;;  %v717_v43 = vld [vmem:[%s17700_s4 + $0x248] sm:$0xff]  ;;  %v558_v44 = vld [vmem:[%s17700_s4 + $0x113] sm:$0xff] }
 0x19c   : > { %10655 = vmatmul.msk.bf16.gmra.mxu1 %vm761_vm2, %v617_v48  ;;  %v598_v48 = vld [vmem:[%s17700_s4 + $0x253] sm:$0xff]  ;;  %v619_v1 = vpack.c.bf16 %v559_v47, %v558_v44 }
 0x19d   : > { %10675 = vmatmul.msk.bf16.gmra.mxu3 %vm761_vm2, %v637_v49  ;;  %v599_v49 = vld [vmem:[%s17700_s4 + $0x25b] sm:$0xff] }
 0x19e   : > { %v1022_v53 = vpop.f32.mrf.mxu2  ;;  %v639_v3 = vpack.c.bf16 %v599_v49, %v598_v48 }
 0x1a0   : > { %v1345_v56 = vpop.f32.mrf.mxu3  ;;  %v924_v59 = vpop.f32.mrf.mxu0 }
 0x1a1   : > { %v12686_v57 = vadd.f32 %v1345_v56, %v1022_v53  ;;  %v1247_v61 = vpop.f32.mrf.mxu1  ;;  %v737_v56 = vpack.c.bf16 %v677_v40, %v676_v38 }
 0x1a2   : > { %v12688_v62 = vadd.f32 %v1247_v61, %v924_v59  ;;  %v757_v59 = vpack.c.bf16 %v717_v43, %v716_v41 }
 0x1a3   : > { %17784 = vst [vmem:[#allocation9_spill] sm:$0xff] %v12686_v57 }
 0x1a6   : > { %v1024_v9 = vpop.f32.mrf.mxu2 }
 0x1a8   : > { %v1347_v11 = vpop.f32.mrf.mxu3  ;;  %v927_v20 = vpop.f32.mrf.mxu0 }
 0x1a9   : > { %v12714_v16 = vadd.f32 %v1347_v11, %v1024_v9  ;;  %v1250_v25 = vpop.f32.mrf.mxu1 }
 0x1aa   : > { %v12716_v28 = vadd.f32 %v1250_v25, %v927_v20  ;;  %v679_v20 = vld [vmem:[%s17700_s4 + $0x118] sm:$0xff]  ;;  %v560_v25 = vld [vmem:[%s17700_s4 + $0x123] sm:$0xff] }
 0x1ab   : > { %17785 = vst [vmem:[#allocation10_spill] sm:$0xff] %v12714_v16  ;;  %10617 = vmatmul.msk.bf16.gmra.mxu0 %vm761_vm2, %v736_v13  ;;  %10637 = vmatmul.msk.bf16.gmra.mxu2 %vm761_vm2, %v756_v14  ;;  %v678_v14 = vld [vmem:[%s17700_s4 + $0x110] sm:$0xff] }
 0x1ac   : > { %10656 = vmatmul.msk.bf16.gmra.mxu1 %vm761_vm2, %v618_v21  ;;  %v718_v21 = vld [vmem:[%s17700_s4 + $0x250] sm:$0xff]  ;;  %v738_v40 = vpack.c.bf16 %v679_v20, %v678_v14  ;;  %v681_v14 = vld [vmem:[%s17700_s4 + $0x128] sm:$0xff]  ;;  %v720_v20 = vld [vmem:[%s17700_s4 + $0x260] sm:$0x3] }
 0x1ad   : > { %10676 = vmatmul.msk.bf16.gmra.mxu3 %vm761_vm2, %v638_v24  ;;  %v719_v24 = vld [vmem:[%s17700_s4 + $0x258] sm:$0xff] }
 0x1ae   : > { %v1027_v30 = vpop.f32.mrf.mxu2  ;;  %v758_v41 = vpack.c.bf16 %v719_v24, %v718_v21  ;;  %v562_v21 = vld [vmem:[%s17700_s4 + $0x133] sm:$0xff]  ;;  %v563_v24 = vld [vmem:[%s17700_s4 + $0x13b] sm:$0xff] }
 0x1b0   : > { %v1350_v32 = vpop.f32.mrf.mxu3  ;;  %v929_v34 = vpop.f32.mrf.mxu0 }
 0x1b1   : > { %v12722_v33 = vadd.f32 %v1350_v32, %v1027_v30  ;;  %v1252_v35 = vpop.f32.mrf.mxu1  ;;  %v561_v30 = vld [vmem:[%s17700_s4 + $0x12b] sm:$0xff]  ;;  %v600_v32 = vld [vmem:[%s17700_s4 + $0x263] sm:$0xff] }
 0x1b2   : > { %v12724_v37 = vadd.f32 %v1252_v35, %v929_v34  ;;  %v601_v34 = vld [vmem:[%s17700_s4 + $0x26b] sm:$0xff]  ;;  %v620_v47 = vpack.c.bf16 %v561_v30, %v560_v25  ;;  %v602_v25 = vld [vmem:[%s17700_s4 + $0x273] sm:$0x3] }
 0x1b3   : > { %17786 = vst [vmem:[#allocation11_spill] sm:$0xff] %v12722_v33  ;;  %v640_v48 = vpack.c.bf16 %v601_v34, %v600_v32 }
 0x1b6   : > { %v1029_v50 = vpop.f32.mrf.mxu2 }
 0x1b8   : > { %v1352_v53 = vpop.f32.mrf.mxu3  ;;  %v932_v0 = vpop.f32.mrf.mxu0 }
 0x1b9   : > { %v12750_v61 = vadd.f32 %v1352_v53, %v1029_v50  ;;  %v1255_v4 = vpop.f32.mrf.mxu1 }
 0x1ba   : > { %v12752_v5 = vadd.f32 %v1255_v4, %v932_v0  ;;  %v10840_v4 = vld [vmem:[%s11473_s25 + $0xc] sm:$0x3] }
 0x1bb   : > { %17787 = vst [vmem:[#allocation12_spill] sm:$0xff] %v12750_v61  ;;  %10618 = vmatmul.msk.bf16.gmra.mxu0 %vm761_vm2, %v737_v56  ;;  %10638 = vmatmul.msk.bf16.gmra.mxu2 %vm761_vm2, %v757_v59 }
 0x1bc   : > { %10657 = vmatmul.msk.bf16.gmra.mxu1 %vm761_vm2, %v619_v1 }
 0x1bd   : > { %10677 = vmatmul.msk.bf16.gmra.mxu3 %vm761_vm2, %v639_v3 }
 0x1be   : > { %v1032_v6 = vpop.f32.mrf.mxu2 }
 0x1c0   : > { %v1355_v7 = vpop.f32.mrf.mxu3  ;;  %v934_v9 = vpop.f32.mrf.mxu0 }
 0x1c1   : > { %v12758_v8 = vadd.f32 %v1355_v7, %v1032_v6  ;;  %v1257_v11 = vpop.f32.mrf.mxu1  ;;  %v10880_v6 = vld [vmem:[%s11473_s25 + $0xe] sm:$0x3]  ;;  %v3717_v7 = vsel %vm879_vm1, %v10840_v4, 0 }
 0x1c2   : > { %v12760_v13 = vadd.f32 %v1257_v11, %v934_v9  ;;  %v4235_v9 = vsel %vm879_vm1, %v10880_v6, 0  ;;  %v680_v11 = vld [vmem:[%s17700_s4 + $0x120] sm:$0xff]  ;;  %3726 = vmatpush.bf16.msra.mxu2 %v3717_v7 }
 0x1c3   : > { %17788 = vst [vmem:[#allocation13_spill] sm:$0xff] %v12758_v8  ;;  %4244 = vmatpush.bf16.msra.mxu3 %v4235_v9  ;;  %v739_v34 = vpack.c.bf16 %v681_v14, %v680_v11  ;;  %v682_v9 = vld [vmem:[%s17700_s4 + $0x130] sm:$0xff]  ;;  %v683_v11 = vld [vmem:[%s17700_s4 + $0x138] sm:$0xff]  ;;  %v564_v14 = vld [vmem:[%s17700_s4 + $0x143] sm:$0xff] }
 0x1c6   : > { %v1034_v35 = vpop.f32.mrf.mxu2 }
 0x1c8   : > { %v1357_v38 = vpop.f32.mrf.mxu3  ;;  %v937_v44 = vpop.f32.mrf.mxu0 }
 0x1c9   : > { %v12786_v43 = vadd.f32 %v1357_v38, %v1034_v35  ;;  %v1260_v49 = vpop.f32.mrf.mxu1  ;;  %v759_v35 = vpack.c.bf16 %v720_v20, %v720_v20  ;;  %v1409_v20 = vld [vmem:[%s17700_s4 + $0x1] sm:$0xff] }
 0x1ca   : > { %v12788_v50 = vadd.f32 %v1260_v49, %v937_v44  ;;  %v641_v44 = vpack.c.bf16 %v602_v25, %v602_v25  ;;  %v10920_v49 = vld [vmem:[%s11473_s25 + $0x10] sm:$0x3]  ;;  %v1927_v25 = vld [vmem:[%s17700_s4 + $0x2] sm:$0xff] }
 0x1cb   : > { %17789 = vst [vmem:[#allocation14_spill] sm:$0xff] %v12786_v43  ;;  %10619 = vmatmul.msk.bf16.gmra.mxu0 %vm761_vm2, %v738_v40  ;;  %10639 = vmatmul.msk.bf16.gmra.mxu2 %vm761_vm2, %v758_v41  ;;  %v621_v41 = vpack.c.bf16 %v563_v24, %v562_v21  ;;  %v1410_v21 = vld [vmem:[%s17700_s4 + $0x9] sm:$0xff] }
 0x1cc   : > { %10658 = vmatmul.msk.bf16.gmra.mxu1 %vm761_vm2, %v620_v47  ;;  %v565_v24 = vld [vmem:[%s17700_s4 + $0x14b] sm:$0xff] }
 0x1cd   : > { %10678 = vmatmul.msk.bf16.gmra.mxu3 %vm761_vm2, %v640_v48 }
 0x1ce   : > { %v1037_v53 = vpop.f32.mrf.mxu2 }
 0x1d0   : > { %v1360_v56 = vpop.f32.mrf.mxu3  ;;  %v939_v0 = vpop.f32.mrf.mxu0 }
 0x1d1   : > { %v12794_v59 = vadd.f32 %v1360_v56, %v1037_v53  ;;  %v1262_v1 = vpop.f32.mrf.mxu1  ;;  %v4753_v53 = vsel %vm879_vm1, %v10920_v49, 0 }
 0x1d2   : > { %v12796_v3 = vadd.f32 %v1262_v1, %v939_v0  ;;  %4762 = vmatpush.bf16.msra.mxu0 %v4753_v53 }
 0x1d3   : > { %17790 = vst [vmem:[#allocation15_spill] sm:$0xff] %v12794_v59 }
 0x1d6   : > { %v1039_v30 = vpop.f32.mrf.mxu2 }
 0x1d8   : > { %v1362_v32 = vpop.f32.mrf.mxu3  ;;  %v942_v40 = vpop.f32.mrf.mxu0 }
 0x1d9   : > { %v12820_v38 = vadd.f32 %v1362_v32, %v1039_v30  ;;  %v1265_v47 = vpop.f32.mrf.mxu1  ;;  %v1928_v30 = vld [vmem:[%s17700_s4 + $0xa] sm:$0xff] }
 0x1da   : > { %v12822_v48 = vadd.f32 %v1265_v47, %v942_v40  ;;  %v1486_v40 = vpack.c.bf16 %v1410_v21, %v1409_v20  ;;  %v622_v47 = vpack.c.bf16 %v565_v24, %v564_v14  ;;  %v2004_v49 = vpack.c.bf16 %v1928_v30, %v1927_v25  ;;  %v1411_v14 = vld [vmem:[%s17700_s4 + $0x11] sm:$0xff]  ;;  %v1412_v21 = vld [vmem:[%s17700_s4 + $0x19] sm:$0xff] }
 0x1db   : > { %17791 = vst [vmem:[#allocation16_spill] sm:$0xff] %v12820_v38  ;;  %10620 = vmatmul.msk.bf16.gmra.mxu0 %vm761_vm2, %v739_v34  ;;  %10640 = vmatmul.msk.bf16.gmra.mxu2 %vm761_vm2, %v759_v35  ;;  %v740_v35 = vpack.c.bf16 %v683_v11, %v682_v9  ;;  %v1929_v24 = vld [vmem:[%s17700_s4 + $0x12] sm:$0xff]  ;;  %v1930_v25 = vld [vmem:[%s17700_s4 + $0x1a] sm:$0xff] }
 0x1dc   : > { %10659 = vmatmul.msk.bf16.gmra.mxu1 %vm761_vm2, %v621_v41  ;;  %v2963_v30 = vld [vmem:[%s17700_s4 + $0x14] sm:$0xff] }
 0x1dd   : > { %10679 = vmatmul.msk.bf16.gmra.mxu3 %vm761_vm2, %v641_v44 }
 0x1de   : > { %v1042_v56 = vpop.f32.mrf.mxu2 }
 0x1e0   : > { %v1365_v0 = vpop.f32.mrf.mxu3  ;;  %v944_v4 = vpop.f32.mrf.mxu0 }
 0x1e1   : > { %v12830_v1 = vadd.f32 %v1365_v0, %v1042_v56  ;;  %v1267_v6 = vpop.f32.mrf.mxu1 }
 0x1e2   : > { %v12832_v7 = vadd.f32 %v1267_v6, %v944_v4 }
 0x1e3   : > { %17792 = vst [vmem:[#allocation17_spill] sm:$0xff] %v12830_v1 }
 0x1e6   : > { %v1044_v32 = vpop.f32.mrf.mxu2 }
 0x1e8   : > { %v1367_v34 = vpop.f32.mrf.mxu3  ;;  %v947_v44 = vpop.f32.mrf.mxu0 }
 0x1e9   : > { %v12858_v41 = vadd.f32 %v1367_v34, %v1044_v32  ;;  %v1270_v53 = vpop.f32.mrf.mxu1  ;;  %v2964_v32 = vld [vmem:[%s17700_s4 + $0x1c] sm:$0xff] }
 0x1ea   : > { %v12860_v56 = vadd.f32 %v1270_v53, %v947_v44  ;;  %v2005_v44 = vpack.c.bf16 %v1930_v25, %v1929_v24  ;;  %v3040_v53 = vpack.c.bf16 %v2964_v32, %v2963_v30  ;;  %v1413_v25 = vld [vmem:[%s17700_s4 + $0x21] sm:$0xff]  ;;  %v1414_v30 = vld [vmem:[%s17700_s4 + $0x29] sm:$0xff] }
 0x1eb   : > { %17793 = vst [vmem:[#allocation18_spill] sm:$0xff] %v12858_v41  ;;  %10621 = vmatmul.msk.bf16.gmra.mxu0 %vm761_vm2, %v740_v35  ;;  %10681 = vmatmul.msk.bf16.vlgmr.msrb.gmra.mxu2 %vm761_vm2, %v1486_v40  ;;  %v1487_v40 = vpack.c.bf16 %v1412_v21, %v1411_v14  ;;  %v1931_v32 = vld [vmem:[%s17700_s4 + $0x22] sm:$0xff] }
 0x1ec   : > { %10660 = vmatmul.msk.bf16.gmra.mxu1 %vm761_vm2, %v622_v47 }
 0x1ed   : > { %10721 = vmatmul.msk.bf16.vlgmr.msrb.gmra.mxu3 %vm761_vm2, %v2004_v49 }
 0x1ee   : > { %v1047_v0 = vpop.f32.mrf.mxu2 }
 0x1f0   : > { %v1370_v4 = vpop.f32.mrf.mxu3  ;;  %v949_v9 = vpop.f32.mrf.mxu0 }
 0x1f1   : > { %v12866_v6 = vadd.f32 %v1370_v4, %v1047_v0  ;;  %v1272_v11 = vpop.f32.mrf.mxu1 }
 0x1f2   : > { %v12868_v20 = vadd.f32 %v1272_v11, %v949_v9 }
 0x1f3   : > { %17794 = vst [vmem:[#allocation19_spill] sm:$0xff] %v12866_v6 }
 0x1f6   : > { %v1049_v34 = vpop.f32.mrf.mxu2 }
 0x1f8   : > { %v1372_v35 = vpop.f32.mrf.mxu3  ;;  %v952_v49 = vpop.f32.mrf.mxu0 }
 0x1f9   : > { %v12888_v47 = vadd.f32 %v1372_v35, %v1049_v34  ;;  %v1275_v0 = vpop.f32.mrf.mxu1  ;;  %v1932_v34 = vld [vmem:[%s17700_s4 + $0x2a] sm:$0xff] }
 0x1fa   : > { %v12890_v4 = vadd.f32 %v1275_v0, %v952_v49  ;;  %v2965_v35 = vld [vmem:[%s17700_s4 + $0x24] sm:$0xff]  ;;  %v2006_v0 = vpack.c.bf16 %v1932_v34, %v1931_v32  ;;  %v1415_v34 = vld [vmem:[%s17700_s4 + $0x31] sm:$0xff] }
 0x1fb   : > { %17795 = vst [vmem:[#allocation20_spill] sm:$0xff] %v12888_v47  ;;  %10682 = vmatmul.msk.bf16.gmra.mxu2 %vm761_vm2, %v1487_v40  ;;  %10761 = vmatmul.msk.bf16.vlgmr.msrb.gmra.mxu0 %vm761_vm2, %v2005_v44  ;;  %v2966_v40 = vld [vmem:[%s17700_s4 + $0x2c] sm:$0xff] }
 0x1fc   : > { %10801 = vmatmul.msk.bf16.vlgmr.msrb.gmra.mxu1 %vm761_vm2, %v3040_v53  ;;  %v1488_v53 = vpack.c.bf16 %v1414_v30, %v1413_v25 }
 0x1fd   : > { %10722 = vmatmul.msk.bf16.gmra.mxu3 %vm761_vm2, %v2005_v44 }
 0x1fe   : > { %v1052_v9 = vpop.f32.mrf.mxu2 }
 0x200   : > { %v1375_v11 = vpop.f32.mrf.mxu3  ;;  %v954_v14 = vpop.f32.mrf.mxu0 }
 0x201   : > { %v12896_v6 = vadd.f32 %v1375_v11, %v1052_v9  ;;  %v1277_v21 = vpop.f32.mrf.mxu1 }
 0x202   : > { %v12898_v24 = vadd.f32 %v1277_v21, %v954_v14  ;;  %v3041_v14 = vpack.c.bf16 %v2966_v40, %v2965_v35  ;;  %v1416_v35 = vld [vmem:[%s17700_s4 + $0x39] sm:$0xff] }
 0x203   : > { %17796 = vst [vmem:[#allocation21_spill] sm:$0xff] %v12896_v6  ;;  %v1933_v40 = vld [vmem:[%s17700_s4 + $0x32] sm:$0xff] }
 0x206   : > { %v1054_v44 = vpop.f32.mrf.mxu2 }
 0x208   : > { %v1377_v49 = vpop.f32.mrf.mxu3  ;;  %v957_v11 = vpop.f32.mrf.mxu0 }
 0x209   : > { %v12918_v9 = vadd.f32 %v1377_v49, %v1054_v44  ;;  %v1280_v21 = vpop.f32.mrf.mxu1  ;;  %v2968_v44 = vld [vmem:[%s17700_s4 + $0x3c] sm:$0xff] }
 0x20a   : > { %v12920_v6 = vadd.f32 %v1280_v21, %v957_v11 }
 0x20b   : > { %17797 = vst [vmem:[#allocation22_spill] sm:$0xff] %v12918_v9  ;;  %10683 = vmatmul.msk.bf16.gmra.mxu2 %vm761_vm2, %v1488_v53  ;;  %10762 = vmatmul.msk.bf16.gmra.mxu0 %vm761_vm2, %v2006_v0 }
 0x20c   : > { %10802 = vmatmul.msk.bf16.gmra.mxu1 %vm761_vm2, %v3041_v14 }
 0x20d   : > { %10723 = vmatmul.msk.bf16.gmra.mxu3 %vm761_vm2, %v2006_v0  ;;  %v1489_v0 = vpack.c.bf16 %v1416_v35, %v1415_v34 }
 0x20e   : > { %v1057_v47 = vpop.f32.mrf.mxu2 }
 0x210   : > { %v1380_v41 = vpop.f32.mrf.mxu3  ;;  %v959_v25 = vpop.f32.mrf.mxu0 }
 0x211   : > { %v12926_v1 = vadd.f32 %v1380_v41, %v1057_v47  ;;  %v1282_v30 = vpop.f32.mrf.mxu1  ;;  %v1934_v41 = vld [vmem:[%s17700_s4 + $0x3a] sm:$0xff] }
 0x212   : > { %v12928_v32 = vadd.f32 %v1282_v30, %v959_v25  ;;  %v2967_v47 = vld [vmem:[%s17700_s4 + $0x34] sm:$0xff]  ;;  %v2007_v11 = vpack.c.bf16 %v1934_v41, %v1933_v40  ;;  %v1417_v41 = vld [vmem:[%s17700_s4 + $0x41] sm:$0xff] }
 0x213   : > { %17798 = vst [vmem:[#allocation23_spill] sm:$0xff] %v12926_v1  ;;  %v3042_v25 = vpack.c.bf16 %v2968_v44, %v2967_v47  ;;  %v1418_v47 = vld [vmem:[%s17700_s4 + $0x49] sm:$0xff] }
 0x214   : > { %v1935_v44 = vld [vmem:[%s17700_s4 + $0x42] sm:$0xff] }
 0x216   : > { %v1059_v49 = vpop.f32.mrf.mxu2 }
 0x218   : > { %v1382_v53 = vpop.f32.mrf.mxu3  ;;  %v962_v21 = vpop.f32.mrf.mxu0 }
 0x219   : > { %v12948_v14 = vadd.f32 %v1382_v53, %v1059_v49  ;;  %v1285_v30 = vpop.f32.mrf.mxu1  ;;  %v2970_v49 = vld [vmem:[%s17700_s4 + $0x4c] sm:$0xff] }
 0x21a   : > { %v12950_v1 = vadd.f32 %v1285_v30, %v962_v21 }
 0x21b   : > { %17799 = vst [vmem:[#allocation24_spill] sm:$0xff] %v12948_v14  ;;  %10684 = vmatmul.msk.bf16.gmra.mxu2 %vm761_vm2, %v1489_v0  ;;  %10763 = vmatmul.msk.bf16.gmra.mxu0 %vm761_vm2, %v2007_v11 }
 0x21c   : > { %10803 = vmatmul.msk.bf16.gmra.mxu1 %vm761_vm2, %v3042_v25 }
 0x21d   : > { %10724 = vmatmul.msk.bf16.gmra.mxu3 %vm761_vm2, %v2007_v11  ;;  %v1490_v11 = vpack.c.bf16 %v1418_v47, %v1417_v41 }
 0x21e   : > { %v1062_v9 = vpop.f32.mrf.mxu2 }
 0x220   : > { %v1385_v38 = vpop.f32.mrf.mxu3  ;;  %v964_v34 = vpop.f32.mrf.mxu0 }
 0x221   : > { %v12956_v59 = vadd.f32 %v1385_v38, %v1062_v9  ;;  %v1287_v35 = vpop.f32.mrf.mxu1  ;;  %v1936_v38 = vld [vmem:[%s17700_s4 + $0x4a] sm:$0xff] }
 0x222   : > { %v12958_v40 = vadd.f32 %v1287_v35, %v964_v34  ;;  %v2969_v9 = vld [vmem:[%s17700_s4 + $0x44] sm:$0xff]  ;;  %v2008_v21 = vpack.c.bf16 %v1936_v38, %v1935_v44  ;;  %v1419_v38 = vld [vmem:[%s17700_s4 + $0x51] sm:$0xff] }
 0x223   : > { %17800 = vst [vmem:[#allocation25_spill] sm:$0xff] %v12956_v59  ;;  %v3043_v34 = vpack.c.bf16 %v2970_v49, %v2969_v9  ;;  %v1420_v9 = vld [vmem:[%s17700_s4 + $0x59] sm:$0xff] }
 0x224   : > { %v1937_v49 = vld [vmem:[%s17700_s4 + $0x52] sm:$0xff] }
 0x226   : > { %v1064_v53 = vpop.f32.mrf.mxu2 }
 0x228   : > { %v1387_v0 = vpop.f32.mrf.mxu3  ;;  %v967_v30 = vpop.f32.mrf.mxu0 }
 0x229   : > { %v12978_v25 = vadd.f32 %v1387_v0, %v1064_v53  ;;  %v1290_v35 = vpop.f32.mrf.mxu1  ;;  %v2972_v53 = vld [vmem:[%s17700_s4 + $0x5c] sm:$0xff] }
 0x22a   : > { %v12980_v59 = vadd.f32 %v1290_v35, %v967_v30 }
 0x22b   : > { %17801 = vst [vmem:[#allocation26_spill] sm:$0xff] %v12978_v25  ;;  %10685 = vmatmul.msk.bf16.gmra.mxu2 %vm761_vm2, %v1490_v11  ;;  %10764 = vmatmul.msk.bf16.gmra.mxu0 %vm761_vm2, %v2008_v21 }
 0x22c   : > { %10804 = vmatmul.msk.bf16.gmra.mxu1 %vm761_vm2, %v3043_v34 }
 0x22d   : > { %10725 = vmatmul.msk.bf16.gmra.mxu3 %vm761_vm2, %v2008_v21  ;;  %v1491_v21 = vpack.c.bf16 %v1420_v9, %v1419_v38 }
 0x22e   : > { %v1067_v14 = vpop.f32.mrf.mxu2 }
 0x230   : > { %v1390_v43 = vpop.f32.mrf.mxu3  ;;  %v969_v41 = vpop.f32.mrf.mxu0 }
 0x231   : > { %v12986_v8 = vadd.f32 %v1390_v43, %v1067_v14  ;;  %v1292_v47 = vpop.f32.mrf.mxu1  ;;  %v1938_v43 = vld [vmem:[%s17700_s4 + $0x5a] sm:$0xff] }
 0x232   : > { %v12988_v44 = vadd.f32 %v1292_v47, %v969_v41  ;;  %v2971_v14 = vld [vmem:[%s17700_s4 + $0x54] sm:$0xff]  ;;  %v2009_v30 = vpack.c.bf16 %v1938_v43, %v1937_v49  ;;  %v1421_v43 = vld [vmem:[%s17700_s4 + $0x61] sm:$0xff] }
 0x233   : > { %17802 = vst [vmem:[#allocation27_spill] sm:$0xff] %v12986_v8  ;;  %v3044_v41 = vpack.c.bf16 %v2972_v53, %v2971_v14  ;;  %v1422_v14 = vld [vmem:[%s17700_s4 + $0x69] sm:$0xff] }
 0x234   : > { %v1939_v53 = vld [vmem:[%s17700_s4 + $0x62] sm:$0xff] }
 0x236   : > { %v1069_v0 = vpop.f32.mrf.mxu2 }
 0x238   : > { %v1392_v11 = vpop.f32.mrf.mxu3  ;;  %v972_v35 = vpop.f32.mrf.mxu0 }
 0x239   : > { %v13008_v34 = vadd.f32 %v1392_v11, %v1069_v0  ;;  %v1295_v47 = vpop.f32.mrf.mxu1  ;;  %v2974_v0 = vld [vmem:[%s17700_s4 + $0x6c] sm:$0xff] }
 0x23a   : > { %v13010_v8 = vadd.f32 %v1295_v47, %v972_v35 }
 0x23b   : > { %17803 = vst [vmem:[#allocation28_spill] sm:$0xff] %v13008_v34  ;;  %10686 = vmatmul.msk.bf16.gmra.mxu2 %vm761_vm2, %v1491_v21  ;;  %10765 = vmatmul.msk.bf16.gmra.mxu0 %vm761_vm2, %v2009_v30 }
 0x23c   : > { %10805 = vmatmul.msk.bf16.gmra.mxu1 %vm761_vm2, %v3044_v41 }
 0x23d   : > { %10726 = vmatmul.msk.bf16.gmra.mxu3 %vm761_vm2, %v2009_v30  ;;  %v1492_v30 = vpack.c.bf16 %v1422_v14, %v1421_v43 }
 0x23e   : > { %v1072_v25 = vpop.f32.mrf.mxu2 }
 0x240   : > { %v1395_v61 = vpop.f32.mrf.mxu3  ;;  %v974_v38 = vpop.f32.mrf.mxu0 }
 0x241   : > { %v13016_v33 = vadd.f32 %v1395_v61, %v1072_v25  ;;  %v1297_v9 = vpop.f32.mrf.mxu1  ;;  %v1940_v61 = vld [vmem:[%s17700_s4 + $0x6a] sm:$0xff] }
 0x242   : > { %v13018_v49 = vadd.f32 %v1297_v9, %v974_v38  ;;  %v2973_v25 = vld [vmem:[%s17700_s4 + $0x64] sm:$0xff]  ;;  %v2010_v35 = vpack.c.bf16 %v1940_v61, %v1939_v53  ;;  %v1423_v61 = vld [vmem:[%s17700_s4 + $0x71] sm:$0xff] }
 0x243   : > { %17804 = vst [vmem:[#allocation29_spill] sm:$0xff] %v13016_v33  ;;  %v3045_v38 = vpack.c.bf16 %v2974_v0, %v2973_v25  ;;  %v1424_v25 = vld [vmem:[%s17700_s4 + $0x79] sm:$0xff] }
 0x244   : > { %v1941_v0 = vld [vmem:[%s17700_s4 + $0x72] sm:$0xff] }
 0x246   : > { %v1074_v11 = vpop.f32.mrf.mxu2 }
 0x248   : > { %v1397_v21 = vpop.f32.mrf.mxu3  ;;  %v977_v47 = vpop.f32.mrf.mxu0 }
 0x249   : > { %v13038_v41 = vadd.f32 %v1397_v21, %v1074_v11  ;;  %v1300_v9 = vpop.f32.mrf.mxu1  ;;  %v2976_v11 = vld [vmem:[%s17700_s4 + $0x7c] sm:$0xff] }
 0x24a   : > { %v13040_v33 = vadd.f32 %v1300_v9, %v977_v47 }
 0x24b   : > { %17805 = vst [vmem:[#allocation30_spill] sm:$0xff] %v13038_v41  ;;  %10687 = vmatmul.msk.bf16.gmra.mxu2 %vm761_vm2, %v1492_v30  ;;  %10766 = vmatmul.msk.bf16.gmra.mxu0 %vm761_vm2, %v2010_v35 }
 0x24c   : > { %10806 = vmatmul.msk.bf16.gmra.mxu1 %vm761_vm2, %v3045_v38 }
 0x24d   : > { %10727 = vmatmul.msk.bf16.gmra.mxu3 %vm761_vm2, %v2010_v35  ;;  %v1493_v35 = vpack.c.bf16 %v1424_v25, %v1423_v61 }
 0x24e   : > { %v1077_v34 = vpop.f32.mrf.mxu2 }
 0x250   : > { %v1400_v16 = vpop.f32.mrf.mxu3  ;;  %v979_v43 = vpop.f32.mrf.mxu0 }
 0x251   : > { %v13046_v57 = vadd.f32 %v1400_v16, %v1077_v34  ;;  %v1302_v14 = vpop.f32.mrf.mxu1  ;;  %v1942_v16 = vld [vmem:[%s17700_s4 + $0x7a] sm:$0xff] }
 0x252   : > { %v13048_v53 = vadd.f32 %v1302_v14, %v979_v43  ;;  %v2975_v34 = vld [vmem:[%s17700_s4 + $0x74] sm:$0xff]  ;;  %v2011_v47 = vpack.c.bf16 %v1942_v16, %v1941_v0  ;;  %v1425_v16 = vld [vmem:[%s17700_s4 + $0x81] sm:$0xff] }
 0x253   : > { %17806 = vst [vmem:[#allocation31_spill] sm:$0xff] %v13046_v57  ;;  %v3046_v43 = vpack.c.bf16 %v2976_v11, %v2975_v34  ;;  %v1426_v34 = vld [vmem:[%s17700_s4 + $0x89] sm:$0xff] }
 0x254   : > { %v1943_v11 = vld [vmem:[%s17700_s4 + $0x82] sm:$0xff] }
 0x256   : > { %v1079_v21 = vpop.f32.mrf.mxu2 }
 0x258   : > { %v1402_v30 = vpop.f32.mrf.mxu3  ;;  %v982_v9 = vpop.f32.mrf.mxu0 }
 0x259   : > { %v13068_v38 = vadd.f32 %v1402_v30, %v1079_v21  ;;  %v1305_v14 = vpop.f32.mrf.mxu1  ;;  %v2978_v21 = vld [vmem:[%s17700_s4 + $0x8c] sm:$0xff] }
 0x25a   : > { %v13070_v57 = vadd.f32 %v1305_v14, %v982_v9 }
 0x25b   : > { %17807 = vst [vmem:[#allocation32_spill] sm:$0xff] %v13068_v38  ;;  %10688 = vmatmul.msk.bf16.gmra.mxu2 %vm761_vm2, %v1493_v35  ;;  %10767 = vmatmul.msk.bf16.gmra.mxu0 %vm761_vm2, %v2011_v47 }
 0x25c   : > { %10807 = vmatmul.msk.bf16.gmra.mxu1 %vm761_vm2, %v3046_v43 }
 0x25d   : > { %10728 = vmatmul.msk.bf16.gmra.mxu3 %vm761_vm2, %v2011_v47  ;;  %v1494_v47 = vpack.c.bf16 %v1426_v34, %v1425_v16 }
 0x25e   : > { %v1082_v41 = vpop.f32.mrf.mxu2 }
 0x260   : > { %v1405_v45 = vpop.f32.mrf.mxu3  ;;  %v984_v61 = vpop.f32.mrf.mxu0 }
 0x261   : > { %v13076_v22 = vadd.f32 %v1405_v45, %v1082_v41  ;;  %v1307_v25 = vpop.f32.mrf.mxu1  ;;  %v1944_v45 = vld [vmem:[%s17700_s4 + $0x8a] sm:$0xff] }
 0x262   : > { %v13078_v0 = vadd.f32 %v1307_v25, %v984_v61  ;;  %v2977_v41 = vld [vmem:[%s17700_s4 + $0x84] sm:$0xff]  ;;  %v2012_v9 = vpack.c.bf16 %v1944_v45, %v1943_v11 }
 0x263   : > { %17808 = vst [vmem:[#allocation33_spill] sm:$0xff] %v13076_v22  ;;  %v3047_v14 = vpack.c.bf16 %v2978_v21, %v2977_v41  ;;  %v10961_v22 = vld [vmem:[%s11473_s25 + $0x1a] sm:$0x3] }
 0x264   : > { %v5974_v38 = vsel %vm879_vm1, %v10961_v22, 0  ;;  %v1945_v22 = vld [vmem:[%s17700_s4 + $0x92] sm:$0xff] }
 0x265   : > { %5983 = vmatpush.bf16.msra.mxu1 %v5974_v38  ;;  %v2979_v38 = vld [vmem:[%s17700_s4 + $0x94] sm:$0xff] }
 0x266   : > { %v1084_v30 = vpop.f32.mrf.mxu2 }
 0x268   : > { %v1407_v35 = vpop.f32.mrf.mxu3  ;;  %v987_v43 = vpop.f32.mrf.mxu0 }
 0x269   : > { %v1310_v61 = vpop.f32.mrf.mxu1  ;;  %v1427_v35 = vld [vmem:[%s17700_s4 + $0x91] sm:$0xff] }
 0x26a   : > { %v13098_v25 = vadd.f32 %v1310_v61, %v987_v43 }
 0x26b   : > { %10689 = vmatmul.msk.bf16.gmra.mxu2 %vm761_vm2, %v1494_v47  ;;  %10768 = vmatmul.msk.bf16.gmra.mxu0 %vm761_vm2, %v2012_v9  ;;  %v1428_v47 = vld [vmem:[%s17700_s4 + $0x99] sm:$0xff] }
 0x26c   : > { %10808 = vmatmul.msk.bf16.gmra.mxu1 %vm761_vm2, %v3047_v14 }
 0x26d   : > { %10729 = vmatmul.msk.bf16.gmra.mxu3 %vm761_vm2, %v2012_v9  ;;  %v2980_v9 = vld [vmem:[%s17700_s4 + $0x9c] sm:$0xff] }
 0x26e   : > { %v1656_v30 = vpop.f32.mrf.mxu2 }
 0x26f   : > { %v1850_v16 = vadd.f32 %v1656_v30, %v12464_v12  ;;  %v1946_v12 = vld [vmem:[%s17700_s4 + $0x9a] sm:$0xff]  ;;  %v1495_v30 = vpack.c.bf16 %v1428_v47, %v1427_v35 }
 0x270   : > { %v2174_v34 = vpop.f32.mrf.mxu3  ;;  %v989_v11 = vpop.f32.mrf.mxu0 }
 0x271   : > { %v2368_v45 = vadd.f32 %v2174_v34, %v1850_v16  ;;  %v1312_v41 = vpop.f32.mrf.mxu1  ;;  %v2013_v16 = vpack.c.bf16 %v1946_v12, %v1945_v22 }
 0x272   : > { %v13107_v21 = vadd.f32 %v1312_v41, %v989_v11  ;;  %v3048_v11 = vpack.c.bf16 %v2980_v9, %v2979_v38  ;;  %v1947_v9 = vld [vmem:[%s17700_s4 + $0xa2] sm:$0xff] }
 0x276   : > { %v1658_v43 = vpop.f32.mrf.mxu2 }
 0x277   : > { %v1851_v14 = vadd.f32 %v1658_v43, %v12472_v18  ;;  %v2982_v43 = vld [vmem:[%s17700_s4 + $0xac] sm:$0xff] }
 0x278   : > { %v2176_v61 = vpop.f32.mrf.mxu3  ;;  %v2692_v34 = vpop.f32.mrf.mxu0 }
 0x279   : > { %v2369_v41 = vadd.f32 %v2176_v61, %v1851_v14  ;;  %v2886_v10 = vadd.f32 %v2692_v34, %v2368_v45  ;;  %v3210_v54 = vpop.f32.mrf.mxu1 }
 0x27b   : > { %v13128_v46 = vadd.f32 %v3210_v54, %v2886_v10  ;;  %10690 = vmatmul.msk.bf16.gmra.mxu2 %vm761_vm2, %v1495_v30  ;;  %10769 = vmatmul.msk.bf16.gmra.mxu0 %vm761_vm2, %v2013_v16  ;;  %v1429_v54 = vld [vmem:[%s17700_s4 + $0xa1] sm:$0xff]  ;;  %v1430_v10 = vld [vmem:[%s17700_s4 + $0xa9] sm:$0xff] }
 0x27c   : > { %10809 = vmatmul.msk.bf16.gmra.mxu1 %vm761_vm2, %v3048_v11 }
 0x27d   : > { %10730 = vmatmul.msk.bf16.gmra.mxu3 %vm761_vm2, %v2013_v16  ;;  %v1496_v16 = vpack.c.bf16 %v1430_v10, %v1429_v54 }
 0x27e   : > { %v1661_v26 = vpop.f32.mrf.mxu2 }
 0x27f   : > { %v1852_v18 = vadd.f32 %v1661_v26, %v12500_v36  ;;  %v1948_v36 = vld [vmem:[%s17700_s4 + $0xaa] sm:$0xff] }
 0x280   : > { %v2179_v35 = vpop.f32.mrf.mxu3  ;;  %v2694_v47 = vpop.f32.mrf.mxu0  ;;  %v2981_v26 = vld [vmem:[%s17700_s4 + $0xa4] sm:$0xff]  ;;  %v2014_v34 = vpack.c.bf16 %v1948_v36, %v1947_v9 }
 0x281   : > { %v2370_v22 = vadd.f32 %v2179_v35, %v1852_v18  ;;  %v2887_v12 = vadd.f32 %v2694_v47, %v2369_v41  ;;  %v3212_v38 = vpop.f32.mrf.mxu1  ;;  %v3049_v41 = vpack.c.bf16 %v2982_v43, %v2981_v26  ;;  %v1431_v43 = vld [vmem:[%s17700_s4 + $0xb1] sm:$0xff] }
 0x283   : > { %v13135_v45 = vadd.f32 %v3212_v38, %v2887_v12 }
 0x286   : > { %v1663_v14 = vpop.f32.mrf.mxu2 }
 0x287   : > { %v1853_v61 = vadd.f32 %v1663_v14, %v12508_v42  ;;  %v1432_v14 = vld [vmem:[%s17700_s4 + $0xb9] sm:$0xff] }
 0x288   : > { %v2181_v30 = vpop.f32.mrf.mxu3  ;;  %v2697_v11 = vpop.f32.mrf.mxu0 }
 0x289   : > { %v2371_v18 = vadd.f32 %v2181_v30, %v1853_v61  ;;  %v2888_v35 = vadd.f32 %v2697_v11, %v2370_v22  ;;  %v3215_v47 = vpop.f32.mrf.mxu1  ;;  %v1949_v61 = vld [vmem:[%s17700_s4 + $0xb2] sm:$0xff] }
 0x28a   : > { %v2983_v30 = vld [vmem:[%s17700_s4 + $0xb4] sm:$0xff] }
 0x28b   : > { %v13156_v12 = vadd.f32 %v3215_v47, %v2888_v35  ;;  %10691 = vmatmul.msk.bf16.gmra.mxu2 %vm761_vm2, %v1496_v16  ;;  %10770 = vmatmul.msk.bf16.gmra.mxu0 %vm761_vm2, %v2014_v34  ;;  %v2984_v16 = vld [vmem:[%s17700_s4 + $0xbc] sm:$0xff] }
 0x28c   : > { %10810 = vmatmul.msk.bf16.gmra.mxu1 %vm761_vm2, %v3049_v41 }
 0x28d   : > { %10731 = vmatmul.msk.bf16.gmra.mxu3 %vm761_vm2, %v2014_v34 }
 0x28e   : > { %v1666_v38 = vpop.f32.mrf.mxu2 }
 0x28f   : > { %v1854_v42 = vadd.f32 %v1666_v38, %v12536_v60  ;;  %v1950_v60 = vld [vmem:[%s17700_s4 + $0xba] sm:$0xff]  ;;  %v3050_v38 = vpack.c.bf16 %v2984_v16, %v2983_v30 }
 0x290   : > { %v2184_v54 = vpop.f32.mrf.mxu3  ;;  %v2699_v10 = vpop.f32.mrf.mxu0  ;;  %v2015_v35 = vpack.c.bf16 %v1950_v60, %v1949_v61  ;;  %v1433_v16 = vld [vmem:[%s17700_s4 + $0xc1] sm:$0xff] }
 0x291   : > { %v2372_v9 = vadd.f32 %v2184_v54, %v1854_v42  ;;  %v2889_v36 = vadd.f32 %v2699_v10, %v2371_v18  ;;  %v3217_v26 = vpop.f32.mrf.mxu1  ;;  %v1497_v18 = vpack.c.bf16 %v1432_v14, %v1431_v43 }
 0x293   : > { %v13163_v22 = vadd.f32 %v3217_v26, %v2889_v36 }
 0x296   : > { %v1668_v34 = vpop.f32.mrf.mxu2 }
 0x297   : > { %v1855_v11 = vadd.f32 %v1668_v34, %v12544_v2  ;;  %v1434_v34 = vld [vmem:[%s17700_s4 + $0xc9] sm:$0xff] }
 0x298   : > { %v2186_v41 = vpop.f32.mrf.mxu3  ;;  %v2702_v47 = vpop.f32.mrf.mxu0 }
 0x299   : > { %v2373_v42 = vadd.f32 %v2186_v41, %v1855_v11  ;;  %v2890_v54 = vadd.f32 %v2702_v47, %v2372_v9  ;;  %v3220_v10 = vpop.f32.mrf.mxu1  ;;  %v1951_v11 = vld [vmem:[%s17700_s4 + $0xc2] sm:$0xff] }
 0x29a   : > { %v2985_v41 = vld [vmem:[%s17700_s4 + $0xc4] sm:$0xff] }
 0x29b   : > { %v13184_v36 = vadd.f32 %v3220_v10, %v2890_v54  ;;  %10692 = vmatmul.msk.bf16.gmra.mxu2 %vm761_vm2, %v1497_v18  ;;  %10771 = vmatmul.msk.bf16.gmra.mxu0 %vm761_vm2, %v2015_v35  ;;  %v2986_v18 = vld [vmem:[%s17700_s4 + $0xcc] sm:$0xff] }
 0x29c   : > { %10811 = vmatmul.msk.bf16.gmra.mxu1 %vm761_vm2, %v3050_v38 }
 0x29d   : > { %10732 = vmatmul.msk.bf16.gmra.mxu3 %vm761_vm2, %v2015_v35 }
 0x29e   : > { %v1671_v26 = vpop.f32.mrf.mxu2 }
 0x29f   : > { %v1856_v2 = vadd.f32 %v1671_v26, %v12572_v23  ;;  %v1952_v23 = vld [vmem:[%s17700_s4 + $0xca] sm:$0xff]  ;;  %v3051_v26 = vpack.c.bf16 %v2986_v18, %v2985_v41 }
 0x2a0   : > { %v2189_v43 = vpop.f32.mrf.mxu3  ;;  %v2704_v14 = vpop.f32.mrf.mxu0  ;;  %v2016_v54 = vpack.c.bf16 %v1952_v23, %v1951_v11  ;;  %v1435_v18 = vld [vmem:[%s17700_s4 + $0xd1] sm:$0xff] }
 0x2a1   : > { %v2374_v61 = vadd.f32 %v2189_v43, %v1856_v2  ;;  %v2891_v60 = vadd.f32 %v2704_v14, %v2373_v42  ;;  %v3222_v30 = vpop.f32.mrf.mxu1  ;;  %v1498_v42 = vpack.c.bf16 %v1434_v34, %v1433_v16 }
 0x2a3   : > { %v13191_v9 = vadd.f32 %v3222_v30, %v2891_v60 }
 0x2a6   : > { %v1673_v35 = vpop.f32.mrf.mxu2 }
 0x2a7   : > { %v1857_v47 = vadd.f32 %v1673_v35, %v12580_v29  ;;  %v1436_v35 = vld [vmem:[%s17700_s4 + $0xd9] sm:$0xff] }
 0x2a8   : > { %v2191_v38 = vpop.f32.mrf.mxu3  ;;  %v2707_v10 = vpop.f32.mrf.mxu0 }
 0x2a9   : > { %v2375_v2 = vadd.f32 %v2191_v38, %v1857_v47  ;;  %v2892_v43 = vadd.f32 %v2707_v10, %v2374_v61  ;;  %v3225_v14 = vpop.f32.mrf.mxu1  ;;  %v1953_v47 = vld [vmem:[%s17700_s4 + $0xd2] sm:$0xff] }
 0x2aa   : > { %v2987_v38 = vld [vmem:[%s17700_s4 + $0xd4] sm:$0xff] }
 0x2ab   : > { %v13212_v60 = vadd.f32 %v3225_v14, %v2892_v43  ;;  %10693 = vmatmul.msk.bf16.gmra.mxu2 %vm761_vm2, %v1498_v42  ;;  %10772 = vmatmul.msk.bf16.gmra.mxu0 %vm761_vm2, %v2016_v54  ;;  %v2988_v42 = vld [vmem:[%s17700_s4 + $0xdc] sm:$0xff] }
 0x2ac   : > { %10812 = vmatmul.msk.bf16.gmra.mxu1 %vm761_vm2, %v3051_v26 }
 0x2ad   : > { %10733 = vmatmul.msk.bf16.gmra.mxu3 %vm761_vm2, %v2016_v54 }
 0x2ae   : > { %v1676_v30 = vpop.f32.mrf.mxu2 }
 0x2af   : > { %v1858_v29 = vadd.f32 %v1676_v30, %v12608_v51  ;;  %v1954_v51 = vld [vmem:[%s17700_s4 + $0xda] sm:$0xff]  ;;  %v3052_v30 = vpack.c.bf16 %v2988_v42, %v2987_v38 }
 0x2b0   : > { %v2194_v16 = vpop.f32.mrf.mxu3  ;;  %v2709_v34 = vpop.f32.mrf.mxu0  ;;  %v2017_v43 = vpack.c.bf16 %v1954_v51, %v1953_v47  ;;  %v1437_v42 = vld [vmem:[%s17700_s4 + $0xe1] sm:$0xff] }
 0x2b1   : > { %v2376_v11 = vadd.f32 %v2194_v16, %v1858_v29  ;;  %v2893_v23 = vadd.f32 %v2709_v34, %v2375_v2  ;;  %v3227_v41 = vpop.f32.mrf.mxu1  ;;  %v1499_v2 = vpack.c.bf16 %v1436_v35, %v1435_v18 }
 0x2b3   : > { %v13219_v61 = vadd.f32 %v3227_v41, %v2893_v23 }
 0x2b6   : > { %v1678_v54 = vpop.f32.mrf.mxu2 }
 0x2b7   : > { %v1859_v10 = vadd.f32 %v1678_v54, %v12616_v58  ;;  %v1438_v54 = vld [vmem:[%s17700_s4 + $0xe9] sm:$0xff] }
 0x2b8   : > { %v2196_v26 = vpop.f32.mrf.mxu3  ;;  %v2712_v14 = vpop.f32.mrf.mxu0 }
 0x2b9   : > { %v2377_v29 = vadd.f32 %v2196_v26, %v1859_v10  ;;  %v2894_v16 = vadd.f32 %v2712_v14, %v2376_v11  ;;  %v3230_v34 = vpop.f32.mrf.mxu1  ;;  %v1955_v10 = vld [vmem:[%s17700_s4 + $0xe2] sm:$0xff] }
 0x2ba   : > { %v2989_v26 = vld [vmem:[%s17700_s4 + $0xe4] sm:$0xff] }
 0x2bb   : > { %v13240_v23 = vadd.f32 %v3230_v34, %v2894_v16  ;;  %10694 = vmatmul.msk.bf16.gmra.mxu2 %vm761_vm2, %v1499_v2  ;;  %10773 = vmatmul.msk.bf16.gmra.mxu0 %vm761_vm2, %v2017_v43  ;;  %v2990_v2 = vld [vmem:[%s17700_s4 + $0xec] sm:$0xff] }
 0x2bc   : > { %10813 = vmatmul.msk.bf16.gmra.mxu1 %vm761_vm2, %v3052_v30 }
 0x2bd   : > { %10734 = vmatmul.msk.bf16.gmra.mxu3 %vm761_vm2, %v2017_v43 }
 0x2be   : > { %v1681_v41 = vpop.f32.mrf.mxu2 }
 0x2bf   : > { %v1860_v58 = vadd.f32 %v1681_v41, %v12644_v19  ;;  %v1956_v19 = vld [vmem:[%s17700_s4 + $0xea] sm:$0xff]  ;;  %v3053_v41 = vpack.c.bf16 %v2990_v2, %v2989_v26 }
 0x2c0   : > { %v2199_v18 = vpop.f32.mrf.mxu3  ;;  %v2714_v35 = vpop.f32.mrf.mxu0  ;;  %v2018_v16 = vpack.c.bf16 %v1956_v19, %v1955_v10  ;;  %v1439_v2 = vld [vmem:[%s17700_s4 + $0xf1] sm:$0xff] }
 0x2c1   : > { %v2378_v47 = vadd.f32 %v2199_v18, %v1860_v58  ;;  %v2895_v51 = vadd.f32 %v2714_v35, %v2377_v29  ;;  %v3232_v38 = vpop.f32.mrf.mxu1  ;;  %v1500_v29 = vpack.c.bf16 %v1438_v54, %v1437_v42 }
 0x2c3   : > { %v13247_v11 = vadd.f32 %v3232_v38, %v2895_v51 }
 0x2c6   : > { %v1683_v43 = vpop.f32.mrf.mxu2 }
 0x2c7   : > { %v1861_v14 = vadd.f32 %v1683_v43, %v12652_v27  ;;  %v1440_v43 = vld [vmem:[%s17700_s4 + $0xf9] sm:$0xff] }
 0x2c8   : > { %v2201_v30 = vpop.f32.mrf.mxu3  ;;  %v2717_v34 = vpop.f32.mrf.mxu0 }
 0x2c9   : > { %v2379_v58 = vadd.f32 %v2201_v30, %v1861_v14  ;;  %v2896_v18 = vadd.f32 %v2717_v34, %v2378_v47  ;;  %v3235_v35 = vpop.f32.mrf.mxu1  ;;  %v1957_v14 = vld [vmem:[%s17700_s4 + $0xf2] sm:$0xff] }
 0x2ca   : > { %v2991_v30 = vld [vmem:[%s17700_s4 + $0xf4] sm:$0xff] }
 0x2cb   : > { %v13268_v51 = vadd.f32 %v3235_v35, %v2896_v18  ;;  %10695 = vmatmul.msk.bf16.gmra.mxu2 %vm761_vm2, %v1500_v29  ;;  %10774 = vmatmul.msk.bf16.gmra.mxu0 %vm761_vm2, %v2018_v16  ;;  %v2992_v29 = vld [vmem:[%s17700_s4 + $0xfc] sm:$0xff] }
 0x2cc   : > { %10814 = vmatmul.msk.bf16.gmra.mxu1 %vm761_vm2, %v3053_v41 }
 0x2cd   : > { %10735 = vmatmul.msk.bf16.gmra.mxu3 %vm761_vm2, %v2018_v16 }
 0x2ce   : > { %v1686_v38 = vpop.f32.mrf.mxu2 }
 0x2cf   : > { %v1862_v27 = vadd.f32 %v1686_v38, %v12680_v52  ;;  %v1958_v52 = vld [vmem:[%s17700_s4 + $0xfa] sm:$0xff]  ;;  %v3054_v38 = vpack.c.bf16 %v2992_v29, %v2991_v30 }
 0x2d0   : > { %v2204_v42 = vpop.f32.mrf.mxu3  ;;  %v2719_v54 = vpop.f32.mrf.mxu0  ;;  %v2019_v18 = vpack.c.bf16 %v1958_v52, %v1957_v14  ;;  %v1441_v29 = vld [vmem:[%s17700_s4 + $0x101] sm:$0xff] }
 0x2d1   : > { %v2380_v10 = vadd.f32 %v2204_v42, %v1862_v27  ;;  %v2897_v19 = vadd.f32 %v2719_v54, %v2379_v58  ;;  %v3237_v26 = vpop.f32.mrf.mxu1  ;;  %v1501_v58 = vpack.c.bf16 %v1440_v43, %v1439_v2 }
 0x2d3   : > { %v13275_v47 = vadd.f32 %v3237_v26, %v2897_v19 }
 0x2d6   : > { %v1688_v16 = vpop.f32.mrf.mxu2 }
 0x2d7   : > { %v1863_v34 = vadd.f32 %v1688_v16, %v12688_v62  ;;  %v1442_v16 = vld [vmem:[%s17700_s4 + $0x109] sm:$0xff] }
 0x2d8   : > { %v2206_v41 = vpop.f32.mrf.mxu3  ;;  %v2722_v35 = vpop.f32.mrf.mxu0 }
 0x2d9   : > { %v2381_v27 = vadd.f32 %v2206_v41, %v1863_v34  ;;  %v2898_v42 = vadd.f32 %v2722_v35, %v2380_v10  ;;  %v3240_v54 = vpop.f32.mrf.mxu1  ;;  %v1959_v34 = vld [vmem:[%s17700_s4 + $0x102] sm:$0xff] }
 0x2da   : > { %v2993_v41 = vld [vmem:[%s17700_s4 + $0x104] sm:$0xff] }
 0x2db   : > { %v13296_v19 = vadd.f32 %v3240_v54, %v2898_v42  ;;  %10696 = vmatmul.msk.bf16.gmra.mxu2 %vm761_vm2, %v1501_v58  ;;  %10775 = vmatmul.msk.bf16.gmra.mxu0 %vm761_vm2, %v2019_v18  ;;  %v2994_v58 = vld [vmem:[%s17700_s4 + $0x10c] sm:$0xff] }
 0x2dc   : > { %10815 = vmatmul.msk.bf16.gmra.mxu1 %vm761_vm2, %v3054_v38 }
 0x2dd   : > { %10736 = vmatmul.msk.bf16.gmra.mxu3 %vm761_vm2, %v2019_v18 }
 0x2de   : > { %v1691_v26 = vpop.f32.mrf.mxu2 }
 0x2df   : > { %v1864_v62 = vadd.f32 %v1691_v26, %v12716_v28  ;;  %v1960_v28 = vld [vmem:[%s17700_s4 + $0x10a] sm:$0xff]  ;;  %v3055_v26 = vpack.c.bf16 %v2994_v58, %v2993_v41 }
 0x2e0   : > { %v2209_v2 = vpop.f32.mrf.mxu3  ;;  %v2724_v43 = vpop.f32.mrf.mxu0  ;;  %v2020_v42 = vpack.c.bf16 %v1960_v28, %v1959_v34  ;;  %v1443_v58 = vld [vmem:[%s17700_s4 + $0x111] sm:$0xff] }
 0x2e1   : > { %v2382_v14 = vadd.f32 %v2209_v2, %v1864_v62  ;;  %v2899_v52 = vadd.f32 %v2724_v43, %v2381_v27  ;;  %v3242_v30 = vpop.f32.mrf.mxu1  ;;  %v1502_v27 = vpack.c.bf16 %v1442_v16, %v1441_v29 }
 0x2e3   : > { %v13303_v10 = vadd.f32 %v3242_v30, %v2899_v52 }
 0x2e6   : > { %v1693_v18 = vpop.f32.mrf.mxu2 }
 0x2e7   : > { %v1865_v35 = vadd.f32 %v1693_v18, %v12724_v37  ;;  %v1444_v18 = vld [vmem:[%s17700_s4 + $0x119] sm:$0xff] }
 0x2e8   : > { %v2211_v38 = vpop.f32.mrf.mxu3  ;;  %v2727_v54 = vpop.f32.mrf.mxu0 }
 0x2e9   : > { %v2383_v62 = vadd.f32 %v2211_v38, %v1865_v35  ;;  %v2900_v2 = vadd.f32 %v2727_v54, %v2382_v14  ;;  %v3245_v43 = vpop.f32.mrf.mxu1  ;;  %v1961_v35 = vld [vmem:[%s17700_s4 + $0x112] sm:$0xff] }
 0x2ea   : > { %v2995_v38 = vld [vmem:[%s17700_s4 + $0x114] sm:$0xff] }
 0x2eb   : > { %v13324_v52 = vadd.f32 %v3245_v43, %v2900_v2  ;;  %10697 = vmatmul.msk.bf16.gmra.mxu2 %vm761_vm2, %v1502_v27  ;;  %10776 = vmatmul.msk.bf16.gmra.mxu0 %vm761_vm2, %v2020_v42  ;;  %v2996_v27 = vld [vmem:[%s17700_s4 + $0x11c] sm:$0xff] }
 0x2ec   : > { %10816 = vmatmul.msk.bf16.gmra.mxu1 %vm761_vm2, %v3055_v26 }
 0x2ed   : > { %10737 = vmatmul.msk.bf16.gmra.mxu3 %vm761_vm2, %v2020_v42 }
 0x2ee   : > { %v1696_v30 = vpop.f32.mrf.mxu2 }
 0x2ef   : > { %v1866_v37 = vadd.f32 %v1696_v30, %v12752_v5  ;;  %v1962_v5 = vld [vmem:[%s17700_s4 + $0x11a] sm:$0xff]  ;;  %v3056_v30 = vpack.c.bf16 %v2996_v27, %v2995_v38 }
 0x2f0   : > { %v2214_v29 = vpop.f32.mrf.mxu3  ;;  %v2729_v16 = vpop.f32.mrf.mxu0  ;;  %v2021_v2 = vpack.c.bf16 %v1962_v5, %v1961_v35  ;;  %v1445_v27 = vld [vmem:[%s17700_s4 + $0x121] sm:$0xff] }
 0x2f1   : > { %v2384_v34 = vadd.f32 %v2214_v29, %v1866_v37  ;;  %v2901_v28 = vadd.f32 %v2729_v16, %v2383_v62  ;;  %v3247_v41 = vpop.f32.mrf.mxu1  ;;  %v1503_v62 = vpack.c.bf16 %v1444_v18, %v1443_v58 }
 0x2f3   : > { %v13331_v14 = vadd.f32 %v3247_v41, %v2901_v28 }
 0x2f6   : > { %v1698_v42 = vpop.f32.mrf.mxu2 }
 0x2f7   : > { %v1867_v54 = vadd.f32 %v1698_v42, %v12760_v13  ;;  %v1446_v42 = vld [vmem:[%s17700_s4 + $0x129] sm:$0xff] }
 0x2f8   : > { %v2216_v26 = vpop.f32.mrf.mxu3  ;;  %v2732_v43 = vpop.f32.mrf.mxu0 }
 0x2f9   : > { %v2385_v37 = vadd.f32 %v2216_v26, %v1867_v54  ;;  %v2902_v29 = vadd.f32 %v2732_v43, %v2384_v34  ;;  %v3250_v16 = vpop.f32.mrf.mxu1  ;;  %v1963_v54 = vld [vmem:[%s17700_s4 + $0x122] sm:$0xff] }
 0x2fa   : > { %v2997_v26 = vld [vmem:[%s17700_s4 + $0x124] sm:$0xff] }
 0x2fb   : > { %v13352_v28 = vadd.f32 %v3250_v16, %v2902_v29  ;;  %10698 = vmatmul.msk.bf16.gmra.mxu2 %vm761_vm2, %v1503_v62  ;;  %10777 = vmatmul.msk.bf16.gmra.mxu0 %vm761_vm2, %v2021_v2  ;;  %v2998_v62 = vld [vmem:[%s17700_s4 + $0x12c] sm:$0xff] }
 0x2fc   : > { %10817 = vmatmul.msk.bf16.gmra.mxu1 %vm761_vm2, %v3056_v30 }
 0x2fd   : > { %10738 = vmatmul.msk.bf16.gmra.mxu3 %vm761_vm2, %v2021_v2 }
 0x2fe   : > { %v1701_v41 = vpop.f32.mrf.mxu2 }
 0x2ff   : > { %v1868_v13 = vadd.f32 %v1701_v41, %v12788_v50  ;;  %v1964_v50 = vld [vmem:[%s17700_s4 + $0x12a] sm:$0xff]  ;;  %v3057_v41 = vpack.c.bf16 %v2998_v62, %v2997_v26 }
 0x300   : > { %v2219_v58 = vpop.f32.mrf.mxu3  ;;  %v2734_v18 = vpop.f32.mrf.mxu0  ;;  %v2022_v29 = vpack.c.bf16 %v1964_v50, %v1963_v54  ;;  %v1447_v62 = vld [vmem:[%s17700_s4 + $0x131] sm:$0xff] }
 0x301   : > { %v2386_v35 = vadd.f32 %v2219_v58, %v1868_v13  ;;  %v2903_v5 = vadd.f32 %v2734_v18, %v2385_v37  ;;  %v3252_v38 = vpop.f32.mrf.mxu1  ;;  %v1504_v37 = vpack.c.bf16 %v1446_v42, %v1445_v27 }
 0x303   : > { %v13359_v34 = vadd.f32 %v3252_v38, %v2903_v5 }
 0x306   : > { %v1703_v2 = vpop.f32.mrf.mxu2 }
 0x307   : > { %v1869_v43 = vadd.f32 %v1703_v2, %v12796_v3  ;;  %v1448_v2 = vld [vmem:[%s17700_s4 + $0x139] sm:$0xff] }
 0x308   : > { %v2221_v30 = vpop.f32.mrf.mxu3  ;;  %v2737_v16 = vpop.f32.mrf.mxu0 }
 0x309   : > { %v2387_v13 = vadd.f32 %v2221_v30, %v1869_v43  ;;  %v2904_v58 = vadd.f32 %v2737_v16, %v2386_v35  ;;  %v3255_v18 = vpop.f32.mrf.mxu1  ;;  %v1965_v43 = vld [vmem:[%s17700_s4 + $0x132] sm:$0xff] }
 0x30a   : > { %v2999_v30 = vld [vmem:[%s17700_s4 + $0x134] sm:$0xff] }
 0x30b   : > { %v13380_v5 = vadd.f32 %v3255_v18, %v2904_v58  ;;  %10699 = vmatmul.msk.bf16.gmra.mxu2 %vm761_vm2, %v1504_v37  ;;  %10778 = vmatmul.msk.bf16.gmra.mxu0 %vm761_vm2, %v2022_v29  ;;  %v3000_v37 = vld [vmem:[%s17700_s4 + $0x13c] sm:$0xff] }
 0x30c   : > { %10818 = vmatmul.msk.bf16.gmra.mxu1 %vm761_vm2, %v3057_v41 }
 0x30d   : > { %10739 = vmatmul.msk.bf16.gmra.mxu3 %vm761_vm2, %v2022_v29 }
 0x30e   : > { %v1706_v38 = vpop.f32.mrf.mxu2 }
 0x30f   : > { %v1870_v3 = vadd.f32 %v1706_v38, %v12822_v48  ;;  %v1966_v48 = vld [vmem:[%s17700_s4 + $0x13a] sm:$0xff]  ;;  %v3058_v38 = vpack.c.bf16 %v3000_v37, %v2999_v30 }
 0x310   : > { %v2224_v27 = vpop.f32.mrf.mxu3  ;;  %v2739_v42 = vpop.f32.mrf.mxu0  ;;  %v2023_v58 = vpack.c.bf16 %v1966_v48, %v1965_v43  ;;  %v1449_v37 = vld [vmem:[%s17700_s4 + $0x141] sm:$0xff] }
 0x311   : > { %v2388_v54 = vadd.f32 %v2224_v27, %v1870_v3  ;;  %v2905_v50 = vadd.f32 %v2739_v42, %v2387_v13  ;;  %v3257_v26 = vpop.f32.mrf.mxu1  ;;  %v1505_v13 = vpack.c.bf16 %v1448_v2, %v1447_v62 }
 0x313   : > { %v13387_v35 = vadd.f32 %v3257_v26, %v2905_v50 }
 0x316   : > { %v1708_v29 = vpop.f32.mrf.mxu2 }
 0x317   : > { %v1871_v16 = vadd.f32 %v1708_v29, %v12832_v7  ;;  %v1450_v29 = vld [vmem:[%s17700_s4 + $0x149] sm:$0xff] }
 0x318   : > { %v2226_v41 = vpop.f32.mrf.mxu3  ;;  %v2742_v18 = vpop.f32.mrf.mxu0 }
 0x319   : > { %v2389_v3 = vadd.f32 %v2226_v41, %v1871_v16  ;;  %v2906_v27 = vadd.f32 %v2742_v18, %v2388_v54  ;;  %v3260_v42 = vpop.f32.mrf.mxu1  ;;  %v1967_v16 = vld [vmem:[%s17700_s4 + $0x142] sm:$0xff] }
 0x31a   : > { %v3001_v41 = vld [vmem:[%s17700_s4 + $0x144] sm:$0xff] }
 0x31b   : > { %v13408_v50 = vadd.f32 %v3260_v42, %v2906_v27  ;;  %10700 = vmatmul.msk.bf16.gmra.mxu2 %vm761_vm2, %v1505_v13  ;;  %10779 = vmatmul.msk.bf16.gmra.mxu0 %vm761_vm2, %v2023_v58  ;;  %v3002_v13 = vld [vmem:[%s17700_s4 + $0x14c] sm:$0xff] }
 0x31c   : > { %10819 = vmatmul.msk.bf16.gmra.mxu1 %vm761_vm2, %v3058_v38 }
 0x31d   : > { %10740 = vmatmul.msk.bf16.gmra.mxu3 %vm761_vm2, %v2023_v58 }
 0x31e   : > { %v1711_v26 = vpop.f32.mrf.mxu2 }
 0x31f   : > { %v1872_v7 = vadd.f32 %v1711_v26, %v12860_v56  ;;  %v1968_v56 = vld [vmem:[%s17700_s4 + $0x14a] sm:$0xff]  ;;  %v3059_v26 = vpack.c.bf16 %v3002_v13, %v3001_v41 }
 0x320   : > { %v2229_v62 = vpop.f32.mrf.mxu3  ;;  %v2744_v2 = vpop.f32.mrf.mxu0  ;;  %v2024_v27 = vpack.c.bf16 %v1968_v56, %v1967_v16  ;;  %v1451_v13 = vld [vmem:[%s17700_s4 + $0x151] sm:$0xff] }
 0x321   : > { %v2390_v43 = vadd.f32 %v2229_v62, %v1872_v7  ;;  %v2907_v48 = vadd.f32 %v2744_v2, %v2389_v3  ;;  %v3262_v30 = vpop.f32.mrf.mxu1  ;;  %v1506_v3 = vpack.c.bf16 %v1450_v29, %v1449_v37 }
 0x323   : > { %v13415_v54 = vadd.f32 %v3262_v30, %v2907_v48 }
 0x326   : > { %v1713_v58 = vpop.f32.mrf.mxu2 }
 0x327   : > { %v1873_v18 = vadd.f32 %v1713_v58, %v12868_v20  ;;  %v1452_v58 = vld [vmem:[%s17700_s4 + $0x159] sm:$0xff] }
 0x328   : > { %v2231_v38 = vpop.f32.mrf.mxu3  ;;  %v2747_v42 = vpop.f32.mrf.mxu0 }
 0x329   : > { %v2391_v7 = vadd.f32 %v2231_v38, %v1873_v18  ;;  %v2908_v62 = vadd.f32 %v2747_v42, %v2390_v43  ;;  %v3265_v2 = vpop.f32.mrf.mxu1  ;;  %v1969_v18 = vld [vmem:[%s17700_s4 + $0x152] sm:$0xff] }
 0x32a   : > { %v3003_v38 = vld [vmem:[%s17700_s4 + $0x154] sm:$0xff] }
 0x32b   : > { %v13436_v48 = vadd.f32 %v3265_v2, %v2908_v62  ;;  %10701 = vmatmul.msk.bf16.gmra.mxu2 %vm761_vm2, %v1506_v3  ;;  %10780 = vmatmul.msk.bf16.gmra.mxu0 %vm761_vm2, %v2024_v27  ;;  %v3004_v3 = vld [vmem:[%s17700_s4 + $0x15c] sm:$0xff] }
 0x32c   : > { %10820 = vmatmul.msk.bf16.gmra.mxu1 %vm761_vm2, %v3059_v26 }
 0x32d   : > { %10741 = vmatmul.msk.bf16.gmra.mxu3 %vm761_vm2, %v2024_v27 }
 0x32e   : > { %v1716_v30 = vpop.f32.mrf.mxu2 }
 0x32f   : > { %v1874_v20 = vadd.f32 %v1716_v30, %v12890_v4  ;;  %v1970_v4 = vld [vmem:[%s17700_s4 + $0x15a] sm:$0xff]  ;;  %v3060_v30 = vpack.c.bf16 %v3004_v3, %v3003_v38 }
 0x330   : > { %v2234_v37 = vpop.f32.mrf.mxu3  ;;  %v2749_v29 = vpop.f32.mrf.mxu0  ;;  %v2025_v62 = vpack.c.bf16 %v1970_v4, %v1969_v18  ;;  %v1453_v3 = vld [vmem:[%s17700_s4 + $0x161] sm:$0xff] }
 0x331   : > { %v2392_v16 = vadd.f32 %v2234_v37, %v1874_v20  ;;  %v2909_v56 = vadd.f32 %v2749_v29, %v2391_v7  ;;  %v3267_v41 = vpop.f32.mrf.mxu1  ;;  %v1507_v7 = vpack.c.bf16 %v1452_v58, %v1451_v13 }
 0x333   : > { %v13443_v43 = vadd.f32 %v3267_v41, %v2909_v56 }
 0x336   : > { %v1718_v27 = vpop.f32.mrf.mxu2 }
 0x337   : > { %v1875_v42 = vadd.f32 %v1718_v27, %v12898_v24  ;;  %v1454_v27 = vld [vmem:[%s17700_s4 + $0x169] sm:$0xff] }
 0x338   : > { %v2236_v26 = vpop.f32.mrf.mxu3  ;;  %v2752_v2 = vpop.f32.mrf.mxu0 }
 0x339   : > { %v2393_v20 = vadd.f32 %v2236_v26, %v1875_v42  ;;  %v2910_v37 = vadd.f32 %v2752_v2, %v2392_v16  ;;  %v3270_v29 = vpop.f32.mrf.mxu1  ;;  %v1971_v42 = vld [vmem:[%s17700_s4 + $0x162] sm:$0xff] }
 0x33a   : > { %v3005_v26 = vld [vmem:[%s17700_s4 + $0x164] sm:$0xff] }
 0x33b   : > { %v13464_v56 = vadd.f32 %v3270_v29, %v2910_v37  ;;  %10702 = vmatmul.msk.bf16.gmra.mxu2 %vm761_vm2, %v1507_v7  ;;  %10781 = vmatmul.msk.bf16.gmra.mxu0 %vm761_vm2, %v2025_v62  ;;  %v3006_v7 = vld [vmem:[%s17700_s4 + $0x16c] sm:$0xff] }
 0x33c   : > { %10821 = vmatmul.msk.bf16.gmra.mxu1 %vm761_vm2, %v3060_v30 }
 0x33d   : > { %10742 = vmatmul.msk.bf16.gmra.mxu3 %vm761_vm2, %v2025_v62 }
 0x33e   : > { %v1721_v41 = vpop.f32.mrf.mxu2 }
 0x33f   : > { %v1876_v24 = vadd.f32 %v1721_v41, %v12920_v6  ;;  %v1972_v6 = vld [vmem:[%s17700_s4 + $0x16a] sm:$0xff]  ;;  %v3061_v41 = vpack.c.bf16 %v3006_v7, %v3005_v26 }
 0x340   : > { %v2239_v13 = vpop.f32.mrf.mxu3  ;;  %v2754_v58 = vpop.f32.mrf.mxu0  ;;  %v2026_v37 = vpack.c.bf16 %v1972_v6, %v1971_v42  ;;  %v1455_v7 = vld [vmem:[%s17700_s4 + $0x171] sm:$0xff] }
 0x341   : > { %v2394_v18 = vadd.f32 %v2239_v13, %v1876_v24  ;;  %v2911_v4 = vadd.f32 %v2754_v58, %v2393_v20  ;;  %v3272_v38 = vpop.f32.mrf.mxu1  ;;  %v1508_v20 = vpack.c.bf16 %v1454_v27, %v1453_v3 }
 0x343   : > { %v13471_v16 = vadd.f32 %v3272_v38, %v2911_v4 }
 0x346   : > { %v1723_v62 = vpop.f32.mrf.mxu2 }
 0x347   : > { %v1877_v2 = vadd.f32 %v1723_v62, %v12928_v32  ;;  %v1456_v62 = vld [vmem:[%s17700_s4 + $0x179] sm:$0xff] }
 0x348   : > { %v2241_v30 = vpop.f32.mrf.mxu3  ;;  %v2757_v29 = vpop.f32.mrf.mxu0 }
 0x349   : > { %v2395_v24 = vadd.f32 %v2241_v30, %v1877_v2  ;;  %v2912_v13 = vadd.f32 %v2757_v29, %v2394_v18  ;;  %v3275_v58 = vpop.f32.mrf.mxu1  ;;  %v1973_v2 = vld [vmem:[%s17700_s4 + $0x172] sm:$0xff] }
 0x34a   : > { %v3007_v30 = vld [vmem:[%s17700_s4 + $0x174] sm:$0xff] }
 0x34b   : > { %v13492_v4 = vadd.f32 %v3275_v58, %v2912_v13  ;;  %10703 = vmatmul.msk.bf16.gmra.mxu2 %vm761_vm2, %v1508_v20  ;;  %10782 = vmatmul.msk.bf16.gmra.mxu0 %vm761_vm2, %v2026_v37  ;;  %v3008_v20 = vld [vmem:[%s17700_s4 + $0x17c] sm:$0xff] }
 0x34c   : > { %10822 = vmatmul.msk.bf16.gmra.mxu1 %vm761_vm2, %v3061_v41 }
 0x34d   : > { %10743 = vmatmul.msk.bf16.gmra.mxu3 %vm761_vm2, %v2026_v37 }
 0x34e   : > { %v1726_v38 = vpop.f32.mrf.mxu2 }
 0x34f   : > { %v1878_v32 = vadd.f32 %v1726_v38, %v12950_v1  ;;  %v1974_v1 = vld [vmem:[%s17700_s4 + $0x17a] sm:$0xff]  ;;  %v3062_v38 = vpack.c.bf16 %v3008_v20, %v3007_v30 }
 0x350   : > { %v2244_v3 = vpop.f32.mrf.mxu3  ;;  %v2759_v27 = vpop.f32.mrf.mxu0  ;;  %v2027_v13 = vpack.c.bf16 %v1974_v1, %v1973_v2  ;;  %v1457_v20 = vld [vmem:[%s17700_s4 + $0x181] sm:$0xff] }
 0x351   : > { %v2396_v42 = vadd.f32 %v2244_v3, %v1878_v32  ;;  %v2913_v6 = vadd.f32 %v2759_v27, %v2395_v24  ;;  %v3277_v26 = vpop.f32.mrf.mxu1  ;;  %v1509_v24 = vpack.c.bf16 %v1456_v62, %v1455_v7 }
 0x353   : > { %v13499_v18 = vadd.f32 %v3277_v26, %v2913_v6 }
 0x356   : > { %v1728_v37 = vpop.f32.mrf.mxu2 }
 0x357   : > { %v1879_v29 = vadd.f32 %v1728_v37, %v12958_v40  ;;  %v1458_v37 = vld [vmem:[%s17700_s4 + $0x189] sm:$0xff] }
 0x358   : > { %v2246_v41 = vpop.f32.mrf.mxu3  ;;  %v2762_v58 = vpop.f32.mrf.mxu0 }
 0x359   : > { %v2397_v32 = vadd.f32 %v2246_v41, %v1879_v29  ;;  %v2914_v3 = vadd.f32 %v2762_v58, %v2396_v42  ;;  %v3280_v27 = vpop.f32.mrf.mxu1  ;;  %v1975_v29 = vld [vmem:[%s17700_s4 + $0x182] sm:$0xff] }
 0x35a   : > { %v3009_v41 = vld [vmem:[%s17700_s4 + $0x184] sm:$0xff] }
 0x35b   : > { %v13520_v6 = vadd.f32 %v3280_v27, %v2914_v3  ;;  %10704 = vmatmul.msk.bf16.gmra.mxu2 %vm761_vm2, %v1509_v24  ;;  %10783 = vmatmul.msk.bf16.gmra.mxu0 %vm761_vm2, %v2027_v13  ;;  %v3010_v24 = vld [vmem:[%s17700_s4 + $0x18c] sm:$0xff] }
 0x35c   : > { %10823 = vmatmul.msk.bf16.gmra.mxu1 %vm761_vm2, %v3062_v38 }
 0x35d   : > { %10744 = vmatmul.msk.bf16.gmra.mxu3 %vm761_vm2, %v2027_v13 }
 0x35e   : > { %v1731_v26 = vpop.f32.mrf.mxu2 }
 0x35f   : > { %v1880_v40 = vadd.f32 %v1731_v26, %v12980_v59  ;;  %v1976_v59 = vld [vmem:[%s17700_s4 + $0x18a] sm:$0xff]  ;;  %v3063_v26 = vpack.c.bf16 %v3010_v24, %v3009_v41 }
 0x360   : > { %v2249_v7 = vpop.f32.mrf.mxu3  ;;  %v2764_v62 = vpop.f32.mrf.mxu0  ;;  %v2028_v3 = vpack.c.bf16 %v1976_v59, %v1975_v29  ;;  %v1459_v24 = vld [vmem:[%s17700_s4 + $0x191] sm:$0xff] }
 0x361   : > { %v2398_v2 = vadd.f32 %v2249_v7, %v1880_v40  ;;  %v2915_v1 = vadd.f32 %v2764_v62, %v2397_v32  ;;  %v3282_v30 = vpop.f32.mrf.mxu1  ;;  %v1510_v32 = vpack.c.bf16 %v1458_v37, %v1457_v20 }
 0x363   : > { %v13527_v42 = vadd.f32 %v3282_v30, %v2915_v1 }
 0x366   : > { %v1733_v13 = vpop.f32.mrf.mxu2 }
 0x367   : > { %v1881_v58 = vadd.f32 %v1733_v13, %v12988_v44  ;;  %v1460_v13 = vld [vmem:[%s17700_s4 + $0x199] sm:$0xff] }
 0x368   : > { %v2251_v38 = vpop.f32.mrf.mxu3  ;;  %v2767_v27 = vpop.f32.mrf.mxu0 }
 0x369   : > { %v2399_v40 = vadd.f32 %v2251_v38, %v1881_v58  ;;  %v2916_v7 = vadd.f32 %v2767_v27, %v2398_v2  ;;  %v3285_v62 = vpop.f32.mrf.mxu1  ;;  %v1977_v58 = vld [vmem:[%s17700_s4 + $0x192] sm:$0xff] }
 0x36a   : > { %v3011_v38 = vld [vmem:[%s17700_s4 + $0x194] sm:$0xff] }
 0x36b   : > { %v13548_v1 = vadd.f32 %v3285_v62, %v2916_v7  ;;  %10705 = vmatmul.msk.bf16.gmra.mxu2 %vm761_vm2, %v1510_v32  ;;  %10784 = vmatmul.msk.bf16.gmra.mxu0 %vm761_vm2, %v2028_v3  ;;  %v3012_v32 = vld [vmem:[%s17700_s4 + $0x19c] sm:$0xff] }
 0x36c   : > { %10824 = vmatmul.msk.bf16.gmra.mxu1 %vm761_vm2, %v3063_v26 }
 0x36d   : > { %10745 = vmatmul.msk.bf16.gmra.mxu3 %vm761_vm2, %v2028_v3 }
 0x36e   : > { %v1736_v30 = vpop.f32.mrf.mxu2 }
 0x36f   : > { %v1882_v44 = vadd.f32 %v1736_v30, %v13010_v8  ;;  %v1978_v8 = vld [vmem:[%s17700_s4 + $0x19a] sm:$0xff]  ;;  %v3064_v30 = vpack.c.bf16 %v3012_v32, %v3011_v38 }
 0x370   : > { %v2254_v20 = vpop.f32.mrf.mxu3  ;;  %v2769_v37 = vpop.f32.mrf.mxu0  ;;  %v2029_v7 = vpack.c.bf16 %v1978_v8, %v1977_v58  ;;  %v1461_v32 = vld [vmem:[%s17700_s4 + $0x1a1] sm:$0xff] }
 0x371   : > { %v2400_v29 = vadd.f32 %v2254_v20, %v1882_v44  ;;  %v2917_v59 = vadd.f32 %v2769_v37, %v2399_v40  ;;  %v3287_v41 = vpop.f32.mrf.mxu1  ;;  %v1511_v40 = vpack.c.bf16 %v1460_v13, %v1459_v24 }
 0x373   : > { %v13555_v2 = vadd.f32 %v3287_v41, %v2917_v59 }
 0x376   : > { %v1738_v3 = vpop.f32.mrf.mxu2 }
 0x377   : > { %v1883_v27 = vadd.f32 %v1738_v3, %v13018_v49  ;;  %v1462_v3 = vld [vmem:[%s17700_s4 + $0x1a9] sm:$0xff] }
 0x378   : > { %v2256_v26 = vpop.f32.mrf.mxu3  ;;  %v2772_v62 = vpop.f32.mrf.mxu0 }
 0x379   : > { %v2401_v44 = vadd.f32 %v2256_v26, %v1883_v27  ;;  %v2918_v20 = vadd.f32 %v2772_v62, %v2400_v29  ;;  %v3290_v37 = vpop.f32.mrf.mxu1  ;;  %v1979_v27 = vld [vmem:[%s17700_s4 + $0x1a2] sm:$0xff] }
 0x37a   : > { %v3013_v26 = vld [vmem:[%s17700_s4 + $0x1a4] sm:$0xff] }
 0x37b   : > { %v13576_v59 = vadd.f32 %v3290_v37, %v2918_v20  ;;  %10706 = vmatmul.msk.bf16.gmra.mxu2 %vm761_vm2, %v1511_v40  ;;  %10785 = vmatmul.msk.bf16.gmra.mxu0 %vm761_vm2, %v2029_v7  ;;  %v3014_v40 = vld [vmem:[%s17700_s4 + $0x1ac] sm:$0xff] }
 0x37c   : > { %10825 = vmatmul.msk.bf16.gmra.mxu1 %vm761_vm2, %v3064_v30 }
 0x37d   : > { %10746 = vmatmul.msk.bf16.gmra.mxu3 %vm761_vm2, %v2029_v7 }
 0x37e   : > { %v1741_v41 = vpop.f32.mrf.mxu2 }
 0x37f   : > { %v1884_v49 = vadd.f32 %v1741_v41, %v13040_v33  ;;  %v1980_v33 = vld [vmem:[%s17700_s4 + $0x1aa] sm:$0xff]  ;;  %v3065_v41 = vpack.c.bf16 %v3014_v40, %v3013_v26 }
 0x380   : > { %v2259_v24 = vpop.f32.mrf.mxu3  ;;  %v2774_v13 = vpop.f32.mrf.mxu0  ;;  %v2030_v20 = vpack.c.bf16 %v1980_v33, %v1979_v27  ;;  %v1463_v40 = vld [vmem:[%s17700_s4 + $0x1b1] sm:$0xff] }
 0x381   : > { %v2402_v58 = vadd.f32 %v2259_v24, %v1884_v49  ;;  %v2919_v8 = vadd.f32 %v2774_v13, %v2401_v44  ;;  %v3292_v38 = vpop.f32.mrf.mxu1  ;;  %v1512_v44 = vpack.c.bf16 %v1462_v3, %v1461_v32 }
 0x383   : > { %v13583_v29 = vadd.f32 %v3292_v38, %v2919_v8 }
 0x386   : > { %v1743_v7 = vpop.f32.mrf.mxu2 }
 0x387   : > { %v1885_v62 = vadd.f32 %v1743_v7, %v13048_v53  ;;  %v449_v7 = vld [vmem:[%s17699_s3] sm:$0xff] }
 0x388   : > { %v2261_v30 = vpop.f32.mrf.mxu3  ;;  %v2777_v37 = vpop.f32.mrf.mxu0 }
 0x389   : > { %v2403_v49 = vadd.f32 %v2261_v30, %v1885_v62  ;;  %v2920_v24 = vadd.f32 %v2777_v37, %v2402_v58  ;;  %v3295_v13 = vpop.f32.mrf.mxu1  ;;  %v1464_v62 = vld [vmem:[%s17700_s4 + $0x1b9] sm:$0xff] }
 0x38a   : > { %v1982_v30 = vld [vmem:[%s17700_s4 + $0x1ba] sm:$0xff] }
 0x38b   : > { %v13604_v8 = vadd.f32 %v3295_v13, %v2920_v24  ;;  %10707 = vmatmul.msk.bf16.gmra.mxu2 %vm761_vm2, %v1512_v44  ;;  %10786 = vmatmul.msk.bf16.gmra.mxu0 %vm761_vm2, %v2030_v20  ;;  %v11431_v44 = vmov 0   ;;  %v3016_v37 = vld [vmem:[%s17700_s4 + $0x1bc] sm:$0xff]  ;;  %v1513_v13 = vpack.c.bf16 %v1464_v62, %v1463_v40 }
 0x38c   : > { %10826 = vmatmul.msk.bf16.gmra.mxu1 %vm761_vm2, %v3065_v41  ;;  %11336 = vset.pattern.permute.xlu0 %v11431_v44 }
 0x38d   : > { %10747 = vmatmul.msk.bf16.gmra.mxu3 %vm761_vm2, %v2030_v20  ;;  %11337 = vset.pattern.permute.xlu1 %v11431_v44  ;;  %v3015_v20 = vld [vmem:[%s17700_s4 + $0x1b4] sm:$0xff] }
 0x38e   : > { %v1746_v38 = vpop.f32.mrf.mxu2  ;;  %5195 = vperm.xlu0 %11336, %v449_v7   ;;  %11338 = vset.pattern.permute.xlu2 %v11431_v44 }
 0x38f   : > { %v1886_v53 = vadd.f32 %v1746_v38, %v13070_v57  ;;  %v1981_v57 = vld [vmem:[%s17700_s4 + $0x1b2] sm:$0xff] }
 0x390   : > { %v2264_v32 = vpop.f32.mrf.mxu3  ;;  %v2779_v3 = vpop.f32.mrf.mxu0  ;;  %v2031_v38 = vpack.c.bf16 %v1982_v30, %v1981_v57 }
 0x391   : > { %v2404_v27 = vadd.f32 %v2264_v32, %v1886_v53  ;;  %v2921_v33 = vadd.f32 %v2779_v3, %v2403_v49  ;;  %v3297_v26 = vpop.f32.mrf.mxu1  ;;  %v3066_v32 = vpack.c.bf16 %v3016_v37, %v3015_v20  ;;  %v1465_v37 = vld [vmem:[%s17700_s4 + $0x1c1] sm:$0xff] }
 0x393   : > { %v13611_v58 = vadd.f32 %v3297_v26, %v2921_v33 }
 0x395   : > { %17809 = vst [vmem:[#allocation34_spill] sm:$0xff] %v13611_v58 }
 0x396   : > { %v1748_v41 = vpop.f32.mrf.mxu2 }
 0x397   : > { %v1887_v49 = vadd.f32 %v1748_v41, %v13078_v0  ;;  %v450_v0 = vld [vmem:[%s17699_s3 + $0x8] sm:$0xff]  ;;  %v451_v41 = vld [vmem:[%s17699_s3 + $0x10] sm:$0xff] }
 0x398   : > { %v2266_v24 = vpop.f32.mrf.mxu3  ;;  %v2782_v53 = vpop.f32.mrf.mxu0  ;;  %5200 = vperm.xlu0 %11336, %v450_v0   ;;  %5205 = vperm.xlu1 %11337, %v451_v41  }
 0x399   : > { %v2405_v3 = vadd.f32 %v2266_v24, %v1887_v49  ;;  %v2922_v33 = vadd.f32 %v2782_v53, %v2404_v27  ;;  %v3300_v26 = vpop.f32.mrf.mxu1  ;;  %v455_v49 = vld [vmem:[%s17699_s3 + $0x30] sm:$0xff]  ;;  %v1983_v24 = vld [vmem:[%s17700_s4 + $0x1c2] sm:$0xff] }
 0x39a   : > { %v3018_v53 = vld [vmem:[%s17700_s4 + $0x1cc] sm:$0xff] }
 0x39b   : > { %v13635_v58 = vadd.f32 %v3300_v26, %v2922_v33  ;;  %10708 = vmatmul.msk.bf16.gmra.mxu2 %vm761_vm2, %v1513_v13  ;;  %10787 = vmatmul.msk.bf16.gmra.mxu0 %vm761_vm2, %v2031_v38  ;;  %v1984_v13 = vld [vmem:[%s17700_s4 + $0x1ca] sm:$0xff] }
 0x39c   : > { %10827 = vmatmul.msk.bf16.gmra.mxu1 %vm761_vm2, %v3066_v32  ;;  %v2032_v0 = vpack.c.bf16 %v1984_v13, %v1983_v24 }
 0x39d   : > { %10748 = vmatmul.msk.bf16.gmra.mxu3 %vm761_vm2, %v2031_v38  ;;  %v3017_v38 = vld [vmem:[%s17700_s4 + $0x1c4] sm:$0xff] }
 0x39e   : > { %v1751_v40 = vpop.f32.mrf.mxu2 }
 0x39f   : > { %v1888_v7 = vadd.f32 %v1751_v40, %v13098_v25  ;;  %v1466_v25 = vld [vmem:[%s17700_s4 + $0x1c9] sm:$0xff] }
 0x3a0   : > { %v2269_v27 = vpop.f32.mrf.mxu3  ;;  %v2784_v62 = vpop.f32.mrf.mxu0  ;;  %5225 = vperm.xlu0 %11336, %v455_v49   ;;  %v1514_v26 = vpack.c.bf16 %v1466_v25, %v1465_v37  ;;  %v458_v37 = vld [vmem:[%s17699_s3 + $0x48] sm:$0xff] }
 0x3a1   : > { %v2406_v57 = vadd.f32 %v2269_v27, %v1888_v7  ;;  %v2923_v30 = vadd.f32 %v2784_v62, %v2405_v3  ;;  %v3302_v44 = vpop.f32.mrf.mxu1  ;;  %v3067_v7 = vpack.c.bf16 %v3018_v53, %v3017_v38 }
 0x3a3   : > { %v13645_v20 = vadd.f32 %v3302_v44, %v2923_v30 }
 0x3a6   : > { %v1753_v32 = vpop.f32.mrf.mxu2 }
 0x3a7   : > { %v1889_v3 = vadd.f32 %v1753_v32, %v13107_v21  ;;  %v452_v21 = vld [vmem:[%s17699_s3 + $0x18] sm:$0xff] }
 0x3a8   : > { %v2271_v33 = vpop.f32.mrf.mxu3  ;;  %v2787_v40 = vpop.f32.mrf.mxu0  ;;  %5210 = vperm.xlu1 %11337, %v452_v21   ;;  %5240 = vperm.xlu0 %11336, %v458_v37   ;;  %v1467_v32 = vld [vmem:[%s17700_s4 + $0x1d1] sm:$0xff] }
 0x3a9   : > { %v2407_v27 = vadd.f32 %v2271_v33, %v1889_v3  ;;  %v2924_v62 = vadd.f32 %v2787_v40, %v2406_v57  ;;  %v3305_v30 = vpop.f32.mrf.mxu1  ;;  %v456_v3 = vld [vmem:[%s17699_s3 + $0x38] sm:$0xff]  ;;  %v461_v33 = vld [vmem:[%s17699_s3 + $0x60] sm:$0xff] }
 0x3aa   : > { %v3019_v40 = vld [vmem:[%s17700_s4 + $0x1d4] sm:$0xff] }
 0x3ab   : > { %v13672_v44 = vadd.f32 %v3305_v30, %v2924_v62  ;;  %10709 = vmatmul.msk.bf16.gmra.mxu2 %vm761_vm2, %v1514_v26  ;;  %10788 = vmatmul.msk.bf16.gmra.mxu0 %vm761_vm2, %v2032_v0  ;;  %v1985_v26 = vld [vmem:[%s17700_s4 + $0x1d2] sm:$0xff] }
 0x3ac   : > { %10828 = vmatmul.msk.bf16.gmra.mxu1 %vm761_vm2, %v3067_v7  ;;  %v3020_v7 = vld [vmem:[%s17700_s4 + $0x1dc] sm:$0xff] }
 0x3ad   : > { %10749 = vmatmul.msk.bf16.gmra.mxu3 %vm761_vm2, %v2032_v0  ;;  %v1986_v0 = vld [vmem:[%s17700_s4 + $0x1da] sm:$0xff] }
 0x3ae   : > { %v1756_v57 = vpop.f32.mrf.mxu2  ;;  %v2033_v37 = vpack.c.bf16 %v1986_v0, %v1985_v26 }
 0x3af   : > { %v1890_v41 = vadd.f32 %v1756_v57, %v12470_v15  ;;  %v1468_v15 = vld [vmem:[%s17700_s4 + $0x1d9] sm:$0xff] }
 0x3b0   : > { %v2274_v49 = vpop.f32.mrf.mxu3  ;;  %v2789_v25 = vpop.f32.mrf.mxu0  ;;  %5230 = vperm.xlu1 %11337, %v456_v3   ;;  %5255 = vperm.xlu0 %11336, %v461_v33   ;;  %v1515_v21 = vpack.c.bf16 %v1468_v15, %v1467_v32  ;;  %v464_v32 = vld [vmem:[%s17699_s3 + $0x78] sm:$0xff] }
 0x3b1   : > { %v2408_v24 = vadd.f32 %v2274_v49, %v1890_v41  ;;  %v2925_v13 = vadd.f32 %v2789_v25, %v2407_v27  ;;  %v3307_v38 = vpop.f32.mrf.mxu1  ;;  %v3068_v41 = vpack.c.bf16 %v3020_v7, %v3019_v40 }
 0x3b3   : > { %v13685_v53 = vadd.f32 %v3307_v38, %v2925_v13 }
 0x3b6   : > { %v1758_v27 = vpop.f32.mrf.mxu2 }
 0x3b7   : > { %v1891_v62 = vadd.f32 %v1758_v27, %v12498_v31  ;;  %v459_v31 = vld [vmem:[%s17699_s3 + $0x50] sm:$0xff]  ;;  %v1469_v27 = vld [vmem:[%s17700_s4 + $0x1e1] sm:$0xff] }
 0x3b8   : > { %v2276_v30 = vpop.f32.mrf.mxu3  ;;  %v2792_v57 = vpop.f32.mrf.mxu0  ;;  %5245 = vperm.xlu1 %11337, %v459_v31   ;;  %5270 = vperm.xlu0 %11336, %v464_v32  }
 0x3b9   : > { %v2409_v49 = vadd.f32 %v2276_v30, %v1891_v62  ;;  %v2926_v25 = vadd.f32 %v2792_v57, %v2408_v24  ;;  %v3310_v13 = vpop.f32.mrf.mxu1  ;;  %v462_v62 = vld [vmem:[%s17699_s3 + $0x68] sm:$0xff]  ;;  %v467_v30 = vld [vmem:[%s17699_s3 + $0x90] sm:$0xff] }
 0x3ba   : > { %v3021_v57 = vld [vmem:[%s17700_s4 + $0x1e4] sm:$0xff] }
 0x3bb   : > { %v13712_v38 = vadd.f32 %v3310_v13, %v2926_v25  ;;  %10710 = vmatmul.msk.bf16.gmra.mxu2 %vm761_vm2, %v1515_v21  ;;  %10789 = vmatmul.msk.bf16.gmra.mxu0 %vm761_vm2, %v2033_v37  ;;  %v1987_v21 = vld [vmem:[%s17700_s4 + $0x1e2] sm:$0xff] }
 0x3bc   : > { %10829 = vmatmul.msk.bf16.gmra.mxu1 %vm761_vm2, %v3068_v41  ;;  %v3022_v41 = vld [vmem:[%s17700_s4 + $0x1ec] sm:$0xff] }
 0x3bd   : > { %10750 = vmatmul.msk.bf16.gmra.mxu3 %vm761_vm2, %v2033_v37  ;;  %v1988_v37 = vld [vmem:[%s17700_s4 + $0x1ea] sm:$0xff] }
 0x3be   : > { %v1761_v24 = vpop.f32.mrf.mxu2  ;;  %v2034_v32 = vpack.c.bf16 %v1988_v37, %v1987_v21 }
 0x3bf   : > { %v1892_v3 = vadd.f32 %v1761_v24, %v12506_v39  ;;  %v1470_v39 = vld [vmem:[%s17700_s4 + $0x1e9] sm:$0xff] }
 0x3c0   : > { %v2279_v33 = vpop.f32.mrf.mxu3  ;;  %v2794_v15 = vpop.f32.mrf.mxu0  ;;  %5260 = vperm.xlu1 %11337, %v462_v62   ;;  %5285 = vperm.xlu0 %11336, %v467_v30   ;;  %v1516_v31 = vpack.c.bf16 %v1470_v39, %v1469_v27  ;;  %v470_v27 = vld [vmem:[%s17699_s3 + $0xa8] sm:$0xff] }
 0x3c1   : > { %v2410_v26 = vadd.f32 %v2279_v33, %v1892_v3  ;;  %v2927_v0 = vadd.f32 %v2794_v15, %v2409_v49  ;;  %v3312_v40 = vpop.f32.mrf.mxu1  ;;  %v3069_v3 = vpack.c.bf16 %v3022_v41, %v3021_v57  ;;  %v1471_v41 = vld [vmem:[%s17700_s4 + $0x1f1] sm:$0xff] }
 0x3c3   : > { %v13725_v7 = vadd.f32 %v3312_v40, %v2927_v0 }
 0x3c6   : > { %v1763_v49 = vpop.f32.mrf.mxu2 }
 0x3c7   : > { %v1893_v25 = vadd.f32 %v1763_v49, %v12534_v55  ;;  %v465_v55 = vld [vmem:[%s17699_s3 + $0x80] sm:$0xff] }
 0x3c8   : > { %v2281_v13 = vpop.f32.mrf.mxu3  ;;  %v2797_v24 = vpop.f32.mrf.mxu0  ;;  %5275 = vperm.xlu1 %11337, %v465_v55   ;;  %5300 = vperm.xlu0 %11336, %v470_v27  }
 0x3c9   : > { %v2411_v33 = vadd.f32 %v2281_v13, %v1893_v25  ;;  %v2928_v15 = vadd.f32 %v2797_v24, %v2410_v26  ;;  %v3315_v0 = vpop.f32.mrf.mxu1  ;;  %v453_v25 = vld [vmem:[%s17699_s3 + $0x20] sm:$0xff]  ;;  %v468_v13 = vld [vmem:[%s17699_s3 + $0x98] sm:$0xff] }
 0x3ca   : > { %v1990_v24 = vld [vmem:[%s17700_s4 + $0x1fa] sm:$0xff]  ;;  %5215 = vperm.xlu2 %11338, %v453_v25  }
 0x3cb   : > { %v13752_v40 = vadd.f32 %v3315_v0, %v2928_v15  ;;  %10711 = vmatmul.msk.bf16.gmra.mxu2 %vm761_vm2, %v1516_v31  ;;  %10790 = vmatmul.msk.bf16.gmra.mxu0 %vm761_vm2, %v2034_v32  ;;  %v1472_v31 = vld [vmem:[%s17700_s4 + $0x1f9] sm:$0xff] }
 0x3cc   : > { %10830 = vmatmul.msk.bf16.gmra.mxu1 %vm761_vm2, %v3069_v3  ;;  %v3023_v3 = vld [vmem:[%s17700_s4 + $0x1f4] sm:$0xff]  ;;  %v1517_v27 = vpack.c.bf16 %v1472_v31, %v1471_v41 }
 0x3cd   : > { %17810 = vst [vmem:[#allocation35_spill] sm:$0xff] %v13752_v40  ;;  %10751 = vmatmul.msk.bf16.gmra.mxu3 %vm761_vm2, %v2034_v32  ;;  %v1989_v32 = vld [vmem:[%s17700_s4 + $0x1f2] sm:$0xff] }
 0x3ce   : > { %v1766_v26 = vpop.f32.mrf.mxu2  ;;  %v471_v41 = vld [vmem:[%s17699_s3 + $0xb0] sm:$0xff] }
 0x3cf   : > { %v1894_v62 = vadd.f32 %v1766_v26, %v12542_v63  ;;  %v473_v63 = vld [vmem:[%s17699_s3 + $0xc0] sm:$0xff]  ;;  %v2035_v26 = vpack.c.bf16 %v1990_v24, %v1989_v32 }
 0x3d0   : > { %v2284_v30 = vpop.f32.mrf.mxu3  ;;  %v2799_v39 = vpop.f32.mrf.mxu0  ;;  %5290 = vperm.xlu1 %11337, %v468_v13   ;;  %5315 = vperm.xlu0 %11336, %v473_v63   ;;  %v17813_v63 = vld [vmem:[#allocation3_spill] sm:$0xff] }
 0x3d1   : > { %v2412_v21 = vadd.f32 %v2284_v30, %v1894_v62  ;;  %v2929_v37 = vadd.f32 %v2799_v39, %v2411_v33  ;;  %v3317_v57 = vpop.f32.mrf.mxu1  ;;  %v3024_v33 = vld [vmem:[%s17700_s4 + $0x1fc] sm:$0xff] }
 0x3d2   : > { %v3070_v30 = vpack.c.bf16 %v3024_v33, %v3023_v3 }
 0x3d3   : > { %v13768_v49 = vadd.f32 %v3317_v57, %v2929_v37 }
 0x3d5   : > { %17811 = vst [vmem:[#allocation36_spill] sm:$0xff] %v13768_v49 }
 0x3d6   : > { %v1768_v15 = vpop.f32.mrf.mxu2 }
 0x3d7   : > { %v1895_v0 = vadd.f32 %v1768_v15, %v12570_v17  ;;  %v454_v17 = vld [vmem:[%s17699_s3 + $0x28] sm:$0xff] }
 0x3d8   : > { %v2286_v55 = vpop.f32.mrf.mxu3  ;;  %v2802_v62 = vpop.f32.mrf.mxu0  ;;  %5220 = vperm.xlu2 %11338, %v454_v17   ;;  %5305 = vperm.xlu1 %11337, %v471_v41   ;;  %v3026_v17 = vld [vmem:[%s17700_s4 + $0x20c] sm:$0xff] }
 0x3d9   : > { %v2413_v39 = vadd.f32 %v2286_v55, %v1895_v0  ;;  %v2930_v37 = vadd.f32 %v2802_v62, %v2412_v21  ;;  %v3320_v57 = vpop.f32.mrf.mxu1  ;;  %v476_v21 = vld [vmem:[%s17699_s3 + $0xd8] sm:$0xff]  ;;  %v1473_v0 = vld [vmem:[%s17700_s4 + $0x201] sm:$0xff]  ;;  %v479_v62 = vld [vmem:[%s17699_s3 + $0xf0] sm:$0xff] }
 0x3da   : > { %5330 = vperm.xlu0 %11336, %v476_v21   ;;  %v17815_v21 = vld [vmem:[#allocation4_spill] sm:$0xff] }
 0x3db   : > { %v13795_v25 = vadd.f32 %v3320_v57, %v2930_v37  ;;  %10712 = vmatmul.msk.bf16.gmra.mxu2 %vm761_vm2, %v1517_v27  ;;  %10791 = vmatmul.msk.bf16.gmra.mxu0 %vm761_vm2, %v2035_v26  ;;  %v457_v27 = vld [vmem:[%s17699_s3 + $0x40] sm:$0xff]  ;;  %v1992_v37 = vld [vmem:[%s17700_s4 + $0x20a] sm:$0xff] }
 0x3dc   : > { %10831 = vmatmul.msk.bf16.gmra.mxu1 %vm761_vm2, %v3070_v30  ;;  %v1474_v30 = vld [vmem:[%s17700_s4 + $0x209] sm:$0xff] }
 0x3dd   : > { %17812 = vst [vmem:[#allocation37_spill] sm:$0xff] %v13795_v25  ;;  %10752 = vmatmul.msk.bf16.gmra.mxu3 %vm761_vm2, %v2035_v26  ;;  %v474_v26 = vld [vmem:[%s17699_s3 + $0xc8] sm:$0xff] }
 0x3de   : > { %v1771_v13 = vpop.f32.mrf.mxu2  ;;  %v3025_v57 = vld [vmem:[%s17700_s4 + $0x204] sm:$0xff] }
 0x3df   : > { %v1896_v31 = vadd.f32 %v1771_v13, %v17813_v63 }
 0x3e0   : > { %v2289_v32 = vpop.f32.mrf.mxu3  ;;  %v2804_v24 = vpop.f32.mrf.mxu0  ;;  %5235 = vperm.xlu2 %11338, %v457_v27   ;;  %5320 = vperm.xlu1 %11337, %v474_v26   ;;  %v477_v27 = vld [vmem:[%s17699_s3 + $0xe0] sm:$0xff] }
 0x3e1   : > { %v2414_v3 = vadd.f32 %v2289_v32, %v1896_v31  ;;  %v2931_v33 = vadd.f32 %v2804_v24, %v2413_v39  ;;  %v3322_v15 = vpop.f32.mrf.mxu1  ;;  %v1991_v39 = vld [vmem:[%s17700_s4 + $0x202] sm:$0xff]  ;;  %v1518_v31 = vpack.c.bf16 %v1474_v30, %v1473_v0  ;;  %v460_v0 = vld [vmem:[%s17699_s3 + $0x58] sm:$0xff] }
 0x3e2   : > { %5345 = vperm.xlu0 %11336, %v479_v62   ;;  %v2036_v32 = vpack.c.bf16 %v1992_v37, %v1991_v39 }
 0x3e3   : > { %v13814_v55 = vadd.f32 %v3322_v15, %v2931_v33  ;;  %v3071_v33 = vpack.c.bf16 %v3026_v17, %v3025_v57  ;;  %v1475_v17 = vld [vmem:[%s17700_s4 + $0x211] sm:$0xff] }
 0x3e5   : > { %17814 = vst [vmem:[#allocation3_spill] sm:$0xff] %v13814_v55 }
 0x3e6   : > { %v1773_v41 = vpop.f32.mrf.mxu2 }
 0x3e7   : > { %v1897_v13 = vadd.f32 %v1773_v41, %v17815_v21  ;;  %v463_v21 = vld [vmem:[%s17699_s3 + $0x70] sm:$0xff] }
 0x3e8   : > { %v2291_v63 = vpop.f32.mrf.mxu3  ;;  %v2807_v24 = vpop.f32.mrf.mxu0  ;;  %5250 = vperm.xlu2 %11338, %v460_v0   ;;  %5335 = vperm.xlu1 %11337, %v477_v27   ;;  %v17819_v27 = vld [vmem:[#allocation6_spill] sm:$0xff] }
 0x3e9   : > { %v2415_v15 = vadd.f32 %v2291_v63, %v1897_v13  ;;  %v2932_v55 = vadd.f32 %v2807_v24, %v2414_v3  ;;  %v3325_v25 = vpop.f32.mrf.mxu1  ;;  %v480_v13 = vld [vmem:[%s17699_s3 + $0xf8] sm:$0xff]  ;;  %v485_v63 = vld [vmem:[%s17699_s3 + $0x120] sm:$0xff] }
 0x3ea   : > { %v1994_v24 = vld [vmem:[%s17700_s4 + $0x21a] sm:$0xff] }
 0x3eb   : > { %v13841_v49 = vadd.f32 %v3325_v25, %v2932_v55  ;;  %10713 = vmatmul.msk.bf16.gmra.mxu2 %vm761_vm2, %v1518_v31  ;;  %10792 = vmatmul.msk.bf16.gmra.mxu0 %vm761_vm2, %v2036_v32  ;;  %v482_v25 = vld [vmem:[%s17699_s3 + $0x108] sm:$0xff]  ;;  %v17817_v55 = vld [vmem:[#allocation5_spill] sm:$0xff] }
 0x3ec   : > { %10832 = vmatmul.msk.bf16.gmra.mxu1 %vm761_vm2, %v3071_v33  ;;  %5360 = vperm.xlu0 %11336, %v482_v25   ;;  %v1476_v31 = vld [vmem:[%s17700_s4 + $0x219] sm:$0xff] }
 0x3ed   : > { %17816 = vst [vmem:[#allocation4_spill] sm:$0xff] %v13841_v49  ;;  %10753 = vmatmul.msk.bf16.gmra.mxu3 %vm761_vm2, %v2036_v32  ;;  %v1993_v32 = vld [vmem:[%s17700_s4 + $0x212] sm:$0xff] }
 0x3ee   : > { %v1776_v3 = vpop.f32.mrf.mxu2  ;;  %v3027_v33 = vld [vmem:[%s17700_s4 + $0x214] sm:$0xff] }
 0x3ef   : > { %v1898_v26 = vadd.f32 %v1776_v3, %v17817_v55  ;;  %v1519_v55 = vpack.c.bf16 %v1476_v31, %v1475_v17  ;;  %v466_v17 = vld [vmem:[%s17699_s3 + $0x88] sm:$0xff] }
 0x3f0   : > { %v2294_v62 = vpop.f32.mrf.mxu3  ;;  %v2809_v30 = vpop.f32.mrf.mxu0  ;;  %5265 = vperm.xlu2 %11338, %v463_v21   ;;  %5350 = vperm.xlu1 %11337, %v480_v13   ;;  %v483_v21 = vld [vmem:[%s17699_s3 + $0x110] sm:$0xff]  ;;  %v17821_v13 = vld [vmem:[#allocation7_spill] sm:$0xff] }
 0x3f1   : > { %v2416_v39 = vadd.f32 %v2294_v62, %v1898_v26  ;;  %v2933_v37 = vadd.f32 %v2809_v30, %v2415_v15  ;;  %v3327_v57 = vpop.f32.mrf.mxu1  ;;  %v3028_v15 = vld [vmem:[%s17700_s4 + $0x21c] sm:$0xff]  ;;  %v2037_v26 = vpack.c.bf16 %v1994_v24, %v1993_v32 }
 0x3f2   : > { %v3072_v30 = vpack.c.bf16 %v3028_v15, %v3027_v33 }
 0x3f3   : > { %v13860_v41 = vadd.f32 %v3327_v57, %v2933_v37 }
 0x3f4   : > { %5375 = vperm.xlu0 %11336, %v485_v63  }
 0x3f5   : > { %17818 = vst [vmem:[#allocation5_spill] sm:$0xff] %v13860_v41 }
 0x3f6   : > { %v1778_v0 = vpop.f32.mrf.mxu2 }
 0x3f7   : > { %v1899_v25 = vadd.f32 %v1778_v0, %v17819_v27  ;;  %v1477_v0 = vld [vmem:[%s17700_s4 + $0x221] sm:$0xff] }
 0x3f8   : > { %v2296_v3 = vpop.f32.mrf.mxu3  ;;  %v2812_v62 = vpop.f32.mrf.mxu0  ;;  %5280 = vperm.xlu2 %11338, %v466_v17   ;;  %5365 = vperm.xlu1 %11337, %v483_v21   ;;  %v17823_v21 = vld [vmem:[#allocation8_spill] sm:$0xff] }
 0x3f9   : > { %v2417_v37 = vadd.f32 %v2296_v3, %v1899_v25  ;;  %v2934_v57 = vadd.f32 %v2812_v62, %v2416_v39  ;;  %v3330_v41 = vpop.f32.mrf.mxu1  ;;  %v488_v39 = vld [vmem:[%s17699_s3 + $0x138] sm:$0xff]  ;;  %v469_v25 = vld [vmem:[%s17699_s3 + $0xa0] sm:$0xff]  ;;  %v486_v3 = vld [vmem:[%s17699_s3 + $0x128] sm:$0xff] }
 0x3fa   : > { %v1995_v62 = vld [vmem:[%s17700_s4 + $0x222] sm:$0xff] }
 0x3fb   : > { %v13887_v49 = vadd.f32 %v3330_v41, %v2934_v57  ;;  %10714 = vmatmul.msk.bf16.gmra.mxu2 %vm761_vm2, %v1519_v55  ;;  %10793 = vmatmul.msk.bf16.gmra.mxu0 %vm761_vm2, %v2037_v26  ;;  %v491_v55 = vld [vmem:[%s17699_s3 + $0x150] sm:$0xff] }
 0x3fc   : > { %10833 = vmatmul.msk.bf16.gmra.mxu1 %vm761_vm2, %v3072_v30  ;;  %5390 = vperm.xlu0 %11336, %v488_v39   ;;  %v1996_v30 = vld [vmem:[%s17700_s4 + $0x22a] sm:$0xff] }
 0x3fd   : > { %17820 = vst [vmem:[#allocation6_spill] sm:$0xff] %v13887_v49  ;;  %10754 = vmatmul.msk.bf16.gmra.mxu3 %vm761_vm2, %v2037_v26  ;;  %v1478_v26 = vld [vmem:[%s17700_s4 + $0x229] sm:$0xff] }
 0x3fe   : > { %v1781_v41 = vpop.f32.mrf.mxu2  ;;  %v3030_v57 = vld [vmem:[%s17700_s4 + $0x22c] sm:$0xff] }
 0x3ff   : > { %v1900_v63 = vadd.f32 %v1781_v41, %v17821_v13  ;;  %v1520_v13 = vpack.c.bf16 %v1478_v26, %v1477_v0  ;;  %v472_v0 = vld [vmem:[%s17699_s3 + $0xb8] sm:$0xff] }
 0x400   : > { %v2299_v31 = vpop.f32.mrf.mxu3  ;;  %v2814_v32 = vpop.f32.mrf.mxu0  ;;  %5295 = vperm.xlu2 %11338, %v469_v25   ;;  %5380 = vperm.xlu1 %11337, %v486_v3   ;;  %v489_v25 = vld [vmem:[%s17699_s3 + $0x140] sm:$0xff]  ;;  %v17825_v3 = vld [vmem:[#allocation9_spill] sm:$0xff] }
 0x401   : > { %v2418_v24 = vadd.f32 %v2299_v31, %v1900_v63  ;;  %v2935_v33 = vadd.f32 %v2814_v32, %v2417_v37  ;;  %v3332_v15 = vpop.f32.mrf.mxu1  ;;  %v3029_v37 = vld [vmem:[%s17700_s4 + $0x224] sm:$0xff]  ;;  %v2038_v63 = vpack.c.bf16 %v1996_v30, %v1995_v62 }
 0x402   : > { %v3073_v32 = vpack.c.bf16 %v3030_v57, %v3029_v37 }
 0x403   : > { %v13906_v27 = vadd.f32 %v3332_v15, %v2935_v33 }
 0x404   : > { %5405 = vperm.xlu0 %11336, %v491_v55  }
 0x405   : > { %17822 = vst [vmem:[#allocation7_spill] sm:$0xff] %v13906_v27 }
 0x406   : > { %v1783_v17 = vpop.f32.mrf.mxu2 }
 0x407   : > { %v1901_v39 = vadd.f32 %v1783_v17, %v17823_v21  ;;  %v1479_v17 = vld [vmem:[%s17700_s4 + $0x231] sm:$0xff] }
 0x408   : > { %v2301_v41 = vpop.f32.mrf.mxu3  ;;  %v2817_v31 = vpop.f32.mrf.mxu0  ;;  %5310 = vperm.xlu2 %11338, %v472_v0   ;;  %5395 = vperm.xlu1 %11337, %v489_v25   ;;  %v17827_v25 = vld [vmem:[#allocation10_spill] sm:$0xff] }
 0x409   : > { %v2419_v33 = vadd.f32 %v2301_v41, %v1901_v39  ;;  %v2936_v15 = vadd.f32 %v2817_v31, %v2418_v24  ;;  %v3335_v27 = vpop.f32.mrf.mxu1  ;;  %v494_v24 = vld [vmem:[%s17699_s3 + $0x168] sm:$0xff]  ;;  %v475_v39 = vld [vmem:[%s17699_s3 + $0xd0] sm:$0xff]  ;;  %v492_v41 = vld [vmem:[%s17699_s3 + $0x158] sm:$0xff] }
 0x40a   : > { %v1997_v31 = vld [vmem:[%s17700_s4 + $0x232] sm:$0xff] }
 0x40b   : > { %v13933_v49 = vadd.f32 %v3335_v27, %v2936_v15  ;;  %10715 = vmatmul.msk.bf16.gmra.mxu2 %vm761_vm2, %v1520_v13  ;;  %10794 = vmatmul.msk.bf16.gmra.mxu0 %vm761_vm2, %v2038_v63  ;;  %v497_v13 = vld [vmem:[%s17699_s3 + $0x180] sm:$0xff] }
 0x40c   : > { %10834 = vmatmul.msk.bf16.gmra.mxu1 %vm761_vm2, %v3073_v32  ;;  %5420 = vperm.xlu0 %11336, %v494_v24   ;;  %v1998_v32 = vld [vmem:[%s17700_s4 + $0x23a] sm:$0xff] }
 0x40d   : > { %17824 = vst [vmem:[#allocation8_spill] sm:$0xff] %v13933_v49  ;;  %10755 = vmatmul.msk.bf16.gmra.mxu3 %vm761_vm2, %v2038_v63  ;;  %v1480_v63 = vld [vmem:[%s17700_s4 + $0x239] sm:$0xff] }
 0x40e   : > { %v1786_v27 = vpop.f32.mrf.mxu2  ;;  %v3032_v15 = vld [vmem:[%s17700_s4 + $0x23c] sm:$0xff] }
 0x40f   : > { %v1902_v55 = vadd.f32 %v1786_v27, %v17825_v3  ;;  %v1521_v3 = vpack.c.bf16 %v1480_v63, %v1479_v17  ;;  %v478_v17 = vld [vmem:[%s17699_s3 + $0xe8] sm:$0xff] }
 0x410   : > { %v2304_v26 = vpop.f32.mrf.mxu3  ;;  %v2819_v62 = vpop.f32.mrf.mxu0  ;;  %5325 = vperm.xlu2 %11338, %v475_v39   ;;  %5410 = vperm.xlu1 %11337, %v492_v41   ;;  %v495_v39 = vld [vmem:[%s17699_s3 + $0x170] sm:$0xff]  ;;  %v17829_v41 = vld [vmem:[#allocation11_spill] sm:$0xff] }
 0x411   : > { %v2420_v30 = vadd.f32 %v2304_v26, %v1902_v55  ;;  %v2937_v37 = vadd.f32 %v2819_v62, %v2419_v33  ;;  %v3337_v57 = vpop.f32.mrf.mxu1  ;;  %v3031_v33 = vld [vmem:[%s17700_s4 + $0x234] sm:$0xff]  ;;  %v2039_v55 = vpack.c.bf16 %v1998_v32, %v1997_v31 }
 0x412   : > { %v3074_v62 = vpack.c.bf16 %v3032_v15, %v3031_v33 }
 0x413   : > { %v13952_v21 = vadd.f32 %v3337_v57, %v2937_v37 }
 0x414   : > { %5435 = vperm.xlu0 %11336, %v497_v13  }
 0x415   : > { %17826 = vst [vmem:[#allocation9_spill] sm:$0xff] %v13952_v21 }
 0x416   : > { %v1788_v0 = vpop.f32.mrf.mxu2 }
 0x417   : > { %v1903_v24 = vadd.f32 %v1788_v0, %v17827_v25  ;;  %v1481_v0 = vld [vmem:[%s17700_s4 + $0x241] sm:$0xff] }
 0x418   : > { %v2306_v27 = vpop.f32.mrf.mxu3  ;;  %v2822_v26 = vpop.f32.mrf.mxu0  ;;  %5340 = vperm.xlu2 %11338, %v478_v17   ;;  %5425 = vperm.xlu1 %11337, %v495_v39   ;;  %v17831_v39 = vld [vmem:[#allocation12_spill] sm:$0xff] }
 0x419   : > { %v2421_v37 = vadd.f32 %v2306_v27, %v1903_v24  ;;  %v2938_v57 = vadd.f32 %v2822_v26, %v2420_v30  ;;  %v3340_v21 = vpop.f32.mrf.mxu1  ;;  %v500_v30 = vld [vmem:[%s17699_s3 + $0x198] sm:$0xff]  ;;  %v481_v24 = vld [vmem:[%s17699_s3 + $0x100] sm:$0xff]  ;;  %v498_v27 = vld [vmem:[%s17699_s3 + $0x188] sm:$0xff] }
 0x41a   : > { %v1999_v26 = vld [vmem:[%s17700_s4 + $0x242] sm:$0xff] }
 0x41b   : > { %v13979_v49 = vadd.f32 %v3340_v21, %v2938_v57  ;;  %10716 = vmatmul.msk.bf16.gmra.mxu2 %vm761_vm2, %v1521_v3  ;;  %10795 = vmatmul.msk.bf16.gmra.mxu0 %vm761_vm2, %v2039_v55  ;;  %v503_v3 = vld [vmem:[%s17699_s3 + $0x1b0] sm:$0xff] }
 0x41c   : > { %10835 = vmatmul.msk.bf16.gmra.mxu1 %vm761_vm2, %v3074_v62  ;;  %5450 = vperm.xlu0 %11336, %v500_v30   ;;  %v2000_v62 = vld [vmem:[%s17700_s4 + $0x24a] sm:$0xff] }
 0x41d   : > { %17828 = vst [vmem:[#allocation10_spill] sm:$0xff] %v13979_v49  ;;  %10756 = vmatmul.msk.bf16.gmra.mxu3 %vm761_vm2, %v2039_v55  ;;  %v1482_v55 = vld [vmem:[%s17700_s4 + $0x249] sm:$0xff] }
 0x41e   : > { %v1791_v21 = vpop.f32.mrf.mxu2  ;;  %v3034_v57 = vld [vmem:[%s17700_s4 + $0x24c] sm:$0xff] }
 0x41f   : > { %v1904_v13 = vadd.f32 %v1791_v21, %v17829_v41  ;;  %v1522_v41 = vpack.c.bf16 %v1482_v55, %v1481_v0  ;;  %v484_v0 = vld [vmem:[%s17699_s3 + $0x118] sm:$0xff] }
 0x420   : > { %v2309_v63 = vpop.f32.mrf.mxu3  ;;  %v2824_v31 = vpop.f32.mrf.mxu0  ;;  %5355 = vperm.xlu2 %11338, %v481_v24   ;;  %5440 = vperm.xlu1 %11337, %v498_v27   ;;  %v501_v24 = vld [vmem:[%s17699_s3 + $0x1a0] sm:$0xff]  ;;  %v17833_v27 = vld [vmem:[#allocation13_spill] sm:$0xff] }
 0x421   : > { %v2422_v32 = vadd.f32 %v2309_v63, %v1904_v13  ;;  %v2939_v33 = vadd.f32 %v2824_v31, %v2421_v37  ;;  %v3342_v15 = vpop.f32.mrf.mxu1  ;;  %v3033_v37 = vld [vmem:[%s17700_s4 + $0x244] sm:$0xff]  ;;  %v2040_v13 = vpack.c.bf16 %v2000_v62, %v1999_v26 }
 0x422   : > { %v3075_v31 = vpack.c.bf16 %v3034_v57, %v3033_v37 }
 0x423   : > { %v13998_v25 = vadd.f32 %v3342_v15, %v2939_v33 }
 0x424   : > { %5465 = vperm.xlu0 %11336, %v503_v3  }
 0x425   : > { %17830 = vst [vmem:[#allocation11_spill] sm:$0xff] %v13998_v25 }
 0x426   : > { %v1793_v17 = vpop.f32.mrf.mxu2 }
 0x427   : > { %v1905_v30 = vadd.f32 %v1793_v17, %v17831_v39  ;;  %v1483_v17 = vld [vmem:[%s17700_s4 + $0x251] sm:$0xff] }
 0x428   : > { %v2311_v21 = vpop.f32.mrf.mxu3  ;;  %v2827_v63 = vpop.f32.mrf.mxu0  ;;  %5370 = vperm.xlu2 %11338, %v484_v0   ;;  %5455 = vperm.xlu1 %11337, %v501_v24   ;;  %v487_v39 = vld [vmem:[%s17699_s3 + $0x130] sm:$0xff]  ;;  %v17836_v0 = vld [vmem:[#allocation14_spill] sm:$0xff] }
 0x429   : > { %v2423_v33 = vadd.f32 %v2311_v21, %v1905_v30  ;;  %v2940_v15 = vadd.f32 %v2827_v63, %v2422_v32  ;;  %v3345_v25 = vpop.f32.mrf.mxu1  ;;  %v506_v32 = vld [vmem:[%s17699_s3 + $0x1c8] sm:$0xff]  ;;  %v504_v30 = vld [vmem:[%s17699_s3 + $0x1b8] sm:$0xff]  ;;  %v509_v21 = vld [vmem:[%s17699_s3 + $0x1e0] sm:$0xff] }
 0x42a   : > { %v2002_v63 = vld [vmem:[%s17700_s4 + $0x25a] sm:$0xff] }
 0x42b   : > { %v14025_v49 = vadd.f32 %v3345_v25, %v2940_v15  ;;  %10717 = vmatmul.msk.bf16.gmra.mxu2 %vm761_vm2, %v1522_v41  ;;  %10796 = vmatmul.msk.bf16.gmra.mxu0 %vm761_vm2, %v2040_v13  ;;  %v1484_v41 = vld [vmem:[%s17700_s4 + $0x259] sm:$0xff] }
 0x42c   : > { %10836 = vmatmul.msk.bf16.gmra.mxu1 %vm761_vm2, %v3075_v31  ;;  %5480 = vperm.xlu0 %11336, %v506_v32   ;;  %v3035_v31 = vld [vmem:[%s17700_s4 + $0x254] sm:$0xff] }
 0x42d   : > { %17832 = vst [vmem:[#allocation12_spill] sm:$0xff] %v14025_v49  ;;  %10757 = vmatmul.msk.bf16.gmra.mxu3 %vm761_vm2, %v2040_v13  ;;  %v2001_v13 = vld [vmem:[%s17700_s4 + $0x252] sm:$0xff] }
 0x42e   : > { %v1796_v25 = vpop.f32.mrf.mxu2 }
 0x42f   : > { %v1906_v3 = vadd.f32 %v1796_v25, %v17833_v27  ;;  %v1523_v25 = vpack.c.bf16 %v1484_v41, %v1483_v17  ;;  %v2041_v27 = vpack.c.bf16 %v2002_v63, %v2001_v13  ;;  %v490_v17 = vld [vmem:[%s17699_s3 + $0x148] sm:$0xff] }
 0x430   : > { %v2314_v55 = vpop.f32.mrf.mxu3  ;;  %v2829_v26 = vpop.f32.mrf.mxu0  ;;  %5385 = vperm.xlu2 %11338, %v487_v39   ;;  %5470 = vperm.xlu1 %11337, %v504_v30   ;;  %v507_v39 = vld [vmem:[%s17699_s3 + $0x1d0] sm:$0xff] }
 0x431   : > { %v2424_v62 = vadd.f32 %v2314_v55, %v1906_v3  ;;  %v14041_v37 = vadd.f32 %v2829_v26, %v2423_v33  ;;  %v14043_v57 = vpop.f32.mrf.mxu1  ;;  %v3036_v33 = vld [vmem:[%s17700_s4 + $0x25c] sm:$0xff] }
 0x432   : > { %17835 = vst [vmem:[#allocation38_spill] sm:$0xff] %v14043_v57  ;;  %v3076_v55 = vpack.c.bf16 %v3036_v33, %v3035_v31  ;;  %v493_v33 = vld [vmem:[%s17699_s3 + $0x160] sm:$0xff] }
 0x433   : > { %17834 = vst [vmem:[#allocation13_spill] sm:$0xff] %v14041_v37 }
 0x434   : > { %5495 = vperm.xlu0 %11336, %v509_v21  }
 0x436   : > { %v1798_v15 = vpop.f32.mrf.mxu2 }
 0x437   : > { %v1907_v24 = vadd.f32 %v1798_v15, %v17836_v0  ;;  %v510_v15 = vld [vmem:[%s17699_s3 + $0x1e8] sm:$0xff]  ;;  %v515_v0 = vld [vmem:[%s17699_s3 + $0x210] sm:$0xff] }
 0x438   : > { %v2316_v32 = vpop.f32.mrf.mxu3  ;;  %v2832_v3 = vpop.f32.mrf.mxu0  ;;  %5400 = vperm.xlu2 %11338, %v490_v17   ;;  %5485 = vperm.xlu1 %11337, %v507_v39   ;;  %v17841_v17 = vld [vmem:[#allocation16_spill] sm:$0xff] }
 0x439   : > { %v2425_v26 = vadd.f32 %v2316_v32, %v1907_v24  ;;  %v2942_v57 = vadd.f32 %v2832_v3, %v2424_v62  ;;  %v3350_v37 = vpop.f32.mrf.mxu1  ;;  %v512_v62 = vld [vmem:[%s17699_s3 + $0x1f8] sm:$0xff]  ;;  %v1485_v24 = vld [vmem:[%s17700_s4 + $0x261] sm:$0x3]  ;;  %v3037_v3 = vld [vmem:[%s17700_s4 + $0x264] sm:$0xff] }
 0x43a   : > { %v2519_v32 = vld [vmem:[%s17700_s4 + $0x262] sm:$0xff] }
 0x43b   : > { %v14073_v49 = vadd.f32 %v3350_v37, %v2942_v57  ;;  %10718 = vmatmul.msk.bf16.gmra.mxu2 %vm761_vm2, %v1523_v25  ;;  %10797 = vmatmul.msk.bf16.gmra.mxu0 %vm761_vm2, %v2041_v27  ;;  %v17838_v57 = vld [vmem:[#allocation15_spill] sm:$0xff] }
 0x43c   : > { %10837 = vmatmul.msk.bf16.gmra.mxu1 %vm761_vm2, %v3076_v55  ;;  %5510 = vperm.xlu0 %11336, %v512_v62   ;;  %v2520_v25 = vld [vmem:[%s17700_s4 + $0x26a] sm:$0xff] }
 0x43d   : > { %17837 = vst [vmem:[#allocation14_spill] sm:$0xff] %v14073_v49  ;;  %10758 = vmatmul.msk.bf16.gmra.mxu3 %vm761_vm2, %v2041_v27  ;;  %v2003_v27 = vld [vmem:[%s17700_s4 + $0x262] sm:$0x3]  ;;  %v3038_v55 = vld [vmem:[%s17700_s4 + $0x26c] sm:$0xff] }
 0x43e   : > { %v1801_v37 = vpop.f32.mrf.mxu2 }
 0x43f   : > { %v1908_v30 = vadd.f32 %v1801_v37, %v17838_v57  ;;  %v1524_v37 = vpack.c.bf16 %v1485_v24, %v1485_v24  ;;  %v2559_v57 = vpack.c.bf16 %v2520_v25, %v2519_v32 }
 0x440   : > { %v2319_v21 = vpop.f32.mrf.mxu3  ;;  %v2834_v41 = vpop.f32.mrf.mxu0  ;;  %5415 = vperm.xlu2 %11338, %v493_v33   ;;  %5500 = vperm.xlu1 %11337, %v510_v15   ;;  %v496_v33 = vld [vmem:[%s17699_s3 + $0x178] sm:$0xff]  ;;  %v513_v15 = vld [vmem:[%s17699_s3 + $0x200] sm:$0xff] }
 0x441   : > { %v2426_v13 = vadd.f32 %v2319_v21, %v1908_v30  ;;  %v14089_v63 = vadd.f32 %v2834_v41, %v2425_v26  ;;  %v14091_v31 = vpop.f32.mrf.mxu1  ;;  %v2042_v21 = vpack.c.bf16 %v2003_v27, %v2003_v27  ;;  %v3077_v41 = vpack.c.bf16 %v3038_v55, %v3037_v3  ;;  %v499_v55 = vld [vmem:[%s17699_s3 + $0x190] sm:$0xff] }
 0x442   : > { %17840 = vst [vmem:[#allocation39_spill] sm:$0xff] %v14091_v31 }
 0x443   : > { %17839 = vst [vmem:[#allocation15_spill] sm:$0xff] %v14089_v63 }
 0x444   : > { %5525 = vperm.xlu0 %11336, %v515_v0  }
 0x446   : > { %v1803_v26 = vpop.f32.mrf.mxu2 }
 0x447   : > { %v1909_v39 = vadd.f32 %v1803_v26, %v17841_v17  ;;  %v516_v26 = vld [vmem:[%s17699_s3 + $0x218] sm:$0xff]  ;;  %v521_v17 = vld [vmem:[%s17699_s3 + $0x240] sm:$0xff] }
 0x448   : > { %v2321_v62 = vpop.f32.mrf.mxu3  ;;  %v2837_v30 = vpop.f32.mrf.mxu0  ;;  %5430 = vperm.xlu2 %11338, %v496_v33   ;;  %5515 = vperm.xlu1 %11337, %v513_v15  }
 0x449   : > { %v2427_v31 = vadd.f32 %v2321_v62, %v1909_v39  ;;  %v2944_v63 = vadd.f32 %v2837_v30, %v2426_v13  ;;  %v3355_v49 = vpop.f32.mrf.mxu1  ;;  %v2521_v39 = vld [vmem:[%s17700_s4 + $0x272] sm:$0x3]  ;;  %v3039_v30 = vld [vmem:[%s17700_s4 + $0x274] sm:$0x3] }
 0x44a   : > { %v3482_v62 = vld [vmem:[%s17700_s4 + $0x2c] sm:$0xff] }
 0x44b   : > { %v14121_v40 = vadd.f32 %v3355_v49, %v2944_v63  ;;  %10719 = vmatmul.msk.bf16.gmra.mxu2 %vm761_vm2, %v1524_v37  ;;  %10798 = vmatmul.msk.bf16.gmra.mxu0 %vm761_vm2, %v2559_v57  ;;  %v518_v49 = vld [vmem:[%s17699_s3 + $0x228] sm:$0xff]  ;;  %v17843_v63 = vld [vmem:[#allocation17_spill] sm:$0xff] }
 0x44c   : > { %10838 = vmatmul.msk.bf16.gmra.mxu1 %vm761_vm2, %v3077_v41  ;;  %5540 = vperm.xlu0 %11336, %v518_v49   ;;  %v3999_v37 = vld [vmem:[%s17700_s4 + $0x25] sm:$0xff]  ;;  %v4000_v57 = vld [vmem:[%s17700_s4 + $0x2d] sm:$0xff]  ;;  %v2560_v49 = vpack.c.bf16 %v2521_v39, %v2521_v39 }
 0x44d   : > { %17842 = vst [vmem:[#allocation16_spill] sm:$0xff] %v14121_v40  ;;  %10759 = vmatmul.msk.bf16.gmra.mxu3 %vm761_vm2, %v2042_v21  ;;  %v17846_v41 = vld [vmem:[#allocation18_spill] sm:$0xff] }
 0x44e   : > { %v1806_v13 = vpop.f32.mrf.mxu2 }
 0x44f   : > { %v1910_v0 = vadd.f32 %v1806_v13, %v17843_v63 }
 0x450   : > { %v2324_v24 = vpop.f32.mrf.mxu3  ;;  %v2839_v32 = vpop.f32.mrf.mxu0  ;;  %5445 = vperm.xlu2 %11338, %v499_v55   ;;  %5530 = vperm.xlu1 %11337, %v516_v26   ;;  %v502_v55 = vld [vmem:[%s17699_s3 + $0x1a8] sm:$0xff]  ;;  %v519_v26 = vld [vmem:[%s17699_s3 + $0x230] sm:$0xff] }
 0x451   : > { %v2428_v25 = vadd.f32 %v2324_v24, %v1910_v0  ;;  %v14137_v27 = vadd.f32 %v2839_v32, %v2427_v31  ;;  %v14139_v3 = vpop.f32.mrf.mxu1  ;;  %v3481_v31 = vld [vmem:[%s17700_s4 + $0x24] sm:$0xff]  ;;  %v4076_v0 = vpack.c.bf16 %v4000_v57, %v3999_v37  ;;  %v3078_v24 = vpack.c.bf16 %v3039_v30, %v3039_v30  ;;  %v3483_v30 = vld [vmem:[%s17700_s4 + $0x34] sm:$0xff] }
 0x452   : > { %17845 = vst [vmem:[#allocation40_spill] sm:$0xff] %v14139_v3  ;;  %v3558_v13 = vpack.c.bf16 %v3482_v62, %v3481_v31 }
 0x453   : > { %17844 = vst [vmem:[#allocation17_spill] sm:$0xff] %v14137_v27 }
 0x454   : > { %5555 = vperm.xlu0 %11336, %v521_v17  }
 0x456   : > { %v1808_v21 = vpop.f32.mrf.mxu2 }
 0x457   : > { %v1911_v33 = vadd.f32 %v1808_v21, %v17846_v41  ;;  %v505_v21 = vld [vmem:[%s17699_s3 + $0x1c0] sm:$0xff]  ;;  %v522_v41 = vld [vmem:[%s17699_s3 + $0x248] sm:$0xff] }
 0x458   : > { %v2326_v15 = vpop.f32.mrf.mxu3  ;;  %v2842_v63 = vpop.f32.mrf.mxu0  ;;  %5460 = vperm.xlu2 %11338, %v502_v55   ;;  %5545 = vperm.xlu1 %11337, %v519_v26  }
 0x459   : > { %v2429_v32 = vadd.f32 %v2326_v15, %v1911_v33  ;;  %v2946_v3 = vadd.f32 %v2842_v63, %v2428_v25  ;;  %v3360_v27 = vpop.f32.mrf.mxu1  ;;  %v524_v25 = vld [vmem:[%s17699_s3 + $0x258] sm:$0xff]  ;;  %v4517_v15 = vld [vmem:[%s17700_s4 + $0x26] sm:$0xff] }
 0x45a   : > { %v3484_v33 = vld [vmem:[%s17700_s4 + $0x3c] sm:$0xff] }
 0x45b   : > { %v14169_v40 = vadd.f32 %v3360_v27, %v2946_v3  ;;  %10799 = vmatmul.msk.bf16.gmra.mxu0 %vm761_vm2, %v2560_v49  ;;  %10841 = vmatmul.msk.bf16.vlgmr.msra.gmra.mxu2 %vm761_vm2, %v3558_v13  ;;  %v17847_v3 = vld [vmem:[#allocation19_spill] sm:$0xff]  ;;  %v4001_v13 = vld [vmem:[%s17700_s4 + $0x35] sm:$0xff]  ;;  %v4002_v63 = vld [vmem:[%s17700_s4 + $0x3d] sm:$0xff]  ;;  %v3559_v26 = vpack.c.bf16 %v3484_v33, %v3483_v30 }
 0x45c   : > { %10839 = vmatmul.msk.bf16.gmra.mxu1 %vm761_vm2, %v3078_v24  ;;  %5570 = vperm.xlu0 %11336, %v524_v25   ;;  %v4518_v49 = vld [vmem:[%s17700_s4 + $0x2e] sm:$0xff]  ;;  %v525_v30 = vld [vmem:[%s17699_s3 + $0x260] sm:$0x3] }
 0x45d   : > { %10881 = vmatmul.msk.bf16.vlgmr.msra.gmra.mxu3 %vm761_vm2, %v4076_v0  ;;  %v17850_v24 = vld [vmem:[#allocation20_spill] sm:$0xff]  ;;  %v4594_v25 = vpack.c.bf16 %v4518_v49, %v4517_v15 }
 0x45e   : > { %v1811_v27 = vpop.f32.mrf.mxu2 }
 0x45f   : > { %v1912_v17 = vadd.f32 %v1811_v27, %v17847_v3  ;;  %v4077_v3 = vpack.c.bf16 %v4002_v63, %v4001_v13 }
 0x460   : > { %v2329_v39 = vpop.f32.mrf.mxu3  ;;  %v2844_v31 = vpop.f32.mrf.mxu0  ;;  %5475 = vperm.xlu2 %11338, %v505_v21   ;;  %5560 = vperm.xlu1 %11337, %v522_v41   ;;  %v508_v21 = vld [vmem:[%s17699_s3 + $0x1d8] sm:$0xff] }
 0x461   : > { %v2430_v62 = vadd.f32 %v2329_v39, %v1912_v17  ;;  %v14185_v37 = vadd.f32 %v2844_v31, %v2429_v32  ;;  %v14187_v57 = vpop.f32.mrf.mxu1  ;;  %v17852_v41 = vld [vmem:[#allocation21_spill] sm:$0xff] }
 0x462   : > { %17849 = vst [vmem:[#allocation19_spill] sm:$0xff] %v14187_v57 }
 0x463   : > { %17848 = vst [vmem:[#allocation18_spill] sm:$0xff] %v14185_v37 }
 0x466   : > { %v1813_v0 = vpop.f32.mrf.mxu2 }
 0x467   : > { %v1913_v32 = vadd.f32 %v1813_v0, %v17850_v24  ;;  %v3485_v24 = vld [vmem:[%s17700_s4 + $0x44] sm:$0xff] }
 0x468   : > { %v2331_v55 = vpop.f32.mrf.mxu3  ;;  %v2847_v27 = vpop.f32.mrf.mxu0  ;;  %5490 = vperm.xlu2 %11338, %v508_v21   ;;  %5575 = vperm.xlu1 %11337, %v525_v30  }
 0x469   : > { %v2431_v17 = vadd.f32 %v2331_v55, %v1913_v32  ;;  %v2948_v39 = vadd.f32 %v2847_v27, %v2430_v62  ;;  %v3365_v31 = vpop.f32.mrf.mxu1  ;;  %v511_v32 = vld [vmem:[%s17699_s3 + $0x1f0] sm:$0xff]  ;;  %v4003_v27 = vld [vmem:[%s17700_s4 + $0x45] sm:$0xff] }
 0x46a   : > { %v3486_v55 = vld [vmem:[%s17700_s4 + $0x4c] sm:$0xff] }
 0x46b   : > { %v14214_v57 = vadd.f32 %v3365_v31, %v2948_v39  ;;  %10842 = vmatmul.msk.bf16.gmra.mxu2 %vm761_vm2, %v3559_v26  ;;  %10921 = vmatmul.msk.bf16.vlgmr.msra.gmra.mxu0 %vm761_vm2, %v4594_v25  ;;  %v4519_v26 = vld [vmem:[%s17700_s4 + $0x36] sm:$0xff]  ;;  %v4520_v25 = vld [vmem:[%s17700_s4 + $0x3e] sm:$0xff]  ;;  %v3560_v30 = vpack.c.bf16 %v3486_v55, %v3485_v24  ;;  %v17857_v55 = vld [vmem:[#allocation23_spill] sm:$0xff] }
 0x46c   : > { %v17855_v39 = vld [vmem:[#allocation22_spill] sm:$0xff] }
 0x46d   : > { %17851 = vst [vmem:[#allocation20_spill] sm:$0xff] %v14214_v57  ;;  %10882 = vmatmul.msk.bf16.gmra.mxu3 %vm761_vm2, %v4077_v3  ;;  %v4004_v3 = vld [vmem:[%s17700_s4 + $0x4d] sm:$0xff] }
 0x46e   : > { %v1816_v62 = vpop.f32.mrf.mxu2  ;;  %v17867_v57 = vld [vmem:[#allocation27_spill] sm:$0xff] }
 0x46f   : > { %v1914_v33 = vadd.f32 %v1816_v62, %v17852_v41  ;;  %v4595_v62 = vpack.c.bf16 %v4520_v25, %v4519_v26 }
 0x470   : > { %v2334_v15 = vpop.f32.mrf.mxu3  ;;  %v2849_v49 = vpop.f32.mrf.mxu0  ;;  %5505 = vperm.xlu2 %11338, %v511_v32   ;;  %v514_v32 = vld [vmem:[%s17699_s3 + $0x208] sm:$0xff] }
 0x471   : > { %v2432_v13 = vadd.f32 %v2334_v15, %v1914_v33  ;;  %v14226_v63 = vadd.f32 %v2849_v49, %v2431_v17  ;;  %v14228_v0 = vpop.f32.mrf.mxu1  ;;  %v4078_v33 = vpack.c.bf16 %v4004_v3, %v4003_v27 }
 0x472   : > { %17854 = vst [vmem:[#allocation41_spill] sm:$0xff] %v14228_v0 }
 0x473   : > { %17853 = vst [vmem:[#allocation21_spill] sm:$0xff] %v14226_v63 }
 0x476   : > { %v1818_v17 = vpop.f32.mrf.mxu2 }
 0x477   : > { %v1915_v31 = vadd.f32 %v1818_v17, %v17855_v39  ;;  %v3487_v17 = vld [vmem:[%s17700_s4 + $0x54] sm:$0xff]  ;;  %v517_v39 = vld [vmem:[%s17699_s3 + $0x220] sm:$0xff] }
 0x478   : > { %v2336_v21 = vpop.f32.mrf.mxu3  ;;  %v2852_v41 = vpop.f32.mrf.mxu0  ;;  %5520 = vperm.xlu2 %11338, %v514_v32  }
 0x479   : > { %v2433_v15 = vadd.f32 %v2336_v21, %v1915_v31  ;;  %v2950_v49 = vadd.f32 %v2852_v41, %v2432_v13  ;;  %v3370_v0 = vpop.f32.mrf.mxu1  ;;  %v3488_v31 = vld [vmem:[%s17700_s4 + $0x5c] sm:$0xff]  ;;  %v4521_v21 = vld [vmem:[%s17700_s4 + $0x46] sm:$0xff] }
 0x47a   : > { %v4006_v41 = vld [vmem:[%s17700_s4 + $0x5d] sm:$0xff] }
 0x47b   : > { %v14252_v63 = vadd.f32 %v3370_v0, %v2950_v49  ;;  %10843 = vmatmul.msk.bf16.gmra.mxu2 %vm761_vm2, %v3560_v30  ;;  %10922 = vmatmul.msk.bf16.gmra.mxu0 %vm761_vm2, %v4595_v62  ;;  %v4522_v30 = vld [vmem:[%s17700_s4 + $0x4e] sm:$0xff] }
 0x47c   : > { %v4005_v62 = vld [vmem:[%s17700_s4 + $0x55] sm:$0xff] }
 0x47d   : > { %17856 = vst [vmem:[#allocation22_spill] sm:$0xff] %v14252_v63  ;;  %10883 = vmatmul.msk.bf16.gmra.mxu3 %vm761_vm2, %v4078_v33 }
 0x47e   : > { %v1821_v24 = vpop.f32.mrf.mxu2 }
 0x47f   : > { %v1916_v26 = vadd.f32 %v1821_v24, %v17857_v55  ;;  %v3561_v24 = vpack.c.bf16 %v3488_v31, %v3487_v17  ;;  %v4596_v55 = vpack.c.bf16 %v4522_v30, %v4521_v21  ;;  %v17862_v31 = vld [vmem:[#allocation25_spill] sm:$0xff] }
 0x480   : > { %v2339_v25 = vpop.f32.mrf.mxu3  ;;  %v2854_v27 = vpop.f32.mrf.mxu0  ;;  %5535 = vperm.xlu2 %11338, %v517_v39   ;;  %v520_v39 = vld [vmem:[%s17699_s3 + $0x238] sm:$0xff] }
 0x481   : > { %v2434_v13 = vadd.f32 %v2339_v25, %v1916_v26  ;;  %v14261_v3 = vadd.f32 %v2854_v27, %v2433_v15  ;;  %v14263_v0 = vpop.f32.mrf.mxu1  ;;  %v17860_v15 = vld [vmem:[#allocation24_spill] sm:$0xff]  ;;  %v4079_v25 = vpack.c.bf16 %v4006_v41, %v4005_v62 }
 0x482   : > { %17859 = vst [vmem:[#allocation42_spill] sm:$0xff] %v14263_v0 }
 0x483   : > { %17858 = vst [vmem:[#allocation23_spill] sm:$0xff] %v14261_v3 }
 0x486   : > { %v1823_v33 = vpop.f32.mrf.mxu2 }
 0x487   : > { %v1917_v49 = vadd.f32 %v1823_v33, %v17860_v15  ;;  %v523_v33 = vld [vmem:[%s17699_s3 + $0x250] sm:$0xff] }
 0x488   : > { %v2341_v32 = vpop.f32.mrf.mxu3  ;;  %v2857_v26 = vpop.f32.mrf.mxu0  ;;  %5550 = vperm.xlu2 %11338, %v520_v39   ;;  %v3490_v15 = vld [vmem:[%s17700_s4 + $0x6c] sm:$0xff] }
 0x489   : > { %v2435_v27 = vadd.f32 %v2341_v32, %v1917_v49  ;;  %v2952_v0 = vadd.f32 %v2857_v26, %v2434_v13  ;;  %v3375_v3 = vpop.f32.mrf.mxu1  ;;  %v4523_v49 = vld [vmem:[%s17700_s4 + $0x56] sm:$0xff]  ;;  %v4524_v32 = vld [vmem:[%s17700_s4 + $0x5e] sm:$0xff] }
 0x48b   : > { %v14287_v63 = vadd.f32 %v3375_v3, %v2952_v0  ;;  %10844 = vmatmul.msk.bf16.gmra.mxu2 %vm761_vm2, %v3561_v24  ;;  %10923 = vmatmul.msk.bf16.gmra.mxu0 %vm761_vm2, %v4596_v55  ;;  %v3489_v0 = vld [vmem:[%s17700_s4 + $0x64] sm:$0xff]  ;;  %v4008_v55 = vld [vmem:[%s17700_s4 + $0x6d] sm:$0xff] }
 0x48c   : > { %v4007_v24 = vld [vmem:[%s17700_s4 + $0x65] sm:$0xff] }
 0x48d   : > { %17861 = vst [vmem:[#allocation24_spill] sm:$0xff] %v14287_v63  ;;  %10884 = vmatmul.msk.bf16.gmra.mxu3 %vm761_vm2, %v4079_v25  ;;  %v17865_v25 = vld [vmem:[#allocation26_spill] sm:$0xff] }
 0x48e   : > { %v1826_v17 = vpop.f32.mrf.mxu2 }
 0x48f   : > { %v1918_v21 = vadd.f32 %v1826_v17, %v17862_v31  ;;  %v3562_v17 = vpack.c.bf16 %v3490_v15, %v3489_v0  ;;  %v4597_v31 = vpack.c.bf16 %v4524_v32, %v4523_v49  ;;  %v4010_v32 = vld [vmem:[%s17700_s4 + $0x7d] sm:$0xff] }
 0x490   : > { %v2344_v30 = vpop.f32.mrf.mxu3  ;;  %v2859_v62 = vpop.f32.mrf.mxu0  ;;  %5565 = vperm.xlu2 %11338, %v523_v33  }
 0x491   : > { %v2436_v13 = vadd.f32 %v2344_v30, %v1918_v21  ;;  %v14296_v41 = vadd.f32 %v2859_v62, %v2435_v27  ;;  %v14298_v3 = vpop.f32.mrf.mxu1  ;;  %v4080_v30 = vpack.c.bf16 %v4008_v55, %v4007_v24  ;;  %v17870_v55 = vld [vmem:[#allocation28_spill] sm:$0xff] }
 0x492   : > { %17864 = vst [vmem:[#allocation43_spill] sm:$0xff] %v14298_v3 }
 0x493   : > { %17863 = vst [vmem:[#allocation25_spill] sm:$0xff] %v14296_v41 }
 0x496   : > { %v1828_v26 = vpop.f32.mrf.mxu2 }
 0x497   : > { %v1919_v27 = vadd.f32 %v1828_v26, %v17865_v25 }
 0x498   : > { %v2346_v39 = vpop.f32.mrf.mxu3  ;;  %v2862_v21 = vpop.f32.mrf.mxu0 }
 0x499   : > { %v2437_v62 = vadd.f32 %v2346_v39, %v1919_v27  ;;  %v2954_v3 = vadd.f32 %v2862_v21, %v2436_v13  ;;  %v3380_v41 = vpop.f32.mrf.mxu1  ;;  %v3491_v13 = vld [vmem:[%s17700_s4 + $0x74] sm:$0xff] }
 0x49b   : > { %v14322_v63 = vadd.f32 %v3380_v41, %v2954_v3  ;;  %10845 = vmatmul.msk.bf16.gmra.mxu2 %vm761_vm2, %v3562_v17  ;;  %10924 = vmatmul.msk.bf16.gmra.mxu0 %vm761_vm2, %v4597_v31  ;;  %v3492_v41 = vld [vmem:[%s17700_s4 + $0x7c] sm:$0xff]  ;;  %v4525_v3 = vld [vmem:[%s17700_s4 + $0x66] sm:$0xff] }
 0x49c   : > { %v3563_v17 = vpack.c.bf16 %v3492_v41, %v3491_v13 }
 0x49d   : > { %17866 = vst [vmem:[#allocation26_spill] sm:$0xff] %v14322_v63  ;;  %10885 = vmatmul.msk.bf16.gmra.mxu3 %vm761_vm2, %v4080_v30 }
 0x49e   : > { %v1831_v33 = vpop.f32.mrf.mxu2 }
 0x49f   : > { %v1920_v37 = vadd.f32 %v1831_v33, %v17867_v57  ;;  %v4009_v57 = vld [vmem:[%s17700_s4 + $0x75] sm:$0xff] }
 0x4a0   : > { %v2349_v26 = vpop.f32.mrf.mxu3  ;;  %v2864_v25 = vpop.f32.mrf.mxu0  ;;  %v4081_v30 = vpack.c.bf16 %v4010_v32, %v4009_v57  ;;  %v4527_v57 = vld [vmem:[%s17700_s4 + $0x76] sm:$0xff] }
 0x4a1   : > { %v2438_v0 = vadd.f32 %v2349_v26, %v1920_v37  ;;  %v14328_v15 = vadd.f32 %v2864_v25, %v2437_v62  ;;  %v14330_v49 = vpop.f32.mrf.mxu1  ;;  %v4526_v37 = vld [vmem:[%s17700_s4 + $0x6e] sm:$0xff] }
 0x4a2   : > { %17869 = vst [vmem:[#allocation44_spill] sm:$0xff] %v14330_v49  ;;  %v4598_v31 = vpack.c.bf16 %v4526_v37, %v4525_v3  ;;  %v3494_v37 = vld [vmem:[%s17700_s4 + $0x8c] sm:$0xff] }
 0x4a3   : > { %17868 = vst [vmem:[#allocation27_spill] sm:$0xff] %v14328_v15  ;;  %v17872_v15 = vld [vmem:[#allocation29_spill] sm:$0xff] }
 0x4a6   : > { %v1833_v24 = vpop.f32.mrf.mxu2 }
 0x4a7   : > { %v1921_v27 = vadd.f32 %v1833_v24, %v17870_v55 }
 0x4a8   : > { %v2351_v39 = vpop.f32.mrf.mxu3  ;;  %v2867_v21 = vpop.f32.mrf.mxu0 }
 0x4a9   : > { %v2439_v62 = vadd.f32 %v2351_v39, %v1921_v27  ;;  %v2956_v33 = vadd.f32 %v2867_v21, %v2438_v0  ;;  %v3385_v26 = vpop.f32.mrf.mxu1  ;;  %v3493_v0 = vld [vmem:[%s17700_s4 + $0x84] sm:$0xff] }
 0x4aa   : > { %v17875_v27 = vld [vmem:[#allocation30_spill] sm:$0xff] }
 0x4ab   : > { %v14351_v25 = vadd.f32 %v3385_v26, %v2956_v33  ;;  %10846 = vmatmul.msk.bf16.gmra.mxu2 %vm761_vm2, %v3563_v17  ;;  %10925 = vmatmul.msk.bf16.gmra.mxu0 %vm761_vm2, %v4598_v31  ;;  %v3564_v31 = vpack.c.bf16 %v3494_v37, %v3493_v0 }
 0x4ad   : > { %17871 = vst [vmem:[#allocation28_spill] sm:$0xff] %v14351_v25  ;;  %10886 = vmatmul.msk.bf16.gmra.mxu3 %vm761_vm2, %v4081_v30 }
 0x4ae   : > { %v1836_v49 = vpop.f32.mrf.mxu2 }
 0x4af   : > { %v1922_v63 = vadd.f32 %v1836_v49, %v17872_v15  ;;  %v4011_v15 = vld [vmem:[%s17700_s4 + $0x85] sm:$0xff]  ;;  %v4012_v49 = vld [vmem:[%s17700_s4 + $0x8d] sm:$0xff] }
 0x4b0   : > { %v2354_v24 = vpop.f32.mrf.mxu3  ;;  %v2869_v55 = vpop.f32.mrf.mxu0 }
 0x4b1   : > { %v2440_v13 = vadd.f32 %v2354_v24, %v1922_v63  ;;  %v14357_v41 = vadd.f32 %v2869_v55, %v2439_v62  ;;  %v14359_v3 = vpop.f32.mrf.mxu1  ;;  %v4528_v63 = vld [vmem:[%s17700_s4 + $0x7e] sm:$0xff]  ;;  %v4082_v62 = vpack.c.bf16 %v4012_v49, %v4011_v15  ;;  %v4529_v15 = vld [vmem:[%s17700_s4 + $0x86] sm:$0xff] }
 0x4b2   : > { %17874 = vst [vmem:[#allocation45_spill] sm:$0xff] %v14359_v3  ;;  %v4599_v21 = vpack.c.bf16 %v4528_v63, %v4527_v57  ;;  %v3496_v63 = vld [vmem:[%s17700_s4 + $0x9c] sm:$0xff] }
 0x4b3   : > { %17873 = vst [vmem:[#allocation29_spill] sm:$0xff] %v14357_v41  ;;  %v17877_v41 = vld [vmem:[#allocation31_spill] sm:$0xff] }
 0x4b6   : > { %v1838_v32 = vpop.f32.mrf.mxu2 }
 0x4b7   : > { %v1923_v39 = vadd.f32 %v1838_v32, %v17875_v27 }
 0x4b8   : > { %v2356_v17 = vpop.f32.mrf.mxu3  ;;  %v2872_v30 = vpop.f32.mrf.mxu0 }
 0x4b9   : > { %v2441_v33 = vadd.f32 %v2356_v17, %v1923_v39  ;;  %v2958_v26 = vadd.f32 %v2872_v30, %v2440_v13  ;;  %v3390_v24 = vpop.f32.mrf.mxu1  ;;  %v3495_v13 = vld [vmem:[%s17700_s4 + $0x94] sm:$0xff] }
 0x4ba   : > { %v17880_v39 = vld [vmem:[#allocation32_spill] sm:$0xff] }
 0x4bb   : > { %v14380_v55 = vadd.f32 %v3390_v24, %v2958_v26  ;;  %10847 = vmatmul.msk.bf16.gmra.mxu2 %vm761_vm2, %v3564_v31  ;;  %10926 = vmatmul.msk.bf16.gmra.mxu0 %vm761_vm2, %v4599_v21  ;;  %v3565_v21 = vpack.c.bf16 %v3496_v63, %v3495_v13 }
 0x4bd   : > { %17876 = vst [vmem:[#allocation30_spill] sm:$0xff] %v14380_v55  ;;  %10887 = vmatmul.msk.bf16.gmra.mxu3 %vm761_vm2, %v4082_v62 }
 0x4be   : > { %v1841_v3 = vpop.f32.mrf.mxu2 }
 0x4bf   : > { %v1924_v25 = vadd.f32 %v1841_v3, %v17877_v41  ;;  %v4013_v41 = vld [vmem:[%s17700_s4 + $0x95] sm:$0xff]  ;;  %v4014_v3 = vld [vmem:[%s17700_s4 + $0x9d] sm:$0xff] }
 0x4c0   : > { %v2359_v32 = vpop.f32.mrf.mxu3  ;;  %v2874_v27 = vpop.f32.mrf.mxu0 }
 0x4c1   : > { %v2442_v0 = vadd.f32 %v2359_v32, %v1924_v25  ;;  %v14386_v37 = vadd.f32 %v2874_v27, %v2441_v33  ;;  %v14388_v57 = vpop.f32.mrf.mxu1  ;;  %v4530_v25 = vld [vmem:[%s17700_s4 + $0x8e] sm:$0xff]  ;;  %v4083_v33 = vpack.c.bf16 %v4014_v3, %v4013_v41 }
 0x4c2   : > { %17879 = vst [vmem:[#allocation46_spill] sm:$0xff] %v14388_v57  ;;  %v4600_v30 = vpack.c.bf16 %v4530_v25, %v4529_v15  ;;  %v3498_v25 = vld [vmem:[%s17700_s4 + $0xac] sm:$0xff] }
 0x4c3   : > { %17878 = vst [vmem:[#allocation31_spill] sm:$0xff] %v14386_v37  ;;  %v17881_v37 = vld [vmem:[#allocation33_spill] sm:$0xff]  ;;  %v4016_v41 = vld [vmem:[%s17700_s4 + $0xad] sm:$0xff] }
 0x4c6   : > { %v1843_v49 = vpop.f32.mrf.mxu2 }
 0x4c7   : > { %v1925_v17 = vadd.f32 %v1843_v49, %v17880_v39 }
 0x4c8   : > { %v2361_v31 = vpop.f32.mrf.mxu3  ;;  %v2877_v62 = vpop.f32.mrf.mxu0 }
 0x4c9   : > { %v2443_v26 = vadd.f32 %v2361_v31, %v1925_v17  ;;  %v2960_v24 = vadd.f32 %v2877_v62, %v2442_v0  ;;  %v3395_v32 = vpop.f32.mrf.mxu1  ;;  %v3497_v0 = vld [vmem:[%s17700_s4 + $0xa4] sm:$0xff] }
 0x4ca   : > { %v3566_v31 = vpack.c.bf16 %v3498_v25, %v3497_v0 }
 0x4cb   : > { %v14409_v27 = vadd.f32 %v3395_v32, %v2960_v24  ;;  %10848 = vmatmul.msk.bf16.gmra.mxu2 %vm761_vm2, %v3565_v21  ;;  %10927 = vmatmul.msk.bf16.gmra.mxu0 %vm761_vm2, %v4600_v30  ;;  %v11001_v24 = vld [vmem:[%s11473_s25 + $0x12] sm:$0x3]  ;;  %v11041_v32 = vld [vmem:[%s11473_s25 + $0x14] sm:$0x3] }
 0x4cd   : > { %10888 = vmatmul.msk.bf16.gmra.mxu3 %vm761_vm2, %v4083_v33 }
 0x4ce   : > { %v1846_v57 = vpop.f32.mrf.mxu2 }
 0x4cf   : > { %v1926_v55 = vadd.f32 %v1846_v57, %v17881_v37  ;;  %v4531_v37 = vld [vmem:[%s17700_s4 + $0x96] sm:$0xff]  ;;  %v4015_v57 = vld [vmem:[%s17700_s4 + $0xa5] sm:$0xff] }
 0x4d0   : > { %v2364_v49 = vpop.f32.mrf.mxu3  ;;  %v2879_v39 = vpop.f32.mrf.mxu0  ;;  %v4084_v62 = vpack.c.bf16 %v4016_v41, %v4015_v57 }
 0x4d1   : > { %v2444_v13 = vadd.f32 %v2364_v49, %v1926_v55  ;;  %v14415_v63 = vadd.f32 %v2879_v39, %v2443_v26  ;;  %v14417_v15 = vpop.f32.mrf.mxu1  ;;  %v4532_v55 = vld [vmem:[%s17700_s4 + $0x9e] sm:$0xff]  ;;  %v6492_v49 = vsel %vm879_vm1, %v11001_v24, 0  ;;  %v7010_v39 = vsel %vm879_vm1, %v11041_v32, 0 }
 0x4d2   : > { %17883 = vst [vmem:[#allocation33_spill] sm:$0xff] %v14417_v15  ;;  %v4601_v21 = vpack.c.bf16 %v4532_v55, %v4531_v37  ;;  %6501 = vmatpush.bf16.msrb.mxu2 %v6492_v49  ;;  %7019 = vmatpush.bf16.msrb.mxu3 %v7010_v39  ;;  %v11081_v37 = vld [vmem:[%s11473_s25 + $0x16] sm:$0x3]  ;;  %v11121_v55 = vld [vmem:[%s11473_s25 + $0x18] sm:$0x3] }
 0x4d3   : > { %17882 = vst [vmem:[#allocation32_spill] sm:$0xff] %v14415_v63  ;;  %v7528_v41 = vsel %vm879_vm1, %v11081_v37, 0  ;;  %v14470_v49 = vld [vmem:[%s11468_s22] ss:$0 sm:$0xff] }
 0x4d4   : > { %7537 = vmatpush.bf16.msrb.mxu0 %v7528_v41 }
 0x4d6   : > { %v1848_v3 = vpop.f32.mrf.mxu2 }
 0x4d7   : > { %v8046_v3 = vsel %vm879_vm1, %v11121_v55, 0 }
 0x4d8   : > { %v2366_v17 = vpop.f32.mrf.mxu3  ;;  %v2882_v30 = vpop.f32.mrf.mxu0  ;;  %8055 = vmatpush.bf16.msrb.mxu1 %v8046_v3 }
 0x4d9   : > { %v2962_v33 = vadd.f32 %v2882_v30, %v2444_v13  ;;  %v3400_v26 = vpop.f32.mrf.mxu1  ;;  %v4533_v30 = vld [vmem:[%s17700_s4 + $0xa6] sm:$0xff]  ;;  %v14476_v3 = vpop.permute.xlu0 %5195 }
 0x4da   : > { %17885 = vst [vmem:[#allocation48_spill] sm:$0xff] %v14476_v3 }
 0x4db   : > { %v14441_v15 = vadd.f32 %v3400_v26, %v2962_v33  ;;  %10849 = vmatmul.msk.bf16.gmra.mxu2 %vm761_vm2, %v3566_v31  ;;  %10928 = vmatmul.msk.bf16.gmra.mxu0 %vm761_vm2, %v4601_v21  ;;  %v3499_v31 = vld [vmem:[%s17700_s4 + $0xb4] sm:$0xff]  ;;  %v3500_v21 = vld [vmem:[%s17700_s4 + $0xbc] sm:$0xff] }
 0x4dc   : > { %v4018_v33 = vld [vmem:[%s17700_s4 + $0xbd] sm:$0xff]  ;;  %v3567_v39 = vpack.c.bf16 %v3500_v21, %v3499_v31 }
 0x4dd   : > { %17884 = vst [vmem:[#allocation47_spill] sm:$0xff] %v14441_v15  ;;  %10889 = vmatmul.msk.bf16.gmra.mxu3 %vm761_vm2, %v4084_v62  ;;  %v4534_v62 = vld [vmem:[%s17700_s4 + $0xae] sm:$0xff] }
 0x4de   : > { %v3728_v0 = vpop.f32.mrf.mxu2 }
 0x4df   : > { %v3922_v17 = vadd.f32 %v3728_v0, %v13128_v46  ;;  %v4017_v46 = vld [vmem:[%s17700_s4 + $0xb5] sm:$0xff]  ;;  %v4602_v0 = vpack.c.bf16 %v4534_v62, %v4533_v30 }
 0x4e0   : > { %v4246_v13 = vpop.f32.mrf.mxu3  ;;  %v2884_v25 = vpop.f32.mrf.mxu0  ;;  %v4085_v37 = vpack.c.bf16 %v4018_v33, %v4017_v46  ;;  %v3501_v33 = vld [vmem:[%s17700_s4 + $0xc4] sm:$0xff] }
 0x4e1   : > { %v3402_v57 = vpop.f32.mrf.mxu1  ;;  %v4440_v24 = vadd.f32 %v4246_v13, %v3922_v17 }
 0x4e6   : > { %v3730_v26 = vpop.f32.mrf.mxu2 }
 0x4e7   : > { %v3923_v57 = vadd.f32 %v3730_v26, %v13135_v45  ;;  %v3502_v26 = vld [vmem:[%s17700_s4 + $0xcc] sm:$0xff] }
 0x4e8   : > { %v4248_v32 = vpop.f32.mrf.mxu3  ;;  %v4764_v25 = vpop.f32.mrf.mxu0 }
 0x4e9   : > { %v4958_v55 = vadd.f32 %v4764_v25, %v4440_v24  ;;  %v4441_v15 = vadd.f32 %v4248_v32, %v3923_v57  ;;  %v4535_v24 = vld [vmem:[%s17700_s4 + $0xb6] sm:$0xff] }
 0x4eb   : > { %v5039_v41 = vadd.f32 %v14470_v49, %v4958_v55  ;;  %10850 = vmatmul.msk.bf16.gmra.mxu2 %vm761_vm2, %v3567_v39  ;;  %10929 = vmatmul.msk.bf16.gmra.mxu0 %vm761_vm2, %v4602_v0  ;;  %v4020_v39 = vld [vmem:[%s17700_s4 + $0xcd] sm:$0xff]  ;;  %v14501_v0 = vpop.permute.xlu0 %5200 }
 0x4ec   : > { %17886 = vst [vmem:[#allocation49_spill] sm:$0xff] %v14501_v0 }
 0x4ed   : > { %10890 = vmatmul.msk.bf16.gmra.mxu3 %vm761_vm2, %v4085_v37  ;;  %v5116_v13 = vmax.f32 %v5039_v41, 0.0  ;;  %v3568_v41 = vpack.c.bf16 %v3502_v26, %v3501_v33 }
 0x4ee   : > { %v3733_v17 = vpop.f32.mrf.mxu2 }
 0x4ef   : > { %v5578_v31 = vmul.f32 %v14476_v3, %v5116_v13  ;;  %v3924_v62 = vadd.f32 %v3733_v17, %v13156_v12  ;;  %v4019_v12 = vld [vmem:[%s17700_s4 + $0xc5] sm:$0xff] }
 0x4f0   : > { %v4251_v21 = vpop.f32.mrf.mxu3  ;;  %v4766_v30 = vpop.f32.mrf.mxu0 }
 0x4f1   : > { %5694 = vst.msk [vmem:[#allocation2 + $0x13] sm:$0xff] %vm761_vm2, %v5578_v31  ;;  %v4959_v45 = vadd.f32 %v4766_v30, %v4441_v15  ;;  %v4536_v15 = vld [vmem:[%s17700_s4 + $0xbe] sm:$0xff]  ;;  %v4442_v37 = vadd.f32 %v4251_v21, %v3924_v62  ;;  %v4086_v30 = vpack.c.bf16 %v4020_v39, %v4019_v12  ;;  %v14509_v21 = vpop.permute.xlu1 %5205  ;;  %v3503_v39 = vld [vmem:[%s17700_s4 + $0xd4] sm:$0xff] }
 0x4f2   : > { %v4603_v13 = vpack.c.bf16 %v4536_v15, %v4535_v24  ;;  %17887 = vst [vmem:[#allocation50_spill] sm:$0xff] %v14509_v21 }
 0x4f3   : > { %v5040_v46 = vadd.f32 %v14470_v49, %v4959_v45 }
 0x4f5   : > { %v5117_v32 = vmax.f32 %v5040_v46, 0.0 }
 0x4f6   : > { %v3735_v25 = vpop.f32.mrf.mxu2 }
 0x4f7   : > { %v5579_v55 = vmul.f32 %v14501_v0, %v5117_v32  ;;  %v3925_v3 = vadd.f32 %v3735_v25, %v13163_v22  ;;  %v4538_v25 = vld [vmem:[%s17700_s4 + $0xce] sm:$0xff] }
 0x4f8   : > { %v4253_v57 = vpop.f32.mrf.mxu3  ;;  %v4769_v17 = vpop.f32.mrf.mxu0 }
 0x4f9   : > { %v5655_v45 = vpack.c.bf16 %v5579_v55, %v5578_v31  ;;  %5695 = vst.msk [vmem:[#allocation2 + $0x1b] sm:$0xff] %vm761_vm2, %v5579_v55  ;;  %v4960_v46 = vadd.f32 %v4769_v17, %v4442_v37  ;;  %v4443_v31 = vadd.f32 %v4253_v57, %v3925_v3  ;;  %v4537_v3 = vld [vmem:[%s17700_s4 + $0xc6] sm:$0xff]  ;;  %v4022_v55 = vld [vmem:[%s17700_s4 + $0xdd] sm:$0xff]  ;;  %v14535_v57 = vpop.permute.xlu1 %5210 }
 0x4fa   : > { %17888 = vst [vmem:[#allocation51_spill] sm:$0xff] %v14535_v57 }
 0x4fb   : > { %v5041_v63 = vadd.f32 %v14470_v49, %v4960_v46  ;;  %10851 = vmatmul.msk.bf16.gmra.mxu2 %vm761_vm2, %v3568_v41  ;;  %10930 = vmatmul.msk.bf16.gmra.mxu0 %vm761_vm2, %v4603_v13  ;;  %v4604_v46 = vpack.c.bf16 %v4538_v25, %v4537_v3 }
 0x4fc   : > { %10962 = vmatmul.msk.bf16.vlgmr.msra.gmra.mxu1 %vm761_vm2, %v5655_v45 }
 0x4fd   : > { %10891 = vmatmul.msk.bf16.gmra.mxu3 %vm761_vm2, %v4086_v30  ;;  %v5118_v62 = vmax.f32 %v5041_v63, 0.0  ;;  %v3504_v63 = vld [vmem:[%s17700_s4 + $0xdc] sm:$0xff] }
 0x4fe   : > { %v3738_v33 = vpop.f32.mrf.mxu2  ;;  %v3569_v45 = vpack.c.bf16 %v3504_v63, %v3503_v39 }
 0x4ff   : > { %v5580_v26 = vmul.f32 %v14509_v21, %v5118_v62  ;;  %v3926_v32 = vadd.f32 %v3738_v33, %v13184_v36  ;;  %v4021_v36 = vld [vmem:[%s17700_s4 + $0xd5] sm:$0xff] }
 0x500   : > { %v4256_v24 = vpop.f32.mrf.mxu3  ;;  %v4771_v15 = vpop.f32.mrf.mxu0  ;;  %v4087_v33 = vpack.c.bf16 %v4022_v55, %v4021_v36  ;;  %v3505_v55 = vld [vmem:[%s17700_s4 + $0xe4] sm:$0xff] }
 0x501   : > { %5696 = vst.msk [vmem:[#allocation2 + $0x23] sm:$0xff] %vm761_vm2, %v5580_v26  ;;  %v4961_v22 = vadd.f32 %v4771_v15, %v4443_v31  ;;  %v4444_v13 = vadd.f32 %v4256_v24, %v3926_v32  ;;  %v14543_v24 = vpop.permute.xlu2 %5215 }
 0x502   : > { %17889 = vst [vmem:[#allocation52_spill] sm:$0xff] %v14543_v24 }
 0x503   : > { %v5042_v12 = vadd.f32 %v14470_v49, %v4961_v22 }
 0x505   : > { %v5119_v37 = vmax.f32 %v5042_v12, 0.0 }
 0x506   : > { %v3740_v41 = vpop.f32.mrf.mxu2 }
 0x507   : > { %v5581_v17 = vmul.f32 %v14535_v57, %v5119_v37  ;;  %v3927_v22 = vadd.f32 %v3740_v41, %v13191_v9  ;;  %v3506_v41 = vld [vmem:[%s17700_s4 + $0xec] sm:$0xff] }
 0x508   : > { %v4258_v30 = vpop.f32.mrf.mxu3  ;;  %v4774_v62 = vpop.f32.mrf.mxu0 }
 0x509   : > { %5697 = vst.msk [vmem:[#allocation2 + $0x2b] sm:$0xff] %vm761_vm2, %v5581_v17  ;;  %v4962_v31 = vadd.f32 %v4774_v62, %v4444_v13  ;;  %v5656_v15 = vpack.c.bf16 %v5581_v17, %v5580_v26  ;;  %v4445_v63 = vadd.f32 %v4258_v30, %v3927_v22  ;;  %v4539_v13 = vld [vmem:[%s17700_s4 + $0xd6] sm:$0xff]  ;;  %v4540_v17 = vld [vmem:[%s17700_s4 + $0xde] sm:$0xff]  ;;  %v3570_v22 = vpack.c.bf16 %v3506_v41, %v3505_v55 }
 0x50b   : > { %v5043_v12 = vadd.f32 %v14470_v49, %v4962_v31  ;;  %10852 = vmatmul.msk.bf16.gmra.mxu2 %vm761_vm2, %v3569_v45  ;;  %10931 = vmatmul.msk.bf16.gmra.mxu0 %vm761_vm2, %v4604_v46  ;;  %v4024_v45 = vld [vmem:[%s17700_s4 + $0xed] sm:$0xff]  ;;  %v14569_v46 = vpop.permute.xlu2 %5220 }
 0x50c   : > { %10963 = vmatmul.msk.bf16.gmra.mxu1 %vm761_vm2, %v5656_v15  ;;  %17890 = vst [vmem:[#allocation53_spill] sm:$0xff] %v14569_v46 }
 0x50d   : > { %10892 = vmatmul.msk.bf16.gmra.mxu3 %vm761_vm2, %v4087_v33  ;;  %v5120_v32 = vmax.f32 %v5043_v12, 0.0  ;;  %v4605_v12 = vpack.c.bf16 %v4540_v17, %v4539_v13 }
 0x50e   : > { %v3743_v39 = vpop.f32.mrf.mxu2 }
 0x50f   : > { %v5582_v3 = vmul.f32 %v14543_v24, %v5120_v32  ;;  %v3928_v37 = vadd.f32 %v3743_v39, %v13212_v60  ;;  %v4023_v60 = vld [vmem:[%s17700_s4 + $0xe5] sm:$0xff] }
 0x510   : > { %v4261_v26 = vpop.f32.mrf.mxu3  ;;  %v4776_v25 = vpop.f32.mrf.mxu0  ;;  %v4088_v39 = vpack.c.bf16 %v4024_v45, %v4023_v60  ;;  %v3507_v45 = vld [vmem:[%s17700_s4 + $0xf4] sm:$0xff] }
 0x511   : > { %5698 = vst.msk [vmem:[#allocation2 + $0x33] sm:$0xff] %vm761_vm2, %v5582_v3  ;;  %v4963_v9 = vadd.f32 %v4776_v25, %v4445_v63  ;;  %v4446_v33 = vadd.f32 %v4261_v26, %v3928_v37  ;;  %v14579_v37 = vpop.permute.xlu0 %5225 }
 0x512   : > { %17891 = vst [vmem:[#allocation54_spill] sm:$0xff] %v14579_v37 }
 0x513   : > { %v5044_v36 = vadd.f32 %v14470_v49, %v4963_v9 }
 0x515   : > { %v5121_v30 = vmax.f32 %v5044_v36, 0.0 }
 0x516   : > { %v3745_v62 = vpop.f32.mrf.mxu2 }
 0x517   : > { %v5583_v31 = vmul.f32 %v14569_v46, %v5121_v30  ;;  %v3929_v9 = vadd.f32 %v3745_v62, %v13219_v61  ;;  %v3508_v62 = vld [vmem:[%s17700_s4 + $0xfc] sm:$0xff] }
 0x518   : > { %v4263_v15 = vpop.f32.mrf.mxu3  ;;  %v4779_v32 = vpop.f32.mrf.mxu0 }
 0x519   : > { %5699 = vst.msk [vmem:[#allocation2 + $0x3b] sm:$0xff] %vm761_vm2, %v5583_v31  ;;  %v4964_v63 = vadd.f32 %v4779_v32, %v4446_v33  ;;  %v5657_v25 = vpack.c.bf16 %v5583_v31, %v5582_v3  ;;  %v4447_v41 = vadd.f32 %v4263_v15, %v3929_v9  ;;  %v4541_v33 = vld [vmem:[%s17700_s4 + $0xe6] sm:$0xff]  ;;  %v4542_v31 = vld [vmem:[%s17700_s4 + $0xee] sm:$0xff]  ;;  %v3571_v9 = vpack.c.bf16 %v3508_v62, %v3507_v45 }
 0x51b   : > { %v5045_v36 = vadd.f32 %v14470_v49, %v4964_v63  ;;  %10853 = vmatmul.msk.bf16.gmra.mxu2 %vm761_vm2, %v3570_v22  ;;  %10932 = vmatmul.msk.bf16.gmra.mxu0 %vm761_vm2, %v4605_v12  ;;  %v4026_v22 = vld [vmem:[%s17700_s4 + $0xfd] sm:$0xff]  ;;  %v14603_v12 = vpop.permute.xlu1 %5230 }
 0x51c   : > { %10964 = vmatmul.msk.bf16.gmra.mxu1 %vm761_vm2, %v5657_v25  ;;  %17892 = vst [vmem:[#allocation55_spill] sm:$0xff] %v14603_v12 }
 0x51d   : > { %10893 = vmatmul.msk.bf16.gmra.mxu3 %vm761_vm2, %v4088_v39  ;;  %v5122_v26 = vmax.f32 %v5045_v36, 0.0  ;;  %v4606_v36 = vpack.c.bf16 %v4542_v31, %v4541_v33 }
 0x51e   : > { %v3748_v55 = vpop.f32.mrf.mxu2 }
 0x51f   : > { %v5584_v13 = vmul.f32 %v14579_v37, %v5122_v26  ;;  %v3930_v30 = vadd.f32 %v3748_v55, %v13240_v23  ;;  %v4025_v23 = vld [vmem:[%s17700_s4 + $0xf5] sm:$0xff] }
 0x520   : > { %v4266_v3 = vpop.f32.mrf.mxu3  ;;  %v4781_v17 = vpop.f32.mrf.mxu0  ;;  %v4089_v55 = vpack.c.bf16 %v4026_v22, %v4025_v23  ;;  %v3509_v22 = vld [vmem:[%s17700_s4 + $0x104] sm:$0xff] }
 0x521   : > { %5700 = vst.msk [vmem:[#allocation2 + $0x43] sm:$0xff] %vm761_vm2, %v5584_v13  ;;  %v4965_v61 = vadd.f32 %v4781_v17, %v4447_v41  ;;  %v4448_v39 = vadd.f32 %v4266_v3, %v3930_v30  ;;  %v14613_v30 = vpop.permute.xlu2 %5235 }
 0x522   : > { %17893 = vst [vmem:[#allocation56_spill] sm:$0xff] %v14613_v30 }
 0x523   : > { %v5046_v60 = vadd.f32 %v14470_v49, %v4965_v61 }
 0x525   : > { %v5123_v15 = vmax.f32 %v5046_v60, 0.0 }
 0x526   : > { %v3750_v32 = vpop.f32.mrf.mxu2 }
 0x527   : > { %v5585_v63 = vmul.f32 %v14603_v12, %v5123_v15  ;;  %v3931_v61 = vadd.f32 %v3750_v32, %v13247_v11  ;;  %v3510_v32 = vld [vmem:[%s17700_s4 + $0x10c] sm:$0xff] }
 0x528   : > { %v4268_v25 = vpop.f32.mrf.mxu3  ;;  %v4784_v26 = vpop.f32.mrf.mxu0 }
 0x529   : > { %5701 = vst.msk [vmem:[#allocation2 + $0x4b] sm:$0xff] %vm761_vm2, %v5585_v63  ;;  %v4966_v41 = vadd.f32 %v4784_v26, %v4448_v39  ;;  %v5658_v17 = vpack.c.bf16 %v5585_v63, %v5584_v13  ;;  %v4449_v62 = vadd.f32 %v4268_v25, %v3931_v61  ;;  %v4543_v39 = vld [vmem:[%s17700_s4 + $0xf6] sm:$0xff]  ;;  %v4544_v63 = vld [vmem:[%s17700_s4 + $0xfe] sm:$0xff]  ;;  %v3572_v61 = vpack.c.bf16 %v3510_v32, %v3509_v22 }
 0x52b   : > { %v5047_v60 = vadd.f32 %v14470_v49, %v4966_v41  ;;  %10854 = vmatmul.msk.bf16.gmra.mxu2 %vm761_vm2, %v3571_v9  ;;  %10933 = vmatmul.msk.bf16.gmra.mxu0 %vm761_vm2, %v4606_v36  ;;  %v4028_v9 = vld [vmem:[%s17700_s4 + $0x10d] sm:$0xff]  ;;  %v14637_v36 = vpop.permute.xlu0 %5240 }
 0x52c   : > { %10965 = vmatmul.msk.bf16.gmra.mxu1 %vm761_vm2, %v5658_v17  ;;  %17894 = vst [vmem:[#allocation57_spill] sm:$0xff] %v14637_v36 }
 0x52d   : > { %10894 = vmatmul.msk.bf16.gmra.mxu3 %vm761_vm2, %v4089_v55  ;;  %v5124_v3 = vmax.f32 %v5047_v60, 0.0  ;;  %v4607_v60 = vpack.c.bf16 %v4544_v63, %v4543_v39 }
 0x52e   : > { %v3753_v45 = vpop.f32.mrf.mxu2 }
 0x52f   : > { %v5586_v33 = vmul.f32 %v14613_v30, %v5124_v3  ;;  %v3932_v15 = vadd.f32 %v3753_v45, %v13268_v51  ;;  %v4027_v51 = vld [vmem:[%s17700_s4 + $0x105] sm:$0xff] }
 0x530   : > { %v4271_v13 = vpop.f32.mrf.mxu3  ;;  %v4786_v31 = vpop.f32.mrf.mxu0  ;;  %v4090_v45 = vpack.c.bf16 %v4028_v9, %v4027_v51  ;;  %v3511_v9 = vld [vmem:[%s17700_s4 + $0x114] sm:$0xff] }
 0x531   : > { %5702 = vst.msk [vmem:[#allocation2 + $0x53] sm:$0xff] %vm761_vm2, %v5586_v33  ;;  %v4967_v11 = vadd.f32 %v4786_v31, %v4449_v62  ;;  %v4450_v55 = vadd.f32 %v4271_v13, %v3932_v15  ;;  %v14647_v15 = vpop.permute.xlu1 %5245 }
 0x532   : > { %17895 = vst [vmem:[#allocation58_spill] sm:$0xff] %v14647_v15 }
 0x533   : > { %v5048_v23 = vadd.f32 %v14470_v49, %v4967_v11 }
 0x535   : > { %v5125_v25 = vmax.f32 %v5048_v23, 0.0 }
 0x536   : > { %v3755_v26 = vpop.f32.mrf.mxu2 }
 0x537   : > { %v5587_v41 = vmul.f32 %v14637_v36, %v5125_v25  ;;  %v3933_v11 = vadd.f32 %v3755_v26, %v13275_v47  ;;  %v3512_v26 = vld [vmem:[%s17700_s4 + $0x11c] sm:$0xff] }
 0x538   : > { %v4273_v17 = vpop.f32.mrf.mxu3  ;;  %v4789_v3 = vpop.f32.mrf.mxu0 }
 0x539   : > { %5703 = vst.msk [vmem:[#allocation2 + $0x5b] sm:$0xff] %vm761_vm2, %v5587_v41  ;;  %v4968_v62 = vadd.f32 %v4789_v3, %v4450_v55  ;;  %v5659_v31 = vpack.c.bf16 %v5587_v41, %v5586_v33  ;;  %v4451_v32 = vadd.f32 %v4273_v17, %v3933_v11  ;;  %v4545_v55 = vld [vmem:[%s17700_s4 + $0x106] sm:$0xff]  ;;  %v4546_v41 = vld [vmem:[%s17700_s4 + $0x10e] sm:$0xff]  ;;  %v3573_v11 = vpack.c.bf16 %v3512_v26, %v3511_v9 }
 0x53b   : > { %v5049_v23 = vadd.f32 %v14470_v49, %v4968_v62  ;;  %10855 = vmatmul.msk.bf16.gmra.mxu2 %vm761_vm2, %v3572_v61  ;;  %10934 = vmatmul.msk.bf16.gmra.mxu0 %vm761_vm2, %v4607_v60  ;;  %v4030_v61 = vld [vmem:[%s17700_s4 + $0x11d] sm:$0xff]  ;;  %v14671_v60 = vpop.permute.xlu2 %5250 }
 0x53c   : > { %10966 = vmatmul.msk.bf16.gmra.mxu1 %vm761_vm2, %v5659_v31  ;;  %17896 = vst [vmem:[#allocation59_spill] sm:$0xff] %v14671_v60 }
 0x53d   : > { %10895 = vmatmul.msk.bf16.gmra.mxu3 %vm761_vm2, %v4090_v45  ;;  %v5126_v13 = vmax.f32 %v5049_v23, 0.0  ;;  %v4608_v23 = vpack.c.bf16 %v4546_v41, %v4545_v55 }
 0x53e   : > { %v3758_v22 = vpop.f32.mrf.mxu2 }
 0x53f   : > { %v5588_v39 = vmul.f32 %v14647_v15, %v5126_v13  ;;  %v3934_v25 = vadd.f32 %v3758_v22, %v13296_v19  ;;  %v4029_v19 = vld [vmem:[%s17700_s4 + $0x115] sm:$0xff] }
 0x540   : > { %v4276_v33 = vpop.f32.mrf.mxu3  ;;  %v4791_v63 = vpop.f32.mrf.mxu0  ;;  %v4091_v22 = vpack.c.bf16 %v4030_v61, %v4029_v19  ;;  %v3513_v61 = vld [vmem:[%s17700_s4 + $0x124] sm:$0xff] }
 0x541   : > { %5704 = vst.msk [vmem:[#allocation2 + $0x63] sm:$0xff] %vm761_vm2, %v5588_v39  ;;  %v4969_v47 = vadd.f32 %v4791_v63, %v4451_v32  ;;  %v4452_v45 = vadd.f32 %v4276_v33, %v3934_v25  ;;  %v14681_v25 = vpop.permute.xlu0 %5255 }
 0x542   : > { %17897 = vst [vmem:[#allocation60_spill] sm:$0xff] %v14681_v25 }
 0x543   : > { %v5050_v51 = vadd.f32 %v14470_v49, %v4969_v47 }
 0x545   : > { %v5127_v17 = vmax.f32 %v5050_v51, 0.0 }
 0x546   : > { %v3760_v3 = vpop.f32.mrf.mxu2 }
 0x547   : > { %v5589_v62 = vmul.f32 %v14671_v60, %v5127_v17  ;;  %v3935_v47 = vadd.f32 %v3760_v3, %v13303_v10  ;;  %v3514_v3 = vld [vmem:[%s17700_s4 + $0x12c] sm:$0xff] }
 0x548   : > { %v4278_v31 = vpop.f32.mrf.mxu3  ;;  %v4794_v13 = vpop.f32.mrf.mxu0 }
 0x549   : > { %5705 = vst.msk [vmem:[#allocation2 + $0x6b] sm:$0xff] %vm761_vm2, %v5589_v62  ;;  %v4970_v32 = vadd.f32 %v4794_v13, %v4452_v45  ;;  %v5660_v63 = vpack.c.bf16 %v5589_v62, %v5588_v39  ;;  %v4453_v26 = vadd.f32 %v4278_v31, %v3935_v47  ;;  %v4547_v45 = vld [vmem:[%s17700_s4 + $0x116] sm:$0xff]  ;;  %v4548_v62 = vld [vmem:[%s17700_s4 + $0x11e] sm:$0xff]  ;;  %v3574_v47 = vpack.c.bf16 %v3514_v3, %v3513_v61 }
 0x54b   : > { %v5051_v51 = vadd.f32 %v14470_v49, %v4970_v32  ;;  %10856 = vmatmul.msk.bf16.gmra.mxu2 %vm761_vm2, %v3573_v11  ;;  %10935 = vmatmul.msk.bf16.gmra.mxu0 %vm761_vm2, %v4608_v23  ;;  %v4032_v11 = vld [vmem:[%s17700_s4 + $0x12d] sm:$0xff]  ;;  %v14705_v23 = vpop.permute.xlu1 %5260 }
 0x54c   : > { %10967 = vmatmul.msk.bf16.gmra.mxu1 %vm761_vm2, %v5660_v63  ;;  %17898 = vst [vmem:[#allocation61_spill] sm:$0xff] %v14705_v23 }
 0x54d   : > { %10896 = vmatmul.msk.bf16.gmra.mxu3 %vm761_vm2, %v4091_v22  ;;  %v5128_v33 = vmax.f32 %v5051_v51, 0.0  ;;  %v4609_v51 = vpack.c.bf16 %v4548_v62, %v4547_v45 }
 0x54e   : > { %v3763_v9 = vpop.f32.mrf.mxu2 }
 0x54f   : > { %v5590_v55 = vmul.f32 %v14681_v25, %v5128_v33  ;;  %v3936_v17 = vadd.f32 %v3763_v9, %v13324_v52  ;;  %v4031_v52 = vld [vmem:[%s17700_s4 + $0x125] sm:$0xff] }
 0x550   : > { %v4281_v39 = vpop.f32.mrf.mxu3  ;;  %v4796_v41 = vpop.f32.mrf.mxu0  ;;  %v4092_v9 = vpack.c.bf16 %v4032_v11, %v4031_v52  ;;  %v3515_v11 = vld [vmem:[%s17700_s4 + $0x134] sm:$0xff] }
 0x551   : > { %5706 = vst.msk [vmem:[#allocation2 + $0x73] sm:$0xff] %vm761_vm2, %v5590_v55  ;;  %v4971_v10 = vadd.f32 %v4796_v41, %v4453_v26  ;;  %v4454_v22 = vadd.f32 %v4281_v39, %v3936_v17  ;;  %v14715_v17 = vpop.permute.xlu2 %5265 }
 0x552   : > { %17899 = vst [vmem:[#allocation62_spill] sm:$0xff] %v14715_v17 }
 0x553   : > { %v5052_v19 = vadd.f32 %v14470_v49, %v4971_v10 }
 0x555   : > { %v5129_v31 = vmax.f32 %v5052_v19, 0.0 }
 0x556   : > { %v3765_v13 = vpop.f32.mrf.mxu2 }
 0x557   : > { %v5591_v32 = vmul.f32 %v14705_v23, %v5129_v31  ;;  %v3937_v10 = vadd.f32 %v3765_v13, %v13331_v14  ;;  %v3516_v13 = vld [vmem:[%s17700_s4 + $0x13c] sm:$0xff] }
 0x558   : > { %v4283_v63 = vpop.f32.mrf.mxu3  ;;  %v4799_v33 = vpop.f32.mrf.mxu0 }
 0x559   : > { %5707 = vst.msk [vmem:[#allocation2 + $0x7b] sm:$0xff] %vm761_vm2, %v5591_v32  ;;  %v4972_v26 = vadd.f32 %v4799_v33, %v4454_v22  ;;  %v5661_v41 = vpack.c.bf16 %v5591_v32, %v5590_v55  ;;  %v4455_v3 = vadd.f32 %v4283_v63, %v3937_v10  ;;  %v4549_v22 = vld [vmem:[%s17700_s4 + $0x126] sm:$0xff]  ;;  %v4550_v32 = vld [vmem:[%s17700_s4 + $0x12e] sm:$0xff]  ;;  %v3575_v10 = vpack.c.bf16 %v3516_v13, %v3515_v11 }
 0x55b   : > { %v5053_v19 = vadd.f32 %v14470_v49, %v4972_v26  ;;  %10857 = vmatmul.msk.bf16.gmra.mxu2 %vm761_vm2, %v3574_v47  ;;  %10936 = vmatmul.msk.bf16.gmra.mxu0 %vm761_vm2, %v4609_v51  ;;  %v4034_v47 = vld [vmem:[%s17700_s4 + $0x13d] sm:$0xff]  ;;  %v14739_v51 = vpop.permute.xlu0 %5270 }
 0x55c   : > { %10968 = vmatmul.msk.bf16.gmra.mxu1 %vm761_vm2, %v5661_v41  ;;  %17900 = vst [vmem:[#allocation63_spill] sm:$0xff] %v14739_v51 }
 0x55d   : > { %10897 = vmatmul.msk.bf16.gmra.mxu3 %vm761_vm2, %v4092_v9  ;;  %v5130_v39 = vmax.f32 %v5053_v19, 0.0  ;;  %v4610_v19 = vpack.c.bf16 %v4550_v32, %v4549_v22 }
 0x55e   : > { %v3768_v61 = vpop.f32.mrf.mxu2 }
 0x55f   : > { %v5592_v45 = vmul.f32 %v14715_v17, %v5130_v39  ;;  %v3938_v31 = vadd.f32 %v3768_v61, %v13352_v28  ;;  %v4033_v28 = vld [vmem:[%s17700_s4 + $0x135] sm:$0xff] }
 0x560   : > { %v4286_v55 = vpop.f32.mrf.mxu3  ;;  %v4801_v62 = vpop.f32.mrf.mxu0  ;;  %v4093_v61 = vpack.c.bf16 %v4034_v47, %v4033_v28  ;;  %v3517_v47 = vld [vmem:[%s17700_s4 + $0x144] sm:$0xff] }
 0x561   : > { %5708 = vst.msk [vmem:[#allocation2 + $0x83] sm:$0xff] %vm761_vm2, %v5592_v45  ;;  %v4973_v14 = vadd.f32 %v4801_v62, %v4455_v3  ;;  %v4456_v9 = vadd.f32 %v4286_v55, %v3938_v31  ;;  %v14749_v31 = vpop.permute.xlu1 %5275 }
 0x562   : > { %17901 = vst [vmem:[#allocation64_spill] sm:$0xff] %v14749_v31 }
 0x563   : > { %v5054_v52 = vadd.f32 %v14470_v49, %v4973_v14 }
 0x565   : > { %v5131_v63 = vmax.f32 %v5054_v52, 0.0 }
 0x566   : > { %v3770_v33 = vpop.f32.mrf.mxu2 }
 0x567   : > { %v5593_v26 = vmul.f32 %v14739_v51, %v5131_v63  ;;  %v3939_v14 = vadd.f32 %v3770_v33, %v13359_v34  ;;  %v3518_v33 = vld [vmem:[%s17700_s4 + $0x14c] sm:$0xff] }
 0x568   : > { %v4288_v41 = vpop.f32.mrf.mxu3  ;;  %v4804_v39 = vpop.f32.mrf.mxu0 }
 0x569   : > { %5709 = vst.msk [vmem:[#allocation2 + $0x8b] sm:$0xff] %vm761_vm2, %v5593_v26  ;;  %v4974_v3 = vadd.f32 %v4804_v39, %v4456_v9  ;;  %v5662_v62 = vpack.c.bf16 %v5593_v26, %v5592_v45  ;;  %v4457_v13 = vadd.f32 %v4288_v41, %v3939_v14  ;;  %v4551_v9 = vld [vmem:[%s17700_s4 + $0x136] sm:$0xff]  ;;  %v4552_v26 = vld [vmem:[%s17700_s4 + $0x13e] sm:$0xff]  ;;  %v3576_v14 = vpack.c.bf16 %v3518_v33, %v3517_v47 }
 0x56b   : > { %v5055_v52 = vadd.f32 %v14470_v49, %v4974_v3  ;;  %10858 = vmatmul.msk.bf16.gmra.mxu2 %vm761_vm2, %v3575_v10  ;;  %10937 = vmatmul.msk.bf16.gmra.mxu0 %vm761_vm2, %v4610_v19  ;;  %v4036_v10 = vld [vmem:[%s17700_s4 + $0x14d] sm:$0xff]  ;;  %v14773_v19 = vpop.permute.xlu2 %5280 }
 0x56c   : > { %10969 = vmatmul.msk.bf16.gmra.mxu1 %vm761_vm2, %v5662_v62  ;;  %17902 = vst [vmem:[#allocation65_spill] sm:$0xff] %v14773_v19 }
 0x56d   : > { %10898 = vmatmul.msk.bf16.gmra.mxu3 %vm761_vm2, %v4093_v61  ;;  %v5132_v55 = vmax.f32 %v5055_v52, 0.0  ;;  %v4611_v52 = vpack.c.bf16 %v4552_v26, %v4551_v9 }
 0x56e   : > { %v3773_v11 = vpop.f32.mrf.mxu2 }
 0x56f   : > { %v5594_v22 = vmul.f32 %v14749_v31, %v5132_v55  ;;  %v3940_v63 = vadd.f32 %v3773_v11, %v13380_v5  ;;  %v4035_v5 = vld [vmem:[%s17700_s4 + $0x145] sm:$0xff] }
 0x570   : > { %v4291_v45 = vpop.f32.mrf.mxu3  ;;  %v4806_v32 = vpop.f32.mrf.mxu0  ;;  %v4094_v11 = vpack.c.bf16 %v4036_v10, %v4035_v5 }
 0x571   : > { %5710 = vst.msk [vmem:[#allocation2 + $0x93] sm:$0xff] %vm761_vm2, %v5594_v22  ;;  %v4975_v34 = vadd.f32 %v4806_v32, %v4457_v13  ;;  %v4458_v61 = vadd.f32 %v4291_v45, %v3940_v63  ;;  %v14785_v63 = vpop.permute.xlu0 %5285 }
 0x572   : > { %17903 = vst [vmem:[#allocation66_spill] sm:$0xff] %v14785_v63 }
 0x573   : > { %v5056_v28 = vadd.f32 %v14470_v49, %v4975_v34 }
 0x575   : > { %v5133_v41 = vmax.f32 %v5056_v28, 0.0 }
 0x576   : > { %v3775_v39 = vpop.f32.mrf.mxu2 }
 0x577   : > { %v5595_v3 = vmul.f32 %v14773_v19, %v5133_v41  ;;  %v3941_v28 = vadd.f32 %v3775_v39, %v13387_v35  ;;  %v3520_v39 = vld [vmem:[%s17700_s4 + $0x15c] sm:$0xff] }
 0x578   : > { %v4293_v62 = vpop.f32.mrf.mxu3  ;;  %v4809_v55 = vpop.f32.mrf.mxu0 }
 0x579   : > { %5711 = vst.msk [vmem:[#allocation2 + $0x9b] sm:$0xff] %vm761_vm2, %v5595_v3  ;;  %v4976_v13 = vadd.f32 %v4809_v55, %v4458_v61  ;;  %v14777_v32 = vpop.f32.mrf.mxu1  ;;  %v5663_v34 = vpack.c.bf16 %v5595_v3, %v5594_v22  ;;  %v4459_v33 = vadd.f32 %v4293_v62, %v3941_v28  ;;  %v4553_v61 = vld [vmem:[%s17700_s4 + $0x146] sm:$0xff]  ;;  %v4554_v3 = vld [vmem:[%s17700_s4 + $0x14e] sm:$0xff] }
 0x57b   : > { %v5057_v31 = vadd.f32 %v14470_v49, %v4976_v13  ;;  %10859 = vmatmul.msk.bf16.gmra.mxu2 %vm761_vm2, %v3576_v14  ;;  %10938 = vmatmul.msk.bf16.gmra.mxu0 %vm761_vm2, %v4611_v52  ;;  %v4038_v14 = vld [vmem:[%s17700_s4 + $0x15d] sm:$0xff]  ;;  %v14811_v52 = vpop.permute.xlu1 %5290 }
 0x57c   : > { %10970 = vmatmul.msk.bf16.gmra.mxu1 %vm761_vm2, %v5663_v34  ;;  %17904 = vst [vmem:[#allocation67_spill] sm:$0xff] %v14811_v52 }
 0x57d   : > { %10899 = vmatmul.msk.bf16.gmra.mxu3 %vm761_vm2, %v4094_v11  ;;  %v5134_v45 = vmax.f32 %v5057_v31, 0.0  ;;  %v3519_v31 = vld [vmem:[%s17700_s4 + $0x154] sm:$0xff] }
 0x57e   : > { %v3778_v47 = vpop.f32.mrf.mxu2  ;;  %v3577_v28 = vpack.c.bf16 %v3520_v39, %v3519_v31 }
 0x57f   : > { %v5596_v9 = vmul.f32 %v14785_v63, %v5134_v45  ;;  %v3942_v5 = vadd.f32 %v3778_v47, %v13408_v50  ;;  %v4037_v50 = vld [vmem:[%s17700_s4 + $0x155] sm:$0xff]  ;;  %v4612_v45 = vpack.c.bf16 %v4554_v3, %v4553_v61 }
 0x580   : > { %v4296_v22 = vpop.f32.mrf.mxu3  ;;  %v4811_v26 = vpop.f32.mrf.mxu0 }
 0x581   : > { %5712 = vst.msk [vmem:[#allocation2 + $0xa3] sm:$0xff] %vm761_vm2, %v5596_v9  ;;  %v4977_v35 = vadd.f32 %v4811_v26, %v4459_v33  ;;  %v14789_v41 = vpop.f32.mrf.mxu1  ;;  %v4460_v11 = vadd.f32 %v4296_v22, %v3942_v5  ;;  %v4095_v33 = vpack.c.bf16 %v4038_v14, %v4037_v50  ;;  %v14823_v5 = vpop.permute.xlu2 %5295 }
 0x582   : > { %17905 = vst [vmem:[#allocation68_spill] sm:$0xff] %v14823_v5 }
 0x583   : > { %v5058_v10 = vadd.f32 %v14470_v49, %v4977_v35 }
 0x585   : > { %v5135_v62 = vmax.f32 %v5058_v10, 0.0 }
 0x586   : > { %v3780_v55 = vpop.f32.mrf.mxu2 }
 0x587   : > { %v5597_v13 = vmul.f32 %v14811_v52, %v5135_v62  ;;  %v3943_v63 = vadd.f32 %v3780_v55, %v13415_v54  ;;  %v4555_v55 = vld [vmem:[%s17700_s4 + $0x156] sm:$0xff] }
 0x588   : > { %v4298_v34 = vpop.f32.mrf.mxu3  ;;  %v4814_v47 = vpop.f32.mrf.mxu0 }
 0x589   : > { %5713 = vst.msk [vmem:[#allocation2 + $0xab] sm:$0xff] %vm761_vm2, %v5597_v13  ;;  %v4978_v26 = vadd.f32 %v4814_v47, %v4460_v11  ;;  %v14815_v35 = vpop.f32.mrf.mxu1  ;;  %v5664_v10 = vpack.c.bf16 %v5597_v13, %v5596_v9  ;;  %v4461_v39 = vadd.f32 %v4298_v34, %v3943_v63  ;;  %v3522_v63 = vld [vmem:[%s17700_s4 + $0x16c] sm:$0xff]  ;;  %v4556_v11 = vld [vmem:[%s17700_s4 + $0x15e] sm:$0xff] }
 0x58a   : > { %v4040_v34 = vld [vmem:[%s17700_s4 + $0x16d] sm:$0xff] }
 0x58b   : > { %v5059_v19 = vadd.f32 %v14470_v49, %v4978_v26  ;;  %10860 = vmatmul.msk.bf16.gmra.mxu2 %vm761_vm2, %v3577_v28  ;;  %10939 = vmatmul.msk.bf16.gmra.mxu0 %vm761_vm2, %v4612_v45  ;;  %v14849_v28 = vpop.permute.xlu0 %5300 }
 0x58c   : > { %10971 = vmatmul.msk.bf16.gmra.mxu1 %vm761_vm2, %v5664_v10  ;;  %17906 = vst [vmem:[#allocation69_spill] sm:$0xff] %v14849_v28 }
 0x58d   : > { %10900 = vmatmul.msk.bf16.gmra.mxu3 %vm761_vm2, %v4095_v33  ;;  %v5136_v22 = vmax.f32 %v5059_v19, 0.0  ;;  %v3521_v19 = vld [vmem:[%s17700_s4 + $0x164] sm:$0xff] }
 0x58e   : > { %v3783_v31 = vpop.f32.mrf.mxu2  ;;  %v3578_v10 = vpack.c.bf16 %v3522_v63, %v3521_v19 }
 0x58f   : > { %v5598_v61 = vmul.f32 %v14823_v5, %v5136_v22  ;;  %v3944_v50 = vadd.f32 %v3783_v31, %v13436_v48  ;;  %v4039_v48 = vld [vmem:[%s17700_s4 + $0x165] sm:$0xff]  ;;  %v4613_v22 = vpack.c.bf16 %v4556_v11, %v4555_v55 }
 0x590   : > { %v4301_v9 = vpop.f32.mrf.mxu3  ;;  %v4816_v3 = vpop.f32.mrf.mxu0 }
 0x591   : > { %5714 = vst.msk [vmem:[#allocation2 + $0xb3] sm:$0xff] %vm761_vm2, %v5598_v61  ;;  %v4979_v54 = vadd.f32 %v4816_v3, %v4461_v39  ;;  %v14827_v62 = vpop.f32.mrf.mxu1  ;;  %v4462_v47 = vadd.f32 %v4301_v9, %v3944_v50  ;;  %v4096_v39 = vpack.c.bf16 %v4040_v34, %v4039_v48  ;;  %v14861_v50 = vpop.permute.xlu1 %5305 }
 0x592   : > { %17907 = vst [vmem:[#allocation70_spill] sm:$0xff] %v14861_v50 }
 0x593   : > { %v5060_v14 = vadd.f32 %v14470_v49, %v4979_v54 }
 0x595   : > { %v5137_v13 = vmax.f32 %v5060_v14, 0.0 }
 0x596   : > { %v3785_v45 = vpop.f32.mrf.mxu2 }
 0x597   : > { %v5599_v33 = vmul.f32 %v14849_v28, %v5137_v13  ;;  %v3945_v5 = vadd.f32 %v3785_v45, %v13443_v43  ;;  %v4557_v45 = vld [vmem:[%s17700_s4 + $0x166] sm:$0xff] }
 0x598   : > { %v4303_v26 = vpop.f32.mrf.mxu3  ;;  %v4819_v31 = vpop.f32.mrf.mxu0 }
 0x599   : > { %5715 = vst.msk [vmem:[#allocation2 + $0xbb] sm:$0xff] %vm761_vm2, %v5599_v33  ;;  %v4980_v3 = vadd.f32 %v4819_v31, %v4462_v47  ;;  %v14853_v54 = vpop.f32.mrf.mxu1  ;;  %v5665_v14 = vpack.c.bf16 %v5599_v33, %v5598_v61  ;;  %v4463_v63 = vadd.f32 %v4303_v26, %v3945_v5  ;;  %v3524_v5 = vld [vmem:[%s17700_s4 + $0x17c] sm:$0xff]  ;;  %v4558_v47 = vld [vmem:[%s17700_s4 + $0x16e] sm:$0xff] }
 0x59a   : > { %v4042_v26 = vld [vmem:[%s17700_s4 + $0x17d] sm:$0xff] }
 0x59b   : > { %v5061_v52 = vadd.f32 %v14470_v49, %v4980_v3  ;;  %10861 = vmatmul.msk.bf16.gmra.mxu2 %vm761_vm2, %v3578_v10  ;;  %10940 = vmatmul.msk.bf16.gmra.mxu0 %vm761_vm2, %v4613_v22  ;;  %v14887_v10 = vpop.permute.xlu2 %5310 }
 0x59c   : > { %10972 = vmatmul.msk.bf16.gmra.mxu1 %vm761_vm2, %v5665_v14  ;;  %17908 = vst [vmem:[#allocation71_spill] sm:$0xff] %v14887_v10 }
 0x59d   : > { %10901 = vmatmul.msk.bf16.gmra.mxu3 %vm761_vm2, %v4096_v39  ;;  %v5138_v9 = vmax.f32 %v5061_v52, 0.0  ;;  %v3523_v52 = vld [vmem:[%s17700_s4 + $0x174] sm:$0xff] }
 0x59e   : > { %v3788_v19 = vpop.f32.mrf.mxu2  ;;  %v3579_v14 = vpack.c.bf16 %v3524_v5, %v3523_v52 }
 0x59f   : > { %v5600_v55 = vmul.f32 %v14861_v50, %v5138_v9  ;;  %v3946_v48 = vadd.f32 %v3788_v19, %v13464_v56  ;;  %v4041_v56 = vld [vmem:[%s17700_s4 + $0x175] sm:$0xff]  ;;  %v4614_v9 = vpack.c.bf16 %v4558_v47, %v4557_v45 }
 0x5a0   : > { %v4306_v61 = vpop.f32.mrf.mxu3  ;;  %v4821_v11 = vpop.f32.mrf.mxu0 }
 0x5a1   : > { %5716 = vst.msk [vmem:[#allocation2 + $0xc3] sm:$0xff] %vm761_vm2, %v5600_v55  ;;  %v4981_v43 = vadd.f32 %v4821_v11, %v4463_v63  ;;  %v14865_v13 = vpop.f32.mrf.mxu1  ;;  %v4464_v31 = vadd.f32 %v4306_v61, %v3946_v48  ;;  %v4097_v63 = vpack.c.bf16 %v4042_v26, %v4041_v56  ;;  %v14899_v48 = vpop.permute.xlu0 %5315 }
 0x5a2   : > { %17909 = vst [vmem:[#allocation72_spill] sm:$0xff] %v14899_v48 }
 0x5a3   : > { %v5062_v34 = vadd.f32 %v14470_v49, %v4981_v43 }
 0x5a5   : > { %v5139_v33 = vmax.f32 %v5062_v34, 0.0 }
 0x5a6   : > { %v3790_v22 = vpop.f32.mrf.mxu2 }
 0x5a7   : > { %v5601_v39 = vmul.f32 %v14887_v10, %v5139_v33  ;;  %v3947_v50 = vadd.f32 %v3790_v22, %v13471_v16  ;;  %v4559_v22 = vld [vmem:[%s17700_s4 + $0x176] sm:$0xff] }
 0x5a8   : > { %v4308_v3 = vpop.f32.mrf.mxu3  ;;  %v4824_v19 = vpop.f32.mrf.mxu0 }
 0x5a9   : > { %5717 = vst.msk [vmem:[#allocation2 + $0xcb] sm:$0xff] %vm761_vm2, %v5601_v39  ;;  %v4982_v11 = vadd.f32 %v4824_v19, %v4464_v31  ;;  %v14891_v43 = vpop.f32.mrf.mxu1  ;;  %v5666_v34 = vpack.c.bf16 %v5601_v39, %v5600_v55  ;;  %v4465_v5 = vadd.f32 %v4308_v3, %v3947_v50  ;;  %v3526_v50 = vld [vmem:[%s17700_s4 + $0x18c] sm:$0xff]  ;;  %v4560_v31 = vld [vmem:[%s17700_s4 + $0x17e] sm:$0xff] }
 0x5aa   : > { %v4044_v3 = vld [vmem:[%s17700_s4 + $0x18d] sm:$0xff] }
 0x5ab   : > { %v5063_v28 = vadd.f32 %v14470_v49, %v4982_v11  ;;  %10862 = vmatmul.msk.bf16.gmra.mxu2 %vm761_vm2, %v3579_v14  ;;  %10941 = vmatmul.msk.bf16.gmra.mxu0 %vm761_vm2, %v4614_v9  ;;  %v14925_v14 = vpop.permute.xlu1 %5320 }
 0x5ac   : > { %10973 = vmatmul.msk.bf16.gmra.mxu1 %vm761_vm2, %v5666_v34  ;;  %17910 = vst [vmem:[#allocation73_spill] sm:$0xff] %v14925_v14 }
 0x5ad   : > { %10902 = vmatmul.msk.bf16.gmra.mxu3 %vm761_vm2, %v4097_v63  ;;  %v5140_v61 = vmax.f32 %v5063_v28, 0.0  ;;  %v3525_v28 = vld [vmem:[%s17700_s4 + $0x184] sm:$0xff] }
 0x5ae   : > { %v3793_v52 = vpop.f32.mrf.mxu2  ;;  %v3580_v34 = vpack.c.bf16 %v3526_v50, %v3525_v28 }
 0x5af   : > { %v5602_v45 = vmul.f32 %v14899_v48, %v5140_v61  ;;  %v3948_v56 = vadd.f32 %v3793_v52, %v13492_v4  ;;  %v4043_v4 = vld [vmem:[%s17700_s4 + $0x185] sm:$0xff]  ;;  %v4615_v61 = vpack.c.bf16 %v4560_v31, %v4559_v22 }
 0x5b0   : > { %v4311_v55 = vpop.f32.mrf.mxu3  ;;  %v4826_v47 = vpop.f32.mrf.mxu0 }
 0x5b1   : > { %5718 = vst.msk [vmem:[#allocation2 + $0xd3] sm:$0xff] %vm761_vm2, %v5602_v45  ;;  %v4983_v16 = vadd.f32 %v4826_v47, %v4465_v5  ;;  %v14903_v33 = vpop.f32.mrf.mxu1  ;;  %v4466_v19 = vadd.f32 %v4311_v55, %v3948_v56  ;;  %v4098_v5 = vpack.c.bf16 %v4044_v3, %v4043_v4  ;;  %v14937_v56 = vpop.permute.xlu2 %5325 }
 0x5b2   : > { %17911 = vst [vmem:[#allocation74_spill] sm:$0xff] %v14937_v56 }
 0x5b3   : > { %v5064_v26 = vadd.f32 %v14470_v49, %v4983_v16 }
 0x5b5   : > { %v5141_v39 = vmax.f32 %v5064_v26, 0.0 }
 0x5b6   : > { %v3795_v9 = vpop.f32.mrf.mxu2 }
 0x5b7   : > { %v5603_v63 = vmul.f32 %v14925_v14, %v5141_v39  ;;  %v3949_v48 = vadd.f32 %v3795_v9, %v13499_v18  ;;  %v4561_v9 = vld [vmem:[%s17700_s4 + $0x186] sm:$0xff] }
 0x5b8   : > { %v4313_v11 = vpop.f32.mrf.mxu3  ;;  %v4829_v52 = vpop.f32.mrf.mxu0 }
 0x5b9   : > { %5719 = vst.msk [vmem:[#allocation2 + $0xdb] sm:$0xff] %vm761_vm2, %v5603_v63  ;;  %v4984_v47 = vadd.f32 %v4829_v52, %v4466_v19  ;;  %v14929_v16 = vpop.f32.mrf.mxu1  ;;  %v5667_v26 = vpack.c.bf16 %v5603_v63, %v5602_v45  ;;  %v4467_v50 = vadd.f32 %v4313_v11, %v3949_v48  ;;  %v3528_v48 = vld [vmem:[%s17700_s4 + $0x19c] sm:$0xff]  ;;  %v4562_v19 = vld [vmem:[%s17700_s4 + $0x18e] sm:$0xff]  ;;  %v14963_v11 = vpop.permute.xlu0 %5330 }
 0x5ba   : > { %17912 = vst [vmem:[#allocation75_spill] sm:$0xff] %v14963_v11 }
 0x5bb   : > { %v5065_v10 = vadd.f32 %v14470_v49, %v4984_v47  ;;  %10863 = vmatmul.msk.bf16.gmra.mxu2 %vm761_vm2, %v3580_v34  ;;  %10942 = vmatmul.msk.bf16.gmra.mxu0 %vm761_vm2, %v4615_v61 }
 0x5bc   : > { %10974 = vmatmul.msk.bf16.gmra.mxu1 %vm761_vm2, %v5667_v26  ;;  %v4616_v26 = vpack.c.bf16 %v4562_v19, %v4561_v9 }
 0x5bd   : > { %10903 = vmatmul.msk.bf16.gmra.mxu3 %vm761_vm2, %v4098_v5  ;;  %v5142_v55 = vmax.f32 %v5065_v10, 0.0  ;;  %v3527_v10 = vld [vmem:[%s17700_s4 + $0x194] sm:$0xff] }
 0x5be   : > { %v3798_v28 = vpop.f32.mrf.mxu2  ;;  %v3581_v47 = vpack.c.bf16 %v3528_v48, %v3527_v10 }
 0x5bf   : > { %v5604_v22 = vmul.f32 %v14937_v56, %v5142_v55  ;;  %v3950_v4 = vadd.f32 %v3798_v28, %v13520_v6  ;;  %v4045_v6 = vld [vmem:[%s17700_s4 + $0x195] sm:$0xff]  ;;  %v14971_v56 = vld [vmem:[%s11468_s22] ss:$0 sm:$0xff] }
 0x5c0   : > { %v4316_v45 = vpop.f32.mrf.mxu3  ;;  %v4831_v31 = vpop.f32.mrf.mxu0 }
 0x5c1   : > { %5720 = vst.msk [vmem:[#allocation2 + $0xe3] sm:$0xff] %vm761_vm2, %v5604_v22  ;;  %v4985_v18 = vadd.f32 %v4831_v31, %v4467_v50  ;;  %v14941_v39 = vpop.f32.mrf.mxu1  ;;  %v4468_v61 = vadd.f32 %v4316_v45, %v3950_v4  ;;  %v14978_v4 = vpop.permute.xlu1 %5335 }
 0x5c2   : > { %17913 = vst [vmem:[#allocation76_spill] sm:$0xff] %v14978_v4 }
 0x5c3   : > { %v5066_v3 = vadd.f32 %v14470_v49, %v4985_v18  ;;  %v4046_v49 = vld [vmem:[%s17700_s4 + $0x19d] sm:$0xff] }
 0x5c4   : > { %v4099_v28 = vpack.c.bf16 %v4046_v49, %v4045_v6 }
 0x5c5   : > { %v5143_v63 = vmax.f32 %v5066_v3, 0.0 }
 0x5c6   : > { %v3800_v34 = vpop.f32.mrf.mxu2 }
 0x5c7   : > { %v5605_v52 = vmul.f32 %v14963_v11, %v5143_v63  ;;  %v3951_v3 = vadd.f32 %v3800_v34, %v13527_v42  ;;  %v3530_v34 = vld [vmem:[%s17700_s4 + $0x1ac] sm:$0xff] }
 0x5c8   : > { %v4318_v5 = vpop.f32.mrf.mxu3  ;;  %v4834_v55 = vpop.f32.mrf.mxu0 }
 0x5c9   : > { %5721 = vst.msk [vmem:[#allocation2 + $0xeb] sm:$0xff] %vm761_vm2, %v5605_v52  ;;  %v4986_v50 = vadd.f32 %v4834_v55, %v4468_v61  ;;  %v14967_v31 = vpop.f32.mrf.mxu1  ;;  %v5668_v18 = vpack.c.bf16 %v5605_v52, %v5604_v22  ;;  %v4469_v48 = vadd.f32 %v4318_v5, %v3951_v3  ;;  %v4563_v61 = vld [vmem:[%s17700_s4 + $0x196] sm:$0xff]  ;;  %v4564_v52 = vld [vmem:[%s17700_s4 + $0x19e] sm:$0xff] }
 0x5cb   : > { %v5067_v14 = vadd.f32 %v14971_v56, %v4986_v50  ;;  %10864 = vmatmul.msk.bf16.gmra.mxu2 %vm761_vm2, %v3581_v47  ;;  %10943 = vmatmul.msk.bf16.gmra.mxu0 %vm761_vm2, %v4616_v26  ;;  %v4048_v47 = vld [vmem:[%s17700_s4 + $0x1ad] sm:$0xff]  ;;  %v15004_v26 = vpop.permute.xlu2 %5340 }
 0x5cc   : > { %10975 = vmatmul.msk.bf16.gmra.mxu1 %vm761_vm2, %v5668_v18  ;;  %17914 = vst [vmem:[#allocation77_spill] sm:$0xff] %v15004_v26 }
 0x5cd   : > { %10904 = vmatmul.msk.bf16.gmra.mxu3 %vm761_vm2, %v4099_v28  ;;  %v5144_v45 = vmax.f32 %v5067_v14, 0.0  ;;  %v3529_v14 = vld [vmem:[%s17700_s4 + $0x1a4] sm:$0xff] }
 0x5ce   : > { %v3803_v10 = vpop.f32.mrf.mxu2  ;;  %v3582_v3 = vpack.c.bf16 %v3530_v34, %v3529_v14 }
 0x5cf   : > { %v5606_v22 = vmul.f32 %v14978_v4, %v5144_v45  ;;  %v3952_v6 = vadd.f32 %v3803_v10, %v13548_v1  ;;  %v4047_v1 = vld [vmem:[%s17700_s4 + $0x1a5] sm:$0xff]  ;;  %v4617_v45 = vpack.c.bf16 %v4564_v52, %v4563_v61 }
 0x5d0   : > { %v4321_v42 = vpop.f32.mrf.mxu3  ;;  %v4836_v9 = vpop.f32.mrf.mxu0 }
 0x5d1   : > { %5722 = vst.msk [vmem:[#allocation2 + $0xf3] sm:$0xff] %vm761_vm2, %v5606_v22  ;;  %v4987_v19 = vadd.f32 %v4836_v9, %v4469_v48  ;;  %v14982_v63 = vpop.f32.mrf.mxu1  ;;  %v4470_v28 = vadd.f32 %v4321_v42, %v3952_v6  ;;  %v4100_v48 = vpack.c.bf16 %v4048_v47, %v4047_v1  ;;  %v15016_v6 = vpop.permute.xlu0 %5345 }
 0x5d2   : > { %17915 = vst [vmem:[#allocation78_spill] sm:$0xff] %v15016_v6 }
 0x5d3   : > { %v5068_v49 = vadd.f32 %v14971_v56, %v4987_v19 }
 0x5d5   : > { %v5145_v5 = vmax.f32 %v5068_v49, 0.0 }
 0x5d6   : > { %v3805_v55 = vpop.f32.mrf.mxu2 }
 0x5d7   : > { %v5607_v50 = vmul.f32 %v15004_v26, %v5145_v5  ;;  %v3953_v4 = vadd.f32 %v3805_v55, %v13555_v2  ;;  %v4565_v55 = vld [vmem:[%s17700_s4 + $0x1a6] sm:$0xff] }
 0x5d8   : > { %v4323_v18 = vpop.f32.mrf.mxu3  ;;  %v4839_v10 = vpop.f32.mrf.mxu0 }
 0x5d9   : > { %5723 = vst.msk [vmem:[#allocation2 + $0xfb] sm:$0xff] %vm761_vm2, %v5607_v50  ;;  %v4988_v9 = vadd.f32 %v4839_v10, %v4470_v28  ;;  %v15008_v19 = vpop.f32.mrf.mxu1  ;;  %v5669_v49 = vpack.c.bf16 %v5607_v50, %v5606_v22  ;;  %v4471_v34 = vadd.f32 %v4323_v18, %v3953_v4  ;;  %v3532_v4 = vld [vmem:[%s17700_s4 + $0x1bc] sm:$0xff]  ;;  %v4566_v28 = vld [vmem:[%s17700_s4 + $0x1ae] sm:$0xff] }
 0x5da   : > { %v4050_v18 = vld [vmem:[%s17700_s4 + $0x1bd] sm:$0xff] }
 0x5db   : > { %v5069_v11 = vadd.f32 %v14971_v56, %v4988_v9  ;;  %10865 = vmatmul.msk.bf16.gmra.mxu2 %vm761_vm2, %v3582_v3  ;;  %10944 = vmatmul.msk.bf16.gmra.mxu0 %vm761_vm2, %v4617_v45  ;;  %v15042_v3 = vpop.permute.xlu1 %5350 }
 0x5dc   : > { %10976 = vmatmul.msk.bf16.gmra.mxu1 %vm761_vm2, %v5669_v49  ;;  %17916 = vst [vmem:[#allocation79_spill] sm:$0xff] %v15042_v3 }
 0x5dd   : > { %10905 = vmatmul.msk.bf16.gmra.mxu3 %vm761_vm2, %v4100_v48  ;;  %v5146_v42 = vmax.f32 %v5069_v11, 0.0  ;;  %v3531_v11 = vld [vmem:[%s17700_s4 + $0x1b4] sm:$0xff] }
 0x5de   : > { %v3808_v14 = vpop.f32.mrf.mxu2  ;;  %v3583_v49 = vpack.c.bf16 %v3532_v4, %v3531_v11 }
 0x5df   : > { %v5608_v61 = vmul.f32 %v15016_v6, %v5146_v42  ;;  %v3954_v1 = vadd.f32 %v3808_v14, %v13576_v59  ;;  %v4049_v59 = vld [vmem:[%s17700_s4 + $0x1b5] sm:$0xff]  ;;  %v4618_v42 = vpack.c.bf16 %v4566_v28, %v4565_v55 }
 0x5e0   : > { %v4326_v22 = vpop.f32.mrf.mxu3  ;;  %v4841_v52 = vpop.f32.mrf.mxu0 }
 0x5e1   : > { %5724 = vst.msk [vmem:[#allocation2 + $0x103] sm:$0xff] %vm761_vm2, %v5608_v61  ;;  %v4989_v2 = vadd.f32 %v4841_v52, %v4471_v34  ;;  %v15020_v5 = vpop.f32.mrf.mxu1  ;;  %v4472_v10 = vadd.f32 %v4326_v22, %v3954_v1  ;;  %v4101_v34 = vpack.c.bf16 %v4050_v18, %v4049_v59  ;;  %v15054_v1 = vpop.permute.xlu2 %5355 }
 0x5e2   : > { %17917 = vst [vmem:[#allocation80_spill] sm:$0xff] %v15054_v1 }
 0x5e3   : > { %v5070_v47 = vadd.f32 %v14971_v56, %v4989_v2 }
 0x5e5   : > { %v5147_v50 = vmax.f32 %v5070_v47, 0.0 }
 0x5e6   : > { %v3810_v45 = vpop.f32.mrf.mxu2 }
 0x5e7   : > { %v5609_v48 = vmul.f32 %v15042_v3, %v5147_v50  ;;  %v3955_v6 = vadd.f32 %v3810_v45, %v13583_v29  ;;  %v4567_v45 = vld [vmem:[%s17700_s4 + $0x1b6] sm:$0xff] }
 0x5e8   : > { %v4328_v9 = vpop.f32.mrf.mxu3  ;;  %v4844_v14 = vpop.f32.mrf.mxu0 }
 0x5e9   : > { %5725 = vst.msk [vmem:[#allocation2 + $0x10b] sm:$0xff] %vm761_vm2, %v5609_v48  ;;  %v4990_v52 = vadd.f32 %v4844_v14, %v4472_v10  ;;  %v15046_v2 = vpop.f32.mrf.mxu1  ;;  %v5670_v47 = vpack.c.bf16 %v5609_v48, %v5608_v61  ;;  %v4473_v4 = vadd.f32 %v4328_v9, %v3955_v6  ;;  %v3534_v6 = vld [vmem:[%s17700_s4 + $0x1cc] sm:$0xff]  ;;  %v4568_v10 = vld [vmem:[%s17700_s4 + $0x1be] sm:$0xff] }
 0x5ea   : > { %v4052_v9 = vld [vmem:[%s17700_s4 + $0x1cd] sm:$0xff] }
 0x5eb   : > { %v5071_v26 = vadd.f32 %v14971_v56, %v4990_v52  ;;  %10866 = vmatmul.msk.bf16.gmra.mxu2 %vm761_vm2, %v3583_v49  ;;  %10945 = vmatmul.msk.bf16.gmra.mxu0 %vm761_vm2, %v4618_v42  ;;  %v15080_v49 = vpop.permute.xlu0 %5360 }
 0x5ec   : > { %10977 = vmatmul.msk.bf16.gmra.mxu1 %vm761_vm2, %v5670_v47  ;;  %17918 = vst [vmem:[#allocation81_spill] sm:$0xff] %v15080_v49 }
 0x5ed   : > { %10906 = vmatmul.msk.bf16.gmra.mxu3 %vm761_vm2, %v4101_v34  ;;  %v5148_v22 = vmax.f32 %v5071_v26, 0.0  ;;  %v3533_v26 = vld [vmem:[%s17700_s4 + $0x1c4] sm:$0xff] }
 0x5ee   : > { %v3813_v11 = vpop.f32.mrf.mxu2  ;;  %v3584_v47 = vpack.c.bf16 %v3534_v6, %v3533_v26 }
 0x5ef   : > { %v5610_v55 = vmul.f32 %v15054_v1, %v5148_v22  ;;  %v3956_v59 = vadd.f32 %v3813_v11, %v13604_v8  ;;  %v4051_v8 = vld [vmem:[%s17700_s4 + $0x1c5] sm:$0xff]  ;;  %v4619_v22 = vpack.c.bf16 %v4568_v10, %v4567_v45 }
 0x5f0   : > { %v4331_v61 = vpop.f32.mrf.mxu3  ;;  %v4846_v28 = vpop.f32.mrf.mxu0  ;;  %v17919_v1 = vld [vmem:[#allocation34_spill] sm:$0xff] }
 0x5f1   : > { %5726 = vst.msk [vmem:[#allocation2 + $0x113] sm:$0xff] %vm761_vm2, %v5610_v55  ;;  %v4991_v29 = vadd.f32 %v4846_v28, %v4473_v4  ;;  %v15058_v50 = vpop.f32.mrf.mxu1  ;;  %v4474_v14 = vadd.f32 %v4331_v61, %v3956_v59  ;;  %v4102_v4 = vpack.c.bf16 %v4052_v9, %v4051_v8  ;;  %v15092_v59 = vpop.permute.xlu1 %5365 }
 0x5f2   : > { %17920 = vst [vmem:[#allocation34_spill] sm:$0xff] %v15092_v59 }
 0x5f3   : > { %v5072_v18 = vadd.f32 %v14971_v56, %v4991_v29 }
 0x5f5   : > { %v5149_v48 = vmax.f32 %v5072_v18, 0.0 }
 0x5f6   : > { %v3815_v42 = vpop.f32.mrf.mxu2 }
 0x5f7   : > { %v5611_v34 = vmul.f32 %v15080_v49, %v5149_v48  ;;  %v3957_v3 = vadd.f32 %v3815_v42, %v17919_v1  ;;  %v4569_v42 = vld [vmem:[%s17700_s4 + $0x1c6] sm:$0xff] }
 0x5f8   : > { %v4333_v52 = vpop.f32.mrf.mxu3  ;;  %v4849_v11 = vpop.f32.mrf.mxu0 }
 0x5f9   : > { %5727 = vst.msk [vmem:[#allocation2 + $0x11b] sm:$0xff] %vm761_vm2, %v5611_v34  ;;  %v4992_v28 = vadd.f32 %v4849_v11, %v4474_v14  ;;  %v15084_v29 = vpop.f32.mrf.mxu1  ;;  %v5671_v18 = vpack.c.bf16 %v5611_v34, %v5610_v55  ;;  %v4475_v6 = vadd.f32 %v4333_v52, %v3957_v3  ;;  %v3536_v3 = vld [vmem:[%s17700_s4 + $0x1dc] sm:$0xff]  ;;  %v4570_v14 = vld [vmem:[%s17700_s4 + $0x1ce] sm:$0xff] }
 0x5fa   : > { %v4054_v52 = vld [vmem:[%s17700_s4 + $0x1dd] sm:$0xff] }
 0x5fb   : > { %v5073_v51 = vadd.f32 %v14971_v56, %v4992_v28  ;;  %10867 = vmatmul.msk.bf16.gmra.mxu2 %vm761_vm2, %v3584_v47  ;;  %10946 = vmatmul.msk.bf16.gmra.mxu0 %vm761_vm2, %v4619_v22  ;;  %v15118_v47 = vpop.permute.xlu2 %5370 }
 0x5fc   : > { %10978 = vmatmul.msk.bf16.gmra.mxu1 %vm761_vm2, %v5671_v18  ;;  %17921 = vst [vmem:[#allocation82_spill] sm:$0xff] %v15118_v47 }
 0x5fd   : > { %10907 = vmatmul.msk.bf16.gmra.mxu3 %vm761_vm2, %v4102_v4  ;;  %v5150_v61 = vmax.f32 %v5073_v51, 0.0  ;;  %v3535_v51 = vld [vmem:[%s17700_s4 + $0x1d4] sm:$0xff] }
 0x5fe   : > { %v3818_v26 = vpop.f32.mrf.mxu2  ;;  %v3585_v18 = vpack.c.bf16 %v3536_v3, %v3535_v51 }
 0x5ff   : > { %v5612_v45 = vmul.f32 %v15092_v59, %v5150_v61  ;;  %v3958_v8 = vadd.f32 %v3818_v26, %v13635_v58  ;;  %v4053_v58 = vld [vmem:[%s17700_s4 + $0x1d5] sm:$0xff]  ;;  %v4620_v61 = vpack.c.bf16 %v4570_v14, %v4569_v42 }
 0x600   : > { %v4336_v55 = vpop.f32.mrf.mxu3  ;;  %v4851_v10 = vpop.f32.mrf.mxu0 }
 0x601   : > { %5728 = vst.msk [vmem:[#allocation2 + $0x123] sm:$0xff] %vm761_vm2, %v5612_v45  ;;  %v4993_v1 = vadd.f32 %v4851_v10, %v4475_v6  ;;  %v15096_v48 = vpop.f32.mrf.mxu1  ;;  %v4476_v11 = vadd.f32 %v4336_v55, %v3958_v8  ;;  %v4103_v6 = vpack.c.bf16 %v4054_v52, %v4053_v58  ;;  %v15130_v8 = vpop.permute.xlu0 %5375 }
 0x602   : > { %17922 = vst [vmem:[#allocation83_spill] sm:$0xff] %v15130_v8 }
 0x603   : > { %v5074_v9 = vadd.f32 %v14971_v56, %v4993_v1 }
 0x605   : > { %v5151_v34 = vmax.f32 %v5074_v9, 0.0 }
 0x606   : > { %v3820_v22 = vpop.f32.mrf.mxu2 }
 0x607   : > { %v5613_v4 = vmul.f32 %v15118_v47, %v5151_v34  ;;  %v3959_v59 = vadd.f32 %v3820_v22, %v13645_v20  ;;  %v4571_v22 = vld [vmem:[%s17700_s4 + $0x1d6] sm:$0xff] }
 0x608   : > { %v4338_v28 = vpop.f32.mrf.mxu3  ;;  %v4854_v26 = vpop.f32.mrf.mxu0 }
 0x609   : > { %5729 = vst.msk [vmem:[#allocation2 + $0x12b] sm:$0xff] %vm761_vm2, %v5613_v4  ;;  %v4994_v10 = vadd.f32 %v4854_v26, %v4476_v11  ;;  %v15122_v1 = vpop.f32.mrf.mxu1  ;;  %v5672_v9 = vpack.c.bf16 %v5613_v4, %v5612_v45  ;;  %v4477_v3 = vadd.f32 %v4338_v28, %v3959_v59  ;;  %v3538_v59 = vld [vmem:[%s17700_s4 + $0x1ec] sm:$0xff]  ;;  %v4572_v11 = vld [vmem:[%s17700_s4 + $0x1de] sm:$0xff] }
 0x60a   : > { %v4056_v28 = vld [vmem:[%s17700_s4 + $0x1ed] sm:$0xff] }
 0x60b   : > { %v5075_v49 = vadd.f32 %v14971_v56, %v4994_v10  ;;  %10868 = vmatmul.msk.bf16.gmra.mxu2 %vm761_vm2, %v3585_v18  ;;  %10947 = vmatmul.msk.bf16.gmra.mxu0 %vm761_vm2, %v4620_v61  ;;  %v15156_v18 = vpop.permute.xlu1 %5380 }
 0x60c   : > { %10979 = vmatmul.msk.bf16.gmra.mxu1 %vm761_vm2, %v5672_v9  ;;  %17923 = vst [vmem:[#allocation84_spill] sm:$0xff] %v15156_v18 }
 0x60d   : > { %10908 = vmatmul.msk.bf16.gmra.mxu3 %vm761_vm2, %v4103_v6  ;;  %v5152_v55 = vmax.f32 %v5075_v49, 0.0  ;;  %v3537_v49 = vld [vmem:[%s17700_s4 + $0x1e4] sm:$0xff] }
 0x60e   : > { %v3823_v51 = vpop.f32.mrf.mxu2  ;;  %v3586_v9 = vpack.c.bf16 %v3538_v59, %v3537_v49 }
 0x60f   : > { %v5614_v42 = vmul.f32 %v15130_v8, %v5152_v55  ;;  %v3960_v58 = vadd.f32 %v3823_v51, %v13672_v44  ;;  %v4055_v44 = vld [vmem:[%s17700_s4 + $0x1e5] sm:$0xff]  ;;  %v4621_v55 = vpack.c.bf16 %v4572_v11, %v4571_v22 }
 0x610   : > { %v4341_v45 = vpop.f32.mrf.mxu3  ;;  %v4856_v14 = vpop.f32.mrf.mxu0 }
 0x611   : > { %5730 = vst.msk [vmem:[#allocation2 + $0x133] sm:$0xff] %vm761_vm2, %v5614_v42  ;;  %v4995_v20 = vadd.f32 %v4856_v14, %v4477_v3  ;;  %v15134_v34 = vpop.f32.mrf.mxu1  ;;  %v4478_v26 = vadd.f32 %v4341_v45, %v3960_v58  ;;  %v4104_v3 = vpack.c.bf16 %v4056_v28, %v4055_v44  ;;  %v15168_v58 = vpop.permute.xlu2 %5385 }
 0x612   : > { %17924 = vst [vmem:[#allocation85_spill] sm:$0xff] %v15168_v58 }
 0x613   : > { %v5076_v52 = vadd.f32 %v14971_v56, %v4995_v20 }
 0x615   : > { %v5153_v4 = vmax.f32 %v5076_v52, 0.0 }
 0x616   : > { %v3825_v61 = vpop.f32.mrf.mxu2 }
 0x617   : > { %v5615_v6 = vmul.f32 %v15156_v18, %v5153_v4  ;;  %v3961_v8 = vadd.f32 %v3825_v61, %v13685_v53  ;;  %v4573_v61 = vld [vmem:[%s17700_s4 + $0x1e6] sm:$0xff] }
 0x618   : > { %v4343_v10 = vpop.f32.mrf.mxu3  ;;  %v4859_v51 = vpop.f32.mrf.mxu0 }
 0x619   : > { %5731 = vst.msk [vmem:[#allocation2 + $0x13b] sm:$0xff] %vm761_vm2, %v5615_v6  ;;  %v4996_v14 = vadd.f32 %v4859_v51, %v4478_v26  ;;  %v15160_v20 = vpop.f32.mrf.mxu1  ;;  %v5673_v52 = vpack.c.bf16 %v5615_v6, %v5614_v42  ;;  %v4479_v59 = vadd.f32 %v4343_v10, %v3961_v8  ;;  %v3540_v8 = vld [vmem:[%s17700_s4 + $0x1fc] sm:$0xff]  ;;  %v4574_v26 = vld [vmem:[%s17700_s4 + $0x1ee] sm:$0xff] }
 0x61a   : > { %v4058_v10 = vld [vmem:[%s17700_s4 + $0x1fd] sm:$0xff] }
 0x61b   : > { %v5077_v47 = vadd.f32 %v14971_v56, %v4996_v14  ;;  %10869 = vmatmul.msk.bf16.gmra.mxu2 %vm761_vm2, %v3586_v9  ;;  %10948 = vmatmul.msk.bf16.gmra.mxu0 %vm761_vm2, %v4621_v55  ;;  %v15194_v9 = vpop.permute.xlu0 %5390 }
 0x61c   : > { %10980 = vmatmul.msk.bf16.gmra.mxu1 %vm761_vm2, %v5673_v52  ;;  %17925 = vst [vmem:[#allocation86_spill] sm:$0xff] %v15194_v9 }
 0x61d   : > { %10909 = vmatmul.msk.bf16.gmra.mxu3 %vm761_vm2, %v4104_v3  ;;  %v5154_v45 = vmax.f32 %v5077_v47, 0.0  ;;  %v3539_v47 = vld [vmem:[%s17700_s4 + $0x1f4] sm:$0xff] }
 0x61e   : > { %v3828_v49 = vpop.f32.mrf.mxu2  ;;  %v3587_v52 = vpack.c.bf16 %v3540_v8, %v3539_v47 }
 0x61f   : > { %v5616_v22 = vmul.f32 %v15168_v58, %v5154_v45  ;;  %v3962_v44 = vadd.f32 %v3828_v49, %v13712_v38  ;;  %v4057_v38 = vld [vmem:[%s17700_s4 + $0x1f5] sm:$0xff]  ;;  %v4622_v45 = vpack.c.bf16 %v4574_v26, %v4573_v61 }
 0x620   : > { %v4346_v42 = vpop.f32.mrf.mxu3  ;;  %v4861_v11 = vpop.f32.mrf.mxu0 }
 0x621   : > { %5732 = vst.msk [vmem:[#allocation2 + $0x143] sm:$0xff] %vm761_vm2, %v5616_v22  ;;  %v4997_v53 = vadd.f32 %v4861_v11, %v4479_v59  ;;  %v15172_v4 = vpop.f32.mrf.mxu1  ;;  %v4480_v51 = vadd.f32 %v4346_v42, %v3962_v44  ;;  %v4105_v59 = vpack.c.bf16 %v4058_v10, %v4057_v38  ;;  %v15206_v44 = vpop.permute.xlu1 %5395  ;;  %v17927_v38 = vld [vmem:[#allocation35_spill] sm:$0xff] }
 0x622   : > { %17926 = vst [vmem:[#allocation87_spill] sm:$0xff] %v15206_v44 }
 0x623   : > { %v5078_v28 = vadd.f32 %v14971_v56, %v4997_v53 }
 0x625   : > { %v5155_v6 = vmax.f32 %v5078_v28, 0.0 }
 0x626   : > { %v3830_v55 = vpop.f32.mrf.mxu2 }
 0x627   : > { %v5617_v3 = vmul.f32 %v15194_v9, %v5155_v6  ;;  %v3963_v58 = vadd.f32 %v3830_v55, %v13725_v7  ;;  %v17929_v9 = vld [vmem:[#allocation36_spill] sm:$0xff] }
 0x628   : > { %v4348_v14 = vpop.f32.mrf.mxu3  ;;  %v4864_v49 = vpop.f32.mrf.mxu0 }
 0x629   : > { %5733 = vst.msk [vmem:[#allocation2 + $0x14b] sm:$0xff] %vm761_vm2, %v5617_v3  ;;  %v4998_v11 = vadd.f32 %v4864_v49, %v4480_v51  ;;  %v15198_v53 = vpop.f32.mrf.mxu1  ;;  %v5674_v28 = vpack.c.bf16 %v5617_v3, %v5616_v22  ;;  %v4481_v8 = vadd.f32 %v4348_v14, %v3963_v58  ;;  %v3542_v58 = vld [vmem:[%s17700_s4 + $0x20c] sm:$0xff]  ;;  %v4575_v51 = vld [vmem:[%s17700_s4 + $0x1f6] sm:$0xff]  ;;  %v4576_v3 = vld [vmem:[%s17700_s4 + $0x1fe] sm:$0xff]  ;;  %v15232_v49 = vpop.permute.xlu2 %5400 }
 0x62a   : > { %17928 = vst [vmem:[#allocation35_spill] sm:$0xff] %v15232_v49 }
 0x62b   : > { %v5079_v18 = vadd.f32 %v14971_v56, %v4998_v11  ;;  %10870 = vmatmul.msk.bf16.gmra.mxu2 %vm761_vm2, %v3587_v52  ;;  %10949 = vmatmul.msk.bf16.gmra.mxu0 %vm761_vm2, %v4622_v45  ;;  %v4059_v52 = vld [vmem:[%s17700_s4 + $0x205] sm:$0xff]  ;;  %v4060_v45 = vld [vmem:[%s17700_s4 + $0x20d] sm:$0xff] }
 0x62c   : > { %10981 = vmatmul.msk.bf16.gmra.mxu1 %vm761_vm2, %v5674_v28 }
 0x62d   : > { %10910 = vmatmul.msk.bf16.gmra.mxu3 %vm761_vm2, %v4105_v59  ;;  %v5156_v42 = vmax.f32 %v5079_v18, 0.0  ;;  %v3541_v18 = vld [vmem:[%s17700_s4 + $0x204] sm:$0xff] }
 0x62e   : > { %v3833_v47 = vpop.f32.mrf.mxu2 }
 0x62f   : > { %v5618_v61 = vmul.f32 %v15206_v44, %v5156_v42  ;;  %v3964_v10 = vadd.f32 %v3833_v47, %v17927_v38  ;;  %v3588_v47 = vpack.c.bf16 %v3542_v58, %v3541_v18 }
 0x630   : > { %v4351_v22 = vpop.f32.mrf.mxu3  ;;  %v4866_v26 = vpop.f32.mrf.mxu0 }
 0x631   : > { %5734 = vst.msk [vmem:[#allocation2 + $0x153] sm:$0xff] %vm761_vm2, %v5618_v61  ;;  %v4999_v7 = vadd.f32 %v4866_v26, %v4481_v8  ;;  %v15210_v6 = vpop.f32.mrf.mxu1  ;;  %v4482_v11 = vadd.f32 %v4351_v22, %v3964_v10  ;;  %v4623_v8 = vpack.c.bf16 %v4576_v3, %v4575_v51  ;;  %v15244_v10 = vpop.permute.xlu0 %5405 }
 0x632   : > { %17930 = vst [vmem:[#allocation36_spill] sm:$0xff] %v15244_v10 }
 0x633   : > { %v5080_v55 = vadd.f32 %v14971_v56, %v4999_v7  ;;  %v4106_v7 = vpack.c.bf16 %v4060_v45, %v4059_v52  ;;  %v17931_v52 = vld [vmem:[#allocation37_spill] sm:$0xff] }
 0x635   : > { %v5157_v14 = vmax.f32 %v5080_v55, 0.0 }
 0x636   : > { %v3835_v59 = vpop.f32.mrf.mxu2 }
 0x637   : > { %v5619_v28 = vmul.f32 %v15232_v49, %v5157_v14  ;;  %v3965_v17 = vadd.f32 %v3835_v59, %v17929_v9  ;;  %v17933_v49 = vld [vmem:[#allocation3_spill] sm:$0xff] }
 0x638   : > { %v4353_v42 = vpop.f32.mrf.mxu3  ;;  %v4869_v26 = vpop.f32.mrf.mxu0 }
 0x639   : > { %5735 = vst.msk [vmem:[#allocation2 + $0x15b] sm:$0xff] %vm761_vm2, %v5619_v28  ;;  %v5000_v38 = vadd.f32 %v4869_v26, %v4482_v11  ;;  %v15236_v55 = vpop.f32.mrf.mxu1  ;;  %v5675_v44 = vpack.c.bf16 %v5619_v28, %v5618_v61  ;;  %v4483_v58 = vadd.f32 %v4353_v42, %v3965_v17  ;;  %v3544_v17 = vld [vmem:[%s17700_s4 + $0x21c] sm:$0xff]  ;;  %v4578_v11 = vld [vmem:[%s17700_s4 + $0x20e] sm:$0xff] }
 0x63a   : > { %v4061_v42 = vld [vmem:[%s17700_s4 + $0x215] sm:$0xff] }
 0x63b   : > { %v5081_v23 = vadd.f32 %v14971_v56, %v5000_v38  ;;  %10871 = vmatmul.msk.bf16.gmra.mxu2 %vm761_vm2, %v3588_v47  ;;  %10950 = vmatmul.msk.bf16.gmra.mxu0 %vm761_vm2, %v4623_v8  ;;  %v4062_v47 = vld [vmem:[%s17700_s4 + $0x21d] sm:$0xff]  ;;  %v15270_v8 = vpop.permute.xlu1 %5410 }
 0x63c   : > { %10982 = vmatmul.msk.bf16.gmra.mxu1 %vm761_vm2, %v5675_v44  ;;  %v4577_v44 = vld [vmem:[%s17700_s4 + $0x206] sm:$0xff]  ;;  %17932 = vst [vmem:[#allocation37_spill] sm:$0xff] %v15270_v8 }
 0x63d   : > { %10911 = vmatmul.msk.bf16.gmra.mxu3 %vm761_vm2, %v4106_v7  ;;  %v5158_v22 = vmax.f32 %v5081_v23, 0.0  ;;  %v3543_v23 = vld [vmem:[%s17700_s4 + $0x214] sm:$0xff] }
 0x63e   : > { %v3838_v18 = vpop.f32.mrf.mxu2 }
 0x63f   : > { %v5620_v51 = vmul.f32 %v15244_v10, %v5158_v22  ;;  %v3966_v45 = vadd.f32 %v3838_v18, %v17931_v52  ;;  %v3589_v18 = vpack.c.bf16 %v3544_v17, %v3543_v23 }
 0x640   : > { %v4356_v61 = vpop.f32.mrf.mxu3  ;;  %v4871_v3 = vpop.f32.mrf.mxu0 }
 0x641   : > { %5736 = vst.msk [vmem:[#allocation2 + $0x163] sm:$0xff] %vm761_vm2, %v5620_v51  ;;  %v5001_v9 = vadd.f32 %v4871_v3, %v4483_v58  ;;  %v15248_v14 = vpop.f32.mrf.mxu1  ;;  %v4484_v7 = vadd.f32 %v4356_v61, %v3966_v45  ;;  %v4624_v58 = vpack.c.bf16 %v4578_v11, %v4577_v44  ;;  %v15282_v45 = vpop.permute.xlu2 %5415 }
 0x642   : > { %17934 = vst [vmem:[#allocation3_spill] sm:$0xff] %v15282_v45 }
 0x643   : > { %v5082_v59 = vadd.f32 %v14971_v56, %v5001_v9  ;;  %v4107_v9 = vpack.c.bf16 %v4062_v47, %v4061_v42  ;;  %v17935_v42 = vld [vmem:[#allocation4_spill] sm:$0xff] }
 0x645   : > { %v5159_v28 = vmax.f32 %v5082_v59, 0.0 }
 0x646   : > { %v3840_v26 = vpop.f32.mrf.mxu2 }
 0x647   : > { %v5621_v38 = vmul.f32 %v15270_v8, %v5159_v28  ;;  %v3967_v25 = vadd.f32 %v3840_v26, %v17933_v49  ;;  %v17937_v8 = vld [vmem:[#allocation5_spill] sm:$0xff] }
 0x648   : > { %v4358_v22 = vpop.f32.mrf.mxu3  ;;  %v4874_v3 = vpop.f32.mrf.mxu0 }
 0x649   : > { %5737 = vst.msk [vmem:[#allocation2 + $0x16b] sm:$0xff] %vm761_vm2, %v5621_v38  ;;  %v5002_v52 = vadd.f32 %v4874_v3, %v4484_v7  ;;  %v15274_v59 = vpop.f32.mrf.mxu1  ;;  %v5676_v10 = vpack.c.bf16 %v5621_v38, %v5620_v51  ;;  %v4485_v17 = vadd.f32 %v4358_v22, %v3967_v25  ;;  %v3546_v25 = vld [vmem:[%s17700_s4 + $0x22c] sm:$0xff]  ;;  %v4580_v7 = vld [vmem:[%s17700_s4 + $0x21e] sm:$0xff] }
 0x64a   : > { %v4063_v22 = vld [vmem:[%s17700_s4 + $0x225] sm:$0xff] }
 0x64b   : > { %v5083_v60 = vadd.f32 %v14971_v56, %v5002_v52  ;;  %10872 = vmatmul.msk.bf16.gmra.mxu2 %vm761_vm2, %v3589_v18  ;;  %10951 = vmatmul.msk.bf16.gmra.mxu0 %vm761_vm2, %v4624_v58  ;;  %v4064_v18 = vld [vmem:[%s17700_s4 + $0x22d] sm:$0xff]  ;;  %v15308_v58 = vpop.permute.xlu0 %5420 }
 0x64c   : > { %10983 = vmatmul.msk.bf16.gmra.mxu1 %vm761_vm2, %v5676_v10  ;;  %v4579_v10 = vld [vmem:[%s17700_s4 + $0x216] sm:$0xff]  ;;  %17936 = vst [vmem:[#allocation4_spill] sm:$0xff] %v15308_v58 }
 0x64d   : > { %10912 = vmatmul.msk.bf16.gmra.mxu3 %vm761_vm2, %v4107_v9  ;;  %v5160_v61 = vmax.f32 %v5083_v60, 0.0  ;;  %v3545_v60 = vld [vmem:[%s17700_s4 + $0x224] sm:$0xff] }
 0x64e   : > { %v3843_v23 = vpop.f32.mrf.mxu2 }
 0x64f   : > { %v5622_v44 = vmul.f32 %v15282_v45, %v5160_v61  ;;  %v3968_v47 = vadd.f32 %v3843_v23, %v17935_v42  ;;  %v3590_v23 = vpack.c.bf16 %v3546_v25, %v3545_v60 }
 0x650   : > { %v4361_v51 = vpop.f32.mrf.mxu3  ;;  %v4876_v11 = vpop.f32.mrf.mxu0 }
 0x651   : > { %5738 = vst.msk [vmem:[#allocation2 + $0x173] sm:$0xff] %vm761_vm2, %v5622_v44  ;;  %v5003_v49 = vadd.f32 %v4876_v11, %v4485_v17  ;;  %v15286_v28 = vpop.f32.mrf.mxu1  ;;  %v4486_v9 = vadd.f32 %v4361_v51, %v3968_v47  ;;  %v4625_v17 = vpack.c.bf16 %v4580_v7, %v4579_v10  ;;  %v15320_v47 = vpop.permute.xlu1 %5425 }
 0x652   : > { %17938 = vst [vmem:[#allocation5_spill] sm:$0xff] %v15320_v47 }
 0x653   : > { %v5084_v26 = vadd.f32 %v14971_v56, %v5003_v49  ;;  %v4108_v49 = vpack.c.bf16 %v4064_v18, %v4063_v22  ;;  %v17939_v22 = vld [vmem:[#allocation6_spill] sm:$0xff] }
 0x655   : > { %v5161_v38 = vmax.f32 %v5084_v26, 0.0 }
 0x656   : > { %v3845_v3 = vpop.f32.mrf.mxu2 }
 0x657   : > { %v5623_v52 = vmul.f32 %v15308_v58, %v5161_v38  ;;  %v3969_v15 = vadd.f32 %v3845_v3, %v17937_v8  ;;  %v17941_v58 = vld [vmem:[#allocation7_spill] sm:$0xff] }
 0x658   : > { %v4363_v61 = vpop.f32.mrf.mxu3  ;;  %v4879_v11 = vpop.f32.mrf.mxu0 }
 0x659   : > { %5739 = vst.msk [vmem:[#allocation2 + $0x17b] sm:$0xff] %vm761_vm2, %v5623_v52  ;;  %v5004_v42 = vadd.f32 %v4879_v11, %v4486_v9  ;;  %v15312_v26 = vpop.f32.mrf.mxu1  ;;  %v5677_v45 = vpack.c.bf16 %v5623_v52, %v5622_v44  ;;  %v4487_v25 = vadd.f32 %v4363_v61, %v3969_v15  ;;  %v3548_v15 = vld [vmem:[%s17700_s4 + $0x23c] sm:$0xff]  ;;  %v4582_v9 = vld [vmem:[%s17700_s4 + $0x22e] sm:$0xff] }
 0x65a   : > { %v4065_v61 = vld [vmem:[%s17700_s4 + $0x235] sm:$0xff] }
 0x65b   : > { %v5085_v36 = vadd.f32 %v14971_v56, %v5004_v42  ;;  %10873 = vmatmul.msk.bf16.gmra.mxu2 %vm761_vm2, %v3590_v23  ;;  %10952 = vmatmul.msk.bf16.gmra.mxu0 %vm761_vm2, %v4625_v17  ;;  %v4066_v23 = vld [vmem:[%s17700_s4 + $0x23d] sm:$0xff]  ;;  %v15346_v17 = vpop.permute.xlu2 %5430 }
 0x65c   : > { %10984 = vmatmul.msk.bf16.gmra.mxu1 %vm761_vm2, %v5677_v45  ;;  %v4581_v45 = vld [vmem:[%s17700_s4 + $0x226] sm:$0xff]  ;;  %17940 = vst [vmem:[#allocation6_spill] sm:$0xff] %v15346_v17 }
 0x65d   : > { %10913 = vmatmul.msk.bf16.gmra.mxu3 %vm761_vm2, %v4108_v49  ;;  %v5162_v51 = vmax.f32 %v5085_v36, 0.0  ;;  %v3547_v36 = vld [vmem:[%s17700_s4 + $0x234] sm:$0xff] }
 0x65e   : > { %v3848_v60 = vpop.f32.mrf.mxu2 }
 0x65f   : > { %v5624_v10 = vmul.f32 %v15320_v47, %v5162_v51  ;;  %v3970_v18 = vadd.f32 %v3848_v60, %v17939_v22  ;;  %v3591_v60 = vpack.c.bf16 %v3548_v15, %v3547_v36 }
 0x660   : > { %v4366_v44 = vpop.f32.mrf.mxu3  ;;  %v4881_v7 = vpop.f32.mrf.mxu0 }
 0x661   : > { %5740 = vst.msk [vmem:[#allocation2 + $0x183] sm:$0xff] %vm761_vm2, %v5624_v10  ;;  %v5005_v8 = vadd.f32 %v4881_v7, %v4487_v25  ;;  %v15324_v38 = vpop.f32.mrf.mxu1  ;;  %v4488_v49 = vadd.f32 %v4366_v44, %v3970_v18  ;;  %v4626_v25 = vpack.c.bf16 %v4582_v9, %v4581_v45  ;;  %v15358_v18 = vpop.permute.xlu0 %5435 }
 0x662   : > { %17942 = vst [vmem:[#allocation7_spill] sm:$0xff] %v15358_v18 }
 0x663   : > { %v5086_v3 = vadd.f32 %v14971_v56, %v5005_v8  ;;  %v4109_v8 = vpack.c.bf16 %v4066_v23, %v4065_v61  ;;  %v17943_v61 = vld [vmem:[#allocation8_spill] sm:$0xff] }
 0x665   : > { %v5163_v52 = vmax.f32 %v5086_v3, 0.0 }
 0x666   : > { %v3850_v11 = vpop.f32.mrf.mxu2 }
 0x667   : > { %v5625_v42 = vmul.f32 %v15346_v17, %v5163_v52  ;;  %v3971_v30 = vadd.f32 %v3850_v11, %v17941_v58  ;;  %v17945_v17 = vld [vmem:[#allocation9_spill] sm:$0xff] }
 0x668   : > { %v4368_v51 = vpop.f32.mrf.mxu3  ;;  %v4884_v7 = vpop.f32.mrf.mxu0 }
 0x669   : > { %5741 = vst.msk [vmem:[#allocation2 + $0x18b] sm:$0xff] %vm761_vm2, %v5625_v42  ;;  %v5006_v22 = vadd.f32 %v4884_v7, %v4488_v49  ;;  %v15350_v3 = vpop.f32.mrf.mxu1  ;;  %v5678_v47 = vpack.c.bf16 %v5625_v42, %v5624_v10  ;;  %v4489_v15 = vadd.f32 %v4368_v51, %v3971_v30  ;;  %v3550_v30 = vld [vmem:[%s17700_s4 + $0x24c] sm:$0xff]  ;;  %v4584_v49 = vld [vmem:[%s17700_s4 + $0x23e] sm:$0xff] }
 0x66a   : > { %v4067_v51 = vld [vmem:[%s17700_s4 + $0x245] sm:$0xff] }
 0x66b   : > { %v5087_v12 = vadd.f32 %v14971_v56, %v5006_v22  ;;  %10874 = vmatmul.msk.bf16.gmra.mxu2 %vm761_vm2, %v3591_v60  ;;  %10953 = vmatmul.msk.bf16.gmra.mxu0 %vm761_vm2, %v4626_v25  ;;  %v4068_v60 = vld [vmem:[%s17700_s4 + $0x24d] sm:$0xff]  ;;  %v15384_v25 = vpop.permute.xlu1 %5440 }
 0x66c   : > { %10985 = vmatmul.msk.bf16.gmra.mxu1 %vm761_vm2, %v5678_v47  ;;  %v4583_v47 = vld [vmem:[%s17700_s4 + $0x236] sm:$0xff]  ;;  %17944 = vst [vmem:[#allocation8_spill] sm:$0xff] %v15384_v25 }
 0x66d   : > { %10914 = vmatmul.msk.bf16.gmra.mxu3 %vm761_vm2, %v4109_v8  ;;  %v5164_v44 = vmax.f32 %v5087_v12, 0.0  ;;  %v3549_v12 = vld [vmem:[%s17700_s4 + $0x244] sm:$0xff] }
 0x66e   : > { %v3853_v36 = vpop.f32.mrf.mxu2 }
 0x66f   : > { %v5626_v45 = vmul.f32 %v15358_v18, %v5164_v44  ;;  %v3972_v23 = vadd.f32 %v3853_v36, %v17943_v61  ;;  %v3592_v36 = vpack.c.bf16 %v3550_v30, %v3549_v12 }
 0x670   : > { %v4371_v10 = vpop.f32.mrf.mxu3  ;;  %v4886_v9 = vpop.f32.mrf.mxu0 }
 0x671   : > { %5742 = vst.msk [vmem:[#allocation2 + $0x193] sm:$0xff] %vm761_vm2, %v5626_v45  ;;  %v5007_v58 = vadd.f32 %v4886_v9, %v4489_v15  ;;  %v15362_v52 = vpop.f32.mrf.mxu1  ;;  %v4490_v8 = vadd.f32 %v4371_v10, %v3972_v23  ;;  %v4627_v15 = vpack.c.bf16 %v4584_v49, %v4583_v47  ;;  %v15396_v23 = vpop.permute.xlu2 %5445 }
 0x672   : > { %17946 = vst [vmem:[#allocation9_spill] sm:$0xff] %v15396_v23 }
 0x673   : > { %v5088_v11 = vadd.f32 %v14971_v56, %v5007_v58  ;;  %v4110_v58 = vpack.c.bf16 %v4068_v60, %v4067_v51  ;;  %v17947_v51 = vld [vmem:[#allocation10_spill] sm:$0xff] }
 0x675   : > { %v5165_v42 = vmax.f32 %v5088_v11, 0.0 }
 0x676   : > { %v3855_v7 = vpop.f32.mrf.mxu2 }
 0x677   : > { %v5627_v22 = vmul.f32 %v15384_v25, %v5165_v42  ;;  %v3973_v37 = vadd.f32 %v3855_v7, %v17945_v17  ;;  %v17950_v25 = vld [vmem:[#allocation11_spill] sm:$0xff] }
 0x678   : > { %v4373_v44 = vpop.f32.mrf.mxu3  ;;  %v4889_v9 = vpop.f32.mrf.mxu0 }
 0x679   : > { %5743 = vst.msk [vmem:[#allocation2 + $0x19b] sm:$0xff] %vm761_vm2, %v5627_v22  ;;  %v5008_v61 = vadd.f32 %v4889_v9, %v4490_v8  ;;  %v15388_v11 = vpop.f32.mrf.mxu1  ;;  %v5679_v18 = vpack.c.bf16 %v5627_v22, %v5626_v45  ;;  %v4491_v30 = vadd.f32 %v4373_v44, %v3973_v37  ;;  %v3552_v37 = vld [vmem:[%s17700_s4 + $0x25c] sm:$0xff]  ;;  %v4586_v8 = vld [vmem:[%s17700_s4 + $0x24e] sm:$0xff] }
 0x67a   : > { %v4069_v44 = vld [vmem:[%s17700_s4 + $0x255] sm:$0xff] }
 0x67b   : > { %v5089_v46 = vadd.f32 %v14971_v56, %v5008_v61  ;;  %10875 = vmatmul.msk.bf16.gmra.mxu2 %vm761_vm2, %v3592_v36  ;;  %10954 = vmatmul.msk.bf16.gmra.mxu0 %vm761_vm2, %v4627_v15  ;;  %v4070_v36 = vld [vmem:[%s17700_s4 + $0x25d] sm:$0xff]  ;;  %v15422_v15 = vpop.permute.xlu0 %5450 }
 0x67c   : > { %10986 = vmatmul.msk.bf16.gmra.mxu1 %vm761_vm2, %v5679_v18  ;;  %v4585_v18 = vld [vmem:[%s17700_s4 + $0x246] sm:$0xff]  ;;  %17948 = vst [vmem:[#allocation10_spill] sm:$0xff] %v15422_v15 }
 0x67d   : > { %10915 = vmatmul.msk.bf16.gmra.mxu3 %vm761_vm2, %v4110_v58  ;;  %v5166_v10 = vmax.f32 %v5089_v46, 0.0  ;;  %v3551_v46 = vld [vmem:[%s17700_s4 + $0x254] sm:$0xff] }
 0x67e   : > { %v3858_v12 = vpop.f32.mrf.mxu2 }
 0x67f   : > { %v5628_v47 = vmul.f32 %v15396_v23, %v5166_v10  ;;  %v3974_v60 = vadd.f32 %v3858_v12, %v17947_v51  ;;  %v3593_v12 = vpack.c.bf16 %v3552_v37, %v3551_v46 }
 0x680   : > { %v4376_v45 = vpop.f32.mrf.mxu3  ;;  %v4891_v49 = vpop.f32.mrf.mxu0 }
 0x681   : > { %5744 = vst.msk [vmem:[#allocation2 + $0x1a3] sm:$0xff] %vm761_vm2, %v5628_v47  ;;  %v5009_v17 = vadd.f32 %v4891_v49, %v4491_v30  ;;  %v15400_v42 = vpop.f32.mrf.mxu1  ;;  %v4492_v58 = vadd.f32 %v4376_v45, %v3974_v60  ;;  %v4628_v30 = vpack.c.bf16 %v4586_v8, %v4585_v18  ;;  %v15434_v60 = vpop.permute.xlu1 %5455 }
 0x682   : > { %17951 = vst [vmem:[#allocation11_spill] sm:$0xff] %v15434_v60 }
 0x683   : > { %v5090_v7 = vadd.f32 %v14971_v56, %v5009_v17  ;;  %v4111_v17 = vpack.c.bf16 %v4070_v36, %v4069_v44  ;;  %v17953_v44 = vld [vmem:[#allocation12_spill] sm:$0xff] }
 0x685   : > { %v5167_v22 = vmax.f32 %v5090_v7, 0.0 }
 0x686   : > { %v3860_v9 = vpop.f32.mrf.mxu2 }
 0x687   : > { %v5629_v61 = vmul.f32 %v15422_v15, %v5167_v22  ;;  %v3975_v24 = vadd.f32 %v3860_v9, %v17950_v25 }
 0x688   : > { %v4378_v10 = vpop.f32.mrf.mxu3  ;;  %v4894_v49 = vpop.f32.mrf.mxu0 }
 0x689   : > { %5745 = vst.msk [vmem:[#allocation2 + $0x1ab] sm:$0xff] %vm761_vm2, %v5629_v61  ;;  %v5010_v51 = vadd.f32 %v4894_v49, %v4492_v58  ;;  %v15426_v7 = vpop.f32.mrf.mxu1  ;;  %v5680_v23 = vpack.c.bf16 %v5629_v61, %v5628_v47  ;;  %v4493_v37 = vadd.f32 %v4378_v10, %v3975_v24  ;;  %v3554_v24 = vld [vmem:[%s17700_s4 + $0x26c] sm:$0xff]  ;;  %v4588_v58 = vld [vmem:[%s17700_s4 + $0x25e] sm:$0xff] }
 0x68a   : > { %17949 = vst [vmem:[#allocation88_spill] sm:$0xff] %v15426_v7  ;;  %v4071_v10 = vld [vmem:[%s17700_s4 + $0x265] sm:$0xff] }
 0x68b   : > { %v5091_v57 = vadd.f32 %v14971_v56, %v5010_v51  ;;  %10876 = vmatmul.msk.bf16.gmra.mxu2 %vm761_vm2, %v3593_v12  ;;  %10955 = vmatmul.msk.bf16.gmra.mxu0 %vm761_vm2, %v4628_v30  ;;  %v4072_v12 = vld [vmem:[%s17700_s4 + $0x26d] sm:$0xff]  ;;  %v15460_v30 = vpop.permute.xlu2 %5460 }
 0x68c   : > { %10987 = vmatmul.msk.bf16.gmra.mxu1 %vm761_vm2, %v5680_v23  ;;  %v4587_v23 = vld [vmem:[%s17700_s4 + $0x256] sm:$0xff]  ;;  %17954 = vst [vmem:[#allocation12_spill] sm:$0xff] %v15460_v30 }
 0x68d   : > { %10916 = vmatmul.msk.bf16.gmra.mxu3 %vm761_vm2, %v4111_v17  ;;  %v5168_v45 = vmax.f32 %v5091_v57, 0.0  ;;  %v3553_v57 = vld [vmem:[%s17700_s4 + $0x264] sm:$0xff] }
 0x68e   : > { %v3863_v46 = vpop.f32.mrf.mxu2 }
 0x68f   : > { %v5630_v18 = vmul.f32 %v15434_v60, %v5168_v45  ;;  %v3976_v36 = vadd.f32 %v3863_v46, %v17953_v44  ;;  %v3594_v46 = vpack.c.bf16 %v3554_v24, %v3553_v57  ;;  %v17955_v44 = vld [vmem:[#allocation13_spill] sm:$0xff] }
 0x690   : > { %v4381_v47 = vpop.f32.mrf.mxu3  ;;  %v4896_v8 = vpop.f32.mrf.mxu0 }
 0x691   : > { %5746 = vst.msk [vmem:[#allocation2 + $0x1b3] sm:$0xff] %vm761_vm2, %v5630_v18  ;;  %v5011_v25 = vadd.f32 %v4896_v8, %v4493_v37  ;;  %v15438_v22 = vpop.f32.mrf.mxu1  ;;  %v4494_v17 = vadd.f32 %v4381_v47, %v3976_v36  ;;  %v4629_v37 = vpack.c.bf16 %v4588_v58, %v4587_v23  ;;  %v15473_v36 = vpop.permute.xlu0 %5465 }
 0x692   : > { %17952 = vst [vmem:[#allocation89_spill] sm:$0xff] %v15438_v22 }
 0x693   : > { %v5092_v9 = vadd.f32 %v14971_v56, %v5011_v25  ;;  %v4112_v25 = vpack.c.bf16 %v4072_v12, %v4071_v10 }
 0x695   : > { %v5169_v61 = vmax.f32 %v5092_v9, 0.0  ;;  %v17956_v9 = vld [vmem:[#allocation38_spill] sm:$0xff] }
 0x696   : > { %v3865_v49 = vpop.f32.mrf.mxu2  ;;  %v3459_v60 = vadd.f32 %v17956_v9, %v17955_v44  ;;  %17958 = vst [vmem:[#allocation38_spill] sm:$0xff] %v15473_v36 }
 0x697   : > { %v5631_v51 = vmul.f32 %v15460_v30, %v5169_v61  ;;  %v17960_v61 = vld [vmem:[#allocation14_spill] sm:$0xff] }
 0x698   : > { %v4383_v45 = vpop.f32.mrf.mxu3  ;;  %v4899_v8 = vpop.f32.mrf.mxu0  ;;  %v3977_v22 = vadd.f32 %v3865_v49, %v3459_v60  ;;  %v4590_v49 = vld [vmem:[%s17700_s4 + $0x26e] sm:$0xff] }
 0x699   : > { %5747 = vst.msk [vmem:[#allocation2 + $0x1bb] sm:$0xff] %vm761_vm2, %v5631_v51  ;;  %v5012_v15 = vadd.f32 %v4899_v8, %v4494_v17  ;;  %v15466_v21 = vpop.f32.mrf.mxu1  ;;  %v5681_v0 = vpack.c.bf16 %v5631_v51, %v5630_v18  ;;  %v4074_v51 = vld [vmem:[%s17700_s4 + $0x27d] sm:$0xff] }
 0x69a   : > { %17957 = vst [vmem:[#allocation13_spill] sm:$0xff] %v15466_v21  ;;  %v4495_v24 = vadd.f32 %v4383_v45, %v3977_v22  ;;  %v4589_v22 = vld [vmem:[%s17700_s4 + $0x266] sm:$0xff]  ;;  %v15499_v45 = vpop.permute.xlu1 %5470 }
 0x69b   : > { %v5093_v7 = vadd.f32 %v14971_v56, %v5012_v15  ;;  %10877 = vmatmul.msk.bf16.gmra.mxu2 %vm761_vm2, %v3594_v46  ;;  %10956 = vmatmul.msk.bf16.gmra.mxu0 %vm761_vm2, %v4629_v37  ;;  %17961 = vst [vmem:[#allocation14_spill] sm:$0xff] %v15499_v45  ;;  %v4630_v9 = vpack.c.bf16 %v4590_v49, %v4589_v22 }
 0x69c   : > { %10988 = vmatmul.msk.bf16.gmra.mxu1 %vm761_vm2, %v5681_v0  ;;  %v3555_v0 = vld [vmem:[%s17700_s4 + $0x274] sm:$0xff] }
 0x69d   : > { %10917 = vmatmul.msk.bf16.gmra.mxu3 %vm761_vm2, %v4112_v25  ;;  %v5170_v47 = vmax.f32 %v5093_v7, 0.0  ;;  %v3556_v7 = vld [vmem:[%s17700_s4 + $0x27c] sm:$0xff] }
 0x69e   : > { %v3868_v57 = vpop.f32.mrf.mxu2  ;;  %v3595_v44 = vpack.c.bf16 %v3556_v7, %v3555_v0  ;;  %v15515_v0 = vpop.permute.xlu2 %5475 }
 0x69f   : > { %v5632_v23 = vmul.f32 %v15473_v36, %v5170_v47  ;;  %v3978_v10 = vadd.f32 %v3868_v57, %v17960_v61 }
 0x6a0   : > { %v4386_v58 = vpop.f32.mrf.mxu3  ;;  %v4901_v18 = vpop.f32.mrf.mxu0 }
 0x6a1   : > { %5748 = vst.msk [vmem:[#allocation2 + $0x1c3] sm:$0xff] %vm761_vm2, %v5632_v23  ;;  %v5013_v15 = vadd.f32 %v4901_v18, %v4495_v24  ;;  %v15477_v60 = vpop.f32.mrf.mxu1  ;;  %v4496_v37 = vadd.f32 %v4386_v58, %v3978_v10  ;;  %v17962_v24 = vld [vmem:[#allocation15_spill] sm:$0xff] }
 0x6a2   : > { %17959 = vst [vmem:[#allocation90_spill] sm:$0xff] %v15477_v60  ;;  %v17963_v18 = vld [vmem:[#allocation39_spill] sm:$0xff]  ;;  %v15508_v60 = vld [vmem:[%s11468_s22] ss:$0 sm:$0xff] }
 0x6a3   : > { %v5094_v12 = vadd.f32 %v14971_v56, %v5013_v15  ;;  %v4073_v56 = vld [vmem:[%s17700_s4 + $0x275] sm:$0xff]  ;;  %v3461_v15 = vadd.f32 %v17963_v18, %v17962_v24  ;;  %17965 = vst [vmem:[#allocation39_spill] sm:$0xff] %v15515_v0 }
 0x6a4   : > { %v4113_v57 = vpack.c.bf16 %v4074_v51, %v4073_v56 }
 0x6a5   : > { %v5171_v17 = vmax.f32 %v5094_v12, 0.0 }
 0x6a6   : > { %v3870_v46 = vpop.f32.mrf.mxu2 }
 0x6a7   : > { %v5633_v8 = vmul.f32 %v15499_v45, %v5171_v17  ;;  %v3979_v30 = vadd.f32 %v3870_v46, %v3461_v15  ;;  %v17967_v46 = vld [vmem:[#allocation16_spill] sm:$0xff] }
 0x6a8   : > { %v4388_v25 = vpop.f32.mrf.mxu3  ;;  %v4904_v47 = vpop.f32.mrf.mxu0 }
 0x6a9   : > { %5749 = vst.msk [vmem:[#allocation2 + $0x1cb] sm:$0xff] %vm761_vm2, %v5633_v8  ;;  %v5014_v61 = vadd.f32 %v4904_v47, %v4496_v37  ;;  %v15505_v12 = vpop.f32.mrf.mxu1  ;;  %v5682_v36 = vpack.c.bf16 %v5633_v8, %v5632_v23  ;;  %v4497_v22 = vadd.f32 %v4388_v25, %v3979_v30  ;;  %v4591_v30 = vld [vmem:[%s17700_s4 + $0x276] sm:$0xff]  ;;  %v4592_v25 = vld [vmem:[%s17700_s4 + $0x27e] sm:$0xff]  ;;  %v15535_v47 = vpop.permute.xlu0 %5480 }
 0x6aa   : > { %17964 = vst [vmem:[#allocation15_spill] sm:$0xff] %v15505_v12 }
 0x6ab   : > { %v5095_v58 = vadd.f32 %v15508_v60, %v5014_v61  ;;  %10878 = vmatmul.msk.bf16.gmra.mxu2 %vm761_vm2, %v3595_v44  ;;  %10957 = vmatmul.msk.bf16.gmra.mxu0 %vm761_vm2, %v4630_v9  ;;  %v4075_v9 = vld [vmem:[%s17700_s4 + $0x285] sm:$0x3]  ;;  %17968 = vst [vmem:[#allocation16_spill] sm:$0xff] %v15535_v47 }
 0x6ac   : > { %10989 = vmatmul.msk.bf16.gmra.mxu1 %vm761_vm2, %v5682_v36  ;;  %v3557_v36 = vld [vmem:[%s17700_s4 + $0x284] sm:$0x3] }
 0x6ad   : > { %10918 = vmatmul.msk.bf16.gmra.mxu3 %vm761_vm2, %v4113_v57  ;;  %v5172_v10 = vmax.f32 %v5095_v58, 0.0  ;;  %v3596_v61 = vpack.c.bf16 %v3557_v36, %v3557_v36  ;;  %v4631_v58 = vpack.c.bf16 %v4592_v25, %v4591_v30 }
 0x6ae   : > { %v3873_v7 = vpop.f32.mrf.mxu2 }
 0x6af   : > { %v5634_v23 = vmul.f32 %v15515_v0, %v5172_v10  ;;  %v3980_v37 = vadd.f32 %v3873_v7, %v17967_v46  ;;  %v4114_v7 = vpack.c.bf16 %v4075_v9, %v4075_v9 }
 0x6b0   : > { %v4391_v49 = vpop.f32.mrf.mxu3  ;;  %v4906_v17 = vpop.f32.mrf.mxu0 }
 0x6b1   : > { %5750 = vst.msk [vmem:[#allocation2 + $0x1d3] sm:$0xff] %vm761_vm2, %v5634_v23  ;;  %v5015_v56 = vadd.f32 %v4906_v17, %v4497_v22  ;;  %v15519_v51 = vpop.f32.mrf.mxu1  ;;  %v4498_v24 = vadd.f32 %v4391_v49, %v3980_v37  ;;  %v17969_v22 = vld [vmem:[#allocation17_spill] sm:$0xff]  ;;  %v17970_v17 = vld [vmem:[#allocation40_spill] sm:$0xff]  ;;  %v15548_v37 = vpop.permute.xlu1 %5485 }
 0x6b2   : > { %17966 = vst [vmem:[#allocation91_spill] sm:$0xff] %v15519_v51 }
 0x6b3   : > { %v5096_v8 = vadd.f32 %v15508_v60, %v5015_v56  ;;  %v3463_v56 = vadd.f32 %v17970_v17, %v17969_v22  ;;  %17972 = vst [vmem:[#allocation40_spill] sm:$0xff] %v15548_v37 }
 0x6b5   : > { %v5173_v44 = vmax.f32 %v5096_v8, 0.0 }
 0x6b6   : > { %v3875_v57 = vpop.f32.mrf.mxu2 }
 0x6b7   : > { %v5635_v18 = vmul.f32 %v15535_v47, %v5173_v44  ;;  %v3981_v45 = vadd.f32 %v3875_v57, %v3463_v56 }
 0x6b8   : > { %v4393_v15 = vpop.f32.mrf.mxu3  ;;  %v4909_v10 = vpop.f32.mrf.mxu0 }
 0x6b9   : > { %5751 = vst.msk [vmem:[#allocation2 + $0x1db] sm:$0xff] %vm761_vm2, %v5635_v18  ;;  %v5016_v46 = vadd.f32 %v4909_v10, %v4498_v24  ;;  %v15541_v8 = vpop.f32.mrf.mxu1  ;;  %v5683_v0 = vpack.c.bf16 %v5635_v18, %v5634_v23  ;;  %v4499_v30 = vadd.f32 %v4393_v15, %v3981_v45  ;;  %v6774_v15 = vld [vmem:[#allocation2 + $0x1] sm:$0xff]  ;;  %v15559_v10 = vpop.permute.xlu2 %5490 }
 0x6ba   : > { %17971 = vst [vmem:[#allocation17_spill] sm:$0xff] %v15541_v8 }
 0x6bb   : > { %v5097_v51 = vadd.f32 %v15508_v60, %v5016_v46  ;;  %10879 = vmatmul.msk.bf16.gmra.mxu2 %vm761_vm2, %v3596_v61  ;;  %10958 = vmatmul.msk.bf16.gmra.mxu0 %vm761_vm2, %v4631_v58  ;;  %v6257_v61 = vld [vmem:[#allocation2 + $0x8] sm:$0xff]  ;;  %17974 = vst [vmem:[#allocation93_spill] sm:$0xff] %v15559_v10 }
 0x6bc   : > { %10990 = vmatmul.msk.bf16.gmra.mxu1 %vm761_vm2, %v5683_v0  ;;  %v4593_v0 = vld [vmem:[%s17700_s4 + $0x286] sm:$0x3]  ;;  %v6775_v58 = vld [vmem:[#allocation2 + $0x9] sm:$0xff] }
 0x6bd   : > { %10919 = vmatmul.msk.bf16.gmra.mxu3 %vm761_vm2, %v4114_v7  ;;  %v5174_v49 = vmax.f32 %v5097_v51, 0.0  ;;  %v6256_v51 = vld [vmem:[#allocation2] sm:$0xff]  ;;  %v4632_v46 = vpack.c.bf16 %v4593_v0, %v4593_v0 }
 0x6be   : > { %v3878_v36 = vpop.f32.mrf.mxu2 }
 0x6bf   : > { %v5636_v25 = vmul.f32 %v15548_v37, %v5174_v49  ;;  %v3982_v24 = vadd.f32 %v3878_v36, %v14169_v40  ;;  %v6333_v40 = vpack.c.bf16 %v6257_v61, %v6256_v51  ;;  %v6851_v36 = vpack.c.bf16 %v6775_v58, %v6774_v15  ;;  %v17980_v58 = vld [vmem:[#allocation20_spill] sm:$0xff] }
 0x6c0   : > { %v4396_v44 = vpop.f32.mrf.mxu3  ;;  %v4911_v23 = vpop.f32.mrf.mxu0 }
 0x6c1   : > { %5752 = vst.msk [vmem:[#allocation2 + $0x1e3] sm:$0xff] %vm761_vm2, %v5636_v25  ;;  %v5017_v9 = vadd.f32 %v4911_v23, %v4499_v30  ;;  %v15552_v57 = vpop.f32.mrf.mxu1  ;;  %v4500_v22 = vadd.f32 %v4396_v44, %v3982_v24  ;;  %v17975_v30 = vld [vmem:[#allocation18_spill] sm:$0xff]  ;;  %v17976_v23 = vld [vmem:[#allocation19_spill] sm:$0xff]  ;;  %v15572_v24 = vpop.permute.xlu0 %5495 }
 0x6c2   : > { %17973 = vst [vmem:[#allocation92_spill] sm:$0xff] %v15552_v57 }
 0x6c3   : > { %v5098_v18 = vadd.f32 %v15508_v60, %v5017_v9  ;;  %v3465_v9 = vadd.f32 %v17976_v23, %v17975_v30  ;;  %17978 = vst [vmem:[#allocation19_spill] sm:$0xff] %v15572_v24  ;;  %v6777_v30 = vld [vmem:[#allocation2 + $0x19] sm:$0xff] }
 0x6c5   : > { %v5175_v45 = vmax.f32 %v5098_v18, 0.0 }
 0x6c6   : > { %v3880_v7 = vpop.f32.mrf.mxu2 }
 0x6c7   : > { %v5637_v17 = vmul.f32 %v15559_v10, %v5175_v45  ;;  %v3983_v57 = vadd.f32 %v3880_v7, %v3465_v9  ;;  %v6776_v10 = vld [vmem:[#allocation2 + $0x11] sm:$0xff] }
 0x6c8   : > { %v4398_v56 = vpop.f32.mrf.mxu3  ;;  %v4914_v49 = vpop.f32.mrf.mxu0 }
 0x6c9   : > { %5753 = vst.msk [vmem:[#allocation2 + $0x1eb] sm:$0xff] %vm761_vm2, %v5637_v17  ;;  %v5018_v37 = vadd.f32 %v4914_v49, %v4500_v22  ;;  %v15565_v18 = vpop.f32.mrf.mxu1  ;;  %v5684_v47 = vpack.c.bf16 %v5637_v17, %v5636_v25  ;;  %v4501_v51 = vadd.f32 %v4398_v56, %v3983_v57  ;;  %v7292_v22 = vld [vmem:[#allocation2 + $0x2] sm:$0xff]  ;;  %v7293_v17 = vld [vmem:[#allocation2 + $0xa] sm:$0xff]  ;;  %v6259_v57 = vld [vmem:[#allocation2 + $0x18] sm:$0xff] }
 0x6ca   : > { %17977 = vst [vmem:[#allocation18_spill] sm:$0xff] %v15565_v18  ;;  %v7369_v23 = vpack.c.bf16 %v7293_v17, %v7292_v22  ;;  %v15593_v17 = vpop.permute.xlu2 %5505 }
 0x6cb   : > { %v5099_v8 = vadd.f32 %v15508_v60, %v5018_v37  ;;  %10959 = vmatmul.msk.bf16.gmra.mxu0 %vm761_vm2, %v4632_v46  ;;  %11002 = vmatmul.msk.bf16.vlgmr.msrb.gmra.mxu2 %vm761_vm2, %v6333_v40  ;;  %v15580_v46 = vpop.permute.xlu1 %5500 }
 0x6cc   : > { %10991 = vmatmul.msk.bf16.gmra.mxu1 %vm761_vm2, %v5684_v47  ;;  %17981 = vst [vmem:[#allocation20_spill] sm:$0xff] %v15580_v46 }
 0x6cd   : > { %11042 = vmatmul.msk.bf16.vlgmr.msrb.gmra.mxu3 %vm761_vm2, %v6851_v36  ;;  %v5176_v44 = vmax.f32 %v5099_v8, 0.0 }
 0x6ce   : > { %v3883_v0 = vpop.f32.mrf.mxu2 }
 0x6cf   : > { %v5638_v61 = vmul.f32 %v15572_v24, %v5176_v44  ;;  %v3984_v7 = vadd.f32 %v3883_v0, %v17980_v58  ;;  %v6258_v44 = vld [vmem:[#allocation2 + $0x10] sm:$0xff] }
 0x6d0   : > { %v4401_v45 = vpop.f32.mrf.mxu3  ;;  %v4916_v25 = vpop.f32.mrf.mxu0  ;;  %v6334_v24 = vpack.c.bf16 %v6259_v57, %v6258_v44 }
 0x6d1   : > { %5754 = vst.msk [vmem:[#allocation2 + $0x1f3] sm:$0xff] %vm761_vm2, %v5638_v61  ;;  %v5019_v37 = vadd.f32 %v4916_v25, %v4501_v51  ;;  %v15576_v15 = vpop.f32.mrf.mxu1  ;;  %v4502_v56 = vadd.f32 %v4401_v45, %v3984_v7  ;;  %v17982_v51 = vld [vmem:[#allocation21_spill] sm:$0xff] }
 0x6d2   : > { %17979 = vst [vmem:[#allocation94_spill] sm:$0xff] %v15576_v15  ;;  %v17983_v25 = vld [vmem:[#allocation41_spill] sm:$0xff]  ;;  %v6852_v15 = vpack.c.bf16 %v6777_v30, %v6776_v10 }
 0x6d3   : > { %v5100_v47 = vadd.f32 %v15508_v60, %v5019_v37  ;;  %v3467_v0 = vadd.f32 %v17983_v25, %v17982_v51  ;;  %17985 = vst [vmem:[#allocation41_spill] sm:$0xff] %v15593_v17  ;;  %v6261_v51 = vld [vmem:[#allocation2 + $0x28] sm:$0xff]  ;;  %v7295_v25 = vld [vmem:[#allocation2 + $0x1a] sm:$0xff] }
 0x6d5   : > { %v5177_v8 = vmax.f32 %v5100_v47, 0.0 }
 0x6d6   : > { %v3885_v40 = vpop.f32.mrf.mxu2 }
 0x6d7   : > { %v5639_v49 = vmul.f32 %v15580_v46, %v5177_v8  ;;  %v3985_v45 = vadd.f32 %v3885_v40, %v3467_v0  ;;  %v6778_v46 = vld [vmem:[#allocation2 + $0x21] sm:$0xff] }
 0x6d8   : > { %v4403_v36 = vpop.f32.mrf.mxu3  ;;  %v4919_v9 = vpop.f32.mrf.mxu0 }
 0x6d9   : > { %5755 = vst.msk [vmem:[#allocation2 + $0x1fb] sm:$0xff] %vm761_vm2, %v5639_v49  ;;  %v5020_v37 = vadd.f32 %v4919_v9, %v4502_v56  ;;  %v15586_v58 = vpop.f32.mrf.mxu1  ;;  %v5685_v47 = vpack.c.bf16 %v5639_v49, %v5638_v61  ;;  %v4503_v56 = vadd.f32 %v4403_v36, %v3985_v45  ;;  %v17989_v45 = vld [vmem:[#allocation23_spill] sm:$0xff] }
 0x6da   : > { %17984 = vst [vmem:[#allocation21_spill] sm:$0xff] %v15586_v58 }
 0x6db   : > { %v5101_v7 = vadd.f32 %v15508_v60, %v5020_v37  ;;  %11003 = vmatmul.msk.bf16.gmra.mxu2 %vm761_vm2, %v6334_v24  ;;  %11082 = vmatmul.msk.bf16.vlgmr.msrb.gmra.mxu0 %vm761_vm2, %v7369_v23  ;;  %v17987_v24 = vld [vmem:[#allocation22_spill] sm:$0xff] }
 0x6dc   : > { %10992 = vmatmul.msk.bf16.gmra.mxu1 %vm761_vm2, %v5685_v47  ;;  %v6779_v47 = vld [vmem:[#allocation2 + $0x29] sm:$0xff] }
 0x6dd   : > { %11043 = vmatmul.msk.bf16.gmra.mxu3 %vm761_vm2, %v6852_v15  ;;  %v5178_v22 = vmax.f32 %v5101_v7, 0.0  ;;  %v15601_v15 = vpop.permute.xlu0 %5510  ;;  %v17990_v7 = vld [vmem:[#allocation42_spill] sm:$0xff] }
 0x6de   : > { %v3888_v8 = vpop.f32.mrf.mxu2  ;;  %17988 = vst [vmem:[#allocation22_spill] sm:$0xff] %v15601_v15 }
 0x6df   : > { %v5640_v61 = vmul.f32 %v15593_v17, %v5178_v22  ;;  %v3986_v30 = vadd.f32 %v3888_v8, %v17987_v24  ;;  %v3469_v22 = vadd.f32 %v17990_v7, %v17989_v45  ;;  %v7294_v17 = vld [vmem:[#allocation2 + $0x12] sm:$0xff]  ;;  %v15617_v45 = vpop.permute.xlu1 %5515 }
 0x6e0   : > { %v4406_v57 = vpop.f32.mrf.mxu3  ;;  %v4921_v10 = vpop.f32.mrf.mxu0  ;;  %17992 = vst [vmem:[#allocation42_spill] sm:$0xff] %v15617_v45 }
 0x6e1   : > { %5756 = vst.msk [vmem:[#allocation2 + $0x203] sm:$0xff] %vm761_vm2, %v5640_v61  ;;  %v5021_v40 = vadd.f32 %v4921_v10, %v4503_v56  ;;  %v15597_v49 = vpop.f32.mrf.mxu1  ;;  %v4504_v36 = vadd.f32 %v4406_v57, %v3986_v30  ;;  %v6260_v10 = vld [vmem:[#allocation2 + $0x20] sm:$0xff]  ;;  %v6853_v57 = vpack.c.bf16 %v6779_v47, %v6778_v46  ;;  %v17994_v47 = vld [vmem:[#allocation24_spill] sm:$0xff] }
 0x6e2   : > { %17986 = vst [vmem:[#allocation95_spill] sm:$0xff] %v15597_v49  ;;  %v15609_v49 = vpack.c.bf16 %v7295_v25, %v7294_v17 }
 0x6e3   : > { %v5102_v23 = vadd.f32 %v15508_v60, %v5021_v40 }
 0x6e5   : > { %v5179_v9 = vmax.f32 %v5102_v23, 0.0  ;;  %v6335_v23 = vpack.c.bf16 %v6261_v51, %v6260_v10  ;;  %v15625_v10 = vpop.permute.xlu2 %5520 }
 0x6e6   : > { %v3890_v44 = vpop.f32.mrf.mxu2  ;;  %17995 = vst [vmem:[#allocation24_spill] sm:$0xff] %v15625_v10 }
 0x6e7   : > { %v5641_v0 = vmul.f32 %v15601_v15, %v5179_v9  ;;  %v3987_v30 = vadd.f32 %v3890_v44, %v3469_v22  ;;  %v6262_v15 = vld [vmem:[#allocation2 + $0x30] sm:$0xff] }
 0x6e8   : > { %v4408_v37 = vpop.f32.mrf.mxu3  ;;  %v4924_v56 = vpop.f32.mrf.mxu0 }
 0x6e9   : > { %5757 = vst.msk [vmem:[#allocation2 + $0x20b] sm:$0xff] %vm761_vm2, %v5641_v0  ;;  %v5022_v8 = vadd.f32 %v4924_v56, %v4504_v36  ;;  %v15607_v40 = vpop.f32.mrf.mxu1  ;;  %v5686_v24 = vpack.c.bf16 %v5641_v0, %v5640_v61  ;;  %v4505_v51 = vadd.f32 %v4408_v37, %v3987_v30 }
 0x6ea   : > { %17991 = vst [vmem:[#allocation23_spill] sm:$0xff] %v15607_v40  ;;  %v6780_v40 = vld [vmem:[#allocation2 + $0x31] sm:$0xff] }
 0x6eb   : > { %v5103_v9 = vadd.f32 %v15508_v60, %v5022_v8  ;;  %11004 = vmatmul.msk.bf16.gmra.mxu2 %vm761_vm2, %v6335_v23  ;;  %11083 = vmatmul.msk.bf16.gmra.mxu0 %vm761_vm2, %v15609_v49  ;;  %v7297_v23 = vld [vmem:[#allocation2 + $0x2a] sm:$0xff] }
 0x6ec   : > { %10993 = vmatmul.msk.bf16.gmra.mxu1 %vm761_vm2, %v5686_v24  ;;  %v6263_v24 = vld [vmem:[#allocation2 + $0x38] sm:$0xff] }
 0x6ed   : > { %11044 = vmatmul.msk.bf16.gmra.mxu3 %vm761_vm2, %v6853_v57  ;;  %v5180_v36 = vmax.f32 %v5103_v9, 0.0  ;;  %v6781_v9 = vld [vmem:[#allocation2 + $0x39] sm:$0xff] }
 0x6ee   : > { %v3893_v61 = vpop.f32.mrf.mxu2 }
 0x6ef   : > { %v5642_v17 = vmul.f32 %v15617_v45, %v5180_v36  ;;  %v3988_v7 = vadd.f32 %v3893_v61, %v17994_v47  ;;  %v17996_v36 = vld [vmem:[#allocation25_spill] sm:$0xff]  ;;  %v17997_v45 = vld [vmem:[#allocation43_spill] sm:$0xff] }
 0x6f0   : > { %v4411_v46 = vpop.f32.mrf.mxu3  ;;  %v4926_v44 = vpop.f32.mrf.mxu0 }
 0x6f1   : > { %5758 = vst.msk [vmem:[#allocation2 + $0x213] sm:$0xff] %vm761_vm2, %v5642_v17  ;;  %v5023_v25 = vadd.f32 %v4926_v44, %v4505_v51  ;;  %v15621_v0 = vpop.f32.mrf.mxu1  ;;  %v4506_v37 = vadd.f32 %v4411_v46, %v3988_v7  ;;  %v3471_v51 = vadd.f32 %v17997_v45, %v17996_v36  ;;  %v6854_v46 = vpack.c.bf16 %v6781_v9, %v6780_v40 }
 0x6f2   : > { %17993 = vst [vmem:[#allocation96_spill] sm:$0xff] %v15621_v0  ;;  %v7296_v0 = vld [vmem:[#allocation2 + $0x22] sm:$0xff] }
 0x6f3   : > { %v5104_v22 = vadd.f32 %v15508_v60, %v5023_v25  ;;  %v15633_v58 = vpack.c.bf16 %v7297_v23, %v7296_v0 }
 0x6f5   : > { %v5181_v56 = vmax.f32 %v5104_v22, 0.0  ;;  %v6336_v22 = vpack.c.bf16 %v6263_v24, %v6262_v15 }
 0x6f6   : > { %v3895_v8 = vpop.f32.mrf.mxu2 }
 0x6f7   : > { %v5643_v57 = vmul.f32 %v15625_v10, %v5181_v56  ;;  %v3989_v7 = vadd.f32 %v3895_v8, %v3471_v51  ;;  %v6264_v10 = vld [vmem:[#allocation2 + $0x40] sm:$0xff] }
 0x6f8   : > { %v4413_v30 = vpop.f32.mrf.mxu3  ;;  %v4929_v44 = vpop.f32.mrf.mxu0 }
 0x6f9   : > { %5759 = vst.msk [vmem:[#allocation2 + $0x21b] sm:$0xff] %vm761_vm2, %v5643_v57  ;;  %v5024_v61 = vadd.f32 %v4929_v44, %v4506_v37  ;;  %v15631_v25 = vpop.f32.mrf.mxu1  ;;  %v5687_v47 = vpack.c.bf16 %v5643_v57, %v5642_v17  ;;  %v15641_v37 = vpop.permute.xlu0 %5525  ;;  %v4507_v17 = vadd.f32 %v4413_v30, %v3989_v7  ;;  %v18001_v57 = vld [vmem:[#allocation26_spill] sm:$0xff] }
 0x6fa   : > { %17998 = vst [vmem:[#allocation25_spill] sm:$0xff] %v15631_v25  ;;  %v15649_v44 = vpop.permute.xlu1 %5530  ;;  %v6782_v25 = vld [vmem:[#allocation2 + $0x41] sm:$0xff] }
 0x6fb   : > { %v5105_v56 = vadd.f32 %v15508_v60, %v5024_v61  ;;  %11005 = vmatmul.msk.bf16.gmra.mxu2 %vm761_vm2, %v6336_v22  ;;  %11084 = vmatmul.msk.bf16.gmra.mxu0 %vm761_vm2, %v15633_v58  ;;  %17999 = vst [vmem:[#allocation43_spill] sm:$0xff] %v15641_v37  ;;  %v7299_v22 = vld [vmem:[#allocation2 + $0x3a] sm:$0xff] }
 0x6fc   : > { %10994 = vmatmul.msk.bf16.gmra.mxu1 %vm761_vm2, %v5687_v47  ;;  %18002 = vst [vmem:[#allocation26_spill] sm:$0xff] %v15649_v44  ;;  %v6265_v47 = vld [vmem:[#allocation2 + $0x48] sm:$0xff] }
 0x6fd   : > { %11045 = vmatmul.msk.bf16.gmra.mxu3 %vm761_vm2, %v6854_v46  ;;  %v5182_v45 = vmax.f32 %v5105_v56, 0.0  ;;  %v6783_v56 = vld [vmem:[#allocation2 + $0x49] sm:$0xff] }
 0x6fe   : > { %v3898_v15 = vpop.f32.mrf.mxu2 }
 0x6ff   : > { %v5644_v0 = vmul.f32 %v15641_v37, %v5182_v45  ;;  %v3990_v9 = vadd.f32 %v3898_v15, %v18001_v57  ;;  %v18003_v45 = vld [vmem:[#allocation27_spill] sm:$0xff]  ;;  %v18004_v37 = vld [vmem:[#allocation44_spill] sm:$0xff] }
 0x700   : > { %v4416_v40 = vpop.f32.mrf.mxu3  ;;  %v4931_v8 = vpop.f32.mrf.mxu0 }
 0x701   : > { %5760 = vst.msk [vmem:[#allocation2 + $0x223] sm:$0xff] %vm761_vm2, %v5644_v0  ;;  %v5025_v24 = vadd.f32 %v4931_v8, %v4507_v17  ;;  %v15645_v23 = vpop.f32.mrf.mxu1  ;;  %v4508_v30 = vadd.f32 %v4416_v40, %v3990_v9  ;;  %v3473_v17 = vadd.f32 %v18004_v37, %v18003_v45  ;;  %v6855_v40 = vpack.c.bf16 %v6783_v56, %v6782_v25 }
 0x702   : > { %18000 = vst [vmem:[#allocation97_spill] sm:$0xff] %v15645_v23  ;;  %v7298_v23 = vld [vmem:[#allocation2 + $0x32] sm:$0xff] }
 0x703   : > { %v5106_v36 = vadd.f32 %v15508_v60, %v5025_v24  ;;  %v15657_v18 = vpack.c.bf16 %v7299_v22, %v7298_v23 }
 0x705   : > { %v5183_v51 = vmax.f32 %v5106_v36, 0.0  ;;  %v6337_v36 = vpack.c.bf16 %v6265_v47, %v6264_v10 }
 0x706   : > { %v3900_v61 = vpop.f32.mrf.mxu2 }
 0x707   : > { %v5645_v46 = vmul.f32 %v15649_v44, %v5183_v51  ;;  %v3991_v9 = vadd.f32 %v3900_v61, %v3473_v17  ;;  %v6266_v44 = vld [vmem:[#allocation2 + $0x50] sm:$0xff] }
 0x708   : > { %v4418_v7 = vpop.f32.mrf.mxu3  ;;  %v4934_v8 = vpop.f32.mrf.mxu0 }
 0x709   : > { %5761 = vst.msk [vmem:[#allocation2 + $0x22b] sm:$0xff] %vm761_vm2, %v5645_v46  ;;  %v5026_v15 = vadd.f32 %v4934_v8, %v4508_v30  ;;  %v15655_v24 = vpop.f32.mrf.mxu1  ;;  %v5688_v57 = vpack.c.bf16 %v5645_v46, %v5644_v0  ;;  %v15665_v30 = vpop.permute.xlu2 %5535  ;;  %v4509_v0 = vadd.f32 %v4418_v7, %v3991_v9  ;;  %v18008_v46 = vld [vmem:[#allocation28_spill] sm:$0xff] }
 0x70a   : > { %18005 = vst [vmem:[#allocation27_spill] sm:$0xff] %v15655_v24  ;;  %v15673_v8 = vpop.permute.xlu0 %5540  ;;  %v6784_v24 = vld [vmem:[#allocation2 + $0x51] sm:$0xff] }
 0x70b   : > { %v5107_v51 = vadd.f32 %v15508_v60, %v5026_v15  ;;  %11006 = vmatmul.msk.bf16.gmra.mxu2 %vm761_vm2, %v6337_v36  ;;  %11085 = vmatmul.msk.bf16.gmra.mxu0 %vm761_vm2, %v15657_v18  ;;  %18006 = vst [vmem:[#allocation44_spill] sm:$0xff] %v15665_v30  ;;  %v7301_v36 = vld [vmem:[#allocation2 + $0x4a] sm:$0xff] }
 0x70c   : > { %10995 = vmatmul.msk.bf16.gmra.mxu1 %vm761_vm2, %v5688_v57  ;;  %18009 = vst [vmem:[#allocation28_spill] sm:$0xff] %v15673_v8  ;;  %v6267_v57 = vld [vmem:[#allocation2 + $0x58] sm:$0xff] }
 0x70d   : > { %11046 = vmatmul.msk.bf16.gmra.mxu3 %vm761_vm2, %v6855_v40  ;;  %v5184_v37 = vmax.f32 %v5107_v51, 0.0  ;;  %v6785_v51 = vld [vmem:[#allocation2 + $0x59] sm:$0xff] }
 0x70e   : > { %v3903_v10 = vpop.f32.mrf.mxu2 }
 0x70f   : > { %v5646_v23 = vmul.f32 %v15665_v30, %v5184_v37  ;;  %v3992_v56 = vadd.f32 %v3903_v10, %v18008_v46  ;;  %v18010_v37 = vld [vmem:[#allocation29_spill] sm:$0xff] }
 0x710   : > { %v4421_v25 = vpop.f32.mrf.mxu3  ;;  %v4936_v61 = vpop.f32.mrf.mxu0  ;;  %v18011_v30 = vld [vmem:[#allocation45_spill] sm:$0xff] }
 0x711   : > { %5762 = vst.msk [vmem:[#allocation2 + $0x233] sm:$0xff] %vm761_vm2, %v5646_v23  ;;  %v5027_v47 = vadd.f32 %v4936_v61, %v4509_v0  ;;  %v15669_v22 = vpop.f32.mrf.mxu1  ;;  %v4510_v7 = vadd.f32 %v4421_v25, %v3992_v56  ;;  %v3475_v0 = vadd.f32 %v18011_v30, %v18010_v37  ;;  %v6856_v25 = vpack.c.bf16 %v6785_v51, %v6784_v24 }
 0x712   : > { %18007 = vst [vmem:[#allocation98_spill] sm:$0xff] %v15669_v22  ;;  %v7300_v22 = vld [vmem:[#allocation2 + $0x42] sm:$0xff] }
 0x713   : > { %v5108_v45 = vadd.f32 %v15508_v60, %v5027_v47  ;;  %v15681_v12 = vpack.c.bf16 %v7301_v36, %v7300_v22 }
 0x715   : > { %v5185_v17 = vmax.f32 %v5108_v45, 0.0  ;;  %v6338_v45 = vpack.c.bf16 %v6267_v57, %v6266_v44 }
 0x716   : > { %v3905_v15 = vpop.f32.mrf.mxu2 }
 0x717   : > { %v5647_v40 = vmul.f32 %v15673_v8, %v5185_v17  ;;  %v3993_v56 = vadd.f32 %v3905_v15, %v3475_v0  ;;  %v6268_v8 = vld [vmem:[#allocation2 + $0x60] sm:$0xff] }
 0x718   : > { %v4423_v9 = vpop.f32.mrf.mxu3  ;;  %v4939_v61 = vpop.f32.mrf.mxu0 }
 0x719   : > { %5763 = vst.msk [vmem:[#allocation2 + $0x23b] sm:$0xff] %vm761_vm2, %v5647_v40  ;;  %v5028_v10 = vadd.f32 %v4939_v61, %v4510_v7  ;;  %v15679_v47 = vpop.f32.mrf.mxu1  ;;  %v5689_v46 = vpack.c.bf16 %v5647_v40, %v5646_v23  ;;  %v15689_v7 = vpop.permute.xlu1 %5545  ;;  %v4511_v23 = vadd.f32 %v4423_v9, %v3993_v56  ;;  %v18015_v40 = vld [vmem:[#allocation30_spill] sm:$0xff] }
 0x71a   : > { %18012 = vst [vmem:[#allocation29_spill] sm:$0xff] %v15679_v47  ;;  %v15697_v61 = vpop.permute.xlu2 %5550  ;;  %v6786_v47 = vld [vmem:[#allocation2 + $0x61] sm:$0xff] }
 0x71b   : > { %v5109_v17 = vadd.f32 %v15508_v60, %v5028_v10  ;;  %11007 = vmatmul.msk.bf16.gmra.mxu2 %vm761_vm2, %v6338_v45  ;;  %11086 = vmatmul.msk.bf16.gmra.mxu0 %vm761_vm2, %v15681_v12  ;;  %18013 = vst [vmem:[#allocation45_spill] sm:$0xff] %v15689_v7  ;;  %v7303_v45 = vld [vmem:[#allocation2 + $0x5a] sm:$0xff] }
 0x71c   : > { %10996 = vmatmul.msk.bf16.gmra.mxu1 %vm761_vm2, %v5689_v46  ;;  %18016 = vst [vmem:[#allocation30_spill] sm:$0xff] %v15697_v61  ;;  %v6269_v46 = vld [vmem:[#allocation2 + $0x68] sm:$0xff] }
 0x71d   : > { %11047 = vmatmul.msk.bf16.gmra.mxu3 %vm761_vm2, %v6856_v25  ;;  %v5186_v30 = vmax.f32 %v5109_v17, 0.0  ;;  %v6787_v17 = vld [vmem:[#allocation2 + $0x69] sm:$0xff] }
 0x71e   : > { %v3908_v44 = vpop.f32.mrf.mxu2 }
 0x71f   : > { %v5648_v22 = vmul.f32 %v15689_v7, %v5186_v30  ;;  %v3994_v51 = vadd.f32 %v3908_v44, %v18015_v40  ;;  %v18017_v30 = vld [vmem:[#allocation31_spill] sm:$0xff]  ;;  %v18018_v7 = vld [vmem:[#allocation46_spill] sm:$0xff] }
 0x720   : > { %v4426_v24 = vpop.f32.mrf.mxu3  ;;  %v4941_v15 = vpop.f32.mrf.mxu0 }
 0x721   : > { %5764 = vst.msk [vmem:[#allocation2 + $0x243] sm:$0xff] %vm761_vm2, %v5648_v22  ;;  %v5029_v57 = vadd.f32 %v4941_v15, %v4511_v23  ;;  %v15693_v36 = vpop.f32.mrf.mxu1  ;;  %v4512_v9 = vadd.f32 %v4426_v24, %v3994_v51  ;;  %v3477_v23 = vadd.f32 %v18018_v7, %v18017_v30  ;;  %v6857_v24 = vpack.c.bf16 %v6787_v17, %v6786_v47 }
 0x722   : > { %18014 = vst [vmem:[#allocation99_spill] sm:$0xff] %v15693_v36  ;;  %v7302_v36 = vld [vmem:[#allocation2 + $0x52] sm:$0xff] }
 0x723   : > { %v5110_v37 = vadd.f32 %v15508_v60, %v5029_v57  ;;  %v15705_v21 = vpack.c.bf16 %v7303_v45, %v7302_v36 }
 0x725   : > { %v5187_v0 = vmax.f32 %v5110_v37, 0.0  ;;  %v6339_v37 = vpack.c.bf16 %v6269_v46, %v6268_v8 }
 0x726   : > { %v3910_v10 = vpop.f32.mrf.mxu2 }
 0x727   : > { %v5649_v25 = vmul.f32 %v15697_v61, %v5187_v0  ;;  %v3995_v51 = vadd.f32 %v3910_v10, %v3477_v23  ;;  %v15721_v23 = vpop.permute.xlu1 %5560  ;;  %v7304_v61 = vld [vmem:[#allocation2 + $0x62] sm:$0xff] }
 0x728   : > { %v4428_v56 = vpop.f32.mrf.mxu3  ;;  %v4944_v15 = vpop.f32.mrf.mxu0  ;;  %18022 = vst [vmem:[#allocation101_spill] sm:$0xff] %v15721_v23 }
 0x729   : > { %5765 = vst.msk [vmem:[#allocation2 + $0x24b] sm:$0xff] %vm761_vm2, %v5649_v25  ;;  %v5030_v44 = vadd.f32 %v4944_v15, %v4512_v9  ;;  %v15703_v57 = vpop.f32.mrf.mxu1  ;;  %v5690_v40 = vpack.c.bf16 %v5649_v25, %v5648_v22  ;;  %v15713_v9 = vpop.permute.xlu0 %5555  ;;  %v4513_v22 = vadd.f32 %v4428_v56, %v3995_v51  ;;  %v6789_v51 = vld [vmem:[#allocation2 + $0x79] sm:$0xff] }
 0x72a   : > { %18019 = vst [vmem:[#allocation31_spill] sm:$0xff] %v15703_v57 }
 0x72b   : > { %v5111_v0 = vadd.f32 %v15508_v60, %v5030_v44  ;;  %11008 = vmatmul.msk.bf16.gmra.mxu2 %vm761_vm2, %v6339_v37  ;;  %11087 = vmatmul.msk.bf16.gmra.mxu0 %vm761_vm2, %v15705_v21  ;;  %18020 = vst [vmem:[#allocation46_spill] sm:$0xff] %v15713_v9  ;;  %v6271_v44 = vld [vmem:[#allocation2 + $0x78] sm:$0xff] }
 0x72c   : > { %10997 = vmatmul.msk.bf16.gmra.mxu1 %vm761_vm2, %v5690_v40  ;;  %v7305_v40 = vld [vmem:[#allocation2 + $0x6a] sm:$0xff] }
 0x72d   : > { %11048 = vmatmul.msk.bf16.gmra.mxu3 %vm761_vm2, %v6857_v24  ;;  %v5188_v7 = vmax.f32 %v5111_v0, 0.0  ;;  %v18023_v0 = vld [vmem:[#allocation32_spill] sm:$0xff]  ;;  %v15729_v57 = vpack.c.bf16 %v7305_v40, %v7304_v61 }
 0x72e   : > { %v3913_v8 = vpop.f32.mrf.mxu2 }
 0x72f   : > { %v5650_v36 = vmul.f32 %v15713_v9, %v5188_v7  ;;  %v3996_v25 = vadd.f32 %v3913_v8, %v14409_v27  ;;  %v18024_v7 = vld [vmem:[#allocation33_spill] sm:$0xff]  ;;  %v6270_v9 = vld [vmem:[#allocation2 + $0x70] sm:$0xff] }
 0x730   : > { %v4431_v47 = vpop.f32.mrf.mxu3  ;;  %v4946_v10 = vpop.f32.mrf.mxu0 }
 0x731   : > { %5766 = vst.msk [vmem:[#allocation2 + $0x253] sm:$0xff] %vm761_vm2, %v5650_v36  ;;  %v5031_v46 = vadd.f32 %v4946_v10, %v4513_v22  ;;  %v15717_v45 = vpop.f32.mrf.mxu1  ;;  %v4514_v56 = vadd.f32 %v4431_v47, %v3996_v25  ;;  %v3479_v22 = vadd.f32 %v18024_v7, %v18023_v0  ;;  %v11201_v0 = vld [vmem:[%s11473_s25 + $0x1e] sm:$0x3]  ;;  %v18026_v7 = vld [vmem:[#allocation47_spill] sm:$0xff] }
 0x732   : > { %18021 = vst [vmem:[#allocation100_spill] sm:$0xff] %v15717_v45  ;;  %v6788_v45 = vld [vmem:[#allocation2 + $0x71] sm:$0xff] }
 0x733   : > { %v5112_v17 = vadd.f32 %v15508_v60, %v5031_v46  ;;  %v6858_v47 = vpack.c.bf16 %v6789_v51, %v6788_v45  ;;  %v11161_v51 = vld [vmem:[%s11473_s25 + $0x1c] sm:$0x3] }
 0x735   : > { %v5189_v30 = vmax.f32 %v5112_v17, 0.0  ;;  %v6340_v17 = vpack.c.bf16 %v6271_v44, %v6270_v9  ;;  %v15737_v9 = vpop.permute.xlu2 %5565 }
 0x736   : > { %v3915_v15 = vpop.f32.mrf.mxu2  ;;  %18025 = vst [vmem:[#allocation32_spill] sm:$0xff] %v15737_v9 }
 0x737   : > { %v5651_v37 = vmul.f32 %v15721_v23, %v5189_v30  ;;  %v3997_v25 = vadd.f32 %v3915_v15, %v3479_v22 }
 0x738   : > { %v4433_v24 = vpop.f32.mrf.mxu3  ;;  %v4949_v10 = vpop.f32.mrf.mxu0 }
 0x739   : > { %5767 = vst.msk [vmem:[#allocation2 + $0x25b] sm:$0xff] %vm761_vm2, %v5651_v37  ;;  %v5032_v27 = vadd.f32 %v4949_v10, %v4514_v56  ;;  %v15727_v8 = vpop.f32.mrf.mxu1  ;;  %v5691_v46 = vpack.c.bf16 %v5651_v37, %v5650_v36  ;;  %v4515_v45 = vadd.f32 %v4433_v24, %v3997_v25  ;;  %v15750_v24 = vld [vmem:[%s11468_s22 + $0x1] ss:$0 sm:$0xff] }
 0x73b   : > { %v5113_v30 = vadd.f32 %v15508_v60, %v5032_v27  ;;  %11009 = vmatmul.msk.bf16.gmra.mxu2 %vm761_vm2, %v6340_v17  ;;  %11088 = vmatmul.msk.bf16.gmra.mxu0 %vm761_vm2, %v15729_v57  ;;  %v8564_v27 = vsel %vm879_vm1, %v11161_v51, 0 }
 0x73c   : > { %10998 = vmatmul.msk.bf16.gmra.mxu1 %vm761_vm2, %v5691_v46  ;;  %v9082_v46 = vsel %vm879_vm1, %v11201_v0, 0  ;;  %8573 = vmatpush.bf16.msra.mxu2 %v8564_v27  ;;  %v6272_v27 = vld [vmem:[#allocation2 + $0x80] sm:$0xff] }
 0x73d   : > { %11049 = vmatmul.msk.bf16.gmra.mxu3 %vm761_vm2, %v6858_v47  ;;  %v5190_v36 = vmax.f32 %v5113_v30, 0.0  ;;  %v15752_v47 = vpop.permute.xlu0 %5570  ;;  %v6273_v30 = vld [vmem:[#allocation2 + $0x88] sm:$0xff] }
 0x73e   : > { %v3918_v61 = vpop.f32.mrf.mxu2  ;;  %9091 = vmatpush.bf16.msra.mxu3 %v9082_v46  ;;  %18027 = vst [vmem:[#allocation33_spill] sm:$0xff] %v15752_v47 }
 0x73f   : > { %v5652_v15 = vmul.f32 %v15737_v9, %v5190_v36  ;;  %v3998_v22 = vadd.f32 %v3918_v61, %v18026_v7  ;;  %v7307_v36 = vld [vmem:[#allocation2 + $0x7a] sm:$0xff]  ;;  %v6791_v7 = vld [vmem:[#allocation2 + $0x89] sm:$0xff] }
 0x740   : > { %v4436_v44 = vpop.f32.mrf.mxu3  ;;  %v4951_v40 = vpop.f32.mrf.mxu0 }
 0x741   : > { %5768 = vst.msk [vmem:[#allocation2 + $0x263] sm:$0xff] %vm761_vm2, %v5652_v15  ;;  %v5033_v56 = vadd.f32 %v4951_v40, %v4515_v45  ;;  %v15741_v37 = vpop.f32.mrf.mxu1  ;;  %v4516_v45 = vadd.f32 %v4436_v44, %v3998_v22  ;;  %v6341_v22 = vpack.c.bf16 %v6273_v30, %v6272_v27 }
 0x743   : > { %v5114_v10 = vadd.f32 %v15508_v60, %v5033_v56  ;;  %v11343_v56 = vld [vmem:[%s17700_s4 + $0x13] sm:$0xff] }
 0x744   : > { %v5777_v51 = vadd.f32 %v11343_v56, %v15750_v24  ;;  %v11281_v56 = vld [vmem:[%s11473_s25 + $0x22] sm:$0x3] }
 0x745   : > { %v5191_v17 = vmax.f32 %v5114_v10, 0.0  ;;  %v7306_v10 = vld [vmem:[#allocation2 + $0x72] sm:$0xff] }
 0x746   : > { %v3920_v25 = vpop.f32.mrf.mxu2 }
 0x747   : > { %v5653_v40 = vmul.f32 %v15752_v47, %v5191_v17  ;;  %v6790_v17 = vld [vmem:[#allocation2 + $0x81] sm:$0xff] }
 0x748   : > { %v4438_v61 = vpop.f32.mrf.mxu3  ;;  %v4954_v0 = vpop.f32.mrf.mxu0  ;;  %v6859_v47 = vpack.c.bf16 %v6791_v7, %v6790_v17  ;;  %v6275_v17 = vld [vmem:[#allocation2 + $0x98] sm:$0xff] }
 0x749   : > { %5769 = vst.msk [vmem:[#allocation2 + $0x26b] sm:$0xff] %vm761_vm2, %v5653_v40  ;;  %v5034_v46 = vadd.f32 %v4954_v0, %v4516_v45  ;;  %v15760_v25 = vpop.f32.mrf.mxu1  ;;  %v5692_v44 = vpack.c.bf16 %v5653_v40, %v5652_v15  ;;  %v15762_v61 = vpack.c.bf16 %v7307_v36, %v7306_v10  ;;  %v11241_v45 = vld [vmem:[%s11473_s25 + $0x20] sm:$0x3]  ;;  %v6179_v15 = vadd.f32 %v14777_v32, %v5777_v51  ;;  %v15775_v7 = vpop.permute.xlu1 %5575 }
 0x74a   : > { %v9600_v36 = vsel %vm879_vm1, %v11241_v45, 0  ;;  %v10118_v40 = vsel %vm879_vm1, %v11281_v56, 0  ;;  %18028 = vst [vmem:[#allocation47_spill] sm:$0xff] %v15775_v7  ;;  %v11344_v32 = vld [vmem:[%s17700_s4 + $0x1b] sm:$0xff]  ;;  %v7309_v45 = vld [vmem:[#allocation2 + $0x8a] sm:$0xff] }
 0x74b   : > { %v5115_v9 = vadd.f32 %v15508_v60, %v5034_v46  ;;  %11010 = vmatmul.msk.bf16.gmra.mxu2 %vm761_vm2, %v6341_v22  ;;  %11089 = vmatmul.msk.bf16.gmra.mxu0 %vm761_vm2, %v15762_v61 }
 0x74c   : > { %10999 = vmatmul.msk.bf16.gmra.mxu1 %vm761_vm2, %v5692_v44  ;;  %9609 = vmatpush.bf16.msra.mxu0 %v9600_v36  ;;  %v11345_v36 = vld [vmem:[%s17700_s4 + $0x23] sm:$0xff] }
 0x74d   : > { %11050 = vmatmul.msk.bf16.gmra.mxu3 %vm761_vm2, %v6859_v47  ;;  %v5192_v30 = vmax.f32 %v5115_v9, 0.0  ;;  %10127 = vmatpush.bf16.msra.mxu1 %v10118_v40  ;;  %v5778_v9 = vadd.f32 %v11344_v32, %v15750_v24  ;;  %v5779_v40 = vadd.f32 %v11345_v36, %v15750_v24  ;;  %v7308_v32 = vld [vmem:[#allocation2 + $0x82] sm:$0xff] }
 0x74e   : > { %v6503_v60 = vpop.f32.mrf.mxu2  ;;  %v15794_v23 = vpack.c.bf16 %v7309_v45, %v7308_v32 }
 0x74f   : > { %v5654_v0 = vmul.f32 %v15775_v7, %v5192_v30  ;;  %v6697_v27 = vadd.f32 %v6503_v60, %v6179_v15  ;;  %v6180_v44 = vadd.f32 %v14789_v41, %v5778_v9  ;;  %v6793_v30 = vld [vmem:[#allocation2 + $0x99] sm:$0xff]  ;;  %v6792_v9 = vld [vmem:[#allocation2 + $0x91] sm:$0xff] }
 0x750   : > { %v7021_v10 = vpop.f32.mrf.mxu3  ;;  %v4956_v47 = vpop.f32.mrf.mxu0 }
 0x751   : > { %5771 = vst.msk [vmem:[#allocation2 + $0x273] sm:$0x3] %vm5770_vm3, %v5654_v0  ;;  %v7215_v51 = vadd.f32 %v7021_v10, %v6697_v27  ;;  %v15783_v46 = vpop.f32.mrf.mxu1  ;;  %v6274_v47 = vld [vmem:[#allocation2 + $0x90] sm:$0xff] }
 0x752   : > { %v6342_v41 = vpack.c.bf16 %v6275_v17, %v6274_v47 }
 0x756   : > { %v6505_v22 = vpop.f32.mrf.mxu2 }
 0x757   : > { %v6698_v56 = vadd.f32 %v6505_v22, %v6180_v44  ;;  %v5693_v44 = vpack.c.bf16 %v5654_v0, %v5654_v0  ;;  %v6860_v22 = vpack.c.bf16 %v6793_v30, %v6792_v9  ;;  %v11346_v0 = vld [vmem:[%s17700_s4 + $0x2b] sm:$0xff] }
 0x758   : > { %v7023_v15 = vpop.f32.mrf.mxu3  ;;  %v7539_v60 = vpop.f32.mrf.mxu0  ;;  %v5780_v45 = vadd.f32 %v11346_v0, %v15750_v24  ;;  %v6277_v9 = vld [vmem:[#allocation2 + $0xa8] sm:$0xff] }
 0x759   : > { %v7216_v27 = vadd.f32 %v7023_v15, %v6698_v56  ;;  %v15790_v10 = vpop.f32.mrf.mxu1  ;;  %v15792_v7 = vadd.f32 %v7539_v60, %v7215_v51  ;;  %v6181_v56 = vadd.f32 %v14815_v35, %v5779_v40  ;;  %v7311_v35 = vld [vmem:[#allocation2 + $0x9a] sm:$0xff] }
 0x75a   : > { %18029 = vst [vmem:[#allocation102_spill] sm:$0xff] %v15790_v10  ;;  %v6182_v32 = vadd.f32 %v14827_v62, %v5780_v45  ;;  %v6794_v45 = vld [vmem:[#allocation2 + $0xa1] sm:$0xff] }
 0x75b   : > { %11011 = vmatmul.msk.bf16.gmra.mxu2 %vm761_vm2, %v6342_v41  ;;  %11090 = vmatmul.msk.bf16.gmra.mxu0 %vm761_vm2, %v15794_v23 }
 0x75c   : > { %11000 = vmatmul.msk.bf16.gmra.mxu1 %vm761_vm2, %v5693_v44 }
 0x75d   : > { %11051 = vmatmul.msk.bf16.gmra.mxu3 %vm761_vm2, %v6860_v22  ;;  %v6795_v22 = vld [vmem:[#allocation2 + $0xa9] sm:$0xff] }
 0x75e   : > { %v6508_v15 = vpop.f32.mrf.mxu2 }
 0x75f   : > { %v6699_v51 = vadd.f32 %v6508_v15, %v6181_v56  ;;  %v11347_v56 = vld [vmem:[%s17700_s4 + $0x33] sm:$0xff] }
 0x760   : > { %v7026_v36 = vpop.f32.mrf.mxu3  ;;  %v7541_v17 = vpop.f32.mrf.mxu0  ;;  %v5781_v15 = vadd.f32 %v11347_v56, %v15750_v24 }
 0x761   : > { %v7217_v30 = vadd.f32 %v7026_v36, %v6699_v51  ;;  %v15806_v60 = vpop.f32.mrf.mxu1  ;;  %v15808_v47 = vadd.f32 %v7541_v17, %v7216_v27  ;;  %v6276_v51 = vld [vmem:[#allocation2 + $0xa0] sm:$0xff]  ;;  %v7310_v36 = vld [vmem:[#allocation2 + $0x92] sm:$0xff] }
 0x762   : > { %18030 = vst [vmem:[#allocation103_spill] sm:$0xff] %v15806_v60  ;;  %v6343_v62 = vpack.c.bf16 %v6277_v9, %v6276_v51  ;;  %v15819_v10 = vpack.c.bf16 %v7311_v35, %v7310_v36  ;;  %v11348_v35 = vld [vmem:[%s17700_s4 + $0x3b] sm:$0xff] }
 0x766   : > { %v6510_v41 = vpop.f32.mrf.mxu2 }
 0x767   : > { %v6700_v40 = vadd.f32 %v6510_v41, %v6182_v32  ;;  %v6861_v32 = vpack.c.bf16 %v6795_v22, %v6794_v45  ;;  %v6183_v41 = vadd.f32 %v14853_v54, %v5781_v15  ;;  %v5782_v22 = vadd.f32 %v11348_v35, %v15750_v24  ;;  %v7313_v54 = vld [vmem:[#allocation2 + $0xaa] sm:$0xff] }
 0x768   : > { %v7028_v44 = vpop.f32.mrf.mxu3  ;;  %v7544_v0 = vpop.f32.mrf.mxu0 }
 0x769   : > { %v7218_v60 = vadd.f32 %v7028_v44, %v6700_v40  ;;  %v15815_v27 = vpop.f32.mrf.mxu1  ;;  %v15817_v17 = vadd.f32 %v7544_v0, %v7217_v30  ;;  %v6184_v36 = vadd.f32 %v14865_v13, %v5782_v22  ;;  %v6796_v22 = vld [vmem:[#allocation2 + $0xb1] sm:$0xff] }
 0x76a   : > { %18031 = vst [vmem:[#allocation104_spill] sm:$0xff] %v15815_v27 }
 0x76b   : > { %11012 = vmatmul.msk.bf16.gmra.mxu2 %vm761_vm2, %v6343_v62  ;;  %11091 = vmatmul.msk.bf16.gmra.mxu0 %vm761_vm2, %v15819_v10  ;;  %v6279_v62 = vld [vmem:[#allocation2 + $0xb8] sm:$0xff] }
 0x76c   : > { %11122 = vmatmul.msk.bf16.vlgmr.msrb.gmra.mxu1 %vm761_vm2, %v15609_v49 }
 0x76d   : > { %11052 = vmatmul.msk.bf16.gmra.mxu3 %vm761_vm2, %v6861_v32  ;;  %v6797_v32 = vld [vmem:[#allocation2 + $0xb9] sm:$0xff] }
 0x76e   : > { %v6513_v40 = vpop.f32.mrf.mxu2 }
 0x76f   : > { %v6701_v30 = vadd.f32 %v6513_v40, %v6183_v41  ;;  %v11349_v41 = vld [vmem:[%s17700_s4 + $0x43] sm:$0xff] }
 0x770   : > { %v7031_v44 = vpop.f32.mrf.mxu3  ;;  %v7546_v9 = vpop.f32.mrf.mxu0  ;;  %v5783_v40 = vadd.f32 %v11349_v41, %v15750_v24 }
 0x771   : > { %v7219_v56 = vadd.f32 %v7031_v44, %v6701_v30  ;;  %v15832_v0 = vpop.f32.mrf.mxu1  ;;  %v15834_v51 = vadd.f32 %v7546_v9, %v7218_v60  ;;  %v6278_v30 = vld [vmem:[#allocation2 + $0xb0] sm:$0xff]  ;;  %v7312_v44 = vld [vmem:[#allocation2 + $0xa2] sm:$0xff] }
 0x772   : > { %18032 = vst [vmem:[#allocation105_spill] sm:$0xff] %v15832_v0  ;;  %v6344_v13 = vpack.c.bf16 %v6279_v62, %v6278_v30  ;;  %v15845_v27 = vpack.c.bf16 %v7313_v54, %v7312_v44  ;;  %v11350_v54 = vld [vmem:[%s17700_s4 + $0x4b] sm:$0xff] }
 0x776   : > { %v6515_v49 = vpop.f32.mrf.mxu2 }
 0x777   : > { %v6702_v15 = vadd.f32 %v6515_v49, %v6184_v36  ;;  %v6862_v36 = vpack.c.bf16 %v6797_v32, %v6796_v22  ;;  %v6185_v49 = vadd.f32 %v14891_v43, %v5783_v40  ;;  %v5784_v32 = vadd.f32 %v11350_v54, %v15750_v24  ;;  %v7315_v43 = vld [vmem:[#allocation2 + $0xba] sm:$0xff] }
 0x778   : > { %v7033_v45 = vpop.f32.mrf.mxu3  ;;  %v7549_v35 = vpop.f32.mrf.mxu0 }
 0x779   : > { %v7220_v0 = vadd.f32 %v7033_v45, %v6702_v15  ;;  %v15841_v60 = vpop.f32.mrf.mxu1  ;;  %v15843_v9 = vadd.f32 %v7549_v35, %v7219_v56  ;;  %v6186_v44 = vadd.f32 %v14903_v33, %v5784_v32  ;;  %v6798_v32 = vld [vmem:[#allocation2 + $0xc1] sm:$0xff] }
 0x77a   : > { %18033 = vst [vmem:[#allocation106_spill] sm:$0xff] %v15841_v60 }
 0x77b   : > { %11013 = vmatmul.msk.bf16.gmra.mxu2 %vm761_vm2, %v6344_v13  ;;  %11092 = vmatmul.msk.bf16.gmra.mxu0 %vm761_vm2, %v15845_v27  ;;  %v6281_v13 = vld [vmem:[#allocation2 + $0xc8] sm:$0xff] }
 0x77c   : > { %11123 = vmatmul.msk.bf16.gmra.mxu1 %vm761_vm2, %v15633_v58 }
 0x77d   : > { %11053 = vmatmul.msk.bf16.gmra.mxu3 %vm761_vm2, %v6862_v36  ;;  %v6799_v36 = vld [vmem:[#allocation2 + $0xc9] sm:$0xff] }
 0x77e   : > { %v6518_v15 = vpop.f32.mrf.mxu2 }
 0x77f   : > { %v6703_v56 = vadd.f32 %v6518_v15, %v6185_v49  ;;  %v11351_v49 = vld [vmem:[%s17700_s4 + $0x53] sm:$0xff] }
 0x780   : > { %v7036_v45 = vpop.f32.mrf.mxu3  ;;  %v7551_v62 = vpop.f32.mrf.mxu0  ;;  %v5785_v15 = vadd.f32 %v11351_v49, %v15750_v24 }
 0x781   : > { %v7221_v41 = vadd.f32 %v7036_v45, %v6703_v56  ;;  %v15858_v35 = vpop.f32.mrf.mxu1  ;;  %v15860_v30 = vadd.f32 %v7551_v62, %v7220_v0  ;;  %v6280_v56 = vld [vmem:[#allocation2 + $0xc0] sm:$0xff]  ;;  %v7314_v45 = vld [vmem:[#allocation2 + $0xb2] sm:$0xff] }
 0x782   : > { %18034 = vst [vmem:[#allocation107_spill] sm:$0xff] %v15858_v35  ;;  %v6345_v33 = vpack.c.bf16 %v6281_v13, %v6280_v56  ;;  %v15871_v60 = vpack.c.bf16 %v7315_v43, %v7314_v45  ;;  %v11352_v43 = vld [vmem:[%s17700_s4 + $0x5b] sm:$0xff] }
 0x786   : > { %v6520_v58 = vpop.f32.mrf.mxu2 }
 0x787   : > { %v6704_v40 = vadd.f32 %v6520_v58, %v6186_v44  ;;  %v6863_v44 = vpack.c.bf16 %v6799_v36, %v6798_v32  ;;  %v6187_v58 = vadd.f32 %v14929_v16, %v5785_v15  ;;  %v5786_v36 = vadd.f32 %v11352_v43, %v15750_v24  ;;  %v7317_v16 = vld [vmem:[#allocation2 + $0xca] sm:$0xff] }
 0x788   : > { %v7038_v22 = vpop.f32.mrf.mxu3  ;;  %v7554_v54 = vpop.f32.mrf.mxu0 }
 0x789   : > { %v7222_v35 = vadd.f32 %v7038_v22, %v6704_v40  ;;  %v15867_v0 = vpop.f32.mrf.mxu1  ;;  %v15869_v62 = vadd.f32 %v7554_v54, %v7221_v41  ;;  %v6188_v45 = vadd.f32 %v14941_v39, %v5786_v36  ;;  %v6800_v36 = vld [vmem:[#allocation2 + $0xd1] sm:$0xff] }
 0x78a   : > { %18035 = vst [vmem:[#allocation108_spill] sm:$0xff] %v15867_v0 }
 0x78b   : > { %11014 = vmatmul.msk.bf16.gmra.mxu2 %vm761_vm2, %v6345_v33  ;;  %11093 = vmatmul.msk.bf16.gmra.mxu0 %vm761_vm2, %v15871_v60  ;;  %v6283_v33 = vld [vmem:[#allocation2 + $0xd8] sm:$0xff] }
 0x78c   : > { %11124 = vmatmul.msk.bf16.gmra.mxu1 %vm761_vm2, %v15657_v18 }
 0x78d   : > { %11054 = vmatmul.msk.bf16.gmra.mxu3 %vm761_vm2, %v6863_v44  ;;  %v6801_v44 = vld [vmem:[#allocation2 + $0xd9] sm:$0xff] }
 0x78e   : > { %v6523_v40 = vpop.f32.mrf.mxu2 }
 0x78f   : > { %v6705_v41 = vadd.f32 %v6523_v40, %v6187_v58  ;;  %v11353_v58 = vld [vmem:[%s17700_s4 + $0x63] sm:$0xff] }
 0x790   : > { %v7041_v22 = vpop.f32.mrf.mxu3  ;;  %v7556_v13 = vpop.f32.mrf.mxu0  ;;  %v5787_v40 = vadd.f32 %v11353_v58, %v15750_v24 }
 0x791   : > { %v7223_v49 = vadd.f32 %v7041_v22, %v6705_v41  ;;  %v15884_v54 = vpop.f32.mrf.mxu1  ;;  %v15886_v56 = vadd.f32 %v7556_v13, %v7222_v35  ;;  %v6282_v41 = vld [vmem:[#allocation2 + $0xd0] sm:$0xff]  ;;  %v7316_v22 = vld [vmem:[#allocation2 + $0xc2] sm:$0xff] }
 0x792   : > { %18036 = vst [vmem:[#allocation109_spill] sm:$0xff] %v15884_v54  ;;  %v6346_v39 = vpack.c.bf16 %v6283_v33, %v6282_v41  ;;  %v15897_v0 = vpack.c.bf16 %v7317_v16, %v7316_v22  ;;  %v11354_v16 = vld [vmem:[%s17700_s4 + $0x6b] sm:$0xff] }
 0x796   : > { %v6525_v18 = vpop.f32.mrf.mxu2 }
 0x797   : > { %v6706_v15 = vadd.f32 %v6525_v18, %v6188_v45  ;;  %v6864_v45 = vpack.c.bf16 %v6801_v44, %v6800_v36  ;;  %v6189_v18 = vadd.f32 %v14967_v31, %v5787_v40  ;;  %v5788_v44 = vadd.f32 %v11354_v16, %v15750_v24  ;;  %v7319_v31 = vld [vmem:[#allocation2 + $0xda] sm:$0xff] }
 0x798   : > { %v7043_v32 = vpop.f32.mrf.mxu3  ;;  %v7559_v43 = vpop.f32.mrf.mxu0 }
 0x799   : > { %v7224_v54 = vadd.f32 %v7043_v32, %v6706_v15  ;;  %v15893_v35 = vpop.f32.mrf.mxu1  ;;  %v15895_v13 = vadd.f32 %v7559_v43, %v7223_v49  ;;  %v6190_v22 = vadd.f32 %v14982_v63, %v5788_v44  ;;  %v6802_v44 = vld [vmem:[#allocation2 + $0xe1] sm:$0xff] }
 0x79a   : > { %18037 = vst [vmem:[#allocation110_spill] sm:$0xff] %v15893_v35 }
 0x79b   : > { %11015 = vmatmul.msk.bf16.gmra.mxu2 %vm761_vm2, %v6346_v39  ;;  %11094 = vmatmul.msk.bf16.gmra.mxu0 %vm761_vm2, %v15897_v0  ;;  %v6285_v39 = vld [vmem:[#allocation2 + $0xe8] sm:$0xff] }
 0x79c   : > { %11125 = vmatmul.msk.bf16.gmra.mxu1 %vm761_vm2, %v15681_v12 }
 0x79d   : > { %11055 = vmatmul.msk.bf16.gmra.mxu3 %vm761_vm2, %v6864_v45  ;;  %v6803_v45 = vld [vmem:[#allocation2 + $0xe9] sm:$0xff] }
 0x79e   : > { %v6528_v15 = vpop.f32.mrf.mxu2 }
 0x79f   : > { %v6707_v49 = vadd.f32 %v6528_v15, %v6189_v18  ;;  %v11355_v18 = vld [vmem:[%s17700_s4 + $0x73] sm:$0xff] }
 0x7a0   : > { %v7046_v32 = vpop.f32.mrf.mxu3  ;;  %v7561_v33 = vpop.f32.mrf.mxu0  ;;  %v5789_v15 = vadd.f32 %v11355_v18, %v15750_v24 }
 0x7a1   : > { %v7225_v58 = vadd.f32 %v7046_v32, %v6707_v49  ;;  %v15910_v43 = vpop.f32.mrf.mxu1  ;;  %v15912_v41 = vadd.f32 %v7561_v33, %v7224_v54  ;;  %v6284_v49 = vld [vmem:[#allocation2 + $0xe0] sm:$0xff]  ;;  %v7318_v32 = vld [vmem:[#allocation2 + $0xd2] sm:$0xff] }
 0x7a2   : > { %18038 = vst [vmem:[#allocation111_spill] sm:$0xff] %v15910_v43  ;;  %v6347_v63 = vpack.c.bf16 %v6285_v39, %v6284_v49  ;;  %v15923_v35 = vpack.c.bf16 %v7319_v31, %v7318_v32  ;;  %v11356_v31 = vld [vmem:[%s17700_s4 + $0x7b] sm:$0xff] }
 0x7a6   : > { %v6530_v12 = vpop.f32.mrf.mxu2 }
 0x7a7   : > { %v6708_v40 = vadd.f32 %v6530_v12, %v6190_v22  ;;  %v6865_v22 = vpack.c.bf16 %v6803_v45, %v6802_v44  ;;  %v6191_v12 = vadd.f32 %v15008_v19, %v5789_v15  ;;  %v5790_v45 = vadd.f32 %v11356_v31, %v15750_v24  ;;  %v7321_v19 = vld [vmem:[#allocation2 + $0xea] sm:$0xff] }
 0x7a8   : > { %v7048_v36 = vpop.f32.mrf.mxu3  ;;  %v7564_v16 = vpop.f32.mrf.mxu0 }
 0x7a9   : > { %v7226_v43 = vadd.f32 %v7048_v36, %v6708_v40  ;;  %v15919_v54 = vpop.f32.mrf.mxu1  ;;  %v15921_v33 = vadd.f32 %v7564_v16, %v7225_v58  ;;  %v6192_v32 = vadd.f32 %v15020_v5, %v5790_v45  ;;  %v6804_v45 = vld [vmem:[#allocation2 + $0xf1] sm:$0xff] }
 0x7aa   : > { %18039 = vst [vmem:[#allocation112_spill] sm:$0xff] %v15919_v54 }
 0x7ab   : > { %11016 = vmatmul.msk.bf16.gmra.mxu2 %vm761_vm2, %v6347_v63  ;;  %11095 = vmatmul.msk.bf16.gmra.mxu0 %vm761_vm2, %v15923_v35  ;;  %v6287_v63 = vld [vmem:[#allocation2 + $0xf8] sm:$0xff] }
 0x7ac   : > { %11126 = vmatmul.msk.bf16.gmra.mxu1 %vm761_vm2, %v15705_v21 }
 0x7ad   : > { %11056 = vmatmul.msk.bf16.gmra.mxu3 %vm761_vm2, %v6865_v22  ;;  %v6805_v22 = vld [vmem:[#allocation2 + $0xf9] sm:$0xff] }
 0x7ae   : > { %v6533_v40 = vpop.f32.mrf.mxu2 }
 0x7af   : > { %v6709_v58 = vadd.f32 %v6533_v40, %v6191_v12  ;;  %v11357_v12 = vld [vmem:[%s17700_s4 + $0x83] sm:$0xff] }
 0x7b0   : > { %v7051_v36 = vpop.f32.mrf.mxu3  ;;  %v7566_v39 = vpop.f32.mrf.mxu0  ;;  %v5791_v40 = vadd.f32 %v11357_v12, %v15750_v24 }
 0x7b1   : > { %v7227_v18 = vadd.f32 %v7051_v36, %v6709_v58  ;;  %v15936_v16 = vpop.f32.mrf.mxu1  ;;  %v15938_v49 = vadd.f32 %v7566_v39, %v7226_v43  ;;  %v6286_v58 = vld [vmem:[#allocation2 + $0xf0] sm:$0xff]  ;;  %v7320_v36 = vld [vmem:[#allocation2 + $0xe2] sm:$0xff] }
 0x7b2   : > { %18040 = vst [vmem:[#allocation113_spill] sm:$0xff] %v15936_v16  ;;  %v6348_v5 = vpack.c.bf16 %v6287_v63, %v6286_v58  ;;  %v15949_v54 = vpack.c.bf16 %v7321_v19, %v7320_v36  ;;  %v11358_v19 = vld [vmem:[%s17700_s4 + $0x8b] sm:$0xff] }
 0x7b6   : > { %v6535_v21 = vpop.f32.mrf.mxu2 }
 0x7b7   : > { %v6710_v15 = vadd.f32 %v6535_v21, %v6192_v32  ;;  %v6866_v32 = vpack.c.bf16 %v6805_v22, %v6804_v45  ;;  %v6193_v21 = vadd.f32 %v15046_v2, %v5791_v40  ;;  %v5792_v22 = vadd.f32 %v11358_v19, %v15750_v24  ;;  %v7323_v2 = vld [vmem:[#allocation2 + $0xfa] sm:$0xff] }
 0x7b8   : > { %v7053_v44 = vpop.f32.mrf.mxu3  ;;  %v7569_v31 = vpop.f32.mrf.mxu0 }
 0x7b9   : > { %v7228_v16 = vadd.f32 %v7053_v44, %v6710_v15  ;;  %v15945_v43 = vpop.f32.mrf.mxu1  ;;  %v15947_v39 = vadd.f32 %v7569_v31, %v7227_v18  ;;  %v6194_v36 = vadd.f32 %v15058_v50, %v5792_v22  ;;  %v6806_v22 = vld [vmem:[#allocation2 + $0x101] sm:$0xff] }
 0x7ba   : > { %18041 = vst [vmem:[#allocation114_spill] sm:$0xff] %v15945_v43 }
 0x7bb   : > { %11017 = vmatmul.msk.bf16.gmra.mxu2 %vm761_vm2, %v6348_v5  ;;  %11096 = vmatmul.msk.bf16.gmra.mxu0 %vm761_vm2, %v15949_v54  ;;  %v6289_v5 = vld [vmem:[#allocation2 + $0x108] sm:$0xff] }
 0x7bc   : > { %11127 = vmatmul.msk.bf16.gmra.mxu1 %vm761_vm2, %v15729_v57 }
 0x7bd   : > { %11057 = vmatmul.msk.bf16.gmra.mxu3 %vm761_vm2, %v6866_v32  ;;  %v6807_v32 = vld [vmem:[#allocation2 + $0x109] sm:$0xff] }
 0x7be   : > { %v6538_v15 = vpop.f32.mrf.mxu2 }
 0x7bf   : > { %v6711_v18 = vadd.f32 %v6538_v15, %v6193_v21  ;;  %v11359_v21 = vld [vmem:[%s17700_s4 + $0x93] sm:$0xff] }
 0x7c0   : > { %v7056_v44 = vpop.f32.mrf.mxu3  ;;  %v7571_v63 = vpop.f32.mrf.mxu0  ;;  %v5793_v15 = vadd.f32 %v11359_v21, %v15750_v24 }
 0x7c1   : > { %v7229_v12 = vadd.f32 %v7056_v44, %v6711_v18  ;;  %v15962_v31 = vpop.f32.mrf.mxu1  ;;  %v15964_v58 = vadd.f32 %v7571_v63, %v7228_v16  ;;  %v6288_v18 = vld [vmem:[#allocation2 + $0x100] sm:$0xff]  ;;  %v7322_v44 = vld [vmem:[#allocation2 + $0xf2] sm:$0xff] }
 0x7c2   : > { %18042 = vst [vmem:[#allocation115_spill] sm:$0xff] %v15962_v31  ;;  %v6349_v50 = vpack.c.bf16 %v6289_v5, %v6288_v18  ;;  %v15975_v43 = vpack.c.bf16 %v7323_v2, %v7322_v44  ;;  %v11360_v2 = vld [vmem:[%s17700_s4 + $0x9b] sm:$0xff] }
 0x7c6   : > { %v6540_v57 = vpop.f32.mrf.mxu2 }
 0x7c7   : > { %v6712_v40 = vadd.f32 %v6540_v57, %v6194_v36  ;;  %v6867_v36 = vpack.c.bf16 %v6807_v32, %v6806_v22  ;;  %v6195_v57 = vadd.f32 %v15084_v29, %v5793_v15  ;;  %v5794_v32 = vadd.f32 %v11360_v2, %v15750_v24  ;;  %v7325_v29 = vld [vmem:[#allocation2 + $0x10a] sm:$0xff] }
 0x7c8   : > { %v7058_v45 = vpop.f32.mrf.mxu3  ;;  %v7574_v19 = vpop.f32.mrf.mxu0 }
 0x7c9   : > { %v7230_v31 = vadd.f32 %v7058_v45, %v6712_v40  ;;  %v15971_v16 = vpop.f32.mrf.mxu1  ;;  %v15973_v63 = vadd.f32 %v7574_v19, %v7229_v12  ;;  %v6196_v44 = vadd.f32 %v15096_v48, %v5794_v32  ;;  %v6808_v32 = vld [vmem:[#allocation2 + $0x111] sm:$0xff] }
 0x7ca   : > { %18043 = vst [vmem:[#allocation116_spill] sm:$0xff] %v15971_v16 }
 0x7cb   : > { %11018 = vmatmul.msk.bf16.gmra.mxu2 %vm761_vm2, %v6349_v50  ;;  %11097 = vmatmul.msk.bf16.gmra.mxu0 %vm761_vm2, %v15975_v43  ;;  %v6291_v50 = vld [vmem:[#allocation2 + $0x118] sm:$0xff] }
 0x7cc   : > { %11128 = vmatmul.msk.bf16.gmra.mxu1 %vm761_vm2, %v15762_v61 }
 0x7cd   : > { %11058 = vmatmul.msk.bf16.gmra.mxu3 %vm761_vm2, %v6867_v36  ;;  %v6809_v36 = vld [vmem:[#allocation2 + $0x119] sm:$0xff] }
 0x7ce   : > { %v6543_v40 = vpop.f32.mrf.mxu2 }
 0x7cf   : > { %v6713_v12 = vadd.f32 %v6543_v40, %v6195_v57  ;;  %v11361_v57 = vld [vmem:[%s17700_s4 + $0xa3] sm:$0xff] }
 0x7d0   : > { %v7061_v45 = vpop.f32.mrf.mxu3  ;;  %v7576_v5 = vpop.f32.mrf.mxu0  ;;  %v5795_v40 = vadd.f32 %v11361_v57, %v15750_v24 }
 0x7d1   : > { %v7231_v21 = vadd.f32 %v7061_v45, %v6713_v12  ;;  %v15988_v19 = vpop.f32.mrf.mxu1  ;;  %v15990_v18 = vadd.f32 %v7576_v5, %v7230_v31  ;;  %v6290_v12 = vld [vmem:[#allocation2 + $0x110] sm:$0xff]  ;;  %v7324_v45 = vld [vmem:[#allocation2 + $0x102] sm:$0xff] }
 0x7d2   : > { %18044 = vst [vmem:[#allocation117_spill] sm:$0xff] %v15988_v19  ;;  %v6350_v48 = vpack.c.bf16 %v6291_v50, %v6290_v12  ;;  %v16001_v16 = vpack.c.bf16 %v7325_v29, %v7324_v45  ;;  %v11362_v29 = vld [vmem:[%s17700_s4 + $0xab] sm:$0xff] }
 0x7d6   : > { %v6545_v61 = vpop.f32.mrf.mxu2 }
 0x7d7   : > { %v6714_v15 = vadd.f32 %v6545_v61, %v6196_v44  ;;  %v6868_v44 = vpack.c.bf16 %v6809_v36, %v6808_v32  ;;  %v6197_v61 = vadd.f32 %v15122_v1, %v5795_v40  ;;  %v5796_v36 = vadd.f32 %v11362_v29, %v15750_v24  ;;  %v7327_v32 = vld [vmem:[#allocation2 + $0x11a] sm:$0xff] }
 0x7d8   : > { %v7063_v22 = vpop.f32.mrf.mxu3  ;;  %v7579_v2 = vpop.f32.mrf.mxu0  ;;  %v6292_v29 = vld [vmem:[#allocation2 + $0x120] sm:$0xff] }
 0x7d9   : > { %v7232_v19 = vadd.f32 %v7063_v22, %v6714_v15  ;;  %v15997_v31 = vpop.f32.mrf.mxu1  ;;  %v15999_v5 = vadd.f32 %v7579_v2, %v7231_v21  ;;  %v6198_v45 = vadd.f32 %v15134_v34, %v5796_v36  ;;  %v6810_v36 = vld [vmem:[#allocation2 + $0x121] sm:$0xff] }
 0x7da   : > { %18045 = vst [vmem:[#allocation118_spill] sm:$0xff] %v15997_v31 }
 0x7db   : > { %11019 = vmatmul.msk.bf16.gmra.mxu2 %vm761_vm2, %v6350_v48  ;;  %11098 = vmatmul.msk.bf16.gmra.mxu0 %vm761_vm2, %v16001_v16 }
 0x7dc   : > { %11129 = vmatmul.msk.bf16.gmra.mxu1 %vm761_vm2, %v15794_v23  ;;  %v6293_v23 = vld [vmem:[#allocation2 + $0x128] sm:$0xff] }
 0x7dd   : > { %11059 = vmatmul.msk.bf16.gmra.mxu3 %vm761_vm2, %v6868_v44  ;;  %v6811_v44 = vld [vmem:[#allocation2 + $0x129] sm:$0xff]  ;;  %v6351_v34 = vpack.c.bf16 %v6293_v23, %v6292_v29 }
 0x7de   : > { %v6548_v15 = vpop.f32.mrf.mxu2 }
 0x7df   : > { %v6715_v21 = vadd.f32 %v6548_v15, %v6197_v61  ;;  %v11363_v61 = vld [vmem:[%s17700_s4 + $0xb3] sm:$0xff] }
 0x7e0   : > { %v7066_v22 = vpop.f32.mrf.mxu3  ;;  %v7581_v50 = vpop.f32.mrf.mxu0  ;;  %v5797_v15 = vadd.f32 %v11363_v61, %v15750_v24 }
 0x7e1   : > { %v7233_v57 = vadd.f32 %v7066_v22, %v6715_v21  ;;  %v6177_v2 = vpop.f32.mrf.mxu1  ;;  %v16014_v12 = vadd.f32 %v7581_v50, %v7232_v19  ;;  %v7326_v21 = vld [vmem:[#allocation2 + $0x112] sm:$0xff] }
 0x7e2   : > { %v16023_v2 = vpack.c.bf16 %v7327_v32, %v7326_v21 }
 0x7e6   : > { %v6550_v48 = vpop.f32.mrf.mxu2 }
 0x7e7   : > { %v6716_v1 = vadd.f32 %v6550_v48, %v6198_v45  ;;  %v6869_v48 = vpack.c.bf16 %v6811_v44, %v6810_v36 }
 0x7e8   : > { %v7068_v40 = vpop.f32.mrf.mxu3  ;;  %v7584_v31 = vpop.f32.mrf.mxu0 }
 0x7e9   : > { %v7234_v22 = vadd.f32 %v7068_v40, %v6716_v1  ;;  %v16021_v19 = vadd.f32 %v7584_v31, %v7233_v57  ;;  %v8057_v50 = vpop.f32.mrf.mxu1  ;;  %v6199_v31 = vadd.f32 %v15160_v20, %v5797_v15  ;;  %v6295_v15 = vld [vmem:[#allocation2 + $0x138] sm:$0xff] }
 0x7ea   : > { %v16026_v45 = vadd.f32 %v8057_v50, %v15792_v7  ;;  %v11364_v7 = vld [vmem:[%s17700_s4 + $0xbb] sm:$0xff]  ;;  %v7329_v50 = vld [vmem:[#allocation2 + $0x12a] sm:$0xff] }
 0x7eb   : > { %11020 = vmatmul.msk.bf16.gmra.mxu2 %vm761_vm2, %v6351_v34  ;;  %11099 = vmatmul.msk.bf16.gmra.mxu0 %vm761_vm2, %v16023_v2  ;;  %v5798_v40 = vadd.f32 %v11364_v7, %v15750_v24 }
 0x7ec   : > { %11130 = vmatmul.msk.bf16.gmra.mxu1 %vm761_vm2, %v15819_v10 }
 0x7ed   : > { %11060 = vmatmul.msk.bf16.gmra.mxu3 %vm761_vm2, %v6869_v48  ;;  %v6200_v10 = vadd.f32 %v15172_v4, %v5798_v40  ;;  %v6813_v48 = vld [vmem:[#allocation2 + $0x139] sm:$0xff]  ;;  %v6812_v40 = vld [vmem:[#allocation2 + $0x131] sm:$0xff] }
 0x7ee   : > { %v6553_v57 = vpop.f32.mrf.mxu2 }
 0x7ef   : > { %v6717_v23 = vadd.f32 %v6553_v57, %v6199_v31  ;;  %v11365_v31 = vld [vmem:[%s17700_s4 + $0xc3] sm:$0xff] }
 0x7f0   : > { %v7071_v32 = vpop.f32.mrf.mxu3  ;;  %v7586_v1 = vpop.f32.mrf.mxu0  ;;  %v5799_v57 = vadd.f32 %v11365_v31, %v15750_v24 }
 0x7f1   : > { %v7235_v44 = vadd.f32 %v7071_v32, %v6717_v23  ;;  %v16039_v61 = vadd.f32 %v7586_v1, %v7234_v22  ;;  %v8059_v29 = vpop.f32.mrf.mxu1  ;;  %v6294_v23 = vld [vmem:[#allocation2 + $0x130] sm:$0xff]  ;;  %v7328_v32 = vld [vmem:[#allocation2 + $0x122] sm:$0xff] }
 0x7f2   : > { %v16042_v21 = vadd.f32 %v8059_v29, %v15808_v47  ;;  %v6352_v4 = vpack.c.bf16 %v6295_v15, %v6294_v23  ;;  %v16051_v29 = vpack.c.bf16 %v7329_v50, %v7328_v32 }
 0x7f6   : > { %v6555_v20 = vpop.f32.mrf.mxu2 }
 0x7f7   : > { %v6718_v34 = vadd.f32 %v6555_v20, %v6200_v10  ;;  %v6870_v20 = vpack.c.bf16 %v6813_v48, %v6812_v40 }
 0x7f8   : > { %v7073_v36 = vpop.f32.mrf.mxu3  ;;  %v7589_v22 = vpop.f32.mrf.mxu0 }
 0x7f9   : > { %v7236_v1 = vadd.f32 %v7073_v36, %v6718_v34  ;;  %v16049_v47 = vadd.f32 %v7589_v22, %v7235_v44  ;;  %v8062_v7 = vpop.f32.mrf.mxu1  ;;  %v6201_v44 = vadd.f32 %v15198_v53, %v5799_v57  ;;  %v6297_v57 = vld [vmem:[#allocation2 + $0x148] sm:$0xff] }
 0x7fa   : > { %v16054_v10 = vadd.f32 %v8062_v7, %v15817_v17  ;;  %v11366_v17 = vld [vmem:[%s17700_s4 + $0xcb] sm:$0xff]  ;;  %v7331_v7 = vld [vmem:[#allocation2 + $0x13a] sm:$0xff] }
 0x7fb   : > { %11021 = vmatmul.msk.bf16.gmra.mxu2 %vm761_vm2, %v6352_v4  ;;  %11100 = vmatmul.msk.bf16.gmra.mxu0 %vm761_vm2, %v16051_v29  ;;  %v5800_v48 = vadd.f32 %v11366_v17, %v15750_v24 }
 0x7fc   : > { %11131 = vmatmul.msk.bf16.gmra.mxu1 %vm761_vm2, %v15845_v27 }
 0x7fd   : > { %11061 = vmatmul.msk.bf16.gmra.mxu3 %vm761_vm2, %v6870_v20  ;;  %v6202_v27 = vadd.f32 %v15210_v6, %v5800_v48  ;;  %v6815_v20 = vld [vmem:[#allocation2 + $0x149] sm:$0xff]  ;;  %v6814_v48 = vld [vmem:[#allocation2 + $0x141] sm:$0xff] }
 0x7fe   : > { %v6558_v15 = vpop.f32.mrf.mxu2 }
 0x7ff   : > { %v6719_v34 = vadd.f32 %v6558_v15, %v6201_v44  ;;  %v11367_v44 = vld [vmem:[%s17700_s4 + $0xd3] sm:$0xff] }
 0x800   : > { %v7076_v50 = vpop.f32.mrf.mxu3  ;;  %v7591_v36 = vpop.f32.mrf.mxu0  ;;  %v5801_v15 = vadd.f32 %v11367_v44, %v15750_v24 }
 0x801   : > { %v7237_v31 = vadd.f32 %v7076_v50, %v6719_v34  ;;  %v16067_v22 = vadd.f32 %v7591_v36, %v7236_v1  ;;  %v8064_v23 = vpop.f32.mrf.mxu1  ;;  %v6296_v34 = vld [vmem:[#allocation2 + $0x140] sm:$0xff]  ;;  %v7330_v50 = vld [vmem:[#allocation2 + $0x132] sm:$0xff] }
 0x802   : > { %v16070_v32 = vadd.f32 %v8064_v23, %v15834_v51  ;;  %v6353_v6 = vpack.c.bf16 %v6297_v57, %v6296_v34  ;;  %v16079_v23 = vpack.c.bf16 %v7331_v7, %v7330_v50 }
 0x806   : > { %v6560_v53 = vpop.f32.mrf.mxu2 }
 0x807   : > { %v6720_v4 = vadd.f32 %v6560_v53, %v6202_v27  ;;  %v6871_v53 = vpack.c.bf16 %v6815_v20, %v6814_v48 }
 0x808   : > { %v7078_v40 = vpop.f32.mrf.mxu3  ;;  %v7594_v1 = vpop.f32.mrf.mxu0 }
 0x809   : > { %v7238_v36 = vadd.f32 %v7078_v40, %v6720_v4  ;;  %v16077_v51 = vadd.f32 %v7594_v1, %v7237_v31  ;;  %v8067_v17 = vpop.f32.mrf.mxu1  ;;  %v6203_v31 = vadd.f32 %v15236_v55, %v5801_v15  ;;  %v6299_v15 = vld [vmem:[#allocation2 + $0x158] sm:$0xff] }
 0x80a   : > { %v16082_v27 = vadd.f32 %v8067_v17, %v15843_v9  ;;  %v11368_v9 = vld [vmem:[%s17700_s4 + $0xdb] sm:$0xff]  ;;  %v7333_v17 = vld [vmem:[#allocation2 + $0x14a] sm:$0xff] }
 0x80b   : > { %11022 = vmatmul.msk.bf16.gmra.mxu2 %vm761_vm2, %v6353_v6  ;;  %11101 = vmatmul.msk.bf16.gmra.mxu0 %vm761_vm2, %v16079_v23  ;;  %v5802_v20 = vadd.f32 %v11368_v9, %v15750_v24 }
 0x80c   : > { %11132 = vmatmul.msk.bf16.gmra.mxu1 %vm761_vm2, %v15871_v60 }
 0x80d   : > { %11062 = vmatmul.msk.bf16.gmra.mxu3 %vm761_vm2, %v6871_v53  ;;  %v6204_v60 = vadd.f32 %v15248_v14, %v5802_v20  ;;  %v6817_v53 = vld [vmem:[#allocation2 + $0x159] sm:$0xff]  ;;  %v6816_v20 = vld [vmem:[#allocation2 + $0x151] sm:$0xff] }
 0x80e   : > { %v6563_v57 = vpop.f32.mrf.mxu2 }
 0x80f   : > { %v6721_v4 = vadd.f32 %v6563_v57, %v6203_v31  ;;  %v11369_v31 = vld [vmem:[%s17700_s4 + $0xe3] sm:$0xff] }
 0x810   : > { %v7081_v7 = vpop.f32.mrf.mxu3  ;;  %v7596_v40 = vpop.f32.mrf.mxu0  ;;  %v5803_v57 = vadd.f32 %v11369_v31, %v15750_v24 }
 0x811   : > { %v7239_v44 = vadd.f32 %v7081_v7, %v6721_v4  ;;  %v16095_v1 = vadd.f32 %v7596_v40, %v7238_v36  ;;  %v8069_v34 = vpop.f32.mrf.mxu1  ;;  %v6298_v4 = vld [vmem:[#allocation2 + $0x150] sm:$0xff]  ;;  %v7332_v7 = vld [vmem:[#allocation2 + $0x142] sm:$0xff] }
 0x812   : > { %v16098_v50 = vadd.f32 %v8069_v34, %v15860_v30  ;;  %v6354_v14 = vpack.c.bf16 %v6299_v15, %v6298_v4  ;;  %v16107_v34 = vpack.c.bf16 %v7333_v17, %v7332_v7 }
 0x816   : > { %v6565_v55 = vpop.f32.mrf.mxu2 }
 0x817   : > { %v6722_v6 = vadd.f32 %v6565_v55, %v6204_v60  ;;  %v6872_v55 = vpack.c.bf16 %v6817_v53, %v6816_v20 }
 0x818   : > { %v7083_v48 = vpop.f32.mrf.mxu3  ;;  %v7599_v36 = vpop.f32.mrf.mxu0 }
 0x819   : > { %v7240_v40 = vadd.f32 %v7083_v48, %v6722_v6  ;;  %v16105_v30 = vadd.f32 %v7599_v36, %v7239_v44  ;;  %v8072_v9 = vpop.f32.mrf.mxu1  ;;  %v6205_v44 = vadd.f32 %v15274_v59, %v5803_v57  ;;  %v6301_v57 = vld [vmem:[#allocation2 + $0x168] sm:$0xff] }
 0x81a   : > { %v16110_v60 = vadd.f32 %v8072_v9, %v15869_v62  ;;  %v11370_v62 = vld [vmem:[%s17700_s4 + $0xeb] sm:$0xff]  ;;  %v7335_v9 = vld [vmem:[#allocation2 + $0x15a] sm:$0xff] }
 0x81b   : > { %11023 = vmatmul.msk.bf16.gmra.mxu2 %vm761_vm2, %v6354_v14  ;;  %11102 = vmatmul.msk.bf16.gmra.mxu0 %vm761_vm2, %v16107_v34  ;;  %v5804_v53 = vadd.f32 %v11370_v62, %v15750_v24 }
 0x81c   : > { %11133 = vmatmul.msk.bf16.gmra.mxu1 %vm761_vm2, %v15897_v0 }
 0x81d   : > { %11063 = vmatmul.msk.bf16.gmra.mxu3 %vm761_vm2, %v6872_v55  ;;  %v6206_v0 = vadd.f32 %v15286_v28, %v5804_v53  ;;  %v6819_v55 = vld [vmem:[#allocation2 + $0x169] sm:$0xff]  ;;  %v6818_v53 = vld [vmem:[#allocation2 + $0x161] sm:$0xff] }
 0x81e   : > { %v6568_v15 = vpop.f32.mrf.mxu2 }
 0x81f   : > { %v6723_v6 = vadd.f32 %v6568_v15, %v6205_v44  ;;  %v11371_v44 = vld [vmem:[%s17700_s4 + $0xf3] sm:$0xff] }
 0x820   : > { %v7086_v17 = vpop.f32.mrf.mxu3  ;;  %v7601_v48 = vpop.f32.mrf.mxu0  ;;  %v5805_v15 = vadd.f32 %v11371_v44, %v15750_v24 }
 0x821   : > { %v7241_v31 = vadd.f32 %v7086_v17, %v6723_v6  ;;  %v16123_v36 = vadd.f32 %v7601_v48, %v7240_v40  ;;  %v8074_v4 = vpop.f32.mrf.mxu1  ;;  %v6300_v6 = vld [vmem:[#allocation2 + $0x160] sm:$0xff]  ;;  %v7334_v17 = vld [vmem:[#allocation2 + $0x152] sm:$0xff] }
 0x822   : > { %v16126_v7 = vadd.f32 %v8074_v4, %v15886_v56  ;;  %v6355_v28 = vpack.c.bf16 %v6301_v57, %v6300_v6  ;;  %v16135_v4 = vpack.c.bf16 %v7335_v9, %v7334_v17 }
 0x826   : > { %v6570_v59 = vpop.f32.mrf.mxu2 }
 0x827   : > { %v6724_v14 = vadd.f32 %v6570_v59, %v6206_v0  ;;  %v6873_v59 = vpack.c.bf16 %v6819_v55, %v6818_v53 }
 0x828   : > { %v7088_v20 = vpop.f32.mrf.mxu3  ;;  %v7604_v40 = vpop.f32.mrf.mxu0 }
 0x829   : > { %v7242_v48 = vadd.f32 %v7088_v20, %v6724_v14  ;;  %v16133_v56 = vadd.f32 %v7604_v40, %v7241_v31  ;;  %v8077_v62 = vpop.f32.mrf.mxu1  ;;  %v6207_v31 = vadd.f32 %v15312_v26, %v5805_v15  ;;  %v6303_v15 = vld [vmem:[#allocation2 + $0x178] sm:$0xff] }
 0x82a   : > { %v16138_v0 = vadd.f32 %v8077_v62, %v15895_v13  ;;  %v11372_v13 = vld [vmem:[%s17700_s4 + $0xfb] sm:$0xff]  ;;  %v7337_v62 = vld [vmem:[#allocation2 + $0x16a] sm:$0xff] }
 0x82b   : > { %11024 = vmatmul.msk.bf16.gmra.mxu2 %vm761_vm2, %v6355_v28  ;;  %11103 = vmatmul.msk.bf16.gmra.mxu0 %vm761_vm2, %v16135_v4  ;;  %v5806_v55 = vadd.f32 %v11372_v13, %v15750_v24 }
 0x82c   : > { %11134 = vmatmul.msk.bf16.gmra.mxu1 %vm761_vm2, %v15923_v35 }
 0x82d   : > { %11064 = vmatmul.msk.bf16.gmra.mxu3 %vm761_vm2, %v6873_v59  ;;  %v6208_v35 = vadd.f32 %v15324_v38, %v5806_v55  ;;  %v6821_v59 = vld [vmem:[#allocation2 + $0x179] sm:$0xff]  ;;  %v6820_v55 = vld [vmem:[#allocation2 + $0x171] sm:$0xff] }
 0x82e   : > { %v6573_v57 = vpop.f32.mrf.mxu2 }
 0x82f   : > { %v6725_v14 = vadd.f32 %v6573_v57, %v6207_v31  ;;  %v11373_v31 = vld [vmem:[%s17700_s4 + $0x103] sm:$0xff] }
 0x830   : > { %v7091_v9 = vpop.f32.mrf.mxu3  ;;  %v7606_v20 = vpop.f32.mrf.mxu0  ;;  %v5807_v57 = vadd.f32 %v11373_v31, %v15750_v24 }
 0x831   : > { %v7243_v44 = vadd.f32 %v7091_v9, %v6725_v14  ;;  %v16151_v40 = vadd.f32 %v7606_v20, %v7242_v48  ;;  %v8079_v6 = vpop.f32.mrf.mxu1  ;;  %v6302_v14 = vld [vmem:[#allocation2 + $0x170] sm:$0xff]  ;;  %v7336_v9 = vld [vmem:[#allocation2 + $0x162] sm:$0xff] }
 0x832   : > { %v16154_v17 = vadd.f32 %v8079_v6, %v15912_v41  ;;  %v6356_v38 = vpack.c.bf16 %v6303_v15, %v6302_v14  ;;  %v16163_v6 = vpack.c.bf16 %v7337_v62, %v7336_v9  ;;  %v6209_v24 = vadd.f32 %v15350_v3, %v5807_v57  ;;  %v6305_v9 = vld [vmem:[#allocation2 + $0x188] sm:$0xff] }
 0x836   : > { %v6575_v26 = vpop.f32.mrf.mxu2 }
 0x837   : > { %v6726_v28 = vadd.f32 %v6575_v26, %v6208_v35  ;;  %v6874_v26 = vpack.c.bf16 %v6821_v59, %v6820_v55 }
 0x838   : > { %v7093_v53 = vpop.f32.mrf.mxu3  ;;  %v7609_v48 = vpop.f32.mrf.mxu0 }
 0x839   : > { %v7244_v20 = vadd.f32 %v7093_v53, %v6726_v28  ;;  %v16161_v41 = vadd.f32 %v7609_v48, %v7243_v44  ;;  %v8082_v13 = vpop.f32.mrf.mxu1  ;;  %v16179_v53 = vld [vmem:[%s11468_s22 + $0x1] ss:$0 sm:$0xff] }
 0x83a   : > { %v16166_v35 = vadd.f32 %v8082_v13, %v15921_v33  ;;  %v11374_v33 = vld [vmem:[%s17700_s4 + $0x10b] sm:$0xff]  ;;  %v7339_v13 = vld [vmem:[#allocation2 + $0x17a] sm:$0xff] }
 0x83b   : > { %11025 = vmatmul.msk.bf16.gmra.mxu2 %vm761_vm2, %v6356_v38  ;;  %11104 = vmatmul.msk.bf16.gmra.mxu0 %vm761_vm2, %v16163_v6  ;;  %v5808_v59 = vadd.f32 %v16179_v53, %v11374_v33 }
 0x83c   : > { %11135 = vmatmul.msk.bf16.gmra.mxu1 %vm761_vm2, %v15949_v54 }
 0x83d   : > { %11065 = vmatmul.msk.bf16.gmra.mxu3 %vm761_vm2, %v6874_v26  ;;  %v6210_v3 = vadd.f32 %v15362_v52, %v5808_v59  ;;  %v6823_v26 = vld [vmem:[#allocation2 + $0x189] sm:$0xff]  ;;  %v6822_v59 = vld [vmem:[#allocation2 + $0x181] sm:$0xff] }
 0x83e   : > { %v6578_v44 = vpop.f32.mrf.mxu2 }
 0x83f   : > { %v6727_v15 = vadd.f32 %v6578_v44, %v6209_v24  ;;  %v11376_v24 = vld [vmem:[%s17700_s4 + $0x113] sm:$0xff] }
 0x840   : > { %v7096_v62 = vpop.f32.mrf.mxu3  ;;  %v7611_v28 = vpop.f32.mrf.mxu0  ;;  %v5809_v44 = vadd.f32 %v11376_v24, %v16179_v53 }
 0x841   : > { %v7245_v31 = vadd.f32 %v7096_v62, %v6727_v15  ;;  %v16182_v48 = vadd.f32 %v7611_v28, %v7244_v20  ;;  %v8084_v14 = vpop.f32.mrf.mxu1  ;;  %v6304_v15 = vld [vmem:[#allocation2 + $0x180] sm:$0xff]  ;;  %v7338_v62 = vld [vmem:[#allocation2 + $0x172] sm:$0xff] }
 0x842   : > { %v16185_v54 = vadd.f32 %v8084_v14, %v15938_v49  ;;  %v6357_v52 = vpack.c.bf16 %v6305_v9, %v6304_v15  ;;  %v16194_v14 = vpack.c.bf16 %v7339_v13, %v7338_v62 }
 0x846   : > { %v6580_v57 = vpop.f32.mrf.mxu2 }
 0x847   : > { %v6728_v38 = vadd.f32 %v6580_v57, %v6210_v3  ;;  %v6875_v57 = vpack.c.bf16 %v6823_v26, %v6822_v59 }
 0x848   : > { %v7098_v55 = vpop.f32.mrf.mxu3  ;;  %v7614_v20 = vpop.f32.mrf.mxu0 }
 0x849   : > { %v7246_v28 = vadd.f32 %v7098_v55, %v6728_v38  ;;  %v16192_v49 = vadd.f32 %v7614_v20, %v7245_v31  ;;  %v8087_v33 = vpop.f32.mrf.mxu1  ;;  %v6211_v31 = vadd.f32 %v15388_v11, %v5809_v44  ;;  %v6307_v44 = vld [vmem:[#allocation2 + $0x198] sm:$0xff] }
 0x84a   : > { %v16197_v3 = vadd.f32 %v8087_v33, %v15947_v39  ;;  %v11377_v39 = vld [vmem:[%s17700_s4 + $0x11b] sm:$0xff]  ;;  %v7341_v33 = vld [vmem:[#allocation2 + $0x18a] sm:$0xff] }
 0x84b   : > { %11026 = vmatmul.msk.bf16.gmra.mxu2 %vm761_vm2, %v6357_v52  ;;  %11105 = vmatmul.msk.bf16.gmra.mxu0 %vm761_vm2, %v16194_v14  ;;  %v5810_v26 = vadd.f32 %v11377_v39, %v16179_v53 }
 0x84c   : > { %11136 = vmatmul.msk.bf16.gmra.mxu1 %vm761_vm2, %v15975_v43 }
 0x84d   : > { %11066 = vmatmul.msk.bf16.gmra.mxu3 %vm761_vm2, %v6875_v57  ;;  %v6212_v43 = vadd.f32 %v15400_v42, %v5810_v26  ;;  %v6825_v57 = vld [vmem:[#allocation2 + $0x199] sm:$0xff]  ;;  %v6824_v26 = vld [vmem:[#allocation2 + $0x191] sm:$0xff] }
 0x84e   : > { %v6583_v9 = vpop.f32.mrf.mxu2 }
 0x84f   : > { %v6729_v38 = vadd.f32 %v6583_v9, %v6211_v31  ;;  %v11378_v31 = vld [vmem:[%s17700_s4 + $0x123] sm:$0xff] }
 0x850   : > { %v7101_v13 = vpop.f32.mrf.mxu3  ;;  %v7616_v55 = vpop.f32.mrf.mxu0  ;;  %v5811_v9 = vadd.f32 %v11378_v31, %v16179_v53 }
 0x851   : > { %v7247_v24 = vadd.f32 %v7101_v13, %v6729_v38  ;;  %v16210_v20 = vadd.f32 %v7616_v55, %v7246_v28  ;;  %v8089_v15 = vpop.f32.mrf.mxu1  ;;  %v6306_v38 = vld [vmem:[#allocation2 + $0x190] sm:$0xff]  ;;  %v7340_v13 = vld [vmem:[#allocation2 + $0x182] sm:$0xff] }
 0x852   : > { %v16213_v62 = vadd.f32 %v8089_v15, %v15964_v58  ;;  %v6358_v42 = vpack.c.bf16 %v6307_v44, %v6306_v38  ;;  %v16222_v15 = vpack.c.bf16 %v7341_v33, %v7340_v13 }
 0x856   : > { %v6585_v11 = vpop.f32.mrf.mxu2 }
 0x857   : > { %v6730_v52 = vadd.f32 %v6585_v11, %v6212_v43  ;;  %v6876_v11 = vpack.c.bf16 %v6825_v57, %v6824_v26  ;;  %v6309_v26 = vld [vmem:[#allocation2 + $0x1a8] sm:$0xff] }
 0x858   : > { %v7103_v59 = vpop.f32.mrf.mxu3  ;;  %v7619_v28 = vpop.f32.mrf.mxu0 }
 0x859   : > { %v7248_v55 = vadd.f32 %v7103_v59, %v6730_v52  ;;  %v16220_v58 = vadd.f32 %v7619_v28, %v7247_v24  ;;  %v8092_v39 = vpop.f32.mrf.mxu1  ;;  %v18047_v24 = vld [vmem:[#allocation88_spill] sm:$0xff] }
 0x85a   : > { %v16225_v43 = vadd.f32 %v8092_v39, %v15973_v63  ;;  %v6213_v52 = vadd.f32 %v18047_v24, %v5811_v9  ;;  %v11379_v63 = vld [vmem:[%s17700_s4 + $0x12b] sm:$0xff] }
 0x85b   : > { %11027 = vmatmul.msk.bf16.gmra.mxu2 %vm761_vm2, %v6358_v42  ;;  %11106 = vmatmul.msk.bf16.gmra.mxu0 %vm761_vm2, %v16222_v15  ;;  %v5812_v57 = vadd.f32 %v11379_v63, %v16179_v53 }
 0x85c   : > { %18046 = vst [vmem:[#allocation119_spill] sm:$0xff] %v16225_v43  ;;  %11137 = vmatmul.msk.bf16.gmra.mxu1 %vm761_vm2, %v16001_v16  ;;  %v18049_v16 = vld [vmem:[#allocation89_spill] sm:$0xff] }
 0x85d   : > { %11067 = vmatmul.msk.bf16.gmra.mxu3 %vm761_vm2, %v6876_v11  ;;  %v6214_v42 = vadd.f32 %v18049_v16, %v5812_v57  ;;  %v7343_v11 = vld [vmem:[#allocation2 + $0x19a] sm:$0xff] }
 0x85e   : > { %v6588_v44 = vpop.f32.mrf.mxu2  ;;  %v11380_v43 = vld [vmem:[%s17700_s4 + $0x133] sm:$0xff]  ;;  %v6826_v16 = vld [vmem:[#allocation2 + $0x1a1] sm:$0xff] }
 0x85f   : > { %v6731_v59 = vadd.f32 %v6588_v44, %v6213_v52  ;;  %v6827_v44 = vld [vmem:[#allocation2 + $0x1a9] sm:$0xff] }
 0x860   : > { %v7106_v33 = vpop.f32.mrf.mxu3  ;;  %v7621_v31 = vpop.f32.mrf.mxu0 }
 0x861   : > { %v7249_v28 = vadd.f32 %v7106_v33, %v6731_v59  ;;  %v16238_v38 = vadd.f32 %v7621_v31, %v7248_v55  ;;  %v8094_v13 = vpop.f32.mrf.mxu1  ;;  %v5813_v59 = vadd.f32 %v11380_v43, %v16179_v53  ;;  %v6308_v33 = vld [vmem:[#allocation2 + $0x1a0] sm:$0xff]  ;;  %v7342_v31 = vld [vmem:[#allocation2 + $0x192] sm:$0xff] }
 0x862   : > { %v16241_v39 = vadd.f32 %v8094_v13, %v15990_v18  ;;  %v6359_v57 = vpack.c.bf16 %v6309_v26, %v6308_v33  ;;  %v18051_v43 = vld [vmem:[#allocation13_spill] sm:$0xff] }
 0x864   : > { %18048 = vst [vmem:[#allocation88_spill] sm:$0xff] %v16241_v39  ;;  %v16250_v39 = vpack.c.bf16 %v7343_v11, %v7342_v31 }
 0x866   : > { %v6590_v9 = vpop.f32.mrf.mxu2 }
 0x867   : > { %v6732_v24 = vadd.f32 %v6590_v9, %v6214_v42  ;;  %v6877_v9 = vpack.c.bf16 %v6827_v44, %v6826_v16  ;;  %v6311_v16 = vld [vmem:[#allocation2 + $0x1b8] sm:$0xff] }
 0x868   : > { %v7108_v52 = vpop.f32.mrf.mxu3  ;;  %v7624_v55 = vpop.f32.mrf.mxu0 }
 0x869   : > { %v7250_v63 = vadd.f32 %v7108_v52, %v6732_v24  ;;  %v16248_v18 = vadd.f32 %v7624_v55, %v7249_v28  ;;  %v8097_v13 = vpop.f32.mrf.mxu1  ;;  %v6215_v28 = vadd.f32 %v18051_v43, %v5813_v59 }
 0x86a   : > { %v16253_v42 = vadd.f32 %v8097_v13, %v15999_v5  ;;  %v11381_v5 = vld [vmem:[%s17700_s4 + $0x13b] sm:$0xff] }
 0x86b   : > { %11028 = vmatmul.msk.bf16.gmra.mxu2 %vm761_vm2, %v6359_v57  ;;  %11107 = vmatmul.msk.bf16.gmra.mxu0 %vm761_vm2, %v16250_v39  ;;  %v5814_v44 = vadd.f32 %v11381_v5, %v16179_v53 }
 0x86c   : > { %18050 = vst [vmem:[#allocation89_spill] sm:$0xff] %v16253_v42  ;;  %11138 = vmatmul.msk.bf16.gmra.mxu1 %vm761_vm2, %v16023_v2  ;;  %v18053_v2 = vld [vmem:[#allocation90_spill] sm:$0xff] }
 0x86d   : > { %11068 = vmatmul.msk.bf16.gmra.mxu3 %vm761_vm2, %v6877_v9  ;;  %v6216_v57 = vadd.f32 %v18053_v2, %v5814_v44  ;;  %v7345_v9 = vld [vmem:[#allocation2 + $0x1aa] sm:$0xff] }
 0x86e   : > { %v6593_v26 = vpop.f32.mrf.mxu2  ;;  %v11382_v42 = vld [vmem:[%s17700_s4 + $0x143] sm:$0xff]  ;;  %v6828_v2 = vld [vmem:[#allocation2 + $0x1b1] sm:$0xff] }
 0x86f   : > { %v6733_v24 = vadd.f32 %v6593_v26, %v6215_v28  ;;  %v6829_v26 = vld [vmem:[#allocation2 + $0x1b9] sm:$0xff] }
 0x870   : > { %v7111_v11 = vpop.f32.mrf.mxu3  ;;  %v7626_v52 = vpop.f32.mrf.mxu0 }
 0x871   : > { %v7251_v55 = vadd.f32 %v7111_v11, %v6733_v24  ;;  %v16266_v33 = vadd.f32 %v7626_v52, %v7250_v63  ;;  %v8099_v31 = vpop.f32.mrf.mxu1  ;;  %v5815_v24 = vadd.f32 %v11382_v42, %v16179_v53  ;;  %v6310_v11 = vld [vmem:[#allocation2 + $0x1b0] sm:$0xff]  ;;  %v7344_v52 = vld [vmem:[#allocation2 + $0x1a2] sm:$0xff] }
 0x872   : > { %v16269_v13 = vadd.f32 %v8099_v31, %v16014_v12  ;;  %v6360_v44 = vpack.c.bf16 %v6311_v16, %v6310_v11  ;;  %v18055_v42 = vld [vmem:[#allocation15_spill] sm:$0xff] }
 0x874   : > { %18052 = vst [vmem:[#allocation13_spill] sm:$0xff] %v16269_v13  ;;  %v16278_v13 = vpack.c.bf16 %v7345_v9, %v7344_v52 }
 0x876   : > { %v6595_v59 = vpop.f32.mrf.mxu2 }
 0x877   : > { %v6734_v43 = vadd.f32 %v6595_v59, %v6216_v57  ;;  %v6878_v59 = vpack.c.bf16 %v6829_v26, %v6828_v2  ;;  %v6313_v2 = vld [vmem:[#allocation2 + $0x1c8] sm:$0xff] }
 0x878   : > { %v7113_v28 = vpop.f32.mrf.mxu3  ;;  %v7629_v63 = vpop.f32.mrf.mxu0 }
 0x879   : > { %v7252_v5 = vadd.f32 %v7113_v28, %v6734_v43  ;;  %v16276_v12 = vadd.f32 %v7629_v63, %v7251_v55  ;;  %v8102_v31 = vpop.f32.mrf.mxu1  ;;  %v6217_v55 = vadd.f32 %v18055_v42, %v5815_v24 }
 0x87a   : > { %v16281_v57 = vadd.f32 %v8102_v31, %v16021_v19  ;;  %v11383_v19 = vld [vmem:[%s17700_s4 + $0x14b] sm:$0xff] }
 0x87b   : > { %11029 = vmatmul.msk.bf16.gmra.mxu2 %vm761_vm2, %v6360_v44  ;;  %11108 = vmatmul.msk.bf16.gmra.mxu0 %vm761_vm2, %v16278_v13  ;;  %v5816_v26 = vadd.f32 %v11383_v19, %v16179_v53 }
 0x87c   : > { %18054 = vst [vmem:[#allocation90_spill] sm:$0xff] %v16281_v57  ;;  %11139 = vmatmul.msk.bf16.gmra.mxu1 %vm761_vm2, %v16051_v29  ;;  %v18057_v29 = vld [vmem:[#allocation91_spill] sm:$0xff]  ;;  %v11384_v57 = vld [vmem:[%s17700_s4 + $0x153] sm:$0xff] }
 0x87d   : > { %11069 = vmatmul.msk.bf16.gmra.mxu3 %vm761_vm2, %v6878_v59  ;;  %v6218_v44 = vadd.f32 %v18057_v29, %v5816_v26  ;;  %v7347_v59 = vld [vmem:[#allocation2 + $0x1ba] sm:$0xff] }
 0x87e   : > { %v6598_v16 = vpop.f32.mrf.mxu2  ;;  %v6830_v29 = vld [vmem:[#allocation2 + $0x1c1] sm:$0xff] }
 0x87f   : > { %v6735_v43 = vadd.f32 %v6598_v16, %v6217_v55  ;;  %v6831_v16 = vld [vmem:[#allocation2 + $0x1c9] sm:$0xff] }
 0x880   : > { %v7116_v9 = vpop.f32.mrf.mxu3  ;;  %v7631_v28 = vpop.f32.mrf.mxu0 }
 0x881   : > { %v7253_v63 = vadd.f32 %v7116_v9, %v6735_v43  ;;  %v16294_v11 = vadd.f32 %v7631_v28, %v7252_v5  ;;  %v8104_v52 = vpop.f32.mrf.mxu1  ;;  %v5817_v43 = vadd.f32 %v11384_v57, %v16179_v53  ;;  %v6312_v9 = vld [vmem:[#allocation2 + $0x1c0] sm:$0xff]  ;;  %v7346_v28 = vld [vmem:[#allocation2 + $0x1b2] sm:$0xff] }
 0x882   : > { %v16297_v31 = vadd.f32 %v8104_v52, %v16039_v61  ;;  %v6361_v26 = vpack.c.bf16 %v6313_v2, %v6312_v9  ;;  %v18059_v57 = vld [vmem:[#allocation17_spill] sm:$0xff] }
 0x884   : > { %18056 = vst [vmem:[#allocation15_spill] sm:$0xff] %v16297_v31  ;;  %v16306_v31 = vpack.c.bf16 %v7347_v59, %v7346_v28 }
 0x886   : > { %v6600_v24 = vpop.f32.mrf.mxu2 }
 0x887   : > { %v6736_v42 = vadd.f32 %v6600_v24, %v6218_v44  ;;  %v6879_v24 = vpack.c.bf16 %v6831_v16, %v6830_v29  ;;  %v6315_v29 = vld [vmem:[#allocation2 + $0x1d8] sm:$0xff] }
 0x888   : > { %v7118_v55 = vpop.f32.mrf.mxu3  ;;  %v7634_v5 = vpop.f32.mrf.mxu0 }
 0x889   : > { %v7254_v19 = vadd.f32 %v7118_v55, %v6736_v42  ;;  %v16304_v61 = vadd.f32 %v7634_v5, %v7253_v63  ;;  %v8107_v52 = vpop.f32.mrf.mxu1  ;;  %v6219_v63 = vadd.f32 %v18059_v57, %v5817_v43 }
 0x88a   : > { %v16309_v44 = vadd.f32 %v8107_v52, %v16049_v47  ;;  %v11385_v47 = vld [vmem:[%s17700_s4 + $0x15b] sm:$0xff] }
 0x88b   : > { %11030 = vmatmul.msk.bf16.gmra.mxu2 %vm761_vm2, %v6361_v26  ;;  %11109 = vmatmul.msk.bf16.gmra.mxu0 %vm761_vm2, %v16306_v31  ;;  %v5818_v16 = vadd.f32 %v11385_v47, %v16179_v53 }
 0x88c   : > { %18058 = vst [vmem:[#allocation91_spill] sm:$0xff] %v16309_v44  ;;  %11140 = vmatmul.msk.bf16.gmra.mxu1 %vm761_vm2, %v16079_v23  ;;  %v18061_v23 = vld [vmem:[#allocation92_spill] sm:$0xff]  ;;  %v11386_v44 = vld [vmem:[%s17700_s4 + $0x163] sm:$0xff] }
 0x88d   : > { %11070 = vmatmul.msk.bf16.gmra.mxu3 %vm761_vm2, %v6879_v24  ;;  %v6220_v26 = vadd.f32 %v18061_v23, %v5818_v16  ;;  %v7349_v24 = vld [vmem:[#allocation2 + $0x1ca] sm:$0xff] }
 0x88e   : > { %v6603_v2 = vpop.f32.mrf.mxu2  ;;  %v6832_v23 = vld [vmem:[#allocation2 + $0x1d1] sm:$0xff] }
 0x88f   : > { %v6737_v42 = vadd.f32 %v6603_v2, %v6219_v63  ;;  %v6833_v2 = vld [vmem:[#allocation2 + $0x1d9] sm:$0xff] }
 0x890   : > { %v7121_v59 = vpop.f32.mrf.mxu3  ;;  %v7636_v55 = vpop.f32.mrf.mxu0 }
 0x891   : > { %v7255_v5 = vadd.f32 %v7121_v59, %v6737_v42  ;;  %v16322_v9 = vadd.f32 %v7636_v55, %v7254_v19  ;;  %v8109_v28 = vpop.f32.mrf.mxu1  ;;  %v5819_v42 = vadd.f32 %v11386_v44, %v16179_v53  ;;  %v6314_v59 = vld [vmem:[#allocation2 + $0x1d0] sm:$0xff]  ;;  %v7348_v55 = vld [vmem:[#allocation2 + $0x1c2] sm:$0xff] }
 0x892   : > { %v16325_v52 = vadd.f32 %v8109_v28, %v16067_v22  ;;  %v6362_v16 = vpack.c.bf16 %v6315_v29, %v6314_v59  ;;  %v18063_v44 = vld [vmem:[#allocation18_spill] sm:$0xff] }
 0x894   : > { %18060 = vst [vmem:[#allocation17_spill] sm:$0xff] %v16325_v52  ;;  %v16334_v52 = vpack.c.bf16 %v7349_v24, %v7348_v55 }
 0x896   : > { %v6605_v43 = vpop.f32.mrf.mxu2 }
 0x897   : > { %v6738_v57 = vadd.f32 %v6605_v43, %v6220_v26  ;;  %v6880_v43 = vpack.c.bf16 %v6833_v2, %v6832_v23  ;;  %v6317_v23 = vld [vmem:[#allocation2 + $0x1e8] sm:$0xff] }
 0x898   : > { %v7123_v63 = vpop.f32.mrf.mxu3  ;;  %v7639_v19 = vpop.f32.mrf.mxu0 }
 0x899   : > { %v7256_v47 = vadd.f32 %v7123_v63, %v6738_v57  ;;  %v16332_v22 = vadd.f32 %v7639_v19, %v7255_v5  ;;  %v8112_v28 = vpop.f32.mrf.mxu1  ;;  %v6221_v5 = vadd.f32 %v18063_v44, %v5819_v42 }
 0x89a   : > { %v16337_v26 = vadd.f32 %v8112_v28, %v16077_v51  ;;  %v11387_v51 = vld [vmem:[%s17700_s4 + $0x16b] sm:$0xff] }
 0x89b   : > { %11031 = vmatmul.msk.bf16.gmra.mxu2 %vm761_vm2, %v6362_v16  ;;  %11110 = vmatmul.msk.bf16.gmra.mxu0 %vm761_vm2, %v16334_v52  ;;  %v5820_v2 = vadd.f32 %v11387_v51, %v16179_v53 }
 0x89c   : > { %18062 = vst [vmem:[#allocation92_spill] sm:$0xff] %v16337_v26  ;;  %11141 = vmatmul.msk.bf16.gmra.mxu1 %vm761_vm2, %v16107_v34  ;;  %v18065_v34 = vld [vmem:[#allocation94_spill] sm:$0xff]  ;;  %v11388_v26 = vld [vmem:[%s17700_s4 + $0x173] sm:$0xff] }
 0x89d   : > { %11071 = vmatmul.msk.bf16.gmra.mxu3 %vm761_vm2, %v6880_v43  ;;  %v6222_v16 = vadd.f32 %v18065_v34, %v5820_v2  ;;  %v7351_v43 = vld [vmem:[#allocation2 + $0x1da] sm:$0xff] }
 0x89e   : > { %v6608_v29 = vpop.f32.mrf.mxu2  ;;  %v6834_v34 = vld [vmem:[#allocation2 + $0x1e1] sm:$0xff] }
 0x89f   : > { %v6739_v57 = vadd.f32 %v6608_v29, %v6221_v5  ;;  %v6835_v29 = vld [vmem:[#allocation2 + $0x1e9] sm:$0xff] }
 0x8a0   : > { %v7126_v24 = vpop.f32.mrf.mxu3  ;;  %v7641_v63 = vpop.f32.mrf.mxu0 }
 0x8a1   : > { %v7257_v19 = vadd.f32 %v7126_v24, %v6739_v57  ;;  %v16350_v59 = vadd.f32 %v7641_v63, %v7256_v47  ;;  %v8114_v55 = vpop.f32.mrf.mxu1  ;;  %v5821_v57 = vadd.f32 %v11388_v26, %v16179_v53  ;;  %v6316_v24 = vld [vmem:[#allocation2 + $0x1e0] sm:$0xff]  ;;  %v7350_v63 = vld [vmem:[#allocation2 + $0x1d2] sm:$0xff] }
 0x8a2   : > { %v16353_v28 = vadd.f32 %v8114_v55, %v16095_v1  ;;  %v6363_v2 = vpack.c.bf16 %v6317_v23, %v6316_v24  ;;  %v18067_v26 = vld [vmem:[#allocation21_spill] sm:$0xff] }
 0x8a4   : > { %18064 = vst [vmem:[#allocation18_spill] sm:$0xff] %v16353_v28  ;;  %v16362_v28 = vpack.c.bf16 %v7351_v43, %v7350_v63 }
 0x8a6   : > { %v6610_v42 = vpop.f32.mrf.mxu2 }
 0x8a7   : > { %v6740_v44 = vadd.f32 %v6610_v42, %v6222_v16  ;;  %v6881_v42 = vpack.c.bf16 %v6835_v29, %v6834_v34  ;;  %v6319_v34 = vld [vmem:[#allocation2 + $0x1f8] sm:$0xff] }
 0x8a8   : > { %v7128_v5 = vpop.f32.mrf.mxu3  ;;  %v7644_v47 = vpop.f32.mrf.mxu0 }
 0x8a9   : > { %v7258_v51 = vadd.f32 %v7128_v5, %v6740_v44  ;;  %v16360_v1 = vadd.f32 %v7644_v47, %v7257_v19  ;;  %v8117_v55 = vpop.f32.mrf.mxu1  ;;  %v6223_v19 = vadd.f32 %v18067_v26, %v5821_v57 }
 0x8aa   : > { %v16365_v16 = vadd.f32 %v8117_v55, %v16105_v30  ;;  %v11389_v30 = vld [vmem:[%s17700_s4 + $0x17b] sm:$0xff] }
 0x8ab   : > { %11032 = vmatmul.msk.bf16.gmra.mxu2 %vm761_vm2, %v6363_v2  ;;  %11111 = vmatmul.msk.bf16.gmra.mxu0 %vm761_vm2, %v16362_v28  ;;  %v5822_v29 = vadd.f32 %v11389_v30, %v16179_v53 }
 0x8ac   : > { %18066 = vst [vmem:[#allocation94_spill] sm:$0xff] %v16365_v16  ;;  %11142 = vmatmul.msk.bf16.gmra.mxu1 %vm761_vm2, %v16135_v4  ;;  %v18069_v4 = vld [vmem:[#allocation95_spill] sm:$0xff] }
 0x8ad   : > { %11072 = vmatmul.msk.bf16.gmra.mxu3 %vm761_vm2, %v6881_v42  ;;  %v6224_v2 = vadd.f32 %v18069_v4, %v5822_v29  ;;  %v7353_v42 = vld [vmem:[#allocation2 + $0x1ea] sm:$0xff] }
 0x8ae   : > { %v6613_v23 = vpop.f32.mrf.mxu2  ;;  %v11390_v16 = vld [vmem:[%s17700_s4 + $0x183] sm:$0xff]  ;;  %v6836_v4 = vld [vmem:[#allocation2 + $0x1f1] sm:$0xff] }
 0x8af   : > { %v6741_v44 = vadd.f32 %v6613_v23, %v6223_v19  ;;  %v6837_v23 = vld [vmem:[#allocation2 + $0x1f9] sm:$0xff] }
 0x8b0   : > { %v7131_v43 = vpop.f32.mrf.mxu3  ;;  %v7646_v5 = vpop.f32.mrf.mxu0 }
 0x8b1   : > { %v7259_v47 = vadd.f32 %v7131_v43, %v6741_v44  ;;  %v16378_v24 = vadd.f32 %v7646_v5, %v7258_v51  ;;  %v8119_v63 = vpop.f32.mrf.mxu1  ;;  %v5823_v44 = vadd.f32 %v11390_v16, %v16179_v53  ;;  %v6318_v43 = vld [vmem:[#allocation2 + $0x1f0] sm:$0xff]  ;;  %v7352_v5 = vld [vmem:[#allocation2 + $0x1e2] sm:$0xff] }
 0x8b2   : > { %v16381_v55 = vadd.f32 %v8119_v63, %v16123_v36  ;;  %v6364_v29 = vpack.c.bf16 %v6319_v34, %v6318_v43  ;;  %v18071_v16 = vld [vmem:[#allocation23_spill] sm:$0xff] }
 0x8b4   : > { %18068 = vst [vmem:[#allocation21_spill] sm:$0xff] %v16381_v55  ;;  %v16390_v55 = vpack.c.bf16 %v7353_v42, %v7352_v5 }
 0x8b6   : > { %v6615_v57 = vpop.f32.mrf.mxu2 }
 0x8b7   : > { %v6742_v26 = vadd.f32 %v6615_v57, %v6224_v2  ;;  %v6882_v57 = vpack.c.bf16 %v6837_v23, %v6836_v4  ;;  %v6321_v4 = vld [vmem:[#allocation2 + $0x208] sm:$0xff] }
 0x8b8   : > { %v7133_v19 = vpop.f32.mrf.mxu3  ;;  %v7649_v51 = vpop.f32.mrf.mxu0 }
 0x8b9   : > { %v7260_v30 = vadd.f32 %v7133_v19, %v6742_v26  ;;  %v16388_v36 = vadd.f32 %v7649_v51, %v7259_v47  ;;  %v8122_v63 = vpop.f32.mrf.mxu1  ;;  %v6225_v47 = vadd.f32 %v18071_v16, %v5823_v44 }
 0x8ba   : > { %v16393_v2 = vadd.f32 %v8122_v63, %v16133_v56  ;;  %v11391_v56 = vld [vmem:[%s17700_s4 + $0x18b] sm:$0xff] }
 0x8bb   : > { %11033 = vmatmul.msk.bf16.gmra.mxu2 %vm761_vm2, %v6364_v29  ;;  %11112 = vmatmul.msk.bf16.gmra.mxu0 %vm761_vm2, %v16390_v55  ;;  %v5824_v23 = vadd.f32 %v11391_v56, %v16179_v53 }
 0x8bc   : > { %18070 = vst [vmem:[#allocation95_spill] sm:$0xff] %v16393_v2  ;;  %11143 = vmatmul.msk.bf16.gmra.mxu1 %vm761_vm2, %v16163_v6  ;;  %v18073_v6 = vld [vmem:[#allocation96_spill] sm:$0xff] }
 0x8bd   : > { %11073 = vmatmul.msk.bf16.gmra.mxu3 %vm761_vm2, %v6882_v57  ;;  %v6226_v29 = vadd.f32 %v18073_v6, %v5824_v23  ;;  %v7355_v57 = vld [vmem:[#allocation2 + $0x1fa] sm:$0xff] }
 0x8be   : > { %v6618_v34 = vpop.f32.mrf.mxu2  ;;  %v11392_v2 = vld [vmem:[%s17700_s4 + $0x193] sm:$0xff]  ;;  %v6838_v6 = vld [vmem:[#allocation2 + $0x201] sm:$0xff] }
 0x8bf   : > { %v6743_v26 = vadd.f32 %v6618_v34, %v6225_v47  ;;  %v6839_v34 = vld [vmem:[#allocation2 + $0x209] sm:$0xff] }
 0x8c0   : > { %v7136_v42 = vpop.f32.mrf.mxu3  ;;  %v7651_v19 = vpop.f32.mrf.mxu0 }
 0x8c1   : > { %v7261_v51 = vadd.f32 %v7136_v42, %v6743_v26  ;;  %v16406_v43 = vadd.f32 %v7651_v19, %v7260_v30  ;;  %v8124_v5 = vpop.f32.mrf.mxu1  ;;  %v5825_v26 = vadd.f32 %v11392_v2, %v16179_v53  ;;  %v6320_v42 = vld [vmem:[#allocation2 + $0x200] sm:$0xff]  ;;  %v7354_v19 = vld [vmem:[#allocation2 + $0x1f2] sm:$0xff] }
 0x8c2   : > { %v16409_v63 = vadd.f32 %v8124_v5, %v16151_v40  ;;  %v6365_v23 = vpack.c.bf16 %v6321_v4, %v6320_v42  ;;  %v18075_v2 = vld [vmem:[#allocation25_spill] sm:$0xff] }
 0x8c4   : > { %18072 = vst [vmem:[#allocation23_spill] sm:$0xff] %v16409_v63  ;;  %v16418_v63 = vpack.c.bf16 %v7355_v57, %v7354_v19 }
 0x8c6   : > { %v6620_v44 = vpop.f32.mrf.mxu2 }
 0x8c7   : > { %v6744_v16 = vadd.f32 %v6620_v44, %v6226_v29  ;;  %v6883_v44 = vpack.c.bf16 %v6839_v34, %v6838_v6  ;;  %v6323_v6 = vld [vmem:[#allocation2 + $0x218] sm:$0xff] }
 0x8c8   : > { %v7138_v47 = vpop.f32.mrf.mxu3  ;;  %v7654_v30 = vpop.f32.mrf.mxu0 }
 0x8c9   : > { %v7262_v56 = vadd.f32 %v7138_v47, %v6744_v16  ;;  %v16416_v40 = vadd.f32 %v7654_v30, %v7261_v51  ;;  %v8127_v5 = vpop.f32.mrf.mxu1  ;;  %v6227_v51 = vadd.f32 %v18075_v2, %v5825_v26 }
 0x8ca   : > { %v16421_v29 = vadd.f32 %v8127_v5, %v16161_v41  ;;  %v11393_v41 = vld [vmem:[%s17700_s4 + $0x19b] sm:$0xff] }
 0x8cb   : > { %11034 = vmatmul.msk.bf16.gmra.mxu2 %vm761_vm2, %v6365_v23  ;;  %11113 = vmatmul.msk.bf16.gmra.mxu0 %vm761_vm2, %v16418_v63  ;;  %v5826_v34 = vadd.f32 %v11393_v41, %v16179_v53 }
 0x8cc   : > { %18074 = vst [vmem:[#allocation96_spill] sm:$0xff] %v16421_v29  ;;  %11144 = vmatmul.msk.bf16.gmra.mxu1 %vm761_vm2, %v16194_v14  ;;  %v18077_v14 = vld [vmem:[#allocation97_spill] sm:$0xff]  ;;  %v11394_v29 = vld [vmem:[%s17700_s4 + $0x1a3] sm:$0xff] }
 0x8cd   : > { %11074 = vmatmul.msk.bf16.gmra.mxu3 %vm761_vm2, %v6883_v44  ;;  %v6228_v23 = vadd.f32 %v18077_v14, %v5826_v34  ;;  %v7357_v44 = vld [vmem:[#allocation2 + $0x20a] sm:$0xff] }
 0x8ce   : > { %v6623_v4 = vpop.f32.mrf.mxu2  ;;  %v6840_v14 = vld [vmem:[#allocation2 + $0x211] sm:$0xff] }
 0x8cf   : > { %v6745_v16 = vadd.f32 %v6623_v4, %v6227_v51  ;;  %v6841_v4 = vld [vmem:[#allocation2 + $0x219] sm:$0xff] }
 0x8d0   : > { %v7141_v57 = vpop.f32.mrf.mxu3  ;;  %v7656_v47 = vpop.f32.mrf.mxu0 }
 0x8d1   : > { %v7263_v30 = vadd.f32 %v7141_v57, %v6745_v16  ;;  %v16434_v42 = vadd.f32 %v7656_v47, %v7262_v56  ;;  %v8129_v19 = vpop.f32.mrf.mxu1  ;;  %v5827_v16 = vadd.f32 %v11394_v29, %v16179_v53  ;;  %v6322_v57 = vld [vmem:[#allocation2 + $0x210] sm:$0xff]  ;;  %v7356_v47 = vld [vmem:[#allocation2 + $0x202] sm:$0xff] }
 0x8d2   : > { %v16437_v5 = vadd.f32 %v8129_v19, %v16182_v48  ;;  %v6366_v34 = vpack.c.bf16 %v6323_v6, %v6322_v57  ;;  %v18079_v29 = vld [vmem:[#allocation27_spill] sm:$0xff] }
 0x8d4   : > { %18076 = vst [vmem:[#allocation25_spill] sm:$0xff] %v16437_v5  ;;  %v16446_v5 = vpack.c.bf16 %v7357_v44, %v7356_v47 }
 0x8d6   : > { %v6625_v26 = vpop.f32.mrf.mxu2 }
 0x8d7   : > { %v6746_v2 = vadd.f32 %v6625_v26, %v6228_v23  ;;  %v6884_v26 = vpack.c.bf16 %v6841_v4, %v6840_v14  ;;  %v6325_v14 = vld [vmem:[#allocation2 + $0x228] sm:$0xff] }
 0x8d8   : > { %v7143_v51 = vpop.f32.mrf.mxu3  ;;  %v7659_v56 = vpop.f32.mrf.mxu0 }
 0x8d9   : > { %v7264_v41 = vadd.f32 %v7143_v51, %v6746_v2  ;;  %v16444_v48 = vadd.f32 %v7659_v56, %v7263_v30  ;;  %v8132_v19 = vpop.f32.mrf.mxu1  ;;  %v6229_v30 = vadd.f32 %v18079_v29, %v5827_v16 }
 0x8da   : > { %v16449_v23 = vadd.f32 %v8132_v19, %v16192_v49  ;;  %v11395_v49 = vld [vmem:[%s17700_s4 + $0x1ab] sm:$0xff] }
 0x8db   : > { %11035 = vmatmul.msk.bf16.gmra.mxu2 %vm761_vm2, %v6366_v34  ;;  %11114 = vmatmul.msk.bf16.gmra.mxu0 %vm761_vm2, %v16446_v5  ;;  %v5828_v4 = vadd.f32 %v11395_v49, %v16179_v53 }
 0x8dc   : > { %18078 = vst [vmem:[#allocation97_spill] sm:$0xff] %v16449_v23  ;;  %11145 = vmatmul.msk.bf16.gmra.mxu1 %vm761_vm2, %v16222_v15  ;;  %v18081_v15 = vld [vmem:[#allocation98_spill] sm:$0xff]  ;;  %v11396_v23 = vld [vmem:[%s17700_s4 + $0x1b3] sm:$0xff] }
 0x8dd   : > { %11075 = vmatmul.msk.bf16.gmra.mxu3 %vm761_vm2, %v6884_v26  ;;  %v6230_v34 = vadd.f32 %v18081_v15, %v5828_v4  ;;  %v7359_v26 = vld [vmem:[#allocation2 + $0x21a] sm:$0xff] }
 0x8de   : > { %v6628_v6 = vpop.f32.mrf.mxu2  ;;  %v6842_v15 = vld [vmem:[#allocation2 + $0x221] sm:$0xff] }
 0x8df   : > { %v6747_v2 = vadd.f32 %v6628_v6, %v6229_v30  ;;  %v6843_v6 = vld [vmem:[#allocation2 + $0x229] sm:$0xff] }
 0x8e0   : > { %v7146_v44 = vpop.f32.mrf.mxu3  ;;  %v7661_v51 = vpop.f32.mrf.mxu0 }
 0x8e1   : > { %v7265_v56 = vadd.f32 %v7146_v44, %v6747_v2  ;;  %v16462_v57 = vadd.f32 %v7661_v51, %v7264_v41  ;;  %v8134_v47 = vpop.f32.mrf.mxu1  ;;  %v5829_v2 = vadd.f32 %v11396_v23, %v16179_v53  ;;  %v6324_v44 = vld [vmem:[#allocation2 + $0x220] sm:$0xff]  ;;  %v7358_v51 = vld [vmem:[#allocation2 + $0x212] sm:$0xff] }
 0x8e2   : > { %v16465_v19 = vadd.f32 %v8134_v47, %v16210_v20  ;;  %v6367_v4 = vpack.c.bf16 %v6325_v14, %v6324_v44  ;;  %v18083_v23 = vld [vmem:[#allocation29_spill] sm:$0xff] }
 0x8e4   : > { %18080 = vst [vmem:[#allocation27_spill] sm:$0xff] %v16465_v19  ;;  %v16474_v19 = vpack.c.bf16 %v7359_v26, %v7358_v51 }
 0x8e6   : > { %v6630_v16 = vpop.f32.mrf.mxu2 }
 0x8e7   : > { %v6748_v29 = vadd.f32 %v6630_v16, %v6230_v34  ;;  %v6885_v16 = vpack.c.bf16 %v6843_v6, %v6842_v15  ;;  %v6327_v15 = vld [vmem:[#allocation2 + $0x238] sm:$0xff] }
 0x8e8   : > { %v7148_v30 = vpop.f32.mrf.mxu3  ;;  %v7664_v41 = vpop.f32.mrf.mxu0 }
 0x8e9   : > { %v7266_v49 = vadd.f32 %v7148_v30, %v6748_v29  ;;  %v16472_v20 = vadd.f32 %v7664_v41, %v7265_v56  ;;  %v8137_v47 = vpop.f32.mrf.mxu1  ;;  %v6231_v56 = vadd.f32 %v18083_v23, %v5829_v2 }
 0x8ea   : > { %v16477_v34 = vadd.f32 %v8137_v47, %v16220_v58  ;;  %v11397_v58 = vld [vmem:[%s17700_s4 + $0x1bb] sm:$0xff] }
 0x8eb   : > { %11036 = vmatmul.msk.bf16.gmra.mxu2 %vm761_vm2, %v6367_v4  ;;  %11115 = vmatmul.msk.bf16.gmra.mxu0 %vm761_vm2, %v16474_v19  ;;  %v5830_v6 = vadd.f32 %v11397_v58, %v16179_v53 }
 0x8ec   : > { %18082 = vst [vmem:[#allocation98_spill] sm:$0xff] %v16477_v34  ;;  %11146 = vmatmul.msk.bf16.gmra.mxu1 %vm761_vm2, %v16250_v39  ;;  %v18085_v39 = vld [vmem:[#allocation99_spill] sm:$0xff] }
 0x8ed   : > { %11076 = vmatmul.msk.bf16.gmra.mxu3 %vm761_vm2, %v6885_v16  ;;  %v6232_v4 = vadd.f32 %v18085_v39, %v5830_v6  ;;  %v7361_v16 = vld [vmem:[#allocation2 + $0x22a] sm:$0xff] }
 0x8ee   : > { %v6633_v14 = vpop.f32.mrf.mxu2  ;;  %v11398_v34 = vld [vmem:[%s17700_s4 + $0x1c3] sm:$0xff]  ;;  %v6844_v39 = vld [vmem:[#allocation2 + $0x231] sm:$0xff] }
 0x8ef   : > { %v6749_v29 = vadd.f32 %v6633_v14, %v6231_v56  ;;  %v6845_v14 = vld [vmem:[#allocation2 + $0x239] sm:$0xff] }
 0x8f0   : > { %v7151_v26 = vpop.f32.mrf.mxu3  ;;  %v7666_v30 = vpop.f32.mrf.mxu0 }
 0x8f1   : > { %v7267_v41 = vadd.f32 %v7151_v26, %v6749_v29  ;;  %v16490_v44 = vadd.f32 %v7666_v30, %v7266_v49  ;;  %v8139_v51 = vpop.f32.mrf.mxu1  ;;  %v5831_v29 = vadd.f32 %v11398_v34, %v16179_v53  ;;  %v6326_v26 = vld [vmem:[#allocation2 + $0x230] sm:$0xff]  ;;  %v7360_v30 = vld [vmem:[#allocation2 + $0x222] sm:$0xff] }
 0x8f2   : > { %v16493_v47 = vadd.f32 %v8139_v51, %v16238_v38  ;;  %v6368_v6 = vpack.c.bf16 %v6327_v15, %v6326_v26  ;;  %v18087_v34 = vld [vmem:[#allocation31_spill] sm:$0xff] }
 0x8f4   : > { %18084 = vst [vmem:[#allocation29_spill] sm:$0xff] %v16493_v47  ;;  %v16502_v47 = vpack.c.bf16 %v7361_v16, %v7360_v30 }
 0x8f6   : > { %v6635_v2 = vpop.f32.mrf.mxu2 }
 0x8f7   : > { %v6750_v23 = vadd.f32 %v6635_v2, %v6232_v4  ;;  %v6886_v2 = vpack.c.bf16 %v6845_v14, %v6844_v39  ;;  %v6329_v39 = vld [vmem:[#allocation2 + $0x248] sm:$0xff] }
 0x8f8   : > { %v7153_v56 = vpop.f32.mrf.mxu3  ;;  %v7669_v49 = vpop.f32.mrf.mxu0 }
 0x8f9   : > { %v7268_v58 = vadd.f32 %v7153_v56, %v6750_v23  ;;  %v16500_v38 = vadd.f32 %v7669_v49, %v7267_v41  ;;  %v8142_v51 = vpop.f32.mrf.mxu1  ;;  %v6233_v41 = vadd.f32 %v18087_v34, %v5831_v29 }
 0x8fa   : > { %v16505_v4 = vadd.f32 %v8142_v51, %v16248_v18  ;;  %v11399_v18 = vld [vmem:[%s17700_s4 + $0x1cb] sm:$0xff] }
 0x8fb   : > { %11037 = vmatmul.msk.bf16.gmra.mxu2 %vm761_vm2, %v6368_v6  ;;  %11116 = vmatmul.msk.bf16.gmra.mxu0 %vm761_vm2, %v16502_v47  ;;  %v5832_v14 = vadd.f32 %v11399_v18, %v16179_v53 }
 0x8fc   : > { %18086 = vst [vmem:[#allocation99_spill] sm:$0xff] %v16505_v4  ;;  %11147 = vmatmul.msk.bf16.gmra.mxu1 %vm761_vm2, %v16278_v13  ;;  %v18089_v13 = vld [vmem:[#allocation100_spill] sm:$0xff] }
 0x8fd   : > { %11077 = vmatmul.msk.bf16.gmra.mxu3 %vm761_vm2, %v6886_v2  ;;  %v6234_v6 = vadd.f32 %v18089_v13, %v5832_v14  ;;  %v7363_v2 = vld [vmem:[#allocation2 + $0x23a] sm:$0xff] }
 0x8fe   : > { %v6638_v15 = vpop.f32.mrf.mxu2  ;;  %v11400_v4 = vld [vmem:[%s17700_s4 + $0x1d3] sm:$0xff]  ;;  %v6846_v13 = vld [vmem:[#allocation2 + $0x241] sm:$0xff] }
 0x8ff   : > { %v6751_v23 = vadd.f32 %v6638_v15, %v6233_v41  ;;  %v6847_v15 = vld [vmem:[#allocation2 + $0x249] sm:$0xff] }
 0x900   : > { %v7156_v16 = vpop.f32.mrf.mxu3  ;;  %v7671_v56 = vpop.f32.mrf.mxu0 }
 0x901   : > { %v7269_v49 = vadd.f32 %v7156_v16, %v6751_v23  ;;  %v16518_v26 = vadd.f32 %v7671_v56, %v7268_v58  ;;  %v8144_v30 = vpop.f32.mrf.mxu1  ;;  %v5833_v23 = vadd.f32 %v11400_v4, %v16179_v53  ;;  %v6328_v16 = vld [vmem:[#allocation2 + $0x240] sm:$0xff]  ;;  %v7362_v56 = vld [vmem:[#allocation2 + $0x232] sm:$0xff] }
 0x902   : > { %v16521_v51 = vadd.f32 %v8144_v30, %v16266_v33  ;;  %v6369_v14 = vpack.c.bf16 %v6329_v39, %v6328_v16 }
 0x903   : > { %v6235_v4 = vadd.f32 %v15727_v8, %v5833_v23  ;;  %v6331_v23 = vld [vmem:[#allocation2 + $0x258] sm:$0xff] }
 0x904   : > { %18088 = vst [vmem:[#allocation31_spill] sm:$0xff] %v16521_v51  ;;  %v16530_v51 = vpack.c.bf16 %v7363_v2, %v7362_v56 }
 0x906   : > { %v6640_v29 = vpop.f32.mrf.mxu2 }
 0x907   : > { %v6752_v34 = vadd.f32 %v6640_v29, %v6234_v6  ;;  %v6887_v29 = vpack.c.bf16 %v6847_v15, %v6846_v13 }
 0x908   : > { %v7158_v41 = vpop.f32.mrf.mxu3  ;;  %v7674_v58 = vpop.f32.mrf.mxu0 }
 0x909   : > { %v7270_v18 = vadd.f32 %v7158_v41, %v6752_v34  ;;  %v16528_v33 = vadd.f32 %v7674_v58, %v7269_v49  ;;  %v8147_v30 = vpop.f32.mrf.mxu1 }
 0x90a   : > { %v16533_v6 = vadd.f32 %v8147_v30, %v16276_v12  ;;  %v11401_v12 = vld [vmem:[%s17700_s4 + $0x1db] sm:$0xff]  ;;  %v7365_v30 = vld [vmem:[#allocation2 + $0x24a] sm:$0xff] }
 0x90b   : > { %11038 = vmatmul.msk.bf16.gmra.mxu2 %vm761_vm2, %v6369_v14  ;;  %11117 = vmatmul.msk.bf16.gmra.mxu0 %vm761_vm2, %v16530_v51  ;;  %v5834_v41 = vadd.f32 %v11401_v12, %v16179_v53 }
 0x90c   : > { %11148 = vmatmul.msk.bf16.gmra.mxu1 %vm761_vm2, %v16306_v31 }
 0x90d   : > { %11078 = vmatmul.msk.bf16.gmra.mxu3 %vm761_vm2, %v6887_v29  ;;  %v6236_v31 = vadd.f32 %v15741_v37, %v5834_v41  ;;  %v6849_v29 = vld [vmem:[#allocation2 + $0x259] sm:$0xff]  ;;  %v6848_v41 = vld [vmem:[#allocation2 + $0x251] sm:$0xff] }
 0x90e   : > { %v6643_v49 = vpop.f32.mrf.mxu2 }
 0x90f   : > { %v6753_v39 = vadd.f32 %v6643_v49, %v6235_v4  ;;  %v11402_v4 = vld [vmem:[%s17700_s4 + $0x1e3] sm:$0xff] }
 0x910   : > { %v7161_v2 = vpop.f32.mrf.mxu3  ;;  %v7676_v34 = vpop.f32.mrf.mxu0  ;;  %v5835_v49 = vadd.f32 %v11402_v4, %v16179_v53 }
 0x911   : > { %v7271_v15 = vadd.f32 %v7161_v2, %v6753_v39  ;;  %v16546_v58 = vadd.f32 %v7676_v34, %v7270_v18  ;;  %v8149_v16 = vpop.f32.mrf.mxu1  ;;  %v6330_v39 = vld [vmem:[#allocation2 + $0x250] sm:$0xff]  ;;  %v7364_v2 = vld [vmem:[#allocation2 + $0x242] sm:$0xff] }
 0x912   : > { %v16549_v56 = vadd.f32 %v8149_v16, %v16294_v11  ;;  %v6370_v37 = vpack.c.bf16 %v6331_v23, %v6330_v39  ;;  %v16558_v16 = vpack.c.bf16 %v7365_v30, %v7364_v2 }
 0x916   : > { %v6645_v8 = vpop.f32.mrf.mxu2 }
 0x917   : > { %v6754_v14 = vadd.f32 %v6645_v8, %v6236_v31  ;;  %v6888_v8 = vpack.c.bf16 %v6849_v29, %v6848_v41 }
 0x918   : > { %v7163_v13 = vpop.f32.mrf.mxu3  ;;  %v7679_v18 = vpop.f32.mrf.mxu0 }
 0x919   : > { %v7272_v34 = vadd.f32 %v7163_v13, %v6754_v14  ;;  %v16556_v11 = vadd.f32 %v7679_v18, %v7271_v15  ;;  %v8152_v12 = vpop.f32.mrf.mxu1  ;;  %v6237_v15 = vadd.f32 %v15760_v25, %v5835_v49  ;;  %v6332_v49 = vld [vmem:[#allocation2 + $0x260] sm:$0x3] }
 0x91a   : > { %v16561_v31 = vadd.f32 %v8152_v12, %v16304_v61  ;;  %v11403_v61 = vld [vmem:[%s17700_s4 + $0x1eb] sm:$0xff]  ;;  %v7367_v12 = vld [vmem:[#allocation2 + $0x25a] sm:$0xff] }
 0x91b   : > { %11039 = vmatmul.msk.bf16.gmra.mxu2 %vm761_vm2, %v6370_v37  ;;  %11118 = vmatmul.msk.bf16.gmra.mxu0 %vm761_vm2, %v16558_v16  ;;  %v5836_v29 = vadd.f32 %v11403_v61, %v16179_v53  ;;  %v6371_v61 = vpack.c.bf16 %v6332_v49, %v6332_v49 }
 0x91c   : > { %18090 = vst [vmem:[#allocation100_spill] sm:$0xff] %v16561_v31  ;;  %11149 = vmatmul.msk.bf16.gmra.mxu1 %vm761_vm2, %v16334_v52 }
 0x91d   : > { %11079 = vmatmul.msk.bf16.gmra.mxu3 %vm761_vm2, %v6888_v8  ;;  %v6238_v52 = vadd.f32 %v15783_v46, %v5836_v29  ;;  %v6850_v8 = vld [vmem:[#allocation2 + $0x261] sm:$0x3] }
 0x91e   : > { %v6648_v23 = vpop.f32.mrf.mxu2 }
 0x91f   : > { %v6755_v14 = vadd.f32 %v6648_v23, %v6237_v15  ;;  %v11404_v15 = vld [vmem:[%s17700_s4 + $0x1f3] sm:$0xff] }
 0x920   : > { %v7166_v30 = vpop.f32.mrf.mxu3  ;;  %v7681_v13 = vpop.f32.mrf.mxu0  ;;  %v5837_v23 = vadd.f32 %v11404_v15, %v16179_v53 }
 0x921   : > { %v7273_v4 = vadd.f32 %v7166_v30, %v6755_v14  ;;  %v16574_v18 = vadd.f32 %v7681_v13, %v7272_v34  ;;  %v8154_v39 = vpop.f32.mrf.mxu1  ;;  %v7366_v14 = vld [vmem:[#allocation2 + $0x252] sm:$0xff] }
 0x922   : > { %v16577_v2 = vadd.f32 %v8154_v39, %v16322_v9  ;;  %v16586_v46 = vpack.c.bf16 %v7367_v12, %v7366_v14  ;;  %v6889_v39 = vpack.c.bf16 %v6850_v8, %v6850_v8 }
 0x924   : > { %18091 = vst [vmem:[#allocation120_spill] sm:$0xff] %v16577_v2 }
 0x926   : > { %v6650_v25 = vpop.f32.mrf.mxu2 }
 0x927   : > { %v6756_v37 = vadd.f32 %v6650_v25, %v6238_v52 }
 0x928   : > { %v7168_v41 = vpop.f32.mrf.mxu3  ;;  %v7684_v34 = vpop.f32.mrf.mxu0 }
 0x929   : > { %v7274_v30 = vadd.f32 %v7168_v41, %v6756_v37  ;;  %v16584_v13 = vadd.f32 %v7684_v34, %v7273_v4  ;;  %v8157_v9 = vpop.f32.mrf.mxu1  ;;  %v18093_v4 = vld [vmem:[#allocation102_spill] sm:$0xff] }
 0x92a   : > { %v16589_v29 = vadd.f32 %v8157_v9, %v16332_v22  ;;  %v6239_v52 = vadd.f32 %v18093_v4, %v5837_v23  ;;  %v11405_v22 = vld [vmem:[%s17700_s4 + $0x1fb] sm:$0xff] }
 0x92b   : > { %11040 = vmatmul.msk.bf16.gmra.mxu2 %vm761_vm2, %v6371_v61  ;;  %11119 = vmatmul.msk.bf16.gmra.mxu0 %vm761_vm2, %v16586_v46  ;;  %v5838_v41 = vadd.f32 %v11405_v22, %v16179_v53  ;;  %v8329_v23 = vld [vmem:[#allocation2 + $0x1c] sm:$0xff] }
 0x92c   : > { %18092 = vst [vmem:[#allocation121_spill] sm:$0xff] %v16589_v29  ;;  %11150 = vmatmul.msk.bf16.gmra.mxu1 %vm761_vm2, %v16362_v28  ;;  %v18094_v28 = vld [vmem:[#allocation103_spill] sm:$0xff] }
 0x92d   : > { %11080 = vmatmul.msk.bf16.gmra.mxu3 %vm761_vm2, %v6889_v39  ;;  %v6240_v9 = vadd.f32 %v18094_v28, %v5838_v41  ;;  %v7368_v39 = vld [vmem:[#allocation2 + $0x262] sm:$0x3]  ;;  %v8847_v29 = vld [vmem:[#allocation2 + $0x2c] sm:$0xff]  ;;  %v8846_v41 = vld [vmem:[#allocation2 + $0x24] sm:$0xff] }
 0x92e   : > { %v6653_v25 = vpop.f32.mrf.mxu2  ;;  %v7407_v22 = vpack.c.bf16 %v7368_v39, %v7368_v39  ;;  %v8923_v28 = vpack.c.bf16 %v8847_v29, %v8846_v41  ;;  %v16627_v29 = vld [vmem:[%s11468_s22 + $0x1] ss:$0 sm:$0xff] }
 0x92f   : > { %v6757_v49 = vadd.f32 %v6653_v25, %v6239_v52  ;;  %v8328_v25 = vld [vmem:[#allocation2 + $0x14] sm:$0xff] }
 0x930   : > { %v7171_v12 = vpop.f32.mrf.mxu3  ;;  %v7686_v37 = vpop.f32.mrf.mxu0  ;;  %v8405_v31 = vpack.c.bf16 %v8329_v23, %v8328_v25  ;;  %v18096_v25 = vld [vmem:[#allocation105_spill] sm:$0xff] }
 0x931   : > { %v7275_v8 = vadd.f32 %v7171_v12, %v6757_v49  ;;  %v16602_v15 = vadd.f32 %v7686_v37, %v7274_v30  ;;  %v8159_v34 = vpop.f32.mrf.mxu1  ;;  %v11406_v30 = vld [vmem:[%s17700_s4 + $0x203] sm:$0xff] }
 0x932   : > { %v16605_v14 = vadd.f32 %v8159_v34, %v16350_v59  ;;  %v5839_v49 = vadd.f32 %v11406_v30, %v16179_v53  ;;  %v18095_v53 = vld [vmem:[#allocation104_spill] sm:$0xff] }
 0x936   : > { %v6655_v61 = vpop.f32.mrf.mxu2 }
 0x937   : > { %v6758_v4 = vadd.f32 %v6655_v61, %v6240_v9 }
 0x938   : > { %v7173_v52 = vpop.f32.mrf.mxu3  ;;  %v7689_v2 = vpop.f32.mrf.mxu0 }
 0x939   : > { %v7276_v12 = vadd.f32 %v7173_v52, %v6758_v4  ;;  %v16612_v59 = vadd.f32 %v7689_v2, %v7275_v8  ;;  %v8162_v37 = vpop.f32.mrf.mxu1  ;;  %v6241_v2 = vadd.f32 %v18095_v53, %v5839_v49  ;;  %v8849_v53 = vld [vmem:[#allocation2 + $0x3c] sm:$0xff] }
 0x93a   : > { %v16615_v34 = vadd.f32 %v8162_v37, %v16360_v1  ;;  %v11407_v1 = vld [vmem:[%s17700_s4 + $0x20b] sm:$0xff] }
 0x93b   : > { %11120 = vmatmul.msk.bf16.gmra.mxu0 %vm761_vm2, %v7407_v22  ;;  %11162 = vmatmul.msk.bf16.vlgmr.msra.gmra.mxu2 %vm761_vm2, %v8405_v31  ;;  %v5840_v39 = vadd.f32 %v16627_v29, %v11407_v1  ;;  %v9365_v37 = vld [vmem:[#allocation2 + $0x2d] sm:$0xff] }
 0x93c   : > { %11151 = vmatmul.msk.bf16.gmra.mxu1 %vm761_vm2, %v16390_v55  ;;  %v11409_v1 = vld [vmem:[%s17700_s4 + $0x213] sm:$0xff] }
 0x93d   : > { %11202 = vmatmul.msk.bf16.vlgmr.msra.gmra.mxu3 %vm761_vm2, %v8923_v28  ;;  %v6242_v30 = vadd.f32 %v18096_v25, %v5840_v39 }
 0x93e   : > { %v6658_v8 = vpop.f32.mrf.mxu2 }
 0x93f   : > { %v6759_v9 = vadd.f32 %v6658_v8, %v6241_v2  ;;  %v9364_v8 = vld [vmem:[#allocation2 + $0x25] sm:$0xff] }
 0x940   : > { %v7176_v23 = vpop.f32.mrf.mxu3  ;;  %v7691_v61 = vpop.f32.mrf.mxu0 }
 0x941   : > { %v7277_v31 = vadd.f32 %v7176_v23, %v6759_v9  ;;  %v16630_v4 = vadd.f32 %v7691_v61, %v7276_v12  ;;  %v8164_v55 = vpop.f32.mrf.mxu1  ;;  %v5841_v12 = vadd.f32 %v11409_v1, %v16627_v29  ;;  %v8848_v61 = vld [vmem:[#allocation2 + $0x34] sm:$0xff]  ;;  %v18099_v1 = vld [vmem:[#allocation107_spill] sm:$0xff] }
 0x942   : > { %v16633_v52 = vadd.f32 %v8164_v55, %v16378_v24  ;;  %v9441_v55 = vpack.c.bf16 %v9365_v37, %v9364_v8  ;;  %v8924_v25 = vpack.c.bf16 %v8849_v53, %v8848_v61  ;;  %v9367_v61 = vld [vmem:[#allocation2 + $0x3d] sm:$0xff] }
 0x946   : > { %v6660_v49 = vpop.f32.mrf.mxu2 }
 0x947   : > { %v6760_v22 = vadd.f32 %v6660_v49, %v6242_v30  ;;  %v18098_v30 = vld [vmem:[#allocation106_spill] sm:$0xff] }
 0x948   : > { %v7178_v41 = vpop.f32.mrf.mxu3  ;;  %v7694_v2 = vpop.f32.mrf.mxu0  ;;  %v6243_v49 = vadd.f32 %v18098_v30, %v5841_v12 }
 0x949   : > { %v7278_v9 = vadd.f32 %v7178_v41, %v6760_v22  ;;  %v16640_v23 = vadd.f32 %v7694_v2, %v7277_v31  ;;  %v8167_v24 = vpop.f32.mrf.mxu1 }
 0x94a   : > { %v16643_v39 = vadd.f32 %v8167_v24, %v16388_v36  ;;  %v11410_v36 = vld [vmem:[%s17700_s4 + $0x21b] sm:$0xff] }
 0x94b   : > { %11163 = vmatmul.msk.bf16.gmra.mxu2 %vm761_vm2, %v8923_v28  ;;  %11242 = vmatmul.msk.bf16.vlgmr.msra.gmra.mxu0 %vm761_vm2, %v9441_v55  ;;  %v5842_v37 = vadd.f32 %v11410_v36, %v16627_v29  ;;  %v11411_v36 = vld [vmem:[%s17700_s4 + $0x223] sm:$0xff] }
 0x94c   : > { %18097 = vst [vmem:[#allocation102_spill] sm:$0xff] %v16643_v39  ;;  %11152 = vmatmul.msk.bf16.gmra.mxu1 %vm761_vm2, %v16418_v63  ;;  %v9366_v39 = vld [vmem:[#allocation2 + $0x35] sm:$0xff] }
 0x94d   : > { %11203 = vmatmul.msk.bf16.gmra.mxu3 %vm761_vm2, %v8924_v25  ;;  %v6244_v24 = vadd.f32 %v18099_v1, %v5842_v37 }
 0x94e   : > { %v6663_v31 = vpop.f32.mrf.mxu2 }
 0x94f   : > { %v6761_v22 = vadd.f32 %v6663_v31, %v6243_v49  ;;  %v8851_v49 = vld [vmem:[#allocation2 + $0x4c] sm:$0xff] }
 0x950   : > { %v7181_v41 = vpop.f32.mrf.mxu3  ;;  %v7696_v2 = vpop.f32.mrf.mxu0 }
 0x951   : > { %v7279_v28 = vadd.f32 %v7181_v41, %v6761_v22  ;;  %v16655_v53 = vadd.f32 %v7696_v2, %v7278_v9  ;;  %v8169_v8 = vpop.f32.mrf.mxu1  ;;  %v5843_v9 = vadd.f32 %v11411_v36, %v16627_v29  ;;  %v8850_v2 = vld [vmem:[#allocation2 + $0x44] sm:$0xff]  ;;  %v18102_v36 = vld [vmem:[#allocation109_spill] sm:$0xff] }
 0x952   : > { %v16658_v63 = vadd.f32 %v8169_v8, %v16406_v43  ;;  %v9442_v8 = vpack.c.bf16 %v9367_v61, %v9366_v39  ;;  %v8925_v1 = vpack.c.bf16 %v8851_v49, %v8850_v2  ;;  %v9369_v2 = vld [vmem:[#allocation2 + $0x4d] sm:$0xff] }
 0x956   : > { %v6665_v12 = vpop.f32.mrf.mxu2 }
 0x957   : > { %v6762_v55 = vadd.f32 %v6665_v12, %v6244_v24  ;;  %v18101_v24 = vld [vmem:[#allocation108_spill] sm:$0xff] }
 0x958   : > { %v7183_v30 = vpop.f32.mrf.mxu3  ;;  %v7699_v31 = vpop.f32.mrf.mxu0  ;;  %v6245_v12 = vadd.f32 %v18101_v24, %v5843_v9 }
 0x959   : > { %v7280_v22 = vadd.f32 %v7183_v30, %v6762_v55  ;;  %v16665_v41 = vadd.f32 %v7699_v31, %v7279_v28  ;;  %v8172_v43 = vpop.f32.mrf.mxu1 }
 0x95a   : > { %v16668_v37 = vadd.f32 %v8172_v43, %v16416_v40  ;;  %v11412_v40 = vld [vmem:[%s17700_s4 + $0x22b] sm:$0xff] }
 0x95b   : > { %11164 = vmatmul.msk.bf16.gmra.mxu2 %vm761_vm2, %v8924_v25  ;;  %11243 = vmatmul.msk.bf16.gmra.mxu0 %vm761_vm2, %v9442_v8  ;;  %v5844_v39 = vadd.f32 %v11412_v40, %v16627_v29  ;;  %v11413_v40 = vld [vmem:[%s17700_s4 + $0x233] sm:$0xff] }
 0x95c   : > { %18100 = vst [vmem:[#allocation103_spill] sm:$0xff] %v16668_v37  ;;  %11153 = vmatmul.msk.bf16.gmra.mxu1 %vm761_vm2, %v16446_v5  ;;  %v9368_v37 = vld [vmem:[#allocation2 + $0x45] sm:$0xff] }
 0x95d   : > { %11204 = vmatmul.msk.bf16.gmra.mxu3 %vm761_vm2, %v8925_v1  ;;  %v6246_v43 = vadd.f32 %v18102_v36, %v5844_v39 }
 0x95e   : > { %v6668_v28 = vpop.f32.mrf.mxu2 }
 0x95f   : > { %v6763_v55 = vadd.f32 %v6668_v28, %v6245_v12  ;;  %v8853_v12 = vld [vmem:[#allocation2 + $0x5c] sm:$0xff] }
 0x960   : > { %v7186_v30 = vpop.f32.mrf.mxu3  ;;  %v7701_v31 = vpop.f32.mrf.mxu0 }
 0x961   : > { %v7281_v25 = vadd.f32 %v7186_v30, %v6763_v55  ;;  %v16680_v61 = vadd.f32 %v7701_v31, %v7280_v22  ;;  %v8174_v49 = vpop.f32.mrf.mxu1  ;;  %v5845_v22 = vadd.f32 %v11413_v40, %v16627_v29  ;;  %v8852_v31 = vld [vmem:[#allocation2 + $0x54] sm:$0xff]  ;;  %v18105_v40 = vld [vmem:[#allocation111_spill] sm:$0xff] }
 0x962   : > { %v16683_v5 = vadd.f32 %v8174_v49, %v16434_v42  ;;  %v9443_v49 = vpack.c.bf16 %v9369_v2, %v9368_v37  ;;  %v8926_v36 = vpack.c.bf16 %v8853_v12, %v8852_v31  ;;  %v9371_v31 = vld [vmem:[#allocation2 + $0x5d] sm:$0xff] }
 0x966   : > { %v6670_v9 = vpop.f32.mrf.mxu2 }
 0x967   : > { %v6764_v8 = vadd.f32 %v6670_v9, %v6246_v43  ;;  %v18104_v43 = vld [vmem:[#allocation110_spill] sm:$0xff] }
 0x968   : > { %v7188_v24 = vpop.f32.mrf.mxu3  ;;  %v7704_v28 = vpop.f32.mrf.mxu0  ;;  %v6247_v9 = vadd.f32 %v18104_v43, %v5845_v22 }
 0x969   : > { %v7282_v55 = vadd.f32 %v7188_v24, %v6764_v8  ;;  %v16690_v30 = vadd.f32 %v7704_v28, %v7281_v25  ;;  %v8177_v42 = vpop.f32.mrf.mxu1 }
 0x96a   : > { %v16693_v39 = vadd.f32 %v8177_v42, %v16444_v48  ;;  %v11414_v48 = vld [vmem:[%s17700_s4 + $0x23b] sm:$0xff] }
 0x96b   : > { %11165 = vmatmul.msk.bf16.gmra.mxu2 %vm761_vm2, %v8925_v1  ;;  %11244 = vmatmul.msk.bf16.gmra.mxu0 %vm761_vm2, %v9443_v49  ;;  %v5846_v37 = vadd.f32 %v11414_v48, %v16627_v29  ;;  %v11415_v48 = vld [vmem:[%s17700_s4 + $0x243] sm:$0xff] }
 0x96c   : > { %18103 = vst [vmem:[#allocation104_spill] sm:$0xff] %v16693_v39  ;;  %11154 = vmatmul.msk.bf16.gmra.mxu1 %vm761_vm2, %v16474_v19  ;;  %v9370_v39 = vld [vmem:[#allocation2 + $0x55] sm:$0xff] }
 0x96d   : > { %11205 = vmatmul.msk.bf16.gmra.mxu3 %vm761_vm2, %v8926_v36  ;;  %v6248_v42 = vadd.f32 %v18105_v40, %v5846_v37 }
 0x96e   : > { %v6673_v25 = vpop.f32.mrf.mxu2 }
 0x96f   : > { %v6765_v8 = vadd.f32 %v6673_v25, %v6247_v9  ;;  %v8855_v9 = vld [vmem:[#allocation2 + $0x6c] sm:$0xff] }
 0x970   : > { %v7191_v24 = vpop.f32.mrf.mxu3  ;;  %v7706_v28 = vpop.f32.mrf.mxu0 }
 0x971   : > { %v7283_v1 = vadd.f32 %v7191_v24, %v6765_v8  ;;  %v16705_v2 = vadd.f32 %v7706_v28, %v7282_v55  ;;  %v8179_v12 = vpop.f32.mrf.mxu1  ;;  %v5847_v55 = vadd.f32 %v11415_v48, %v16627_v29  ;;  %v8854_v28 = vld [vmem:[#allocation2 + $0x64] sm:$0xff]  ;;  %v18108_v48 = vld [vmem:[#allocation113_spill] sm:$0xff] }
 0x972   : > { %v16708_v19 = vadd.f32 %v8179_v12, %v16462_v57  ;;  %v9444_v12 = vpack.c.bf16 %v9371_v31, %v9370_v39  ;;  %v8927_v40 = vpack.c.bf16 %v8855_v9, %v8854_v28  ;;  %v9373_v28 = vld [vmem:[#allocation2 + $0x6d] sm:$0xff] }
 0x976   : > { %v6675_v22 = vpop.f32.mrf.mxu2 }
 0x977   : > { %v6766_v49 = vadd.f32 %v6675_v22, %v6248_v42  ;;  %v18107_v42 = vld [vmem:[#allocation112_spill] sm:$0xff] }
 0x978   : > { %v7193_v43 = vpop.f32.mrf.mxu3  ;;  %v7709_v25 = vpop.f32.mrf.mxu0  ;;  %v6249_v22 = vadd.f32 %v18107_v42, %v5847_v55 }
 0x979   : > { %v7284_v8 = vadd.f32 %v7193_v43, %v6766_v49  ;;  %v16715_v24 = vadd.f32 %v7709_v25, %v7283_v1  ;;  %v8182_v57 = vpop.f32.mrf.mxu1 }
 0x97a   : > { %v16718_v37 = vadd.f32 %v8182_v57, %v16472_v20  ;;  %v11416_v20 = vld [vmem:[%s17700_s4 + $0x24b] sm:$0xff] }
 0x97b   : > { %11166 = vmatmul.msk.bf16.gmra.mxu2 %vm761_vm2, %v8926_v36  ;;  %11245 = vmatmul.msk.bf16.gmra.mxu0 %vm761_vm2, %v9444_v12  ;;  %v5848_v39 = vadd.f32 %v11416_v20, %v16627_v29  ;;  %v11417_v20 = vld [vmem:[%s17700_s4 + $0x253] sm:$0xff] }
 0x97c   : > { %18106 = vst [vmem:[#allocation105_spill] sm:$0xff] %v16718_v37  ;;  %11155 = vmatmul.msk.bf16.gmra.mxu1 %vm761_vm2, %v16502_v47  ;;  %v9372_v37 = vld [vmem:[#allocation2 + $0x65] sm:$0xff] }
 0x97d   : > { %11206 = vmatmul.msk.bf16.gmra.mxu3 %vm761_vm2, %v8927_v40  ;;  %v6250_v57 = vadd.f32 %v18108_v48, %v5848_v39 }
 0x97e   : > { %v6678_v1 = vpop.f32.mrf.mxu2 }
 0x97f   : > { %v6767_v49 = vadd.f32 %v6678_v1, %v6249_v22  ;;  %v8857_v22 = vld [vmem:[#allocation2 + $0x7c] sm:$0xff] }
 0x980   : > { %v7196_v43 = vpop.f32.mrf.mxu3  ;;  %v7711_v25 = vpop.f32.mrf.mxu0 }
 0x981   : > { %v7285_v36 = vadd.f32 %v7196_v43, %v6767_v49  ;;  %v16730_v31 = vadd.f32 %v7711_v25, %v7284_v8  ;;  %v8184_v9 = vpop.f32.mrf.mxu1  ;;  %v5849_v8 = vadd.f32 %v11417_v20, %v16627_v29  ;;  %v8856_v25 = vld [vmem:[#allocation2 + $0x74] sm:$0xff]  ;;  %v18111_v20 = vld [vmem:[#allocation115_spill] sm:$0xff] }
 0x982   : > { %v16733_v47 = vadd.f32 %v8184_v9, %v16490_v44  ;;  %v9445_v9 = vpack.c.bf16 %v9373_v28, %v9372_v37  ;;  %v8928_v48 = vpack.c.bf16 %v8857_v22, %v8856_v25  ;;  %v9375_v25 = vld [vmem:[#allocation2 + $0x7d] sm:$0xff] }
 0x986   : > { %v6680_v55 = vpop.f32.mrf.mxu2 }
 0x987   : > { %v6768_v12 = vadd.f32 %v6680_v55, %v6250_v57  ;;  %v18110_v57 = vld [vmem:[#allocation114_spill] sm:$0xff] }
 0x988   : > { %v7198_v42 = vpop.f32.mrf.mxu3  ;;  %v7714_v1 = vpop.f32.mrf.mxu0  ;;  %v6251_v55 = vadd.f32 %v18110_v57, %v5849_v8 }
 0x989   : > { %v7286_v49 = vadd.f32 %v7198_v42, %v6768_v12  ;;  %v16740_v43 = vadd.f32 %v7714_v1, %v7285_v36  ;;  %v8187_v44 = vpop.f32.mrf.mxu1 }
 0x98a   : > { %v16743_v39 = vadd.f32 %v8187_v44, %v16500_v38  ;;  %v11418_v38 = vld [vmem:[%s17700_s4 + $0x25b] sm:$0xff] }
 0x98b   : > { %11167 = vmatmul.msk.bf16.gmra.mxu2 %vm761_vm2, %v8927_v40  ;;  %11246 = vmatmul.msk.bf16.gmra.mxu0 %vm761_vm2, %v9445_v9  ;;  %v5850_v37 = vadd.f32 %v11418_v38, %v16627_v29  ;;  %v11419_v38 = vld [vmem:[%s17700_s4 + $0x263] sm:$0xff] }
 0x98c   : > { %18109 = vst [vmem:[#allocation106_spill] sm:$0xff] %v16743_v39  ;;  %11156 = vmatmul.msk.bf16.gmra.mxu1 %vm761_vm2, %v16530_v51  ;;  %v9374_v39 = vld [vmem:[#allocation2 + $0x75] sm:$0xff] }
 0x98d   : > { %11207 = vmatmul.msk.bf16.gmra.mxu3 %vm761_vm2, %v8928_v48  ;;  %v6252_v44 = vadd.f32 %v18111_v20, %v5850_v37 }
 0x98e   : > { %v6683_v36 = vpop.f32.mrf.mxu2 }
 0x98f   : > { %v6769_v12 = vadd.f32 %v6683_v36, %v6251_v55  ;;  %v8859_v55 = vld [vmem:[#allocation2 + $0x8c] sm:$0xff] }
 0x990   : > { %v7201_v42 = vpop.f32.mrf.mxu3  ;;  %v7716_v1 = vpop.f32.mrf.mxu0 }
 0x991   : > { %v7287_v40 = vadd.f32 %v7201_v42, %v6769_v12  ;;  %v16755_v28 = vadd.f32 %v7716_v1, %v7286_v49  ;;  %v8189_v22 = vpop.f32.mrf.mxu1  ;;  %v5851_v49 = vadd.f32 %v11419_v38, %v16627_v29  ;;  %v8858_v1 = vld [vmem:[#allocation2 + $0x84] sm:$0xff]  ;;  %v18114_v38 = vld [vmem:[#allocation117_spill] sm:$0xff] }
 0x992   : > { %v16758_v51 = vadd.f32 %v8189_v22, %v16518_v26  ;;  %v9446_v22 = vpack.c.bf16 %v9375_v25, %v9374_v39  ;;  %v8929_v20 = vpack.c.bf16 %v8859_v55, %v8858_v1  ;;  %v9377_v1 = vld [vmem:[#allocation2 + $0x8d] sm:$0xff] }
 0x996   : > { %v6685_v8 = vpop.f32.mrf.mxu2 }
 0x997   : > { %v6770_v9 = vadd.f32 %v6685_v8, %v6252_v44  ;;  %v18113_v44 = vld [vmem:[#allocation116_spill] sm:$0xff] }
 0x998   : > { %v7203_v57 = vpop.f32.mrf.mxu3  ;;  %v7719_v36 = vpop.f32.mrf.mxu0  ;;  %v6253_v8 = vadd.f32 %v18113_v44, %v5851_v49 }
 0x999   : > { %v7288_v12 = vadd.f32 %v7203_v57, %v6770_v9  ;;  %v16765_v42 = vadd.f32 %v7719_v36, %v7287_v40  ;;  %v8192_v26 = vpop.f32.mrf.mxu1 }
 0x99a   : > { %v16768_v37 = vadd.f32 %v8192_v26, %v16528_v33  ;;  %v11420_v33 = vld [vmem:[%s17700_s4 + $0x26b] sm:$0xff] }
 0x99b   : > { %11168 = vmatmul.msk.bf16.gmra.mxu2 %vm761_vm2, %v8928_v48  ;;  %11247 = vmatmul.msk.bf16.gmra.mxu0 %vm761_vm2, %v9446_v22  ;;  %v5852_v39 = vadd.f32 %v11420_v33, %v16627_v29  ;;  %v11421_v33 = vld [vmem:[%s17700_s4 + $0x273] sm:$0x3] }
 0x99c   : > { %18112 = vst [vmem:[#allocation107_spill] sm:$0xff] %v16768_v37  ;;  %11157 = vmatmul.msk.bf16.gmra.mxu1 %vm761_vm2, %v16558_v16  ;;  %v9376_v37 = vld [vmem:[#allocation2 + $0x85] sm:$0xff] }
 0x99d   : > { %11208 = vmatmul.msk.bf16.gmra.mxu3 %vm761_vm2, %v8929_v20  ;;  %v6254_v26 = vadd.f32 %v18114_v38, %v5852_v39 }
 0x99e   : > { %v6688_v40 = vpop.f32.mrf.mxu2 }
 0x99f   : > { %v6771_v9 = vadd.f32 %v6688_v40, %v6253_v8  ;;  %v8861_v8 = vld [vmem:[#allocation2 + $0x9c] sm:$0xff] }
 0x9a0   : > { %v7206_v57 = vpop.f32.mrf.mxu3  ;;  %v7721_v36 = vpop.f32.mrf.mxu0 }
 0x9a1   : > { %v7289_v48 = vadd.f32 %v7206_v57, %v6771_v9  ;;  %v16780_v25 = vadd.f32 %v7721_v36, %v7288_v12  ;;  %v8194_v55 = vpop.f32.mrf.mxu1  ;;  %v5853_v12 = vadd.f32 %v11421_v33, %v16627_v29  ;;  %v8860_v36 = vld [vmem:[#allocation2 + $0x94] sm:$0xff]  ;;  %v18116_v29 = vld [vmem:[#allocation118_spill] sm:$0xff] }
 0x9a2   : > { %v16783_v16 = vadd.f32 %v8194_v55, %v16546_v58  ;;  %v9447_v55 = vpack.c.bf16 %v9377_v1, %v9376_v37  ;;  %v8930_v38 = vpack.c.bf16 %v8861_v8, %v8860_v36 }
 0x9a6   : > { %v6690_v49 = vpop.f32.mrf.mxu2 }
 0x9a7   : > { %v6772_v22 = vadd.f32 %v6690_v49, %v6254_v26  ;;  %v6255_v26 = vadd.f32 %v18116_v29, %v5853_v12  ;;  %v7884_v29 = vld [vmem:[#allocation2 + $0x262] sm:$0xff] }
 0x9a8   : > { %v7208_v44 = vpop.f32.mrf.mxu3  ;;  %v7724_v40 = vpop.f32.mrf.mxu0 }
 0x9a9   : > { %v7290_v9 = vadd.f32 %v7208_v44, %v6772_v22  ;;  %v16790_v57 = vadd.f32 %v7724_v40, %v7289_v48  ;;  %v8197_v58 = vpop.f32.mrf.mxu1  ;;  %v9379_v40 = vld [vmem:[#allocation2 + $0x9d] sm:$0xff] }
 0x9aa   : > { %v16793_v39 = vadd.f32 %v8197_v58, %v16556_v11  ;;  %v7885_v58 = vld [vmem:[#allocation2 + $0x26a] sm:$0xff] }
 0x9ab   : > { %11169 = vmatmul.msk.bf16.gmra.mxu2 %vm761_vm2, %v8929_v20  ;;  %11248 = vmatmul.msk.bf16.gmra.mxu0 %vm761_vm2, %v9447_v55  ;;  %v9378_v55 = vld [vmem:[#allocation2 + $0x95] sm:$0xff] }
 0x9ac   : > { %18115 = vst [vmem:[#allocation108_spill] sm:$0xff] %v16793_v39  ;;  %11158 = vmatmul.msk.bf16.gmra.mxu1 %vm761_vm2, %v16586_v46  ;;  %v8863_v46 = vld [vmem:[#allocation2 + $0xac] sm:$0xff] }
 0x9ad   : > { %11209 = vmatmul.msk.bf16.gmra.mxu3 %vm761_vm2, %v8930_v38 }
 0x9ae   : > { %v6693_v48 = vpop.f32.mrf.mxu2 }
 0x9af   : > { %v6773_v49 = vadd.f32 %v6693_v48, %v6255_v26  ;;  %v8862_v26 = vld [vmem:[#allocation2 + $0xa4] sm:$0xff]  ;;  %v9448_v48 = vpack.c.bf16 %v9379_v40, %v9378_v55  ;;  %v8865_v55 = vld [vmem:[#allocation2 + $0xbc] sm:$0xff] }
 0x9b0   : > { %v7211_v22 = vpop.f32.mrf.mxu3  ;;  %v7726_v44 = vpop.f32.mrf.mxu0 }
 0x9b1   : > { %v7291_v37 = vadd.f32 %v7211_v22, %v6773_v49  ;;  %v16801_v1 = vadd.f32 %v7726_v44, %v7290_v9  ;;  %v8199_v11 = vpop.f32.mrf.mxu1  ;;  %v7924_v49 = vpack.c.bf16 %v7885_v58, %v7884_v29  ;;  %v8931_v22 = vpack.c.bf16 %v8863_v46, %v8862_v26  ;;  %v9381_v58 = vld [vmem:[#allocation2 + $0xad] sm:$0xff]  ;;  %v9380_v29 = vld [vmem:[#allocation2 + $0xa5] sm:$0xff] }
 0x9b2   : > { %v16804_v8 = vadd.f32 %v8199_v11, %v16574_v18 }
 0x9b6   : > { %v6695_v20 = vpop.f32.mrf.mxu2 }
 0x9b8   : > { %v7213_v33 = vpop.f32.mrf.mxu3  ;;  %v7729_v36 = vpop.f32.mrf.mxu0 }
 0x9b9   : > { %v16806_v39 = vadd.f32 %v7729_v36, %v7291_v37  ;;  %v8202_v12 = vpop.f32.mrf.mxu1  ;;  %v7886_v36 = vld [vmem:[#allocation2 + $0x272] sm:$0x3] }
 0x9ba   : > { %v16809_v9 = vadd.f32 %v8202_v12, %v16584_v13 }
 0x9bb   : > { %11170 = vmatmul.msk.bf16.gmra.mxu2 %vm761_vm2, %v8930_v38  ;;  %11249 = vmatmul.msk.bf16.gmra.mxu0 %vm761_vm2, %v9448_v48 }
 0x9bc   : > { %11159 = vmatmul.msk.bf16.gmra.mxu1 %vm761_vm2, %v7924_v49 }
 0x9bd   : > { %11210 = vmatmul.msk.bf16.gmra.mxu3 %vm761_vm2, %v8931_v22 }
 0x9be   : > { %v8575_v18 = vpop.f32.mrf.mxu2 }
 0x9bf   : > { %v8769_v44 = vadd.f32 %v8575_v18, %v16026_v45  ;;  %v8864_v45 = vld [vmem:[#allocation2 + $0xb4] sm:$0xff]  ;;  %v9449_v18 = vpack.c.bf16 %v9381_v58, %v9380_v29 }
 0x9c0   : > { %v9093_v37 = vpop.f32.mrf.mxu3  ;;  %v7731_v11 = vpop.f32.mrf.mxu0  ;;  %v9883_v29 = vld [vmem:[#allocation2 + $0x2e] sm:$0xff] }
 0x9c1   : > { %v9287_v20 = vadd.f32 %v9093_v37, %v8769_v44  ;;  %v8204_v40 = vpop.f32.mrf.mxu1  ;;  %v8932_v37 = vpack.c.bf16 %v8865_v55, %v8864_v45  ;;  %v9382_v45 = vld [vmem:[#allocation2 + $0xb5] sm:$0xff] }
 0x9c2   : > { %v16817_v13 = vadd.f32 %v8204_v40, %v16602_v15  ;;  %v7925_v15 = vpack.c.bf16 %v7886_v36, %v7886_v36 }
 0x9c6   : > { %v8577_v33 = vpop.f32.mrf.mxu2 }
 0x9c7   : > { %v8770_v38 = vadd.f32 %v8577_v33, %v16042_v21 }
 0x9c8   : > { %v9095_v46 = vpop.f32.mrf.mxu3  ;;  %v9611_v12 = vpop.f32.mrf.mxu0 }
 0x9c9   : > { %v9288_v26 = vadd.f32 %v9095_v46, %v8770_v38  ;;  %v8207_v48 = vpop.f32.mrf.mxu1  ;;  %v16820_v49 = vadd.f32 %v9611_v12, %v9287_v20  ;;  %v8867_v12 = vld [vmem:[#allocation2 + $0xcc] sm:$0xff] }
 0x9ca   : > { %v16823_v44 = vadd.f32 %v8207_v48, %v16612_v59 }
 0x9cb   : > { %11171 = vmatmul.msk.bf16.gmra.mxu2 %vm761_vm2, %v8931_v22  ;;  %11250 = vmatmul.msk.bf16.gmra.mxu0 %vm761_vm2, %v9449_v18  ;;  %v9383_v22 = vld [vmem:[#allocation2 + $0xbd] sm:$0xff] }
 0x9cc   : > { %11160 = vmatmul.msk.bf16.gmra.mxu1 %vm761_vm2, %v7925_v15 }
 0x9cd   : > { %11211 = vmatmul.msk.bf16.gmra.mxu3 %vm761_vm2, %v8932_v37 }
 0x9ce   : > { %v8580_v21 = vpop.f32.mrf.mxu2 }
 0x9cf   : > { %v8771_v11 = vadd.f32 %v8580_v21, %v16054_v10  ;;  %v8866_v21 = vld [vmem:[#allocation2 + $0xc4] sm:$0xff] }
 0x9d0   : > { %v9098_v20 = vpop.f32.mrf.mxu3  ;;  %v9613_v40 = vpop.f32.mrf.mxu0 }
 0x9d1   : > { %v9289_v33 = vadd.f32 %v9098_v20, %v8771_v11  ;;  %v8209_v58 = vpop.f32.mrf.mxu1  ;;  %v16830_v38 = vadd.f32 %v9613_v40, %v9288_v26  ;;  %v9450_v11 = vpack.c.bf16 %v9383_v22, %v9382_v45  ;;  %v9882_v26 = vld [vmem:[#allocation2 + $0x26] sm:$0xff]  ;;  %v8869_v45 = vld [vmem:[#allocation2 + $0xdc] sm:$0xff] }
 0x9d2   : > { %v16833_v59 = vadd.f32 %v8209_v58, %v16630_v4  ;;  %v8933_v4 = vpack.c.bf16 %v8867_v12, %v8866_v21  ;;  %v9959_v40 = vpack.c.bf16 %v9883_v29, %v9882_v26 }
 0x9d6   : > { %v8582_v46 = vpop.f32.mrf.mxu2 }
 0x9d7   : > { %v8772_v36 = vadd.f32 %v8582_v46, %v16070_v32 }
 0x9d8   : > { %v9100_v55 = vpop.f32.mrf.mxu3  ;;  %v9616_v48 = vpop.f32.mrf.mxu0 }
 0x9d9   : > { %v9290_v18 = vadd.f32 %v9100_v55, %v8772_v36  ;;  %v8212_v10 = vpop.f32.mrf.mxu1  ;;  %v16836_v15 = vadd.f32 %v9616_v48, %v9289_v33 }
 0x9da   : > { %v16839_v20 = vadd.f32 %v8212_v10, %v16640_v23  ;;  %v9885_v10 = vld [vmem:[#allocation2 + $0x3e] sm:$0xff] }
 0x9db   : > { %11172 = vmatmul.msk.bf16.gmra.mxu2 %vm761_vm2, %v8932_v37  ;;  %11251 = vmatmul.msk.bf16.gmra.mxu0 %vm761_vm2, %v9450_v11  ;;  %v9385_v37 = vld [vmem:[#allocation2 + $0xcd] sm:$0xff]  ;;  %v9384_v11 = vld [vmem:[#allocation2 + $0xc5] sm:$0xff] }
 0x9dc   : > { %11282 = vmatmul.msk.bf16.vlgmr.msra.gmra.mxu1 %vm761_vm2, %v9959_v40 }
 0x9dd   : > { %11212 = vmatmul.msk.bf16.gmra.mxu3 %vm761_vm2, %v8933_v4 }
 0x9de   : > { %v8585_v32 = vpop.f32.mrf.mxu2 }
 0x9df   : > { %v8773_v33 = vadd.f32 %v8585_v32, %v16082_v27  ;;  %v8868_v32 = vld [vmem:[#allocation2 + $0xd4] sm:$0xff] }
 0x9e0   : > { %v9103_v58 = vpop.f32.mrf.mxu3  ;;  %v9618_v46 = vpop.f32.mrf.mxu0 }
 0x9e1   : > { %v9291_v22 = vadd.f32 %v9103_v58, %v8773_v33  ;;  %v8214_v36 = vpop.f32.mrf.mxu1  ;;  %v16846_v55 = vadd.f32 %v9618_v46, %v9290_v18  ;;  %v9451_v33 = vpack.c.bf16 %v9385_v37, %v9384_v11  ;;  %v9884_v18 = vld [vmem:[#allocation2 + $0x36] sm:$0xff]  ;;  %v8871_v11 = vld [vmem:[#allocation2 + $0xec] sm:$0xff] }
 0x9e2   : > { %v16849_v23 = vadd.f32 %v8214_v36, %v16655_v53  ;;  %v8934_v53 = vpack.c.bf16 %v8869_v45, %v8868_v32  ;;  %v9960_v46 = vpack.c.bf16 %v9885_v10, %v9884_v18 }
 0x9e6   : > { %v8587_v12 = vpop.f32.mrf.mxu2 }
 0x9e7   : > { %v8774_v29 = vadd.f32 %v8587_v12, %v16098_v50 }
 0x9e8   : > { %v9105_v48 = vpop.f32.mrf.mxu3  ;;  %v9621_v21 = vpop.f32.mrf.mxu0 }
 0x9e9   : > { %v9292_v26 = vadd.f32 %v9105_v48, %v8774_v29  ;;  %v8217_v27 = vpop.f32.mrf.mxu1  ;;  %v16852_v40 = vadd.f32 %v9621_v21, %v9291_v22 }
 0x9ea   : > { %v16855_v58 = vadd.f32 %v8217_v27, %v16665_v41  ;;  %v9887_v27 = vld [vmem:[#allocation2 + $0x4e] sm:$0xff] }
 0x9eb   : > { %11173 = vmatmul.msk.bf16.gmra.mxu2 %vm761_vm2, %v8933_v4  ;;  %11252 = vmatmul.msk.bf16.gmra.mxu0 %vm761_vm2, %v9451_v33  ;;  %v9387_v4 = vld [vmem:[#allocation2 + $0xdd] sm:$0xff]  ;;  %v9386_v33 = vld [vmem:[#allocation2 + $0xd5] sm:$0xff] }
 0x9ec   : > { %11283 = vmatmul.msk.bf16.gmra.mxu1 %vm761_vm2, %v9960_v46 }
 0x9ed   : > { %11213 = vmatmul.msk.bf16.gmra.mxu3 %vm761_vm2, %v8934_v53 }
 0x9ee   : > { %v8590_v50 = vpop.f32.mrf.mxu2 }
 0x9ef   : > { %v8775_v22 = vadd.f32 %v8590_v50, %v16110_v60  ;;  %v8870_v50 = vld [vmem:[#allocation2 + $0xe4] sm:$0xff] }
 0x9f0   : > { %v9108_v36 = vpop.f32.mrf.mxu3  ;;  %v9623_v12 = vpop.f32.mrf.mxu0 }
 0x9f1   : > { %v9293_v37 = vadd.f32 %v9108_v36, %v8775_v22  ;;  %v8219_v29 = vpop.f32.mrf.mxu1  ;;  %v16862_v48 = vadd.f32 %v9623_v12, %v9292_v26  ;;  %v9452_v22 = vpack.c.bf16 %v9387_v4, %v9386_v33  ;;  %v9886_v26 = vld [vmem:[#allocation2 + $0x46] sm:$0xff]  ;;  %v8873_v33 = vld [vmem:[#allocation2 + $0xfc] sm:$0xff] }
 0x9f2   : > { %v16865_v41 = vadd.f32 %v8219_v29, %v16680_v61  ;;  %v8935_v61 = vpack.c.bf16 %v8871_v11, %v8870_v50  ;;  %v9961_v12 = vpack.c.bf16 %v9887_v27, %v9886_v26 }
 0x9f6   : > { %v8592_v45 = vpop.f32.mrf.mxu2 }
 0x9f7   : > { %v8776_v10 = vadd.f32 %v8592_v45, %v16126_v7 }
 0x9f8   : > { %v9110_v21 = vpop.f32.mrf.mxu3  ;;  %v9626_v32 = vpop.f32.mrf.mxu0 }
 0x9f9   : > { %v9294_v18 = vadd.f32 %v9110_v21, %v8776_v10  ;;  %v8222_v60 = vpop.f32.mrf.mxu1  ;;  %v16868_v46 = vadd.f32 %v9626_v32, %v9293_v37 }
 0x9fa   : > { %v16871_v36 = vadd.f32 %v8222_v60, %v16690_v30  ;;  %v9889_v60 = vld [vmem:[#allocation2 + $0x5e] sm:$0xff] }
 0x9fb   : > { %11174 = vmatmul.msk.bf16.gmra.mxu2 %vm761_vm2, %v8934_v53  ;;  %11253 = vmatmul.msk.bf16.gmra.mxu0 %vm761_vm2, %v9452_v22  ;;  %v9389_v53 = vld [vmem:[#allocation2 + $0xed] sm:$0xff]  ;;  %v9388_v22 = vld [vmem:[#allocation2 + $0xe5] sm:$0xff] }
 0x9fc   : > { %11284 = vmatmul.msk.bf16.gmra.mxu1 %vm761_vm2, %v9961_v12 }
 0x9fd   : > { %11214 = vmatmul.msk.bf16.gmra.mxu3 %vm761_vm2, %v8935_v61 }
 0x9fe   : > { %v8595_v7 = vpop.f32.mrf.mxu2 }
 0x9ff   : > { %v8777_v37 = vadd.f32 %v8595_v7, %v16138_v0  ;;  %v8872_v7 = vld [vmem:[#allocation2 + $0xf4] sm:$0xff] }
 0xa00   : > { %v9113_v29 = vpop.f32.mrf.mxu3  ;;  %v9628_v45 = vpop.f32.mrf.mxu0 }
 0xa01   : > { %v9295_v4 = vadd.f32 %v9113_v29, %v8777_v37  ;;  %v8224_v10 = vpop.f32.mrf.mxu1  ;;  %v16878_v21 = vadd.f32 %v9628_v45, %v9294_v18  ;;  %v9453_v37 = vpack.c.bf16 %v9389_v53, %v9388_v22  ;;  %v9888_v18 = vld [vmem:[#allocation2 + $0x56] sm:$0xff]  ;;  %v8875_v22 = vld [vmem:[#allocation2 + $0x10c] sm:$0xff] }
 0xa02   : > { %v16881_v30 = vadd.f32 %v8224_v10, %v16705_v2  ;;  %v8936_v2 = vpack.c.bf16 %v8873_v33, %v8872_v7  ;;  %v9962_v45 = vpack.c.bf16 %v9889_v60, %v9888_v18 }
 0xa06   : > { %v8597_v11 = vpop.f32.mrf.mxu2 }
 0xa07   : > { %v8778_v27 = vadd.f32 %v8597_v11, %v16154_v17 }
 0xa08   : > { %v9115_v32 = vpop.f32.mrf.mxu3  ;;  %v9631_v50 = vpop.f32.mrf.mxu0 }
 0xa09   : > { %v9296_v26 = vadd.f32 %v9115_v32, %v8778_v27  ;;  %v8227_v0 = vpop.f32.mrf.mxu1  ;;  %v16884_v12 = vadd.f32 %v9631_v50, %v9295_v4 }
 0xa0a   : > { %v16887_v29 = vadd.f32 %v8227_v0, %v16715_v24  ;;  %v9891_v0 = vld [vmem:[#allocation2 + $0x6e] sm:$0xff] }
 0xa0b   : > { %11175 = vmatmul.msk.bf16.gmra.mxu2 %vm761_vm2, %v8935_v61  ;;  %11254 = vmatmul.msk.bf16.gmra.mxu0 %vm761_vm2, %v9453_v37  ;;  %v9391_v61 = vld [vmem:[#allocation2 + $0xfd] sm:$0xff]  ;;  %v9390_v37 = vld [vmem:[#allocation2 + $0xf5] sm:$0xff] }
 0xa0c   : > { %11285 = vmatmul.msk.bf16.gmra.mxu1 %vm761_vm2, %v9962_v45 }
 0xa0d   : > { %11215 = vmatmul.msk.bf16.gmra.mxu3 %vm761_vm2, %v8936_v2 }
 0xa0e   : > { %v8600_v17 = vpop.f32.mrf.mxu2 }
 0xa0f   : > { %v8779_v4 = vadd.f32 %v8600_v17, %v16166_v35  ;;  %v8874_v17 = vld [vmem:[#allocation2 + $0x104] sm:$0xff] }
 0xa10   : > { %v9118_v10 = vpop.f32.mrf.mxu3  ;;  %v9633_v11 = vpop.f32.mrf.mxu0 }
 0xa11   : > { %v9297_v53 = vadd.f32 %v9118_v10, %v8779_v4  ;;  %v8229_v27 = vpop.f32.mrf.mxu1  ;;  %v16894_v32 = vadd.f32 %v9633_v11, %v9296_v26  ;;  %v9454_v4 = vpack.c.bf16 %v9391_v61, %v9390_v37  ;;  %v9890_v26 = vld [vmem:[#allocation2 + $0x66] sm:$0xff]  ;;  %v8877_v37 = vld [vmem:[#allocation2 + $0x11c] sm:$0xff] }
 0xa12   : > { %v16897_v24 = vadd.f32 %v8229_v27, %v16730_v31  ;;  %v8937_v31 = vpack.c.bf16 %v8875_v22, %v8874_v17  ;;  %v9963_v11 = vpack.c.bf16 %v9891_v0, %v9890_v26 }
 0xa16   : > { %v8602_v33 = vpop.f32.mrf.mxu2 }
 0xa17   : > { %v8780_v60 = vadd.f32 %v8602_v33, %v16185_v54 }
 0xa18   : > { %v9120_v50 = vpop.f32.mrf.mxu3  ;;  %v9636_v7 = vpop.f32.mrf.mxu0 }
 0xa19   : > { %v9298_v18 = vadd.f32 %v9120_v50, %v8780_v60  ;;  %v8232_v35 = vpop.f32.mrf.mxu1  ;;  %v16900_v45 = vadd.f32 %v9636_v7, %v9297_v53 }
 0xa1a   : > { %v16903_v10 = vadd.f32 %v8232_v35, %v16740_v43  ;;  %v9893_v35 = vld [vmem:[#allocation2 + $0x7e] sm:$0xff] }
 0xa1b   : > { %11176 = vmatmul.msk.bf16.gmra.mxu2 %vm761_vm2, %v8936_v2  ;;  %11255 = vmatmul.msk.bf16.gmra.mxu0 %vm761_vm2, %v9454_v4  ;;  %v9393_v2 = vld [vmem:[#allocation2 + $0x10d] sm:$0xff]  ;;  %v9392_v4 = vld [vmem:[#allocation2 + $0x105] sm:$0xff] }
 0xa1c   : > { %18117 = vst [vmem:[#allocation109_spill] sm:$0xff] %v16903_v10  ;;  %11286 = vmatmul.msk.bf16.gmra.mxu1 %vm761_vm2, %v9963_v11  ;;  %v9898_v10 = vld [vmem:[#allocation2 + $0xa6] sm:$0xff] }
 0xa1d   : > { %11216 = vmatmul.msk.bf16.gmra.mxu3 %vm761_vm2, %v8937_v31 }
 0xa1e   : > { %v8605_v54 = vpop.f32.mrf.mxu2 }
 0xa1f   : > { %v8781_v53 = vadd.f32 %v8605_v54, %v16197_v3  ;;  %v8876_v54 = vld [vmem:[#allocation2 + $0x114] sm:$0xff] }
 0xa20   : > { %v9123_v27 = vpop.f32.mrf.mxu3  ;;  %v9638_v33 = vpop.f32.mrf.mxu0 }
 0xa21   : > { %v9299_v61 = vadd.f32 %v9123_v27, %v8781_v53  ;;  %v8234_v60 = vpop.f32.mrf.mxu1  ;;  %v16910_v50 = vadd.f32 %v9638_v33, %v9298_v18  ;;  %v9455_v53 = vpack.c.bf16 %v9393_v2, %v9392_v4  ;;  %v9892_v18 = vld [vmem:[#allocation2 + $0x76] sm:$0xff] }
 0xa22   : > { %v16913_v43 = vadd.f32 %v8234_v60, %v16755_v28  ;;  %v8938_v28 = vpack.c.bf16 %v8877_v37, %v8876_v54  ;;  %v9964_v33 = vpack.c.bf16 %v9893_v35, %v9892_v18  ;;  %v18120_v60 = vld [vmem:[#allocation119_spill] sm:$0xff]  ;;  %v18122_v35 = vld [vmem:[#allocation88_spill] sm:$0xff] }
 0xa23   : > { %v8879_v54 = vld [vmem:[#allocation2 + $0x12c] sm:$0xff] }
 0xa24   : > { %18118 = vst [vmem:[#allocation110_spill] sm:$0xff] %v16913_v43 }
 0xa26   : > { %v8607_v22 = vpop.f32.mrf.mxu2 }
 0xa27   : > { %v8782_v0 = vadd.f32 %v8607_v22, %v16213_v62 }
 0xa28   : > { %v9125_v7 = vpop.f32.mrf.mxu3  ;;  %v9641_v17 = vpop.f32.mrf.mxu0 }
 0xa29   : > { %v9300_v26 = vadd.f32 %v9125_v7, %v8782_v0  ;;  %v8237_v3 = vpop.f32.mrf.mxu1  ;;  %v16916_v11 = vadd.f32 %v9641_v17, %v9299_v61 }
 0xa2a   : > { %v16919_v27 = vadd.f32 %v8237_v3, %v16765_v42 }
 0xa2b   : > { %11177 = vmatmul.msk.bf16.gmra.mxu2 %vm761_vm2, %v8937_v31  ;;  %11256 = vmatmul.msk.bf16.gmra.mxu0 %vm761_vm2, %v9455_v53  ;;  %v9395_v31 = vld [vmem:[#allocation2 + $0x11d] sm:$0xff]  ;;  %v9895_v53 = vld [vmem:[#allocation2 + $0x8e] sm:$0xff] }
 0xa2c   : > { %18119 = vst [vmem:[#allocation111_spill] sm:$0xff] %v16919_v27  ;;  %11287 = vmatmul.msk.bf16.gmra.mxu1 %vm761_vm2, %v9964_v33  ;;  %v9394_v33 = vld [vmem:[#allocation2 + $0x115] sm:$0xff] }
 0xa2d   : > { %11217 = vmatmul.msk.bf16.gmra.mxu3 %vm761_vm2, %v8938_v28 }
 0xa2e   : > { %v8610_v62 = vpop.f32.mrf.mxu2 }
 0xa2f   : > { %v8783_v61 = vadd.f32 %v8610_v62, %v18120_v60 }
 0xa30   : > { %v9128_v22 = vpop.f32.mrf.mxu3  ;;  %v9643_v0 = vpop.f32.mrf.mxu0 }
 0xa31   : > { %v9301_v2 = vadd.f32 %v9128_v22, %v8783_v61  ;;  %v8239_v7 = vpop.f32.mrf.mxu1  ;;  %v16926_v17 = vadd.f32 %v9643_v0, %v9300_v26  ;;  %v8878_v61 = vld [vmem:[#allocation2 + $0x124] sm:$0xff]  ;;  %v9456_v22 = vpack.c.bf16 %v9395_v31, %v9394_v33 }
 0xa32   : > { %v16929_v42 = vadd.f32 %v8239_v7, %v16780_v25  ;;  %v9894_v26 = vld [vmem:[#allocation2 + $0x86] sm:$0xff]  ;;  %v8939_v25 = vpack.c.bf16 %v8879_v54, %v8878_v61 }
 0xa33   : > { %v9965_v7 = vpack.c.bf16 %v9895_v53, %v9894_v26  ;;  %v18126_v53 = vld [vmem:[#allocation13_spill] sm:$0xff] }
 0xa34   : > { %18121 = vst [vmem:[#allocation112_spill] sm:$0xff] %v16929_v42  ;;  %v9897_v26 = vld [vmem:[#allocation2 + $0x9e] sm:$0xff] }
 0xa36   : > { %v8612_v37 = vpop.f32.mrf.mxu2 }
 0xa37   : > { %v8784_v4 = vadd.f32 %v8612_v37, %v18122_v35  ;;  %v18124_v35 = vld [vmem:[#allocation89_spill] sm:$0xff] }
 0xa38   : > { %v9130_v3 = vpop.f32.mrf.mxu3  ;;  %v9646_v18 = vpop.f32.mrf.mxu0 }
 0xa39   : > { %v9302_v27 = vadd.f32 %v9130_v3, %v8784_v4  ;;  %v8242_v62 = vpop.f32.mrf.mxu1  ;;  %v16932_v60 = vadd.f32 %v9646_v18, %v9301_v2 }
 0xa3a   : > { %v16935_v0 = vadd.f32 %v8242_v62, %v16790_v57 }
 0xa3b   : > { %11178 = vmatmul.msk.bf16.gmra.mxu2 %vm761_vm2, %v8938_v28  ;;  %11257 = vmatmul.msk.bf16.gmra.mxu0 %vm761_vm2, %v9456_v22  ;;  %v9397_v28 = vld [vmem:[#allocation2 + $0x12d] sm:$0xff]  ;;  %v8881_v22 = vld [vmem:[#allocation2 + $0x13c] sm:$0xff] }
 0xa3c   : > { %18123 = vst [vmem:[#allocation113_spill] sm:$0xff] %v16935_v0  ;;  %11288 = vmatmul.msk.bf16.gmra.mxu1 %vm761_vm2, %v9965_v7  ;;  %v9396_v0 = vld [vmem:[#allocation2 + $0x125] sm:$0xff] }
 0xa3d   : > { %11218 = vmatmul.msk.bf16.gmra.mxu3 %vm761_vm2, %v8939_v25 }
 0xa3e   : > { %v8615_v37 = vpop.f32.mrf.mxu2 }
 0xa3f   : > { %v8785_v2 = vadd.f32 %v8615_v37, %v18124_v35 }
 0xa40   : > { %v9133_v4 = vpop.f32.mrf.mxu3  ;;  %v9648_v3 = vpop.f32.mrf.mxu0 }
 0xa41   : > { %v9303_v31 = vadd.f32 %v9133_v4, %v8785_v2  ;;  %v8244_v18 = vpop.f32.mrf.mxu1  ;;  %v16942_v33 = vadd.f32 %v9648_v3, %v9302_v27  ;;  %v8880_v2 = vld [vmem:[#allocation2 + $0x134] sm:$0xff]  ;;  %v9457_v4 = vpack.c.bf16 %v9397_v28, %v9396_v0 }
 0xa42   : > { %v16945_v57 = vadd.f32 %v8244_v18, %v16801_v1  ;;  %v9896_v27 = vld [vmem:[#allocation2 + $0x96] sm:$0xff]  ;;  %v8940_v1 = vpack.c.bf16 %v8881_v22, %v8880_v2  ;;  %v8883_v2 = vld [vmem:[#allocation2 + $0x14c] sm:$0xff] }
 0xa43   : > { %v9966_v18 = vpack.c.bf16 %v9897_v26, %v9896_v27  ;;  %v9399_v22 = vld [vmem:[#allocation2 + $0x13d] sm:$0xff]  ;;  %v18129_v26 = vld [vmem:[#allocation15_spill] sm:$0xff] }
 0xa44   : > { %18125 = vst [vmem:[#allocation114_spill] sm:$0xff] %v16945_v57 }
 0xa46   : > { %v8617_v54 = vpop.f32.mrf.mxu2 }
 0xa47   : > { %v8786_v62 = vadd.f32 %v8617_v54, %v18126_v53  ;;  %v18128_v53 = vld [vmem:[#allocation90_spill] sm:$0xff] }
 0xa48   : > { %v9135_v61 = vpop.f32.mrf.mxu3  ;;  %v9651_v7 = vpop.f32.mrf.mxu0 }
 0xa49   : > { %v9304_v42 = vadd.f32 %v9135_v61, %v8786_v62  ;;  %v8247_v37 = vpop.f32.mrf.mxu1  ;;  %v16948_v35 = vadd.f32 %v9651_v7, %v9303_v31 }
 0xa4a   : > { %v16951_v3 = vadd.f32 %v8247_v37, %v16806_v39 }
 0xa4b   : > { %11179 = vmatmul.msk.bf16.gmra.mxu2 %vm761_vm2, %v8939_v25  ;;  %11258 = vmatmul.msk.bf16.gmra.mxu0 %vm761_vm2, %v9457_v4  ;;  %v9899_v4 = vld [vmem:[#allocation2 + $0xae] sm:$0xff] }
 0xa4c   : > { %18127 = vst [vmem:[#allocation115_spill] sm:$0xff] %v16951_v3  ;;  %11289 = vmatmul.msk.bf16.gmra.mxu1 %vm761_vm2, %v9966_v18  ;;  %v9398_v3 = vld [vmem:[#allocation2 + $0x135] sm:$0xff] }
 0xa4d   : > { %11219 = vmatmul.msk.bf16.gmra.mxu3 %vm761_vm2, %v8940_v1 }
 0xa4e   : > { %v8620_v54 = vpop.f32.mrf.mxu2 }
 0xa4f   : > { %v8787_v31 = vadd.f32 %v8620_v54, %v18128_v53  ;;  %v8882_v54 = vld [vmem:[#allocation2 + $0x144] sm:$0xff]  ;;  %v9458_v53 = vpack.c.bf16 %v9399_v22, %v9398_v3 }
 0xa50   : > { %v9138_v62 = vpop.f32.mrf.mxu3  ;;  %v9653_v61 = vpop.f32.mrf.mxu0 }
 0xa51   : > { %v9305_v0 = vadd.f32 %v9138_v62, %v8787_v31  ;;  %v8249_v28 = vpop.f32.mrf.mxu1  ;;  %v16958_v7 = vadd.f32 %v9653_v61, %v9304_v42  ;;  %v8941_v42 = vpack.c.bf16 %v8883_v2, %v8882_v54  ;;  %v9967_v62 = vpack.c.bf16 %v9899_v4, %v9898_v10  ;;  %v18130_v61 = vld [vmem:[#allocation48_spill] sm:$0xff] }
 0xa52   : > { %v9401_v4 = vld [vmem:[#allocation2 + $0x14d] sm:$0xff] }
 0xa56   : > { %v8622_v39 = vpop.f32.mrf.mxu2 }
 0xa57   : > { %v8788_v37 = vadd.f32 %v8622_v39, %v18129_v26 }
 0xa58   : > { %v9140_v25 = vpop.f32.mrf.mxu3  ;;  %v9656_v27 = vpop.f32.mrf.mxu0 }
 0xa59   : > { %v9306_v57 = vadd.f32 %v9140_v25, %v8788_v37  ;;  %v16961_v18 = vadd.f32 %v9656_v27, %v9305_v0  ;;  %v10129_v43 = vpop.f32.mrf.mxu1  ;;  %v18131_v0 = vld [vmem:[#allocation91_spill] sm:$0xff]  ;;  %v18132_v37 = vld [vmem:[#allocation49_spill] sm:$0xff] }
 0xa5a   : > { %v10323_v31 = vadd.f32 %v10129_v43, %v16820_v49  ;;  %v18133_v27 = vld [vmem:[#allocation17_spill] sm:$0xff] }
 0xa5b   : > { %11180 = vmatmul.msk.bf16.gmra.mxu2 %vm761_vm2, %v8940_v1  ;;  %11259 = vmatmul.msk.bf16.gmra.mxu0 %vm761_vm2, %v9458_v53 }
 0xa5c   : > { %v10400_v28 = vmul.f32 %v10323_v31, %v18130_v61  ;;  %11290 = vmatmul.msk.bf16.gmra.mxu1 %vm761_vm2, %v9967_v62  ;;  %v8885_v31 = vld [vmem:[#allocation2 + $0x15c] sm:$0xff] }
 0xa5d   : > { %11220 = vmatmul.msk.bf16.gmra.mxu3 %vm761_vm2, %v8941_v42  ;;  %v9901_v62 = vld [vmem:[#allocation2 + $0xbe] sm:$0xff] }
 0xa5e   : > { %10477 = vst.msk [vmem:[%s17700_s4 + $0x13] sm:$0xff] %vm761_vm2, %v10400_v28  ;;  %v8625_v3 = vpop.f32.mrf.mxu2 }
 0xa5f   : > { %v8789_v49 = vadd.f32 %v8625_v3, %v18131_v0  ;;  %v8884_v0 = vld [vmem:[#allocation2 + $0x154] sm:$0xff] }
 0xa60   : > { %v9143_v43 = vpop.f32.mrf.mxu3  ;;  %v9658_v10 = vpop.f32.mrf.mxu0 }
 0xa61   : > { %v9307_v39 = vadd.f32 %v9143_v43, %v8789_v49  ;;  %v16974_v1 = vadd.f32 %v9658_v10, %v9306_v57  ;;  %v10131_v22 = vpop.f32.mrf.mxu1  ;;  %v9400_v57 = vld [vmem:[#allocation2 + $0x145] sm:$0xff]  ;;  %v9900_v43 = vld [vmem:[#allocation2 + $0xb6] sm:$0xff] }
 0xa62   : > { %v10324_v26 = vadd.f32 %v10131_v22, %v16830_v38  ;;  %v9459_v49 = vpack.c.bf16 %v9401_v4, %v9400_v57  ;;  %v8942_v22 = vpack.c.bf16 %v8885_v31, %v8884_v0  ;;  %v18137_v0 = vld [vmem:[#allocation18_spill] sm:$0xff] }
 0xa64   : > { %v10401_v25 = vmul.f32 %v10324_v26, %v18132_v37  ;;  %v9968_v26 = vpack.c.bf16 %v9901_v62, %v9900_v43  ;;  %v18134_v37 = vld [vmem:[#allocation50_spill] sm:$0xff]  ;;  %v18136_v62 = vld [vmem:[#allocation51_spill] sm:$0xff] }
 0xa66   : > { %10478 = vst.msk [vmem:[%s17700_s4 + $0x1b] sm:$0xff] %vm761_vm2, %v10401_v25  ;;  %v8627_v2 = vpop.f32.mrf.mxu2 }
 0xa67   : > { %v8790_v54 = vadd.f32 %v8627_v2, %v18133_v27  ;;  %v18135_v2 = vld [vmem:[#allocation92_spill] sm:$0xff] }
 0xa68   : > { %v9145_v53 = vpop.f32.mrf.mxu3  ;;  %v9661_v61 = vpop.f32.mrf.mxu0 }
 0xa69   : > { %v9308_v28 = vadd.f32 %v9145_v53, %v8790_v54  ;;  %v16983_v3 = vadd.f32 %v9661_v61, %v9307_v39  ;;  %v10134_v38 = vpop.f32.mrf.mxu1 }
 0xa6a   : > { %v10325_v10 = vadd.f32 %v10134_v38, %v16836_v15  ;;  %v9403_v38 = vld [vmem:[#allocation2 + $0x15d] sm:$0xff] }
 0xa6b   : > { %11181 = vmatmul.msk.bf16.gmra.mxu2 %vm761_vm2, %v8941_v42  ;;  %11260 = vmatmul.msk.bf16.gmra.mxu0 %vm761_vm2, %v9459_v49 }
 0xa6c   : > { %v10402_v25 = vmul.f32 %v10325_v10, %v18134_v37  ;;  %11291 = vmatmul.msk.bf16.gmra.mxu1 %vm761_vm2, %v9968_v26  ;;  %v8887_v10 = vld [vmem:[#allocation2 + $0x16c] sm:$0xff] }
 0xa6d   : > { %11221 = vmatmul.msk.bf16.gmra.mxu3 %vm761_vm2, %v8942_v22  ;;  %v9903_v26 = vld [vmem:[#allocation2 + $0xce] sm:$0xff] }
 0xa6e   : > { %10479 = vst.msk [vmem:[%s17700_s4 + $0x23] sm:$0xff] %vm761_vm2, %v10402_v25  ;;  %v8630_v39 = vpop.f32.mrf.mxu2 }
 0xa6f   : > { %v8791_v15 = vadd.f32 %v8630_v39, %v18135_v2  ;;  %v8886_v2 = vld [vmem:[#allocation2 + $0x164] sm:$0xff] }
 0xa70   : > { %v9148_v4 = vpop.f32.mrf.mxu3  ;;  %v9663_v27 = vpop.f32.mrf.mxu0 }
 0xa71   : > { %v9309_v54 = vadd.f32 %v9148_v4, %v8791_v15  ;;  %v16996_v42 = vadd.f32 %v9663_v27, %v9308_v28  ;;  %v10136_v53 = vpop.f32.mrf.mxu1  ;;  %v9402_v28 = vld [vmem:[#allocation2 + $0x155] sm:$0xff]  ;;  %v9902_v4 = vld [vmem:[#allocation2 + $0xc6] sm:$0xff] }
 0xa72   : > { %v10326_v31 = vadd.f32 %v10136_v53, %v16846_v55  ;;  %v9460_v15 = vpack.c.bf16 %v9403_v38, %v9402_v28  ;;  %v8943_v53 = vpack.c.bf16 %v8887_v10, %v8886_v2  ;;  %v18141_v2 = vld [vmem:[#allocation21_spill] sm:$0xff] }
 0xa74   : > { %v10403_v61 = vmul.f32 %v10326_v31, %v18136_v62  ;;  %v9969_v31 = vpack.c.bf16 %v9903_v26, %v9902_v4  ;;  %v18138_v62 = vld [vmem:[#allocation52_spill] sm:$0xff]  ;;  %v18140_v26 = vld [vmem:[#allocation53_spill] sm:$0xff] }
 0xa76   : > { %10480 = vst.msk [vmem:[%s17700_s4 + $0x2b] sm:$0xff] %vm761_vm2, %v10403_v61  ;;  %v8632_v57 = vpop.f32.mrf.mxu2 }
 0xa77   : > { %v8792_v49 = vadd.f32 %v8632_v57, %v18137_v0  ;;  %v18139_v57 = vld [vmem:[#allocation94_spill] sm:$0xff] }
 0xa78   : > { %v9150_v43 = vpop.f32.mrf.mxu3  ;;  %v9666_v37 = vpop.f32.mrf.mxu0 }
 0xa79   : > { %v9310_v25 = vadd.f32 %v9150_v43, %v8792_v49  ;;  %v17005_v39 = vadd.f32 %v9666_v37, %v9309_v54  ;;  %v10139_v55 = vpop.f32.mrf.mxu1 }
 0xa7a   : > { %v10327_v27 = vadd.f32 %v10139_v55, %v16852_v40  ;;  %v9405_v55 = vld [vmem:[#allocation2 + $0x16d] sm:$0xff] }
 0xa7b   : > { %11182 = vmatmul.msk.bf16.gmra.mxu2 %vm761_vm2, %v8942_v22  ;;  %11261 = vmatmul.msk.bf16.gmra.mxu0 %vm761_vm2, %v9460_v15 }
 0xa7c   : > { %v10404_v61 = vmul.f32 %v10327_v27, %v18138_v62  ;;  %11292 = vmatmul.msk.bf16.gmra.mxu1 %vm761_vm2, %v9969_v31  ;;  %v8889_v27 = vld [vmem:[#allocation2 + $0x17c] sm:$0xff] }
 0xa7d   : > { %11222 = vmatmul.msk.bf16.gmra.mxu3 %vm761_vm2, %v8943_v53  ;;  %v9905_v31 = vld [vmem:[#allocation2 + $0xde] sm:$0xff] }
 0xa7e   : > { %10481 = vst.msk [vmem:[%s17700_s4 + $0x33] sm:$0xff] %vm761_vm2, %v10404_v61  ;;  %v8635_v54 = vpop.f32.mrf.mxu2 }
 0xa7f   : > { %v8793_v40 = vadd.f32 %v8635_v54, %v18139_v57  ;;  %v8888_v57 = vld [vmem:[#allocation2 + $0x174] sm:$0xff] }
 0xa80   : > { %v9153_v38 = vpop.f32.mrf.mxu3  ;;  %v9668_v0 = vpop.f32.mrf.mxu0 }
 0xa81   : > { %v9311_v49 = vadd.f32 %v9153_v38, %v8793_v40  ;;  %v17018_v22 = vadd.f32 %v9668_v0, %v9310_v25  ;;  %v10141_v43 = vpop.f32.mrf.mxu1  ;;  %v9404_v25 = vld [vmem:[#allocation2 + $0x165] sm:$0xff]  ;;  %v9904_v38 = vld [vmem:[#allocation2 + $0xd6] sm:$0xff] }
 0xa82   : > { %v10328_v10 = vadd.f32 %v10141_v43, %v16862_v48  ;;  %v9461_v40 = vpack.c.bf16 %v9405_v55, %v9404_v25  ;;  %v8944_v43 = vpack.c.bf16 %v8889_v27, %v8888_v57  ;;  %v18145_v57 = vld [vmem:[#allocation23_spill] sm:$0xff] }
 0xa84   : > { %v10405_v37 = vmul.f32 %v10328_v10, %v18140_v26  ;;  %v9970_v10 = vpack.c.bf16 %v9905_v31, %v9904_v38  ;;  %v18142_v26 = vld [vmem:[#allocation54_spill] sm:$0xff]  ;;  %v18144_v31 = vld [vmem:[#allocation55_spill] sm:$0xff] }
 0xa86   : > { %10482 = vst.msk [vmem:[%s17700_s4 + $0x3b] sm:$0xff] %vm761_vm2, %v10405_v37  ;;  %v8637_v28 = vpop.f32.mrf.mxu2 }
 0xa87   : > { %v8794_v15 = vadd.f32 %v8637_v28, %v18141_v2  ;;  %v18143_v28 = vld [vmem:[#allocation95_spill] sm:$0xff] }
 0xa88   : > { %v9155_v4 = vpop.f32.mrf.mxu3  ;;  %v9671_v62 = vpop.f32.mrf.mxu0 }
 0xa89   : > { %v9312_v61 = vadd.f32 %v9155_v4, %v8794_v15  ;;  %v17027_v54 = vadd.f32 %v9671_v62, %v9311_v49  ;;  %v10144_v48 = vpop.f32.mrf.mxu1 }
 0xa8a   : > { %v10329_v0 = vadd.f32 %v10144_v48, %v16868_v46  ;;  %v9407_v48 = vld [vmem:[#allocation2 + $0x17d] sm:$0xff] }
 0xa8b   : > { %11183 = vmatmul.msk.bf16.gmra.mxu2 %vm761_vm2, %v8943_v53  ;;  %11262 = vmatmul.msk.bf16.gmra.mxu0 %vm761_vm2, %v9461_v40 }
 0xa8c   : > { %v10406_v37 = vmul.f32 %v10329_v0, %v18142_v26  ;;  %11293 = vmatmul.msk.bf16.gmra.mxu1 %vm761_vm2, %v9970_v10  ;;  %v8891_v0 = vld [vmem:[#allocation2 + $0x18c] sm:$0xff] }
 0xa8d   : > { %11223 = vmatmul.msk.bf16.gmra.mxu3 %vm761_vm2, %v8944_v43  ;;  %v9907_v10 = vld [vmem:[#allocation2 + $0xee] sm:$0xff] }
 0xa8e   : > { %10483 = vst.msk [vmem:[%s17700_s4 + $0x43] sm:$0xff] %vm761_vm2, %v10406_v37  ;;  %v8640_v49 = vpop.f32.mrf.mxu2 }
 0xa8f   : > { %v8795_v46 = vadd.f32 %v8640_v49, %v18143_v28  ;;  %v8890_v28 = vld [vmem:[#allocation2 + $0x184] sm:$0xff] }
 0xa90   : > { %v9158_v55 = vpop.f32.mrf.mxu3  ;;  %v9673_v2 = vpop.f32.mrf.mxu0 }
 0xa91   : > { %v9313_v15 = vadd.f32 %v9158_v55, %v8795_v46  ;;  %v17040_v53 = vadd.f32 %v9673_v2, %v9312_v61  ;;  %v10146_v4 = vpop.f32.mrf.mxu1  ;;  %v9406_v61 = vld [vmem:[#allocation2 + $0x175] sm:$0xff]  ;;  %v9906_v55 = vld [vmem:[#allocation2 + $0xe6] sm:$0xff] }
 0xa92   : > { %v10330_v27 = vadd.f32 %v10146_v4, %v16878_v21  ;;  %v9462_v46 = vpack.c.bf16 %v9407_v48, %v9406_v61  ;;  %v8945_v4 = vpack.c.bf16 %v8891_v0, %v8890_v28  ;;  %v18149_v28 = vld [vmem:[#allocation25_spill] sm:$0xff] }
 0xa94   : > { %v10407_v62 = vmul.f32 %v10330_v27, %v18144_v31  ;;  %v9971_v27 = vpack.c.bf16 %v9907_v10, %v9906_v55  ;;  %v18146_v31 = vld [vmem:[#allocation56_spill] sm:$0xff]  ;;  %v18148_v10 = vld [vmem:[#allocation57_spill] sm:$0xff] }
 0xa96   : > { %10484 = vst.msk [vmem:[%s17700_s4 + $0x4b] sm:$0xff] %vm761_vm2, %v10407_v62  ;;  %v8642_v25 = vpop.f32.mrf.mxu2 }
 0xa97   : > { %v8796_v40 = vadd.f32 %v8642_v25, %v18145_v57  ;;  %v18147_v25 = vld [vmem:[#allocation96_spill] sm:$0xff] }
 0xa98   : > { %v9160_v38 = vpop.f32.mrf.mxu3  ;;  %v9676_v26 = vpop.f32.mrf.mxu0 }
 0xa99   : > { %v9314_v37 = vadd.f32 %v9160_v38, %v8796_v40  ;;  %v17049_v49 = vadd.f32 %v9676_v26, %v9313_v15  ;;  %v10149_v21 = vpop.f32.mrf.mxu1 }
 0xa9a   : > { %v10331_v2 = vadd.f32 %v10149_v21, %v16884_v12  ;;  %v9409_v21 = vld [vmem:[#allocation2 + $0x18d] sm:$0xff] }
 0xa9b   : > { %11184 = vmatmul.msk.bf16.gmra.mxu2 %vm761_vm2, %v8944_v43  ;;  %11263 = vmatmul.msk.bf16.gmra.mxu0 %vm761_vm2, %v9462_v46 }
 0xa9c   : > { %v10408_v62 = vmul.f32 %v10331_v2, %v18146_v31  ;;  %11294 = vmatmul.msk.bf16.gmra.mxu1 %vm761_vm2, %v9971_v27  ;;  %v8893_v2 = vld [vmem:[#allocation2 + $0x19c] sm:$0xff] }
 0xa9d   : > { %11224 = vmatmul.msk.bf16.gmra.mxu3 %vm761_vm2, %v8945_v4  ;;  %v9909_v27 = vld [vmem:[#allocation2 + $0xfe] sm:$0xff] }
 0xa9e   : > { %10485 = vst.msk [vmem:[%s17700_s4 + $0x53] sm:$0xff] %vm761_vm2, %v10408_v62  ;;  %v8645_v15 = vpop.f32.mrf.mxu2 }
 0xa9f   : > { %v8797_v12 = vadd.f32 %v8645_v15, %v18147_v25  ;;  %v8892_v25 = vld [vmem:[#allocation2 + $0x194] sm:$0xff] }
 0xaa0   : > { %v9163_v48 = vpop.f32.mrf.mxu3  ;;  %v9678_v57 = vpop.f32.mrf.mxu0 }
 0xaa1   : > { %v9315_v40 = vadd.f32 %v9163_v48, %v8797_v12  ;;  %v17062_v43 = vadd.f32 %v9678_v57, %v9314_v37  ;;  %v10151_v38 = vpop.f32.mrf.mxu1  ;;  %v9408_v37 = vld [vmem:[#allocation2 + $0x185] sm:$0xff]  ;;  %v9908_v48 = vld [vmem:[#allocation2 + $0xf6] sm:$0xff] }
 0xaa2   : > { %v10332_v0 = vadd.f32 %v10151_v38, %v16894_v32  ;;  %v9463_v12 = vpack.c.bf16 %v9409_v21, %v9408_v37  ;;  %v8946_v38 = vpack.c.bf16 %v8893_v2, %v8892_v25  ;;  %v18153_v25 = vld [vmem:[#allocation27_spill] sm:$0xff] }
 0xaa4   : > { %v10409_v26 = vmul.f32 %v10332_v0, %v18148_v10  ;;  %v9972_v0 = vpack.c.bf16 %v9909_v27, %v9908_v48  ;;  %v18150_v10 = vld [vmem:[#allocation58_spill] sm:$0xff]  ;;  %v18152_v27 = vld [vmem:[#allocation59_spill] sm:$0xff] }
 0xaa6   : > { %10486 = vst.msk [vmem:[%s17700_s4 + $0x5b] sm:$0xff] %vm761_vm2, %v10409_v26  ;;  %v8647_v61 = vpop.f32.mrf.mxu2 }
 0xaa7   : > { %v8798_v46 = vadd.f32 %v8647_v61, %v18149_v28  ;;  %v18151_v61 = vld [vmem:[#allocation97_spill] sm:$0xff] }
 0xaa8   : > { %v9165_v55 = vpop.f32.mrf.mxu3  ;;  %v9681_v31 = vpop.f32.mrf.mxu0 }
 0xaa9   : > { %v9316_v62 = vadd.f32 %v9165_v55, %v8798_v46  ;;  %v17071_v15 = vadd.f32 %v9681_v31, %v9315_v40  ;;  %v10154_v32 = vpop.f32.mrf.mxu1 }
 0xaaa   : > { %v10333_v57 = vadd.f32 %v10154_v32, %v16900_v45  ;;  %v9411_v32 = vld [vmem:[#allocation2 + $0x19d] sm:$0xff] }
 0xaab   : > { %11185 = vmatmul.msk.bf16.gmra.mxu2 %vm761_vm2, %v8945_v4  ;;  %11264 = vmatmul.msk.bf16.gmra.mxu0 %vm761_vm2, %v9463_v12 }
 0xaac   : > { %v10410_v26 = vmul.f32 %v10333_v57, %v18150_v10  ;;  %11295 = vmatmul.msk.bf16.gmra.mxu1 %vm761_vm2, %v9972_v0  ;;  %v8895_v57 = vld [vmem:[#allocation2 + $0x1ac] sm:$0xff] }
 0xaad   : > { %11225 = vmatmul.msk.bf16.gmra.mxu3 %vm761_vm2, %v8946_v38  ;;  %v9911_v0 = vld [vmem:[#allocation2 + $0x10e] sm:$0xff] }
 0xaae   : > { %10487 = vst.msk [vmem:[%s17700_s4 + $0x63] sm:$0xff] %vm761_vm2, %v10410_v26  ;;  %v8650_v40 = vpop.f32.mrf.mxu2 }
 0xaaf   : > { %v8799_v45 = vadd.f32 %v8650_v40, %v18151_v61  ;;  %v8894_v61 = vld [vmem:[#allocation2 + $0x1a4] sm:$0xff] }
 0xab0   : > { %v9168_v21 = vpop.f32.mrf.mxu3  ;;  %v9683_v28 = vpop.f32.mrf.mxu0 }
 0xab1   : > { %v9317_v46 = vadd.f32 %v9168_v21, %v8799_v45  ;;  %v17084_v4 = vadd.f32 %v9683_v28, %v9316_v62  ;;  %v10156_v55 = vpop.f32.mrf.mxu1  ;;  %v9410_v62 = vld [vmem:[#allocation2 + $0x195] sm:$0xff]  ;;  %v9910_v21 = vld [vmem:[#allocation2 + $0x106] sm:$0xff] }
 0xab2   : > { %v10334_v2 = vadd.f32 %v10156_v55, %v16910_v50  ;;  %v9464_v45 = vpack.c.bf16 %v9411_v32, %v9410_v62  ;;  %v8947_v55 = vpack.c.bf16 %v8895_v57, %v8894_v61  ;;  %v18157_v61 = vld [vmem:[#allocation29_spill] sm:$0xff] }
 0xab4   : > { %v10411_v31 = vmul.f32 %v10334_v2, %v18152_v27  ;;  %v9973_v2 = vpack.c.bf16 %v9911_v0, %v9910_v21  ;;  %v18154_v27 = vld [vmem:[#allocation60_spill] sm:$0xff]  ;;  %v18156_v0 = vld [vmem:[#allocation61_spill] sm:$0xff] }
 0xab6   : > { %10488 = vst.msk [vmem:[%s17700_s4 + $0x6b] sm:$0xff] %vm761_vm2, %v10411_v31  ;;  %v8652_v37 = vpop.f32.mrf.mxu2 }
 0xab7   : > { %v8800_v12 = vadd.f32 %v8652_v37, %v18153_v25  ;;  %v18155_v37 = vld [vmem:[#allocation98_spill] sm:$0xff] }
 0xab8   : > { %v9170_v48 = vpop.f32.mrf.mxu3  ;;  %v9686_v10 = vpop.f32.mrf.mxu0 }
 0xab9   : > { %v9318_v26 = vadd.f32 %v9170_v48, %v8800_v12  ;;  %v17093_v40 = vadd.f32 %v9686_v10, %v9317_v46  ;;  %v10159_v50 = vpop.f32.mrf.mxu1 }
 0xaba   : > { %v10335_v28 = vadd.f32 %v10159_v50, %v16916_v11  ;;  %v9413_v50 = vld [vmem:[#allocation2 + $0x1ad] sm:$0xff] }
 0xabb   : > { %11186 = vmatmul.msk.bf16.gmra.mxu2 %vm761_vm2, %v8946_v38  ;;  %11265 = vmatmul.msk.bf16.gmra.mxu0 %vm761_vm2, %v9464_v45 }
 0xabc   : > { %v10412_v31 = vmul.f32 %v10335_v28, %v18154_v27  ;;  %11296 = vmatmul.msk.bf16.gmra.mxu1 %vm761_vm2, %v9973_v2  ;;  %v8897_v28 = vld [vmem:[#allocation2 + $0x1bc] sm:$0xff] }
 0xabd   : > { %11226 = vmatmul.msk.bf16.gmra.mxu3 %vm761_vm2, %v8947_v55  ;;  %v9913_v2 = vld [vmem:[#allocation2 + $0x11e] sm:$0xff] }
 0xabe   : > { %10489 = vst.msk [vmem:[%s17700_s4 + $0x73] sm:$0xff] %vm761_vm2, %v10412_v31  ;;  %v8655_v46 = vpop.f32.mrf.mxu2 }
 0xabf   : > { %v8801_v11 = vadd.f32 %v8655_v46, %v18155_v37  ;;  %v8896_v37 = vld [vmem:[#allocation2 + $0x1b4] sm:$0xff] }
 0xac0   : > { %v9173_v32 = vpop.f32.mrf.mxu3  ;;  %v9688_v25 = vpop.f32.mrf.mxu0 }
 0xac1   : > { %v9319_v12 = vadd.f32 %v9173_v32, %v8801_v11  ;;  %v17106_v38 = vadd.f32 %v9688_v25, %v9318_v26  ;;  %v10161_v48 = vpop.f32.mrf.mxu1  ;;  %v9412_v26 = vld [vmem:[#allocation2 + $0x1a5] sm:$0xff]  ;;  %v9912_v32 = vld [vmem:[#allocation2 + $0x116] sm:$0xff] }
 0xac2   : > { %v10336_v57 = vadd.f32 %v10161_v48, %v16926_v17  ;;  %v9465_v11 = vpack.c.bf16 %v9413_v50, %v9412_v26  ;;  %v8948_v48 = vpack.c.bf16 %v8897_v28, %v8896_v37  ;;  %v18161_v37 = vld [vmem:[#allocation31_spill] sm:$0xff] }
 0xac4   : > { %v10413_v10 = vmul.f32 %v10336_v57, %v18156_v0  ;;  %v9974_v57 = vpack.c.bf16 %v9913_v2, %v9912_v32  ;;  %v18158_v0 = vld [vmem:[#allocation62_spill] sm:$0xff]  ;;  %v18160_v2 = vld [vmem:[#allocation63_spill] sm:$0xff] }
 0xac6   : > { %10490 = vst.msk [vmem:[%s17700_s4 + $0x7b] sm:$0xff] %vm761_vm2, %v10413_v10  ;;  %v8657_v62 = vpop.f32.mrf.mxu2 }
 0xac7   : > { %v8802_v45 = vadd.f32 %v8657_v62, %v18157_v61  ;;  %v18159_v62 = vld [vmem:[#allocation99_spill] sm:$0xff] }
 0xac8   : > { %v9175_v21 = vpop.f32.mrf.mxu3  ;;  %v9691_v27 = vpop.f32.mrf.mxu0 }
 0xac9   : > { %v9320_v31 = vadd.f32 %v9175_v21, %v8802_v45  ;;  %v17115_v46 = vadd.f32 %v9691_v27, %v9319_v12  ;;  %v10164_v17 = vpop.f32.mrf.mxu1 }
 0xaca   : > { %v10337_v25 = vadd.f32 %v10164_v17, %v16932_v60  ;;  %v9415_v17 = vld [vmem:[#allocation2 + $0x1bd] sm:$0xff] }
 0xacb   : > { %11187 = vmatmul.msk.bf16.gmra.mxu2 %vm761_vm2, %v8947_v55  ;;  %11266 = vmatmul.msk.bf16.gmra.mxu0 %vm761_vm2, %v9465_v11 }
 0xacc   : > { %v10414_v10 = vmul.f32 %v10337_v25, %v18158_v0  ;;  %11297 = vmatmul.msk.bf16.gmra.mxu1 %vm761_vm2, %v9974_v57  ;;  %v8899_v25 = vld [vmem:[#allocation2 + $0x1cc] sm:$0xff] }
 0xacd   : > { %11227 = vmatmul.msk.bf16.gmra.mxu3 %vm761_vm2, %v8948_v48  ;;  %v9915_v57 = vld [vmem:[#allocation2 + $0x12e] sm:$0xff] }
 0xace   : > { %10491 = vst.msk [vmem:[%s17700_s4 + $0x83] sm:$0xff] %vm761_vm2, %v10414_v10  ;;  %v8660_v12 = vpop.f32.mrf.mxu2 }
 0xacf   : > { %v8803_v60 = vadd.f32 %v8660_v12, %v18159_v62  ;;  %v8898_v62 = vld [vmem:[#allocation2 + $0x1c4] sm:$0xff] }
 0xad0   : > { %v9178_v50 = vpop.f32.mrf.mxu3  ;;  %v9693_v61 = vpop.f32.mrf.mxu0 }
 0xad1   : > { %v9321_v45 = vadd.f32 %v9178_v50, %v8803_v60  ;;  %v17128_v55 = vadd.f32 %v9693_v61, %v9320_v31  ;;  %v10166_v21 = vpop.f32.mrf.mxu1  ;;  %v9414_v31 = vld [vmem:[#allocation2 + $0x1b5] sm:$0xff]  ;;  %v9914_v50 = vld [vmem:[#allocation2 + $0x126] sm:$0xff] }
 0xad2   : > { %v10338_v28 = vadd.f32 %v10166_v21, %v16942_v33  ;;  %v9466_v60 = vpack.c.bf16 %v9415_v17, %v9414_v31  ;;  %v8949_v21 = vpack.c.bf16 %v8899_v25, %v8898_v62  ;;  %v18163_v25 = vld [vmem:[#allocation65_spill] sm:$0xff]  ;;  %v9417_v31 = vld [vmem:[#allocation2 + $0x1cd] sm:$0xff] }
 0xad3   : > { %v8901_v62 = vld [vmem:[#allocation2 + $0x1dc] sm:$0xff] }
 0xad4   : > { %v10415_v27 = vmul.f32 %v10338_v28, %v18160_v2  ;;  %v9975_v28 = vpack.c.bf16 %v9915_v57, %v9914_v50  ;;  %v18162_v2 = vld [vmem:[#allocation64_spill] sm:$0xff] }
 0xad6   : > { %10492 = vst.msk [vmem:[%s17700_s4 + $0x8b] sm:$0xff] %vm761_vm2, %v10415_v27  ;;  %v8662_v26 = vpop.f32.mrf.mxu2 }
 0xad7   : > { %v8804_v11 = vadd.f32 %v8662_v26, %v18161_v37 }
 0xad8   : > { %v9180_v32 = vpop.f32.mrf.mxu3  ;;  %v9696_v0 = vpop.f32.mrf.mxu0 }
 0xad9   : > { %v9322_v10 = vadd.f32 %v9180_v32, %v8804_v11  ;;  %v17137_v12 = vadd.f32 %v9696_v0, %v9321_v45  ;;  %v10169_v33 = vpop.f32.mrf.mxu1 }
 0xada   : > { %v10339_v61 = vadd.f32 %v10169_v33, %v16948_v35 }
 0xadb   : > { %11188 = vmatmul.msk.bf16.gmra.mxu2 %vm761_vm2, %v8948_v48  ;;  %11267 = vmatmul.msk.bf16.gmra.mxu0 %vm761_vm2, %v9466_v60  ;;  %v9917_v60 = vld [vmem:[#allocation2 + $0x13e] sm:$0xff] }
 0xadc   : > { %v10416_v27 = vmul.f32 %v10339_v61, %v18162_v2  ;;  %11298 = vmatmul.msk.bf16.gmra.mxu1 %vm761_vm2, %v9975_v28  ;;  %v8900_v2 = vld [vmem:[#allocation2 + $0x1d4] sm:$0xff] }
 0xadd   : > { %11228 = vmatmul.msk.bf16.gmra.mxu3 %vm761_vm2, %v8949_v21 }
 0xade   : > { %10493 = vst.msk [vmem:[%s17700_s4 + $0x93] sm:$0xff] %vm761_vm2, %v10416_v27  ;;  %v8665_v45 = vpop.f32.mrf.mxu2 }
 0xadf   : > { %v8805_v35 = vadd.f32 %v8665_v45, %v16533_v6  ;;  %v9916_v45 = vld [vmem:[#allocation2 + $0x136] sm:$0xff] }
 0xae0   : > { %v9183_v26 = vpop.f32.mrf.mxu3  ;;  %v9698_v17 = vpop.f32.mrf.mxu0 }
 0xae1   : > { %v9323_v37 = vadd.f32 %v9183_v26, %v8805_v35  ;;  %v17150_v48 = vadd.f32 %v9698_v17, %v9322_v10  ;;  %v10171_v11 = vpop.f32.mrf.mxu1  ;;  %v9416_v10 = vld [vmem:[#allocation2 + $0x1c5] sm:$0xff]  ;;  %v8950_v26 = vpack.c.bf16 %v8901_v62, %v8900_v2  ;;  %v9976_v17 = vpack.c.bf16 %v9917_v60, %v9916_v45  ;;  %v9919_v45 = vld [vmem:[#allocation2 + $0x14e] sm:$0xff] }
 0xae2   : > { %v10340_v32 = vadd.f32 %v10171_v11, %v16958_v7  ;;  %v9467_v27 = vpack.c.bf16 %v9417_v31, %v9416_v10  ;;  %v18167_v10 = vld [vmem:[#allocation120_spill] sm:$0xff] }
 0xae4   : > { %v10417_v57 = vmul.f32 %v10340_v32, %v18163_v25  ;;  %v18165_v32 = vld [vmem:[#allocation100_spill] sm:$0xff] }
 0xae6   : > { %10494 = vst.msk [vmem:[%s17700_s4 + $0x9b] sm:$0xff] %vm761_vm2, %v10417_v57  ;;  %v8667_v0 = vpop.f32.mrf.mxu2 }
 0xae7   : > { %v8806_v33 = vadd.f32 %v8667_v0, %v16549_v56  ;;  %v18164_v56 = vld [vmem:[#allocation66_spill] sm:$0xff] }
 0xae8   : > { %v9185_v6 = vpop.f32.mrf.mxu3  ;;  %v9701_v50 = vpop.f32.mrf.mxu0 }
 0xae9   : > { %v9324_v61 = vadd.f32 %v9185_v6, %v8806_v33  ;;  %v17159_v28 = vadd.f32 %v9701_v50, %v9323_v37  ;;  %v10174_v7 = vpop.f32.mrf.mxu1  ;;  %v18166_v6 = vld [vmem:[#allocation67_spill] sm:$0xff]  ;;  %v9419_v50 = vld [vmem:[#allocation2 + $0x1dd] sm:$0xff] }
 0xaea   : > { %v10341_v35 = vadd.f32 %v10174_v7, %v16961_v18 }
 0xaeb   : > { %11189 = vmatmul.msk.bf16.gmra.mxu2 %vm761_vm2, %v8949_v21  ;;  %11268 = vmatmul.msk.bf16.gmra.mxu0 %vm761_vm2, %v9467_v27  ;;  %v8903_v27 = vld [vmem:[#allocation2 + $0x1ec] sm:$0xff] }
 0xaec   : > { %v10418_v11 = vmul.f32 %v10341_v35, %v18164_v56  ;;  %11299 = vmatmul.msk.bf16.gmra.mxu1 %vm761_vm2, %v9976_v17 }
 0xaed   : > { %11229 = vmatmul.msk.bf16.gmra.mxu3 %vm761_vm2, %v8950_v26 }
 0xaee   : > { %10495 = vst.msk [vmem:[%s17700_s4 + $0xa3] sm:$0xff] %vm761_vm2, %v10418_v11  ;;  %v8670_v37 = vpop.f32.mrf.mxu2  ;;  %v8902_v11 = vld [vmem:[#allocation2 + $0x1e4] sm:$0xff] }
 0xaef   : > { %v8807_v18 = vadd.f32 %v8670_v37, %v18165_v32  ;;  %v9918_v32 = vld [vmem:[#allocation2 + $0x146] sm:$0xff] }
 0xaf0   : > { %v9188_v25 = vpop.f32.mrf.mxu3  ;;  %v9703_v57 = vpop.f32.mrf.mxu0 }
 0xaf1   : > { %v9325_v0 = vadd.f32 %v9188_v25, %v8807_v18  ;;  %v17172_v21 = vadd.f32 %v9703_v57, %v9324_v61  ;;  %v10176_v31 = vpop.f32.mrf.mxu1  ;;  %v9418_v61 = vld [vmem:[#allocation2 + $0x1d5] sm:$0xff]  ;;  %v8951_v25 = vpack.c.bf16 %v8903_v27, %v8902_v11  ;;  %v9977_v57 = vpack.c.bf16 %v9919_v45, %v9918_v32 }
 0xaf2   : > { %v10342_v33 = vadd.f32 %v10176_v31, %v16974_v1  ;;  %v9468_v37 = vpack.c.bf16 %v9419_v50, %v9418_v61  ;;  %v18168_v31 = vld [vmem:[#allocation68_spill] sm:$0xff]  ;;  %v8905_v11 = vld [vmem:[#allocation2 + $0x1fc] sm:$0xff] }
 0xaf4   : > { %v10419_v62 = vmul.f32 %v10342_v33, %v18166_v6  ;;  %v18169_v6 = vld [vmem:[#allocation121_spill] sm:$0xff] }
 0xaf6   : > { %10496 = vst.msk [vmem:[%s17700_s4 + $0xab] sm:$0xff] %vm761_vm2, %v10419_v62  ;;  %v8672_v60 = vpop.f32.mrf.mxu2 }
 0xaf7   : > { %v8808_v7 = vadd.f32 %v8672_v60, %v18167_v10 }
 0xaf8   : > { %v9190_v2 = vpop.f32.mrf.mxu3  ;;  %v9706_v35 = vpop.f32.mrf.mxu0 }
 0xaf9   : > { %v9326_v17 = vadd.f32 %v9190_v2, %v8808_v7  ;;  %v17181_v56 = vadd.f32 %v9706_v35, %v9325_v0  ;;  %v10179_v1 = vpop.f32.mrf.mxu1  ;;  %v18170_v2 = vld [vmem:[#allocation69_spill] sm:$0xff]  ;;  %v9421_v35 = vld [vmem:[#allocation2 + $0x1ed] sm:$0xff] }
 0xafa   : > { %v10343_v18 = vadd.f32 %v10179_v1, %v16983_v3 }
 0xafb   : > { %11190 = vmatmul.msk.bf16.gmra.mxu2 %vm761_vm2, %v8950_v26  ;;  %11269 = vmatmul.msk.bf16.gmra.mxu0 %vm761_vm2, %v9468_v37  ;;  %v9921_v37 = vld [vmem:[#allocation2 + $0x15e] sm:$0xff] }
 0xafc   : > { %v10420_v33 = vmul.f32 %v10343_v18, %v18168_v31  ;;  %11300 = vmatmul.msk.bf16.gmra.mxu1 %vm761_vm2, %v9977_v57  ;;  %v8904_v31 = vld [vmem:[#allocation2 + $0x1f4] sm:$0xff] }
 0xafd   : > { %11230 = vmatmul.msk.bf16.gmra.mxu3 %vm761_vm2, %v8951_v25 }
 0xafe   : > { %10497 = vst.msk [vmem:[%s17700_s4 + $0xb3] sm:$0xff] %vm761_vm2, %v10420_v33  ;;  %v8675_v0 = vpop.f32.mrf.mxu2 }
 0xaff   : > { %v8809_v3 = vadd.f32 %v8675_v0, %v18169_v6  ;;  %v9920_v0 = vld [vmem:[#allocation2 + $0x156] sm:$0xff] }
 0xb00   : > { %v9193_v62 = vpop.f32.mrf.mxu3  ;;  %v9708_v60 = vpop.f32.mrf.mxu0 }
 0xb01   : > { %v9327_v50 = vadd.f32 %v9193_v62, %v8809_v3  ;;  %v17194_v26 = vadd.f32 %v9708_v60, %v9326_v17  ;;  %v10181_v10 = vpop.f32.mrf.mxu1  ;;  %v9420_v17 = vld [vmem:[#allocation2 + $0x1e5] sm:$0xff]  ;;  %v8952_v3 = vpack.c.bf16 %v8905_v11, %v8904_v31  ;;  %v9978_v62 = vpack.c.bf16 %v9921_v37, %v9920_v0  ;;  %v9423_v11 = vld [vmem:[#allocation2 + $0x1fd] sm:$0xff] }
 0xb02   : > { %v10344_v7 = vadd.f32 %v10181_v10, %v16996_v42  ;;  %v9469_v33 = vpack.c.bf16 %v9421_v35, %v9420_v17  ;;  %v18172_v35 = vld [vmem:[#allocation71_spill] sm:$0xff] }
 0xb03   : > { %v9923_v17 = vld [vmem:[#allocation2 + $0x16e] sm:$0xff]  ;;  %v8906_v0 = vld [vmem:[#allocation2 + $0x204] sm:$0xff] }
 0xb04   : > { %v10421_v27 = vmul.f32 %v10344_v7, %v18170_v2 }
 0xb06   : > { %10498 = vst.msk [vmem:[%s17700_s4 + $0xbb] sm:$0xff] %vm761_vm2, %v10421_v27  ;;  %v8677_v45 = vpop.f32.mrf.mxu2 }
 0xb07   : > { %v8810_v61 = vadd.f32 %v8677_v45, %v16605_v14  ;;  %v18171_v14 = vld [vmem:[#allocation70_spill] sm:$0xff] }
 0xb08   : > { %v9195_v1 = vpop.f32.mrf.mxu3  ;;  %v9711_v32 = vpop.f32.mrf.mxu0 }
 0xb09   : > { %v9328_v18 = vadd.f32 %v9195_v1, %v8810_v61  ;;  %v17203_v57 = vadd.f32 %v9711_v32, %v9327_v50  ;;  %v10184_v42 = vpop.f32.mrf.mxu1  ;;  %v8907_v32 = vld [vmem:[#allocation2 + $0x20c] sm:$0xff] }
 0xb0a   : > { %v10345_v6 = vadd.f32 %v10184_v42, %v17005_v39 }
 0xb0b   : > { %11191 = vmatmul.msk.bf16.gmra.mxu2 %vm761_vm2, %v8951_v25  ;;  %11270 = vmatmul.msk.bf16.gmra.mxu0 %vm761_vm2, %v9469_v33 }
 0xb0c   : > { %v10422_v60 = vmul.f32 %v10345_v6, %v18171_v14  ;;  %11301 = vmatmul.msk.bf16.gmra.mxu1 %vm761_vm2, %v9978_v62  ;;  %v9922_v62 = vld [vmem:[#allocation2 + $0x166] sm:$0xff] }
 0xb0d   : > { %11231 = vmatmul.msk.bf16.gmra.mxu3 %vm761_vm2, %v8952_v3 }
 0xb0e   : > { %10499 = vst.msk [vmem:[%s17700_s4 + $0xc3] sm:$0xff] %vm761_vm2, %v10422_v60  ;;  %v8680_v50 = vpop.f32.mrf.mxu2  ;;  %v8953_v60 = vpack.c.bf16 %v8907_v32, %v8906_v0 }
 0xb0f   : > { %v8811_v39 = vadd.f32 %v8680_v50, %v16615_v34  ;;  %v9979_v50 = vpack.c.bf16 %v9923_v17, %v9922_v62  ;;  %v8908_v62 = vld [vmem:[#allocation2 + $0x214] sm:$0xff] }
 0xb10   : > { %v9198_v10 = vpop.f32.mrf.mxu3  ;;  %v9713_v7 = vpop.f32.mrf.mxu0 }
 0xb11   : > { %v9329_v2 = vadd.f32 %v9198_v10, %v8811_v39  ;;  %v17216_v25 = vadd.f32 %v9713_v7, %v9328_v18  ;;  %v10186_v27 = vpop.f32.mrf.mxu1  ;;  %v9422_v18 = vld [vmem:[#allocation2 + $0x1f5] sm:$0xff]  ;;  %v18174_v7 = vld [vmem:[#allocation102_spill] sm:$0xff] }
 0xb12   : > { %v10346_v45 = vadd.f32 %v10186_v27, %v17018_v22  ;;  %v9470_v6 = vpack.c.bf16 %v9423_v11, %v9422_v18  ;;  %v9925_v18 = vld [vmem:[#allocation2 + $0x17e] sm:$0xff] }
 0xb14   : > { %v10423_v61 = vmul.f32 %v10346_v45, %v18172_v35 }
 0xb16   : > { %10500 = vst.msk [vmem:[%s17700_s4 + $0xcb] sm:$0xff] %vm761_vm2, %v10423_v61  ;;  %v8682_v1 = vpop.f32.mrf.mxu2 }
 0xb17   : > { %v8812_v37 = vadd.f32 %v8682_v1, %v16633_v52  ;;  %v18173_v52 = vld [vmem:[#allocation72_spill] sm:$0xff]  ;;  %v18175_v1 = vld [vmem:[#allocation73_spill] sm:$0xff] }
 0xb18   : > { %v9200_v34 = vpop.f32.mrf.mxu3  ;;  %v9716_v42 = vpop.f32.mrf.mxu0 }
 0xb19   : > { %v9330_v31 = vadd.f32 %v9200_v34, %v8812_v37  ;;  %v17225_v33 = vadd.f32 %v9716_v42, %v9329_v2  ;;  %v10189_v22 = vpop.f32.mrf.mxu1  ;;  %v9425_v34 = vld [vmem:[#allocation2 + $0x20d] sm:$0xff]  ;;  %v8909_v42 = vld [vmem:[#allocation2 + $0x21c] sm:$0xff] }
 0xb1a   : > { %v10347_v14 = vadd.f32 %v10189_v22, %v17027_v54 }
 0xb1b   : > { %11192 = vmatmul.msk.bf16.gmra.mxu2 %vm761_vm2, %v8952_v3  ;;  %11271 = vmatmul.msk.bf16.gmra.mxu0 %vm761_vm2, %v9470_v6 }
 0xb1c   : > { %v10424_v39 = vmul.f32 %v10347_v14, %v18173_v52  ;;  %11302 = vmatmul.msk.bf16.gmra.mxu1 %vm761_vm2, %v9979_v50  ;;  %v9924_v50 = vld [vmem:[#allocation2 + $0x176] sm:$0xff] }
 0xb1d   : > { %11232 = vmatmul.msk.bf16.gmra.mxu3 %vm761_vm2, %v8953_v60 }
 0xb1e   : > { %10501 = vst.msk [vmem:[%s17700_s4 + $0xd3] sm:$0xff] %vm761_vm2, %v10424_v39  ;;  %v8685_v10 = vpop.f32.mrf.mxu2  ;;  %v8954_v39 = vpack.c.bf16 %v8909_v42, %v8908_v62 }
 0xb1f   : > { %v8813_v54 = vadd.f32 %v8685_v10, %v18174_v7  ;;  %v9980_v10 = vpack.c.bf16 %v9925_v18, %v9924_v50  ;;  %v8911_v18 = vld [vmem:[#allocation2 + $0x22c] sm:$0xff] }
 0xb20   : > { %v9203_v2 = vpop.f32.mrf.mxu3  ;;  %v9718_v27 = vpop.f32.mrf.mxu0 }
 0xb21   : > { %v9331_v45 = vadd.f32 %v9203_v2, %v8813_v54  ;;  %v17238_v3 = vadd.f32 %v9718_v27, %v9330_v31  ;;  %v10191_v35 = vpop.f32.mrf.mxu1  ;;  %v9424_v31 = vld [vmem:[#allocation2 + $0x205] sm:$0xff] }
 0xb22   : > { %v10348_v61 = vadd.f32 %v10191_v35, %v17040_v53  ;;  %v9471_v14 = vpack.c.bf16 %v9425_v34, %v9424_v31  ;;  %v18177_v2 = vld [vmem:[#allocation103_spill] sm:$0xff] }
 0xb24   : > { %v10425_v11 = vmul.f32 %v10348_v61, %v18175_v1 }
 0xb26   : > { %10502 = vst.msk [vmem:[%s17700_s4 + $0xdb] sm:$0xff] %vm761_vm2, %v10425_v11  ;;  %v8687_v37 = vpop.f32.mrf.mxu2  ;;  %v18178_v11 = vld [vmem:[#allocation75_spill] sm:$0xff] }
 0xb27   : > { %v8814_v32 = vadd.f32 %v8687_v37, %v16658_v63  ;;  %v18176_v63 = vld [vmem:[#allocation74_spill] sm:$0xff] }
 0xb28   : > { %v9205_v17 = vpop.f32.mrf.mxu3  ;;  %v9721_v22 = vpop.f32.mrf.mxu0 }
 0xb29   : > { %v9332_v0 = vadd.f32 %v9205_v17, %v8814_v32  ;;  %v17247_v6 = vadd.f32 %v9721_v22, %v9331_v45  ;;  %v10194_v53 = vpop.f32.mrf.mxu1  ;;  %v9427_v32 = vld [vmem:[#allocation2 + $0x21d] sm:$0xff]  ;;  %v9927_v22 = vld [vmem:[#allocation2 + $0x18e] sm:$0xff] }
 0xb2a   : > { %v10349_v52 = vadd.f32 %v10194_v53, %v17049_v49 }
 0xb2b   : > { %11193 = vmatmul.msk.bf16.gmra.mxu2 %vm761_vm2, %v8953_v60  ;;  %11272 = vmatmul.msk.bf16.gmra.mxu0 %vm761_vm2, %v9471_v14  ;;  %v8910_v14 = vld [vmem:[#allocation2 + $0x224] sm:$0xff] }
 0xb2c   : > { %v10426_v7 = vmul.f32 %v10349_v52, %v18176_v63  ;;  %11303 = vmatmul.msk.bf16.gmra.mxu1 %vm761_vm2, %v9980_v10  ;;  %v9926_v52 = vld [vmem:[#allocation2 + $0x186] sm:$0xff]  ;;  %v8955_v63 = vpack.c.bf16 %v8911_v18, %v8910_v14  ;;  %v8913_v18 = vld [vmem:[#allocation2 + $0x23c] sm:$0xff]  ;;  %v8912_v14 = vld [vmem:[#allocation2 + $0x234] sm:$0xff] }
 0xb2d   : > { %11233 = vmatmul.msk.bf16.gmra.mxu3 %vm761_vm2, %v8954_v39 }
 0xb2e   : > { %10503 = vst.msk [vmem:[%s17700_s4 + $0xe3] sm:$0xff] %vm761_vm2, %v10426_v7  ;;  %v8690_v54 = vpop.f32.mrf.mxu2  ;;  %v9981_v7 = vpack.c.bf16 %v9927_v22, %v9926_v52  ;;  %v9929_v22 = vld [vmem:[#allocation2 + $0x19e] sm:$0xff]  ;;  %v9928_v52 = vld [vmem:[#allocation2 + $0x196] sm:$0xff] }
 0xb2f   : > { %v8815_v49 = vadd.f32 %v8690_v54, %v18177_v2 }
 0xb30   : > { %v9208_v27 = vpop.f32.mrf.mxu3  ;;  %v9723_v45 = vpop.f32.mrf.mxu0 }
 0xb31   : > { %v9333_v35 = vadd.f32 %v9208_v27, %v8815_v49  ;;  %v17260_v60 = vadd.f32 %v9723_v45, %v9332_v0  ;;  %v10196_v61 = vpop.f32.mrf.mxu1  ;;  %v9426_v0 = vld [vmem:[#allocation2 + $0x215] sm:$0xff] }
 0xb32   : > { %v10350_v1 = vadd.f32 %v10196_v61, %v17062_v43  ;;  %v9472_v50 = vpack.c.bf16 %v9427_v32, %v9426_v0  ;;  %v18180_v49 = vld [vmem:[#allocation104_spill] sm:$0xff]  ;;  %v9428_v0 = vld [vmem:[#allocation2 + $0x225] sm:$0xff] }
 0xb33   : > { %v9429_v32 = vld [vmem:[#allocation2 + $0x22d] sm:$0xff] }
 0xb34   : > { %v10427_v37 = vmul.f32 %v10350_v1, %v18178_v11  ;;  %v18181_v11 = vld [vmem:[#allocation77_spill] sm:$0xff] }
 0xb36   : > { %10504 = vst.msk [vmem:[%s17700_s4 + $0xeb] sm:$0xff] %vm761_vm2, %v10427_v37  ;;  %v8692_v34 = vpop.f32.mrf.mxu2 }
 0xb37   : > { %v8816_v17 = vadd.f32 %v8692_v34, %v16683_v5  ;;  %v18179_v5 = vld [vmem:[#allocation76_spill] sm:$0xff] }
 0xb38   : > { %v9210_v42 = vpop.f32.mrf.mxu3  ;;  %v9726_v31 = vpop.f32.mrf.mxu0 }
 0xb39   : > { %v9334_v53 = vadd.f32 %v9210_v42, %v8816_v17  ;;  %v17269_v62 = vadd.f32 %v9726_v31, %v9333_v35  ;;  %v10199_v43 = vpop.f32.mrf.mxu1 }
 0xb3a   : > { %v10351_v10 = vadd.f32 %v10199_v43, %v17071_v15 }
 0xb3b   : > { %11194 = vmatmul.msk.bf16.gmra.mxu2 %vm761_vm2, %v8954_v39  ;;  %11273 = vmatmul.msk.bf16.gmra.mxu0 %vm761_vm2, %v9472_v50  ;;  %v9473_v50 = vpack.c.bf16 %v9429_v32, %v9428_v0 }
 0xb3c   : > { %v10428_v54 = vmul.f32 %v10351_v10, %v18179_v5  ;;  %11304 = vmatmul.msk.bf16.gmra.mxu1 %vm761_vm2, %v9981_v7  ;;  %v8956_v7 = vpack.c.bf16 %v8913_v18, %v8912_v14  ;;  %v9982_v5 = vpack.c.bf16 %v9929_v22, %v9928_v52  ;;  %v9931_v18 = vld [vmem:[#allocation2 + $0x1ae] sm:$0xff] }
 0xb3d   : > { %11234 = vmatmul.msk.bf16.gmra.mxu3 %vm761_vm2, %v8955_v63 }
 0xb3e   : > { %10505 = vst.msk [vmem:[%s17700_s4 + $0xf3] sm:$0xff] %vm761_vm2, %v10428_v54  ;;  %v8695_v2 = vpop.f32.mrf.mxu2 }
 0xb3f   : > { %v8817_v15 = vadd.f32 %v8695_v2, %v18180_v49  ;;  %v18183_v49 = vld [vmem:[#allocation105_spill] sm:$0xff] }
 0xb40   : > { %v9213_v27 = vpop.f32.mrf.mxu3  ;;  %v9728_v45 = vpop.f32.mrf.mxu0 }
 0xb41   : > { %v9335_v35 = vadd.f32 %v9213_v27, %v8817_v15  ;;  %v17282_v39 = vadd.f32 %v9728_v45, %v9334_v53  ;;  %v10201_v61 = vpop.f32.mrf.mxu1 }
 0xb42   : > { %v10352_v1 = vadd.f32 %v10201_v61, %v17084_v4 }
 0xb44   : > { %v10429_v37 = vmul.f32 %v10352_v1, %v18181_v11  ;;  %v18184_v1 = vld [vmem:[#allocation79_spill] sm:$0xff] }
 0xb46   : > { %10506 = vst.msk [vmem:[%s17700_s4 + $0xfb] sm:$0xff] %vm761_vm2, %v10429_v37  ;;  %v8697_v34 = vpop.f32.mrf.mxu2 }
 0xb47   : > { %v8818_v17 = vadd.f32 %v8697_v34, %v16708_v19  ;;  %v18182_v19 = vld [vmem:[#allocation78_spill] sm:$0xff] }
 0xb48   : > { %v9215_v42 = vpop.f32.mrf.mxu3  ;;  %v9731_v31 = vpop.f32.mrf.mxu0  ;;  %v9431_v34 = vld [vmem:[#allocation2 + $0x23d] sm:$0xff] }
 0xb49   : > { %v9336_v53 = vadd.f32 %v9215_v42, %v8818_v17  ;;  %v17291_v43 = vadd.f32 %v9731_v31, %v9335_v35  ;;  %v10204_v4 = vpop.f32.mrf.mxu1  ;;  %v8915_v42 = vld [vmem:[#allocation2 + $0x24c] sm:$0xff]  ;;  %v9430_v31 = vld [vmem:[#allocation2 + $0x235] sm:$0xff] }
 0xb4a   : > { %v10353_v10 = vadd.f32 %v10204_v4, %v17093_v40  ;;  %v8914_v4 = vld [vmem:[#allocation2 + $0x244] sm:$0xff]  ;;  %v9474_v14 = vpack.c.bf16 %v9431_v34, %v9430_v31 }
 0xb4b   : > { %11195 = vmatmul.msk.bf16.gmra.mxu2 %vm761_vm2, %v8955_v63  ;;  %11274 = vmatmul.msk.bf16.gmra.mxu0 %vm761_vm2, %v9473_v50  ;;  %v9930_v50 = vld [vmem:[#allocation2 + $0x1a6] sm:$0xff] }
 0xb4c   : > { %v10430_v54 = vmul.f32 %v10353_v10, %v18182_v19  ;;  %11305 = vmatmul.msk.bf16.gmra.mxu1 %vm761_vm2, %v9982_v5  ;;  %v8957_v10 = vpack.c.bf16 %v8915_v42, %v8914_v4  ;;  %v9983_v5 = vpack.c.bf16 %v9931_v18, %v9930_v50  ;;  %v9432_v18 = vld [vmem:[#allocation2 + $0x245] sm:$0xff]  ;;  %v9932_v4 = vld [vmem:[#allocation2 + $0x1b6] sm:$0xff] }
 0xb4d   : > { %11235 = vmatmul.msk.bf16.gmra.mxu3 %vm761_vm2, %v8956_v7 }
 0xb4e   : > { %10507 = vst.msk [vmem:[%s17700_s4 + $0x103] sm:$0xff] %vm761_vm2, %v10430_v54  ;;  %v8700_v2 = vpop.f32.mrf.mxu2 }
 0xb4f   : > { %v8819_v40 = vadd.f32 %v8700_v2, %v18183_v49  ;;  %v18186_v2 = vld [vmem:[#allocation106_spill] sm:$0xff] }
 0xb50   : > { %v9218_v15 = vpop.f32.mrf.mxu3  ;;  %v9733_v27 = vpop.f32.mrf.mxu0 }
 0xb51   : > { %v9337_v45 = vadd.f32 %v9218_v15, %v8819_v40  ;;  %v17304_v63 = vadd.f32 %v9733_v27, %v9336_v53  ;;  %v10206_v35 = vpop.f32.mrf.mxu1 }
 0xb52   : > { %v10354_v61 = vadd.f32 %v10206_v35, %v17106_v38  ;;  %v18187_v35 = vld [vmem:[#allocation81_spill] sm:$0xff] }
 0xb54   : > { %v10431_v11 = vmul.f32 %v10354_v61, %v18184_v1 }
 0xb56   : > { %10508 = vst.msk [vmem:[%s17700_s4 + $0x10b] sm:$0xff] %vm761_vm2, %v10431_v11  ;;  %v8702_v37 = vpop.f32.mrf.mxu2  ;;  %v9433_v11 = vld [vmem:[#allocation2 + $0x24d] sm:$0xff] }
 0xb57   : > { %v8820_v32 = vadd.f32 %v8702_v37, %v16733_v47  ;;  %v18185_v47 = vld [vmem:[#allocation80_spill] sm:$0xff] }
 0xb58   : > { %v9220_v17 = vpop.f32.mrf.mxu3  ;;  %v9736_v22 = vpop.f32.mrf.mxu0 }
 0xb59   : > { %v9338_v0 = vadd.f32 %v9220_v17, %v8820_v32  ;;  %v17313_v53 = vadd.f32 %v9736_v22, %v9337_v45  ;;  %v10209_v38 = vpop.f32.mrf.mxu1  ;;  %v8917_v32 = vld [vmem:[#allocation2 + $0x25c] sm:$0xff] }
 0xb5a   : > { %v10355_v52 = vadd.f32 %v10209_v38, %v17115_v46  ;;  %v9933_v17 = vld [vmem:[#allocation2 + $0x1be] sm:$0xff]  ;;  %v9475_v38 = vpack.c.bf16 %v9433_v11, %v9432_v18  ;;  %v8919_v11 = vld [vmem:[#allocation2 + $0x26c] sm:$0xff] }
 0xb5b   : > { %11196 = vmatmul.msk.bf16.gmra.mxu2 %vm761_vm2, %v8956_v7  ;;  %11275 = vmatmul.msk.bf16.gmra.mxu0 %vm761_vm2, %v9474_v14  ;;  %v8918_v18 = vld [vmem:[#allocation2 + $0x264] sm:$0xff] }
 0xb5c   : > { %v10432_v19 = vmul.f32 %v10355_v52, %v18185_v47  ;;  %11306 = vmatmul.msk.bf16.gmra.mxu1 %vm761_vm2, %v9983_v5  ;;  %v9984_v52 = vpack.c.bf16 %v9933_v17, %v9932_v4 }
 0xb5d   : > { %11236 = vmatmul.msk.bf16.gmra.mxu3 %vm761_vm2, %v8957_v10 }
 0xb5e   : > { %10509 = vst.msk [vmem:[%s17700_s4 + $0x113] sm:$0xff] %vm761_vm2, %v10432_v19  ;;  %v8705_v54 = vpop.f32.mrf.mxu2  ;;  %v18189_v19 = vld [vmem:[#allocation107_spill] sm:$0xff] }
 0xb5f   : > { %v8821_v46 = vadd.f32 %v8705_v54, %v18186_v2 }
 0xb60   : > { %v9223_v49 = vpop.f32.mrf.mxu3  ;;  %v9738_v40 = vpop.f32.mrf.mxu0 }
 0xb61   : > { %v9339_v15 = vadd.f32 %v9223_v49, %v8821_v46  ;;  %v17326_v7 = vadd.f32 %v9738_v40, %v9338_v0  ;;  %v10211_v27 = vpop.f32.mrf.mxu1  ;;  %v8916_v0 = vld [vmem:[#allocation2 + $0x254] sm:$0xff] }
 0xb62   : > { %v10356_v45 = vadd.f32 %v10211_v27, %v17128_v55  ;;  %v8958_v50 = vpack.c.bf16 %v8917_v32, %v8916_v0  ;;  %v9434_v32 = vld [vmem:[#allocation2 + $0x255] sm:$0xff] }
 0xb64   : > { %v10433_v61 = vmul.f32 %v10356_v45, %v18187_v35  ;;  %v9435_v35 = vld [vmem:[#allocation2 + $0x25d] sm:$0xff] }
 0xb66   : > { %10510 = vst.msk [vmem:[%s17700_s4 + $0x11b] sm:$0xff] %vm761_vm2, %v10433_v61  ;;  %v8707_v1 = vpop.f32.mrf.mxu2 }
 0xb67   : > { %v8822_v37 = vadd.f32 %v8707_v1, %v16758_v51  ;;  %v18188_v51 = vld [vmem:[#allocation34_spill] sm:$0xff] }
 0xb68   : > { %v9225_v34 = vpop.f32.mrf.mxu3  ;;  %v9741_v42 = vpop.f32.mrf.mxu0 }
 0xb69   : > { %v9340_v22 = vadd.f32 %v9225_v34, %v8822_v37  ;;  %v17335_v31 = vadd.f32 %v9741_v42, %v9339_v15  ;;  %v10214_v55 = vpop.f32.mrf.mxu1  ;;  %v18190_v15 = vld [vmem:[#allocation82_spill] sm:$0xff]  ;;  %v9935_v37 = vld [vmem:[#allocation2 + $0x1ce] sm:$0xff] }
 0xb6a   : > { %v10357_v14 = vadd.f32 %v10214_v55, %v17137_v12  ;;  %v9934_v55 = vld [vmem:[#allocation2 + $0x1c6] sm:$0xff] }
 0xb6b   : > { %11197 = vmatmul.msk.bf16.gmra.mxu2 %vm761_vm2, %v8957_v10  ;;  %11276 = vmatmul.msk.bf16.gmra.mxu0 %vm761_vm2, %v9475_v38  ;;  %v8959_v38 = vpack.c.bf16 %v8919_v11, %v8918_v18  ;;  %v9985_v4 = vpack.c.bf16 %v9935_v37, %v9934_v55  ;;  %v9436_v11 = vld [vmem:[#allocation2 + $0x265] sm:$0xff] }
 0xb6c   : > { %v10434_v5 = vmul.f32 %v10357_v14, %v18188_v51  ;;  %11307 = vmatmul.msk.bf16.gmra.mxu1 %vm761_vm2, %v9984_v52  ;;  %v18192_v51 = vld [vmem:[#allocation108_spill] sm:$0xff] }
 0xb6d   : > { %11237 = vmatmul.msk.bf16.gmra.mxu3 %vm761_vm2, %v8958_v50 }
 0xb6e   : > { %10511 = vst.msk [vmem:[%s17700_s4 + $0x123] sm:$0xff] %vm761_vm2, %v10434_v5  ;;  %v8710_v47 = vpop.f32.mrf.mxu2 }
 0xb6f   : > { %v8823_v12 = vadd.f32 %v8710_v47, %v18189_v19 }
 0xb70   : > { %v9228_v54 = vpop.f32.mrf.mxu3  ;;  %v9743_v2 = vpop.f32.mrf.mxu0 }
 0xb71   : > { %v9341_v46 = vadd.f32 %v9228_v54, %v8823_v12  ;;  %v17348_v10 = vadd.f32 %v9743_v2, %v9340_v22  ;;  %v10216_v49 = vpop.f32.mrf.mxu1  ;;  %v9476_v22 = vpack.c.bf16 %v9435_v35, %v9434_v32  ;;  %v18193_v2 = vld [vmem:[#allocation84_spill] sm:$0xff]  ;;  %v8921_v35 = vld [vmem:[#allocation2 + $0x27c] sm:$0xff] }
 0xb72   : > { %v10358_v40 = vadd.f32 %v10216_v49, %v17150_v48 }
 0xb74   : > { %v10435_v27 = vmul.f32 %v10358_v40, %v18190_v15  ;;  %v9437_v40 = vld [vmem:[#allocation2 + $0x26d] sm:$0xff] }
 0xb75   : > { %v9477_v32 = vpack.c.bf16 %v9437_v40, %v9436_v11  ;;  %v9939_v40 = vld [vmem:[#allocation2 + $0x1ee] sm:$0xff] }
 0xb76   : > { %10512 = vst.msk [vmem:[%s17700_s4 + $0x12b] sm:$0xff] %vm761_vm2, %v10435_v27  ;;  %v8712_v45 = vpop.f32.mrf.mxu2 }
 0xb77   : > { %v8824_v61 = vadd.f32 %v8712_v45, %v16783_v16  ;;  %v18191_v16 = vld [vmem:[#allocation83_spill] sm:$0xff]  ;;  %v8920_v45 = vld [vmem:[#allocation2 + $0x274] sm:$0xff] }
 0xb78   : > { %v9230_v1 = vpop.f32.mrf.mxu3  ;;  %v9746_v34 = vpop.f32.mrf.mxu0  ;;  %v8960_v18 = vpack.c.bf16 %v8921_v35, %v8920_v45 }
 0xb79   : > { %v9342_v17 = vadd.f32 %v9230_v1, %v8824_v61  ;;  %v17357_v42 = vadd.f32 %v9746_v34, %v9341_v46  ;;  %v10219_v48 = vpop.f32.mrf.mxu1  ;;  %v9937_v61 = vld [vmem:[#allocation2 + $0x1de] sm:$0xff] }
 0xb7a   : > { %v10359_v0 = vadd.f32 %v10219_v48, %v17159_v28 }
 0xb7b   : > { %11198 = vmatmul.msk.bf16.gmra.mxu2 %vm761_vm2, %v8958_v50  ;;  %11277 = vmatmul.msk.bf16.gmra.mxu0 %vm761_vm2, %v9476_v22 }
 0xb7c   : > { %v10436_v14 = vmul.f32 %v10359_v0, %v18191_v16  ;;  %11308 = vmatmul.msk.bf16.gmra.mxu1 %vm761_vm2, %v9985_v4 }
 0xb7d   : > { %11238 = vmatmul.msk.bf16.gmra.mxu3 %vm761_vm2, %v8959_v38 }
 0xb7e   : > { %10513 = vst.msk [vmem:[%s17700_s4 + $0x133] sm:$0xff] %vm761_vm2, %v10436_v14  ;;  %v8715_v52 = vpop.f32.mrf.mxu2 }
 0xb7f   : > { %v8825_v28 = vadd.f32 %v8715_v52, %v18192_v51 }
 0xb80   : > { %v9233_v5 = vpop.f32.mrf.mxu3  ;;  %v9748_v47 = vpop.f32.mrf.mxu0 }
 0xb81   : > { %v9343_v19 = vadd.f32 %v9233_v5, %v8825_v28  ;;  %v17370_v50 = vadd.f32 %v9748_v47, %v9342_v17  ;;  %v10221_v12 = vpop.f32.mrf.mxu1  ;;  %v9936_v17 = vld [vmem:[#allocation2 + $0x1d6] sm:$0xff]  ;;  %v18195_v28 = vld [vmem:[#allocation86_spill] sm:$0xff] }
 0xb82   : > { %v10360_v54 = vadd.f32 %v10221_v12, %v17172_v21  ;;  %v9986_v22 = vpack.c.bf16 %v9937_v61, %v9936_v17  ;;  %v9438_v47 = vld [vmem:[#allocation2 + $0x275] sm:$0xff]  ;;  %v8922_v12 = vld [vmem:[#allocation2 + $0x284] sm:$0x3] }
 0xb84   : > { %v10437_v46 = vmul.f32 %v10360_v54, %v18193_v2 }
 0xb86   : > { %10514 = vst.msk [vmem:[%s17700_s4 + $0x13b] sm:$0xff] %vm761_vm2, %v10437_v46  ;;  %v8717_v49 = vpop.f32.mrf.mxu2 }
 0xb87   : > { %v8826_v15 = vadd.f32 %v8717_v49, %v16804_v8  ;;  %v18194_v8 = vld [vmem:[#allocation85_spill] sm:$0xff] }
 0xb88   : > { %v9235_v27 = vpop.f32.mrf.mxu3  ;;  %v9751_v1 = vpop.f32.mrf.mxu0 }
 0xb89   : > { %v9344_v37 = vadd.f32 %v9235_v27, %v8826_v15  ;;  %v17379_v34 = vadd.f32 %v9751_v1, %v9343_v19  ;;  %v10224_v21 = vpop.f32.mrf.mxu1  ;;  %v9439_v19 = vld [vmem:[#allocation2 + $0x27d] sm:$0xff]  ;;  %v8961_v27 = vpack.c.bf16 %v8922_v12, %v8922_v12  ;;  %v9938_v1 = vld [vmem:[#allocation2 + $0x1e6] sm:$0xff] }
 0xb8a   : > { %v10361_v48 = vadd.f32 %v10224_v21, %v17181_v56  ;;  %v9478_v49 = vpack.c.bf16 %v9439_v19, %v9438_v47  ;;  %v18196_v21 = vld [vmem:[#allocation87_spill] sm:$0xff] }
 0xb8b   : > { %11199 = vmatmul.msk.bf16.gmra.mxu2 %vm761_vm2, %v8959_v38  ;;  %11278 = vmatmul.msk.bf16.gmra.mxu0 %vm761_vm2, %v9477_v32 }
 0xb8c   : > { %v10438_v55 = vmul.f32 %v10361_v48, %v18194_v8  ;;  %11309 = vmatmul.msk.bf16.gmra.mxu1 %vm761_vm2, %v9986_v22 }
 0xb8d   : > { %11239 = vmatmul.msk.bf16.gmra.mxu3 %vm761_vm2, %v8960_v18 }
 0xb8e   : > { %10515 = vst.msk [vmem:[%s17700_s4 + $0x143] sm:$0xff] %vm761_vm2, %v10438_v55  ;;  %v8720_v0 = vpop.f32.mrf.mxu2 }
 0xb8f   : > { %v8827_v56 = vadd.f32 %v8720_v0, %v16809_v9  ;;  %v8404_v9 = vld [vmem:[#allocation2 + $0x274] sm:$0x3]  ;;  %v18197_v0 = vld [vmem:[#allocation35_spill] sm:$0xff] }
 0xb90   : > { %v9238_v4 = vpop.f32.mrf.mxu3  ;;  %v9753_v16 = vpop.f32.mrf.mxu0  ;;  %v8443_v61 = vpack.c.bf16 %v8404_v9, %v8404_v9  ;;  %v18198_v9 = vld [vmem:[#allocation36_spill] sm:$0xff] }
 0xb91   : > { %v9345_v14 = vadd.f32 %v9238_v4, %v8827_v56  ;;  %v17392_v38 = vadd.f32 %v9753_v16, %v9344_v37  ;;  %v10226_v52 = vpop.f32.mrf.mxu1  ;;  %v9987_v37 = vpack.c.bf16 %v9939_v40, %v9938_v1  ;;  %v9440_v4 = vld [vmem:[#allocation2 + $0x285] sm:$0x3] }
 0xb92   : > { %v10362_v51 = vadd.f32 %v10226_v52, %v17194_v26  ;;  %v9479_v52 = vpack.c.bf16 %v9440_v4, %v9440_v4 }
 0xb94   : > { %v10439_v5 = vmul.f32 %v10362_v51, %v18195_v28  ;;  %v9941_v51 = vld [vmem:[#allocation2 + $0x1fe] sm:$0xff] }
 0xb96   : > { %10516 = vst.msk [vmem:[%s17700_s4 + $0x14b] sm:$0xff] %vm761_vm2, %v10439_v5  ;;  %v8722_v54 = vpop.f32.mrf.mxu2 }
 0xb97   : > { %v8828_v2 = vadd.f32 %v8722_v54, %v16817_v13 }
 0xb98   : > { %v9240_v46 = vpop.f32.mrf.mxu3  ;;  %v9756_v15 = vpop.f32.mrf.mxu0 }
 0xb99   : > { %v9346_v26 = vadd.f32 %v9240_v46, %v8828_v2  ;;  %v17401_v45 = vadd.f32 %v9756_v15, %v9345_v14  ;;  %v10229_v35 = vpop.f32.mrf.mxu1 }
 0xb9a   : > { %v10363_v11 = vadd.f32 %v10229_v35, %v17203_v57  ;;  %v18199_v35 = vld [vmem:[#allocation37_spill] sm:$0xff] }
 0xb9b   : > { %11200 = vmatmul.msk.bf16.gmra.mxu2 %vm761_vm2, %v8443_v61  ;;  %11279 = vmatmul.msk.bf16.gmra.mxu0 %vm761_vm2, %v9478_v49 }
 0xb9c   : > { %v10440_v13 = vmul.f32 %v10363_v11, %v18196_v21  ;;  %11310 = vmatmul.msk.bf16.gmra.mxu1 %vm761_vm2, %v9987_v37 }
 0xb9d   : > { %11240 = vmatmul.msk.bf16.gmra.mxu3 %vm761_vm2, %v8961_v27 }
 0xb9e   : > { %10517 = vst.msk [vmem:[%s17700_s4 + $0x153] sm:$0xff] %vm761_vm2, %v10440_v13  ;;  %v8725_v32 = vpop.f32.mrf.mxu2 }
 0xb9f   : > { %v8829_v17 = vadd.f32 %v8725_v32, %v16823_v44 }
 0xba0   : > { %v9243_v57 = vpop.f32.mrf.mxu3  ;;  %v9758_v48 = vpop.f32.mrf.mxu0 }
 0xba1   : > { %v9347_v18 = vadd.f32 %v9243_v57, %v8829_v17  ;;  %v17414_v22 = vadd.f32 %v9758_v48, %v9346_v26  ;;  %v10231_v8 = vpop.f32.mrf.mxu1  ;;  %v9942_v57 = vld [vmem:[#allocation2 + $0x206] sm:$0xff] }
 0xba2   : > { %v10364_v55 = vadd.f32 %v10231_v8, %v17216_v25  ;;  %v9940_v25 = vld [vmem:[#allocation2 + $0x1f6] sm:$0xff] }
 0xba3   : > { %v9988_v54 = vpack.c.bf16 %v9941_v51, %v9940_v25 }
 0xba4   : > { %v10441_v56 = vmul.f32 %v10364_v55, %v18197_v0 }
 0xba6   : > { %10518 = vst.msk [vmem:[%s17700_s4 + $0x15b] sm:$0xff] %vm761_vm2, %v10441_v56  ;;  %v8727_v16 = vpop.f32.mrf.mxu2 }
 0xba7   : > { %v8830_v14 = vadd.f32 %v8727_v16, %v16833_v59 }
 0xba8   : > { %v9245_v44 = vpop.f32.mrf.mxu3  ;;  %v9761_v28 = vpop.f32.mrf.mxu0 }
 0xba9   : > { %v9348_v5 = vadd.f32 %v9245_v44, %v8830_v14  ;;  %v17423_v47 = vadd.f32 %v9761_v28, %v9347_v18  ;;  %v10234_v19 = vpop.f32.mrf.mxu1  ;;  %v18200_v18 = vld [vmem:[#allocation3_spill] sm:$0xff]  ;;  %v18201_v44 = vld [vmem:[#allocation4_spill] sm:$0xff] }
 0xbaa   : > { %v10365_v12 = vadd.f32 %v10234_v19, %v17225_v33 }
 0xbab   : > { %11280 = vmatmul.msk.bf16.gmra.mxu0 %vm761_vm2, %v9479_v52 }
 0xbac   : > { %v10442_v2 = vmul.f32 %v10365_v12, %v18198_v9  ;;  %11311 = vmatmul.msk.bf16.gmra.mxu1 %vm761_vm2, %v9988_v54  ;;  %v9944_v9 = vld [vmem:[#allocation2 + $0x216] sm:$0xff] }
 0xbae   : > { %10519 = vst.msk [vmem:[%s17700_s4 + $0x163] sm:$0xff] %vm761_vm2, %v10442_v2  ;;  %v8730_v59 = vpop.f32.mrf.mxu2 }
 0xbaf   : > { %v8831_v46 = vadd.f32 %v8730_v59, %v16839_v20  ;;  %v9943_v20 = vld [vmem:[#allocation2 + $0x20e] sm:$0xff]  ;;  %v18202_v59 = vld [vmem:[#allocation5_spill] sm:$0xff] }
 0xbb0   : > { %v9248_v49 = vpop.f32.mrf.mxu3  ;;  %v9763_v40 = vpop.f32.mrf.mxu0  ;;  %v9989_v48 = vpack.c.bf16 %v9943_v20, %v9942_v57 }
 0xbb1   : > { %v9349_v15 = vadd.f32 %v9248_v49, %v8831_v46  ;;  %v17434_v27 = vadd.f32 %v9763_v40, %v9348_v5  ;;  %v10236_v33 = vpop.f32.mrf.mxu1 }
 0xbb2   : > { %v10366_v26 = vadd.f32 %v10236_v33, %v17238_v3 }
 0xbb4   : > { %v10443_v61 = vmul.f32 %v10366_v26, %v18199_v35 }
 0xbb6   : > { %10520 = vst.msk [vmem:[%s17700_s4 + $0x16b] sm:$0xff] %vm761_vm2, %v10443_v61  ;;  %v8732_v1 = vpop.f32.mrf.mxu2  ;;  %v18203_v61 = vld [vmem:[#allocation6_spill] sm:$0xff] }
 0xbb7   : > { %v8832_v11 = vadd.f32 %v8732_v1, %v16849_v23 }
 0xbb8   : > { %v9250_v37 = vpop.f32.mrf.mxu3  ;;  %v9766_v21 = vpop.f32.mrf.mxu0 }
 0xbb9   : > { %v9350_v13 = vadd.f32 %v9250_v37, %v8832_v11  ;;  %v17443_v32 = vadd.f32 %v9766_v21, %v9349_v15  ;;  %v10239_v17 = vpop.f32.mrf.mxu1 }
 0xbba   : > { %v10367_v3 = vadd.f32 %v10239_v17, %v17247_v6 }
 0xbbc   : > { %v10444_v8 = vmul.f32 %v10367_v3, %v18200_v18  ;;  %11312 = vmatmul.msk.bf16.gmra.mxu1 %vm761_vm2, %v9989_v48  ;;  %v9946_v3 = vld [vmem:[#allocation2 + $0x226] sm:$0xff] }
 0xbbd   : > { %v18204_v18 = vld [vmem:[#allocation7_spill] sm:$0xff] }
 0xbbe   : > { %10521 = vst.msk [vmem:[%s17700_s4 + $0x173] sm:$0xff] %vm761_vm2, %v10444_v8  ;;  %v8735_v23 = vpop.f32.mrf.mxu2 }
 0xbbf   : > { %v8833_v55 = vadd.f32 %v8735_v23, %v16855_v58  ;;  %v9945_v58 = vld [vmem:[#allocation2 + $0x21e] sm:$0xff] }
 0xbc0   : > { %v9253_v0 = vpop.f32.mrf.mxu3  ;;  %v9768_v56 = vpop.f32.mrf.mxu0  ;;  %v9990_v2 = vpack.c.bf16 %v9945_v58, %v9944_v9 }
 0xbc1   : > { %v9351_v4 = vadd.f32 %v9253_v0, %v8833_v55  ;;  %v17453_v16 = vadd.f32 %v9768_v56, %v9350_v13  ;;  %v10241_v14 = vpop.f32.mrf.mxu1 }
 0xbc2   : > { %v10368_v6 = vadd.f32 %v10241_v14, %v17260_v60 }
 0xbc4   : > { %v10445_v52 = vmul.f32 %v10368_v6, %v18201_v44  ;;  %v18205_v6 = vld [vmem:[#allocation8_spill] sm:$0xff] }
 0xbc6   : > { %10522 = vst.msk [vmem:[%s17700_s4 + $0x17b] sm:$0xff] %vm761_vm2, %v10445_v52  ;;  %v8737_v51 = vpop.f32.mrf.mxu2 }
 0xbc7   : > { %v8834_v28 = vadd.f32 %v8737_v51, %v16865_v41 }
 0xbc8   : > { %v9255_v5 = vpop.f32.mrf.mxu3  ;;  %v9771_v19 = vpop.f32.mrf.mxu0 }
 0xbc9   : > { %v9352_v25 = vadd.f32 %v9255_v5, %v8834_v28  ;;  %v17462_v12 = vadd.f32 %v9771_v19, %v9351_v4  ;;  %v10244_v54 = vpop.f32.mrf.mxu1 }
 0xbca   : > { %v10369_v60 = vadd.f32 %v10244_v54, %v17269_v62  ;;  %v9948_v54 = vld [vmem:[#allocation2 + $0x236] sm:$0xff] }
 0xbcc   : > { %v10446_v46 = vmul.f32 %v10369_v60, %v18202_v59  ;;  %11313 = vmatmul.msk.bf16.gmra.mxu1 %vm761_vm2, %v9990_v2  ;;  %v18206_v60 = vld [vmem:[#allocation9_spill] sm:$0xff] }
 0xbcd   : > { %v18207_v59 = vld [vmem:[#allocation109_spill] sm:$0xff] }
 0xbce   : > { %10523 = vst.msk [vmem:[%s17700_s4 + $0x183] sm:$0xff] %vm761_vm2, %v10446_v46  ;;  %v8740_v41 = vpop.f32.mrf.mxu2 }
 0xbcf   : > { %v8835_v49 = vadd.f32 %v8740_v41, %v16871_v36  ;;  %v9947_v36 = vld [vmem:[#allocation2 + $0x22e] sm:$0xff] }
 0xbd0   : > { %v9258_v40 = vpop.f32.mrf.mxu3  ;;  %v9773_v15 = vpop.f32.mrf.mxu0  ;;  %v9991_v48 = vpack.c.bf16 %v9947_v36, %v9946_v3  ;;  %v9950_v3 = vld [vmem:[#allocation2 + $0x246] sm:$0xff] }
 0xbd1   : > { %v9353_v33 = vadd.f32 %v9258_v40, %v8835_v49  ;;  %v17472_v26 = vadd.f32 %v9773_v15, %v9352_v25  ;;  %v10246_v35 = vpop.f32.mrf.mxu1 }
 0xbd2   : > { %v10370_v62 = vadd.f32 %v10246_v35, %v17282_v39  ;;  %v18208_v35 = vld [vmem:[#allocation10_spill] sm:$0xff] }
 0xbd4   : > { %v10447_v1 = vmul.f32 %v10370_v62, %v18203_v61 }
 0xbd6   : > { %10524 = vst.msk [vmem:[%s17700_s4 + $0x18b] sm:$0xff] %vm761_vm2, %v10447_v1  ;;  %v8742_v11 = vpop.f32.mrf.mxu2  ;;  %v18209_v1 = vld [vmem:[#allocation110_spill] sm:$0xff] }
 0xbd7   : > { %v8836_v37 = vadd.f32 %v8742_v11, %v16881_v30 }
 0xbd8   : > { %v9260_v20 = vpop.f32.mrf.mxu3  ;;  %v9776_v21 = vpop.f32.mrf.mxu0 }
 0xbd9   : > { %v9354_v13 = vadd.f32 %v9260_v20, %v8836_v37  ;;  %v17481_v17 = vadd.f32 %v9776_v21, %v9353_v33  ;;  %v10249_v57 = vpop.f32.mrf.mxu1  ;;  %v9951_v20 = vld [vmem:[#allocation2 + $0x24e] sm:$0xff] }
 0xbda   : > { %v10371_v39 = vadd.f32 %v10249_v57, %v17291_v43 }
 0xbdc   : > { %v10448_v8 = vmul.f32 %v10371_v39, %v18204_v18  ;;  %11314 = vmatmul.msk.bf16.gmra.mxu1 %vm761_vm2, %v9991_v48  ;;  %v9993_v39 = vpack.c.bf16 %v9951_v20, %v9950_v3  ;;  %v18210_v48 = vld [vmem:[#allocation11_spill] sm:$0xff] }
 0xbde   : > { %10525 = vst.msk [vmem:[%s17700_s4 + $0x193] sm:$0xff] %vm761_vm2, %v10448_v8  ;;  %v8745_v30 = vpop.f32.mrf.mxu2 }
 0xbdf   : > { %v8837_v23 = vadd.f32 %v8745_v30, %v16887_v29  ;;  %v9949_v29 = vld [vmem:[#allocation2 + $0x23e] sm:$0xff]  ;;  %v18211_v30 = vld [vmem:[#allocation111_spill] sm:$0xff] }
 0xbe0   : > { %v9263_v55 = vpop.f32.mrf.mxu3  ;;  %v9778_v0 = vpop.f32.mrf.mxu0  ;;  %v9992_v9 = vpack.c.bf16 %v9949_v29, %v9948_v54 }
 0xbe1   : > { %v9355_v56 = vadd.f32 %v9263_v55, %v8837_v23  ;;  %v17491_v4 = vadd.f32 %v9778_v0, %v9354_v13  ;;  %v10251_v14 = vpop.f32.mrf.mxu1 }
 0xbe2   : > { %v10372_v43 = vadd.f32 %v10251_v14, %v17304_v63 }
 0xbe4   : > { %v10449_v44 = vmul.f32 %v10372_v43, %v18205_v6  ;;  %v18212_v6 = vld [vmem:[#allocation12_spill] sm:$0xff] }
 0xbe6   : > { %10526 = vst.msk [vmem:[%s17700_s4 + $0x19b] sm:$0xff] %vm761_vm2, %v10449_v44  ;;  %v8747_v52 = vpop.f32.mrf.mxu2 }
 0xbe7   : > { %v8838_v51 = vadd.f32 %v8747_v52, %v16897_v24 }
 0xbe8   : > { %v9265_v28 = vpop.f32.mrf.mxu3  ;;  %v9781_v5 = vpop.f32.mrf.mxu0 }
 0xbe9   : > { %v9356_v58 = vadd.f32 %v9265_v28, %v8838_v51  ;;  %v17500_v19 = vadd.f32 %v9781_v5, %v9355_v56  ;;  %v10254_v25 = vpop.f32.mrf.mxu1  ;;  %v18213_v51 = vld [vmem:[#allocation112_spill] sm:$0xff]  ;;  %v9953_v5 = vld [vmem:[#allocation2 + $0x25e] sm:$0xff] }
 0xbea   : > { %v10373_v63 = vadd.f32 %v10254_v25, %v17313_v53 }
 0xbec   : > { %v10450_v2 = vmul.f32 %v10373_v63, %v18206_v60  ;;  %11315 = vmatmul.msk.bf16.gmra.mxu1 %vm761_vm2, %v9992_v9  ;;  %v9952_v9 = vld [vmem:[#allocation2 + $0x256] sm:$0xff] }
 0xbed   : > { %v9994_v60 = vpack.c.bf16 %v9953_v5, %v9952_v9 }
 0xbee   : > { %10527 = vst.msk [vmem:[%s17700_s4 + $0x1a3] sm:$0xff] %vm761_vm2, %v10450_v2  ;;  %v8750_v24 = vpop.f32.mrf.mxu2  ;;  %v18214_v2 = vld [vmem:[#allocation38_spill] sm:$0xff] }
 0xbef   : > { %v8839_v46 = vadd.f32 %v8750_v24, %v18207_v59 }
 0xbf0   : > { %v9268_v41 = vpop.f32.mrf.mxu3  ;;  %v9783_v49 = vpop.f32.mrf.mxu0 }
 0xbf1   : > { %v9357_v40 = vadd.f32 %v9268_v41, %v8839_v46  ;;  %v17510_v15 = vadd.f32 %v9783_v49, %v9356_v58  ;;  %v10256_v33 = vpop.f32.mrf.mxu1  ;;  %v18215_v46 = vld [vmem:[#allocation113_spill] sm:$0xff] }
 0xbf2   : > { %v10374_v53 = vadd.f32 %v10256_v33, %v17326_v7 }
 0xbf4   : > { %v10451_v62 = vmul.f32 %v10374_v53, %v18208_v35 }
 0xbf6   : > { %10528 = vst.msk [vmem:[%s17700_s4 + $0x1ab] sm:$0xff] %vm761_vm2, %v10451_v62  ;;  %v8752_v61 = vpop.f32.mrf.mxu2  ;;  %v18216_v62 = vld [vmem:[#allocation14_spill] sm:$0xff] }
 0xbf7   : > { %v8840_v11 = vadd.f32 %v8752_v61, %v18209_v1 }
 0xbf8   : > { %v9270_v37 = vpop.f32.mrf.mxu3  ;;  %v9786_v36 = vpop.f32.mrf.mxu0 }
 0xbf9   : > { %v9358_v21 = vadd.f32 %v9270_v37, %v8840_v11  ;;  %v17519_v13 = vadd.f32 %v9786_v36, %v9357_v40  ;;  %v10259_v57 = vpop.f32.mrf.mxu1  ;;  %v18217_v11 = vld [vmem:[#allocation114_spill] sm:$0xff]  ;;  %v9955_v36 = vld [vmem:[#allocation2 + $0x26e] sm:$0xff] }
 0xbfa   : > { %v10375_v7 = vadd.f32 %v10259_v57, %v17335_v31 }
 0xbfc   : > { %v10452_v18 = vmul.f32 %v10375_v7, %v18210_v48  ;;  %11316 = vmatmul.msk.bf16.gmra.mxu1 %vm761_vm2, %v9993_v39  ;;  %v9954_v39 = vld [vmem:[#allocation2 + $0x266] sm:$0xff] }
 0xbfd   : > { %v9995_v48 = vpack.c.bf16 %v9955_v36, %v9954_v39  ;;  %v18227_v39 = vld [vmem:[#allocation42_spill] sm:$0xff] }
 0xbfe   : > { %10529 = vst.msk [vmem:[%s17700_s4 + $0x1b3] sm:$0xff] %vm761_vm2, %v10452_v18  ;;  %v8755_v8 = vpop.f32.mrf.mxu2  ;;  %v18218_v18 = vld [vmem:[#allocation39_spill] sm:$0xff] }
 0xbff   : > { %v8841_v23 = vadd.f32 %v8755_v8, %v18211_v30 }
 0xc00   : > { %v9273_v55 = vpop.f32.mrf.mxu3  ;;  %v9788_v0 = vpop.f32.mrf.mxu0 }
 0xc01   : > { %v9359_v56 = vadd.f32 %v9273_v55, %v8841_v23  ;;  %v17529_v14 = vadd.f32 %v9788_v0, %v9358_v21  ;;  %v10261_v43 = vpop.f32.mrf.mxu1  ;;  %v18219_v23 = vld [vmem:[#allocation115_spill] sm:$0xff] }
 0xc02   : > { %v10376_v31 = vadd.f32 %v10261_v43, %v17348_v10 }
 0xc04   : > { %v10453_v44 = vmul.f32 %v10376_v31, %v18212_v6 }
 0xc06   : > { %10530 = vst.msk [vmem:[%s17700_s4 + $0x1bb] sm:$0xff] %vm761_vm2, %v10453_v44  ;;  %v8757_v52 = vpop.f32.mrf.mxu2  ;;  %v18220_v44 = vld [vmem:[#allocation16_spill] sm:$0xff] }
 0xc07   : > { %v8842_v28 = vadd.f32 %v8757_v52, %v18213_v51  ;;  %v9956_v51 = vld [vmem:[#allocation2 + $0x276] sm:$0xff] }
 0xc08   : > { %v9275_v29 = vpop.f32.mrf.mxu3  ;;  %v9791_v58 = vpop.f32.mrf.mxu0 }
 0xc09   : > { %v9360_v25 = vadd.f32 %v9275_v29, %v8842_v28  ;;  %v17538_v54 = vadd.f32 %v9791_v58, %v9359_v56  ;;  %v10264_v63 = vpop.f32.mrf.mxu1  ;;  %v9957_v28 = vld [vmem:[#allocation2 + $0x27e] sm:$0xff] }
 0xc0a   : > { %v10377_v10 = vadd.f32 %v10264_v63, %v17357_v42 }
 0xc0c   : > { %v10454_v24 = vmul.f32 %v10377_v10, %v18214_v2  ;;  %11317 = vmatmul.msk.bf16.gmra.mxu1 %vm761_vm2, %v9994_v60  ;;  %v18221_v60 = vld [vmem:[#allocation40_spill] sm:$0xff] }
 0xc0e   : > { %10531 = vst.msk [vmem:[%s17700_s4 + $0x1c3] sm:$0xff] %vm761_vm2, %v10454_v24  ;;  %v8760_v59 = vpop.f32.mrf.mxu2 }
 0xc0f   : > { %v8843_v41 = vadd.f32 %v8760_v59, %v18215_v46  ;;  %v18222_v46 = vld [vmem:[#allocation93_spill] sm:$0xff] }
 0xc10   : > { %v9278_v49 = vpop.f32.mrf.mxu3  ;;  %v9793_v40 = vpop.f32.mrf.mxu0 }
 0xc11   : > { %v9361_v33 = vadd.f32 %v9278_v49, %v8843_v41  ;;  %v17548_v53 = vadd.f32 %v9793_v40, %v9360_v25  ;;  %v10266_v35 = vpop.f32.mrf.mxu1  ;;  %v9996_v25 = vpack.c.bf16 %v9957_v28, %v9956_v51  ;;  %v9958_v49 = vld [vmem:[#allocation2 + $0x286] sm:$0x3]  ;;  %v18232_v51 = vld [vmem:[#allocation28_spill] sm:$0xff] }
 0xc12   : > { %v10378_v42 = vadd.f32 %v10266_v35, %v17370_v50  ;;  %v18223_v35 = vld [vmem:[#allocation19_spill] sm:$0xff] }
 0xc14   : > { %v10455_v61 = vmul.f32 %v10378_v42, %v18216_v62 }
 0xc16   : > { %10532 = vst.msk [vmem:[%s17700_s4 + $0x1cb] sm:$0xff] %vm761_vm2, %v10455_v61  ;;  %v8762_v1 = vpop.f32.mrf.mxu2  ;;  %v18224_v61 = vld [vmem:[#allocation20_spill] sm:$0xff] }
 0xc17   : > { %v8844_v37 = vadd.f32 %v8762_v1, %v18217_v11 }
 0xc18   : > { %v9280_v20 = vpop.f32.mrf.mxu3  ;;  %v9796_v21 = vpop.f32.mrf.mxu0 }
 0xc19   : > { %v9362_v57 = vadd.f32 %v9280_v20, %v8844_v37  ;;  %v17557_v3 = vadd.f32 %v9796_v21, %v9361_v33  ;;  %v10269_v7 = vpop.f32.mrf.mxu1  ;;  %v18225_v37 = vld [vmem:[#allocation41_spill] sm:$0xff]  ;;  %v18226_v21 = vld [vmem:[#allocation22_spill] sm:$0xff] }
 0xc1a   : > { %v10379_v50 = vadd.f32 %v10269_v7, %v17379_v34 }
 0xc1c   : > { %v10456_v8 = vmul.f32 %v10379_v50, %v18218_v18  ;;  %11318 = vmatmul.msk.bf16.gmra.mxu1 %vm761_vm2, %v9995_v48  ;;  %v18228_v18 = vld [vmem:[#allocation24_spill] sm:$0xff] }
 0xc1e   : > { %10533 = vst.msk [vmem:[%s17700_s4 + $0x1d3] sm:$0xff] %vm761_vm2, %v10456_v8  ;;  %v8765_v30 = vpop.f32.mrf.mxu2 }
 0xc1f   : > { %v8845_v55 = vadd.f32 %v8765_v30, %v18219_v23  ;;  %v18229_v23 = vld [vmem:[#allocation43_spill] sm:$0xff] }
 0xc20   : > { %v9283_v0 = vpop.f32.mrf.mxu3  ;;  %v9798_v56 = vpop.f32.mrf.mxu0 }
 0xc21   : > { %v9363_v43 = vadd.f32 %v9283_v0, %v8845_v55  ;;  %v17567_v31 = vadd.f32 %v9798_v56, %v9362_v57  ;;  %v10271_v6 = vpop.f32.mrf.mxu1  ;;  %v18230_v56 = vld [vmem:[#allocation26_spill] sm:$0xff] }
 0xc22   : > { %v10380_v34 = vadd.f32 %v10271_v6, %v17392_v38 }
 0xc24   : > { %v10457_v52 = vmul.f32 %v10380_v34, %v18220_v44  ;;  %v18231_v34 = vld [vmem:[#allocation44_spill] sm:$0xff] }
 0xc26   : > { %10534 = vst.msk [vmem:[%s17700_s4 + $0x1db] sm:$0xff] %vm761_vm2, %v10457_v52  ;;  %v8767_v29 = vpop.f32.mrf.mxu2 }
 0xc28   : > { %v9285_v5 = vpop.f32.mrf.mxu3  ;;  %v9801_v58 = vpop.f32.mrf.mxu0 }
 0xc29   : > { %v17575_v63 = vadd.f32 %v9801_v58, %v9363_v43  ;;  %v10274_v9 = vpop.f32.mrf.mxu1  ;;  %v18233_v5 = vld [vmem:[#allocation45_spill] sm:$0xff] }
 0xc2a   : > { %v10381_v10 = vadd.f32 %v10274_v9, %v17401_v45  ;;  %v9997_v45 = vpack.c.bf16 %v9958_v49, %v9958_v49  ;;  %v18234_v9 = vld [vmem:[#allocation30_spill] sm:$0xff]  ;;  %v18237_v49 = vld [vmem:[#allocation32_spill] sm:$0xff] }
 0xc2c   : > { %v10458_v38 = vmul.f32 %v10381_v10, %v18221_v60  ;;  %11319 = vmatmul.msk.bf16.gmra.mxu1 %vm761_vm2, %v9996_v25 }
 0xc2e   : > { %10535 = vst.msk [vmem:[%s17700_s4 + $0x1e3] sm:$0xff] %vm761_vm2, %v10458_v38  ;;  %v18235_v38 = vld [vmem:[#allocation46_spill] sm:$0xff] }
 0xc30   : > { %v9803_v2 = vpop.f32.mrf.mxu0 }
 0xc31   : > { %v10276_v24 = vpop.f32.mrf.mxu1 }
 0xc32   : > { %v10382_v59 = vadd.f32 %v10276_v24, %v17414_v22 }
 0xc34   : > { %v10459_v41 = vmul.f32 %v10382_v59, %v18222_v46  ;;  %v18236_v59 = vld [vmem:[#allocation101_spill] sm:$0xff] }
 0xc36   : > { %10536 = vst.msk [vmem:[%s17700_s4 + $0x1eb] sm:$0xff] %vm761_vm2, %v10459_v41 }
 0xc39   : > { %v10279_v40 = vpop.f32.mrf.mxu1 }
 0xc3a   : > { %v10383_v33 = vadd.f32 %v10279_v40, %v17423_v47 }
 0xc3c   : > { %v10460_v42 = vmul.f32 %v10383_v33, %v18223_v35  ;;  %11320 = vmatmul.msk.bf16.gmra.mxu1 %vm761_vm2, %v9997_v45  ;;  %v18238_v33 = vld [vmem:[#allocation33_spill] sm:$0xff] }
 0xc3e   : > { %10537 = vst.msk [vmem:[%s17700_s4 + $0x1f3] sm:$0xff] %vm761_vm2, %v10460_v42 }
 0xc41   : > { %v10281_v22 = vpop.f32.mrf.mxu1 }
 0xc42   : > { %v10384_v62 = vadd.f32 %v10281_v22, %v17434_v27  ;;  %v18239_v22 = vld [vmem:[#allocation47_spill] sm:$0xff] }
 0xc44   : > { %v10461_v1 = vmul.f32 %v10384_v62, %v18224_v61 }
 0xc46   : > { %10538 = vst.msk [vmem:[%s17700_s4 + $0x1fb] sm:$0xff] %vm761_vm2, %v10461_v1 }
 0xc49   : > { %v10284_v47 = vpop.f32.mrf.mxu1 }
 0xc4a   : > { %v10385_v11 = vadd.f32 %v10284_v47, %v17443_v32 }
 0xc4c   : > { %v10462_v20 = vmul.f32 %v10385_v11, %v18225_v37 }
 0xc4e   : > { %10539 = vst.msk [vmem:[%s17700_s4 + $0x203] sm:$0xff] %vm761_vm2, %v10462_v20 }
 0xc51   : > { %v10286_v36 = vpop.f32.mrf.mxu1 }
 0xc52   : > { %v10386_v27 = vadd.f32 %v10286_v36, %v17453_v16 }
 0xc54   : > { %v10463_v57 = vmul.f32 %v10386_v27, %v18226_v21 }
 0xc56   : > { %10540 = vst.msk [vmem:[%s17700_s4 + $0x20b] sm:$0xff] %vm761_vm2, %v10463_v57 }
 0xc59   : > { %v10289_v7 = vpop.f32.mrf.mxu1 }
 0xc5a   : > { %v10387_v32 = vadd.f32 %v10289_v7, %v17462_v12 }
 0xc5c   : > { %v10464_v50 = vmul.f32 %v10387_v32, %v18227_v39 }
 0xc5e   : > { %10541 = vst.msk [vmem:[%s17700_s4 + $0x213] sm:$0xff] %vm761_vm2, %v10464_v50 }
 0xc61   : > { %v10291_v48 = vpop.f32.mrf.mxu1 }
 0xc62   : > { %v10388_v16 = vadd.f32 %v10291_v48, %v17472_v26 }
 0xc64   : > { %v10465_v8 = vmul.f32 %v10388_v16, %v18228_v18 }
 0xc66   : > { %10542 = vst.msk [vmem:[%s17700_s4 + $0x21b] sm:$0xff] %vm761_vm2, %v10465_v8 }
 0xc69   : > { %v10294_v30 = vpop.f32.mrf.mxu1 }
 0xc6a   : > { %v10389_v12 = vadd.f32 %v10294_v30, %v17481_v17 }
 0xc6c   : > { %v10466_v55 = vmul.f32 %v10389_v12, %v18229_v23 }
 0xc6e   : > { %10543 = vst.msk [vmem:[%s17700_s4 + $0x223] sm:$0xff] %vm761_vm2, %v10466_v55 }
 0xc71   : > { %v10296_v0 = vpop.f32.mrf.mxu1 }
 0xc72   : > { %v10390_v26 = vadd.f32 %v10296_v0, %v17491_v4 }
 0xc74   : > { %v10467_v43 = vmul.f32 %v10390_v26, %v18230_v56 }
 0xc76   : > { %10544 = vst.msk [vmem:[%s17700_s4 + $0x22b] sm:$0xff] %vm761_vm2, %v10467_v43 }
 0xc79   : > { %v10299_v6 = vpop.f32.mrf.mxu1 }
 0xc7a   : > { %v10391_v17 = vadd.f32 %v10299_v6, %v17500_v19 }
 0xc7c   : > { %v10468_v44 = vmul.f32 %v10391_v17, %v18231_v34 }
 0xc7e   : > { %10545 = vst.msk [vmem:[%s17700_s4 + $0x233] sm:$0xff] %vm761_vm2, %v10468_v44 }
 0xc81   : > { %v10301_v52 = vpop.f32.mrf.mxu1 }
 0xc82   : > { %v10392_v4 = vadd.f32 %v10301_v52, %v17510_v15 }
 0xc84   : > { %v10469_v28 = vmul.f32 %v10392_v4, %v18232_v51 }
 0xc86   : > { %10546 = vst.msk [vmem:[%s17700_s4 + $0x23b] sm:$0xff] %vm761_vm2, %v10469_v28 }
 0xc89   : > { %v10304_v29 = vpop.f32.mrf.mxu1 }
 0xc8a   : > { %v10393_v19 = vadd.f32 %v10304_v29, %v17519_v13 }
 0xc8c   : > { %v10470_v58 = vmul.f32 %v10393_v19, %v18233_v5 }
 0xc8e   : > { %10547 = vst.msk [vmem:[%s17700_s4 + $0x243] sm:$0xff] %vm761_vm2, %v10470_v58 }
 0xc91   : > { %v10306_v25 = vpop.f32.mrf.mxu1 }
 0xc92   : > { %v10394_v15 = vadd.f32 %v10306_v25, %v17529_v14 }
 0xc94   : > { %v10471_v10 = vmul.f32 %v10394_v15, %v18234_v9 }
 0xc96   : > { %10548 = vst.msk [vmem:[%s17700_s4 + $0x24b] sm:$0xff] %vm761_vm2, %v10471_v10 }
 0xc99   : > { %v10309_v60 = vpop.f32.mrf.mxu1 }
 0xc9a   : > { %v10395_v13 = vadd.f32 %v10309_v60, %v17538_v54 }
 0xc9c   : > { %v10472_v2 = vmul.f32 %v10395_v13, %v18235_v38 }
 0xc9e   : > { %10549 = vst.msk [vmem:[%s17700_s4 + $0x253] sm:$0xff] %vm761_vm2, %v10472_v2 }
 0xca1   : > { %v10311_v24 = vpop.f32.mrf.mxu1 }
 0xca2   : > { %v10396_v14 = vadd.f32 %v10311_v24, %v17548_v53 }
 0xca4   : > { %v10473_v46 = vmul.f32 %v10396_v14, %v18236_v59 }
 0xca6   : > { %10550 = vst.msk [vmem:[%s17700_s4 + $0x25b] sm:$0xff] %vm761_vm2, %v10473_v46 }
 0xca9   : > { %v10314_v41 = vpop.f32.mrf.mxu1 }
 0xcaa   : > { %v10397_v54 = vadd.f32 %v10314_v41, %v17557_v3 }
 0xcac   : > { %v10474_v45 = vmul.f32 %v10397_v54, %v18237_v49 }
 0xcae   : > { %10551 = vst.msk [vmem:[%s17700_s4 + $0x263] sm:$0xff] %vm761_vm2, %v10474_v45 }
 0xcb1   : > { %v10316_v40 = vpop.f32.mrf.mxu1 }
 0xcb2   : > { %v10398_v53 = vadd.f32 %v10316_v40, %v17567_v31 }
 0xcb4   : > { %v10475_v35 = vmul.f32 %v10398_v53, %v18238_v33 }
 0xcb6   : > { %10552 = vst.msk [vmem:[%s17700_s4 + $0x26b] sm:$0xff] %vm761_vm2, %v10475_v35 }
 0xcb9   : > { %v10319_v42 = vpop.f32.mrf.mxu1 }
 0xcba   : > { %v10399_v3 = vadd.f32 %v10319_v42, %v17575_v63 }
 0xcbc   : > { %v10476_v62 = vmul.f32 %v10399_v3, %v18239_v22 }
 0xcbe   : > { %10553 = vst.msk [vmem:[%s17700_s4 + $0x273] sm:$0x3] %vm5770_vm3, %v10476_v62 }
 0xcc1   : > { %v10321_v61 = vpop.f32.mrf.mxu1 }
 0xcc2 PF: > { %s14_s15 = sadd.s32 1, %s11428_s15  }
 0xcc3   : > { %p11_p5 = scmp.ge.s32.totalorder %s14_s15, 10  }
 0xcc5   :  { %13 = sbr.rel (!%p11_p5) target bundleno = 1 (0x1), region = 87 }

</bundles_post_ra>
